<compile_context>
chip_gen: v7x
topology: tpu7x:2x2x1
jax: 0.10.0
libtpu: 0.0.40
codegen_flags: <defaults>
</compile_context>

<pallas_src>
import functools

import jax
import jax.numpy as jnp
from jax import lax
from jax.experimental import pallas as pl
from jax.experimental.pallas import tpu as pltpu


def _make_res3d_kernel(D, Hp, Wp, Cin, Cout, EXT, identity_skip):
    """Fused Res3DBlock kernel; one batch element per grid step.

    Flattened-plane layout: each padded depth plane is a (Rext, C) matrix with
    Rext = Hp*Wp + 2*EXT; rows [EXT, EXT+Hp*Wp) hold the Hp x Wp plane in
    row-major order and the EXT rows on each side are zero, so the 9 in-plane
    conv taps are plain static row shifts (offset EXT + (kh-1)*Wp + (kw-1)).
    Border output rows are garbage and discarded by the wrapper; border rows of
    the conv1 activation are forced to zero with a mask (they are conv2's
    spatial padding).

    Depth handled by scatter-accumulation: plane q of the (unpadded-depth)
    input contributes to output planes q+1, q, q-1 through weight slices
    kd=0,1,2.  Rolling 3-slot f32 accumulators hold the in-flight output
    planes; a plane is finalized right after receiving its kd=2 contribution.
    """
    HpWp = Hp * Wp
    Rext = HpWp + 2 * EXT
    offs = [EXT + (kh - 1) * Wp + (kw - 1) for kh in range(3) for kw in range(3)]

    def gather9(plane):
        # plane: (Rext, C) bf16 -> im2col slab (HpWp, 9*C) bf16 (gathered once
        # per plane; reused for all 3 output planes it feeds).
        return jnp.concatenate([plane[o:o + HpWp, :] for o in offs], axis=-1)

    def mm(a, w):
        return jnp.dot(a, w, preferred_element_type=jnp.float32)

    def body(mask_ref, xf_ref, w1_ref, b1_ref, w2_ref, b2_ref, wsk_ref,
             out_ref, midp_ref, macc_ref, oacc_ref):
        # Hoisted loop-invariant broadcasts (emitted once, reused every plane).
        mask_b = jnp.broadcast_to(mask_ref[...], (HpWp, Cout))
        b1_b = jnp.broadcast_to(b1_ref[...], (HpWp, Cout))
        b2_b = jnp.broadcast_to(b2_ref[...], (HpWp, Cout))

        # Zero rolling accumulators (only plane-0 slots strictly need it) and
        # the mid plane's row-extension halo (its interior is overwritten).
        macc_ref[...] = jnp.zeros_like(macc_ref)
        oacc_ref[...] = jnp.zeros_like(oacc_ref)
        zext = jnp.zeros((EXT, Cout), jnp.bfloat16)
        midp_ref[pl.ds(0, EXT), :] = zext
        midp_ref[pl.ds(EXT + HpWp, EXT), :] = zext

        w1 = [w1_ref[kd] for kd in range(3)]   # (9*Cin,  Cout) bf16
        w2 = [w2_ref[kd] for kd in range(3)]   # (9*Cout, Cout) bf16

        def finalize_out(o):
            # conv2 + folded BN2 + skip + ReLU for output depth plane o.
            y = oacc_ref[o % 3] + b2_b
            xs = xf_ref[0, o, pl.ds(EXT, HpWp), :]          # (HpWp, Cin) bf16
            if identity_skip:
                y = y + xs.astype(jnp.float32)
            else:
                y = y + mm(xs, wsk_ref[...])                 # fused 1x1 conv skip
            out_ref[0, o, :, :] = jnp.maximum(y, 0.0)

        def consume_mid(m):
            # Finalize conv1 plane m (bias+ReLU+halo mask), then immediately
            # conv2-scatter it so only ONE mid plane is ever resident.
            y1 = jnp.maximum(macc_ref[m % 3] + b1_b, 0.0) * mask_b
            midp_ref[pl.ds(EXT, HpWp), :] = y1.astype(jnp.bfloat16)
            slab2 = gather9(midp_ref[...])                   # (HpWp, 9*Cout)
            if m + 1 < D:
                oacc_ref[(m + 1) % 3] = mm(slab2, w2[0])     # open plane m+1
            oacc_ref[m % 3] += mm(slab2, w2[1])
            if m > 0:
                oacc_ref[(m - 1) % 3] += mm(slab2, w2[2])
                finalize_out(m - 1)

        # Static Python loop over depth planes (D is a compile-time constant
        # and small here).  TODO(synk): lax.fori_loop + pl.when for large D.
        for p in range(D):
            slab1 = gather9(xf_ref[0, p, :, :])              # (HpWp, 9*Cin)
            if p + 1 < D:
                macc_ref[(p + 1) % 3] = mm(slab1, w1[0])     # open plane p+1
            macc_ref[p % 3] += mm(slab1, w1[1])
            if p > 0:
                macc_ref[(p - 1) % 3] += mm(slab1, w1[2])
                consume_mid(p - 1)

        # Drain: last mid plane, then last output plane.
        consume_mid(D - 1)
        finalize_out(D - 1)

    if identity_skip:
        def kernel(mask_ref, xf_ref, w1_ref, b1_ref, w2_ref, b2_ref,
                   out_ref, midp_ref, macc_ref, oacc_ref):
            body(mask_ref, xf_ref, w1_ref, b1_ref, w2_ref, b2_ref, None,
                 out_ref, midp_ref, macc_ref, oacc_ref)
        return kernel
    return body


def _prep_weights(params, identity_skip, Cin, Cout):
    """Fold BN scales into conv weights, cast to bf16, fold skip BN bias."""
    w1f = (params["w1"] * params["s1"][0]).reshape(3, 9 * Cin, Cout)
    w2f = (params["w2"] * params["s2"][0]).reshape(3, 9 * Cout, Cout)
    w1f = w1f.astype(jnp.bfloat16)
    w2f = w2f.astype(jnp.bfloat16)
    b1 = params["b1"]                                       # (1, Cout) f32
    b2 = params["b2"]
    if identity_skip:
        return w1f, b1, w2f, b2, None
    wsk = (params["wsk"] * params["ssk"][0]).astype(jnp.bfloat16)   # (Cin, Cout)
    return w1f, b1, w2f, b2 + params["bsk"], wsk


@functools.partial(jax.jit, static_argnames=("identity_skip",))
def res3d_block_forward(x, params, identity_skip=False):
    """x: (N, D, H, W, Cin) float32 -> (N, D, H, W, Cout) float32."""
    N, D, H, W, Cin = x.shape
    Cout = params["w1"].shape[-1]
    if identity_skip and Cin != Cout:
        raise ValueError("identity skip requires Cin == Cout")
    Hp, Wp = H + 2, W + 2
    HpWp = Hp * Wp
    EXT = ((Wp + 1 + 7) // 8) * 8            # 8-aligned row extension >= Wp+1
    Rext = HpWp + 2 * EXT

    w1f, b1, w2f, b2, wsk = _prep_weights(params, identity_skip, Cin, Cout)

    # bf16 cast first (so padded HBM copy is half-size), then spatial H/W zero
    # padding only (no depth padding needed by the scatter structure), flatten
    # (Hp, Wp) -> rows, and add the zero row extension so all 9 in-plane taps
    # are in-bounds row shifts.
    xb = x.astype(jnp.bfloat16)
    xp = jnp.pad(xb, ((0, 0), (0, 0), (1, 1), (1, 1), (0, 0)))
    xf = xp.reshape(N, D, HpWp, Cin)
    xf = jnp.pad(xf, ((0, 0), (0, 0), (EXT, EXT), (0, 0)))   # (N, D, Rext, Cin)

    rows = jnp.arange(HpWp)
    hh, ww = rows // Wp, rows % Wp
    mask = (((hh >= 1) & (hh <= H) & (ww >= 1) & (ww <= W))
            .astype(jnp.float32).reshape(HpWp, 1))

    kernel = _make_res3d_kernel(D, Hp, Wp, Cin, Cout, EXT, identity_skip)

    in_specs = [
        pl.BlockSpec((HpWp, 1), lambda n: (0, 0)),                 # interior mask
        pl.BlockSpec((1, D, Rext, Cin), lambda n: (n, 0, 0, 0)),   # x (bf16)
        pl.BlockSpec((3, 9 * Cin, Cout), lambda n: (0, 0, 0)),     # w1 (folded, bf16)
        pl.BlockSpec((1, Cout), lambda n: (0, 0)),                 # b1 (f32)
        pl.BlockSpec((3, 9 * Cout, Cout), lambda n: (0, 0, 0)),    # w2 (folded, bf16)
        pl.BlockSpec((1, Cout), lambda n: (0, 0)),                 # b2 (+skip bias)
    ]
    args = [mask, xf, w1f, b1, w2f, b2]
    if not identity_skip:
        in_specs.append(pl.BlockSpec((Cin, Cout), lambda n: (0, 0)))  # skip 1x1 w
        args.append(wsk)

    # Explicit VMEM budget: double-buffered in/out blocks + weights + scratch,
    # ~40% headroom, clamped to [32 MiB, 64 MiB] (v7x physical is 64 MiB).
    need = (2 * D * Rext * Cin * 2                 # xf block (bf16)
            + 2 * D * HpWp * Cout * 4              # out block (f32)
            + 2 * (27 * Cin * Cout + 27 * Cout * Cout + Cin * Cout) * 2
            + 2 * 3 * HpWp * Cout * 4              # rolling f32 accumulators
            + Rext * Cout * 2                      # rolling mid plane (bf16)
            + 2 * HpWp * 9 * max(Cin, Cout) * 2)   # im2col slabs / temps
    vmem_limit = int(min(max(need * 1.4 + (4 << 20), 32 << 20), 64 << 20))

    out_flat = pl.pallas_call(
        kernel,
        out_shape=jax.ShapeDtypeStruct((N, D, HpWp, Cout), jnp.float32),
        grid=(N,),
        in_specs=in_specs,
        out_specs=pl.BlockSpec((1, D, HpWp, Cout), lambda n: (n, 0, 0, 0)),
        scratch_shapes=[
            pltpu.VMEM((Rext, Cout), jnp.bfloat16),     # rolling mid plane
            pltpu.VMEM((3, HpWp, Cout), jnp.float32),   # conv1 accumulators
            pltpu.VMEM((3, HpWp, Cout), jnp.float32),   # conv2 accumulators
        ],
        compiler_params=pltpu.CompilerParams(
            dimension_semantics=("parallel",),
            vmem_limit_bytes=vmem_limit),
    )(*args)

    # Drop the spatial-halo rows (they hold discarded garbage).
    out = out_flat.reshape(N, D, Hp, Wp, Cout)[:, :, 1:H + 1, 1:W + 1, :]
    return out


# ---------------- pure-JAX reference (for correctness check) ----------------
def _conv3d_ref(x, w):
    return lax.conv_general_dilated(
        x, w, window_strides=(1, 1, 1),
        padding=((1, 1), (1, 1), (1, 1)),
        dimension_numbers=("NDHWC", "DHWIO", "NDHWC"))


def res3d_block_ref(x, params, identity_skip=False):
    """Reference that mirrors the kernel's bf16-operand / f32-accum numerics."""
    def q(a):
        return a.astype(jnp.bfloat16).astype(jnp.float32)
    w1 = q(params["w1"] * params["s1"][0])
    w2 = q(params["w2"] * params["s2"][0])
    xq = q(x)
    y = _conv3d_ref(xq, w1) + params["b1"][0]
    y = q(jnp.maximum(y, 0.0))
    y = _conv3d_ref(y, w2) + params["b2"][0]
    if identity_skip:
        skip = xq
    else:
        wsk = q(params["wsk"] * params["ssk"][0])
        skip = jnp.einsum("ndhwc,co->ndhwo", xq, wsk) + params["bsk"][0]
    return jnp.maximum(y + skip, 0.0)


# ---------------- deterministic parameter construction ----------------
def _fold_bn(key, C, conv_bias, eps=1e-5):
    kg, kb, km, kv = jax.random.split(key, 4)
    gamma = 1.0 + 0.1 * jax.random.normal(kg, (C,), jnp.float32)
    beta = 0.1 * jax.random.normal(kb, (C,), jnp.float32)
    mean = 0.1 * jax.random.normal(km, (C,), jnp.float32)
    var = 1.0 + 0.1 * jnp.abs(jax.random.normal(kv, (C,), jnp.float32))
    scale = gamma / jnp.sqrt(var + eps)
    bias = (conv_bias - mean) * scale + beta
    return scale.reshape(1, C), bias.reshape(1, C)


def init_params(key, Cin, Cout):
    ks = jax.random.split(key, 9)
    w1 = 0.1 * jax.random.normal(ks[0], (3, 3, 3, Cin, Cout), jnp.float32)
    cb1 = 0.05 * jax.random.normal(ks[1], (Cout,), jnp.float32)
    s1, b1 = _fold_bn(ks[2], Cout, cb1)

    w2 = 0.1 * jax.random.normal(ks[3], (3, 3, 3, Cout, Cout), jnp.float32)
    cb2 = 0.05 * jax.random.normal(ks[4], (Cout,), jnp.float32)
    s2, b2 = _fold_bn(ks[5], Cout, cb2)

    wsk = 0.1 * jax.random.normal(ks[6], (Cin, Cout), jnp.float32)
    cbsk = 0.05 * jax.random.normal(ks[7], (Cout,), jnp.float32)
    ssk, bsk = _fold_bn(ks[8], Cout, cbsk)

    return dict(w1=w1, s1=s1, b1=b1, w2=w2, s2=s2, b2=b2,
                wsk=wsk, ssk=ssk, bsk=bsk)


def _check(name, out, ref, atol=5e-3, rtol=5e-3):
    max_err = float(jnp.max(jnp.abs(out - ref)))
    if not bool(jnp.allclose(out, ref, atol=atol, rtol=rtol)):
        raise AssertionError(f"{name}: Pallas kernel mismatch vs reference "
                             f"(max abs err {max_err})")


if __name__ == "__main__":
    key = jax.random.PRNGKey(0)
    kx1, kp1, kx2, kp2 = jax.random.split(key, 4)

    N, D, H, W = 2, 6, 6, 6

    # Case 1: in_planes != out_planes -> 1x1-conv + BN skip branch (fused).
    Cin, Cout = 4, 8
    x1 = jax.random.normal(kx1, (N, D, H, W, Cin), jnp.float32)
    p1 = init_params(kp1, Cin, Cout)
    out1 = jax.block_until_ready(res3d_block_forward(x1, p1, identity_skip=False))
    assert out1.shape == (N, D, H, W, Cout)
    _check("skip-conv", out1, res3d_block_ref(x1, p1, identity_skip=False))

    # Case 2: in_planes == out_planes -> identity skip branch.
    C = 8
    x2 = jax.random.normal(kx2, (N, D, H, W, C), jnp.float32)
    p2 = init_params(kp2, C, C)
    out2 = jax.block_until_ready(res3d_block_forward(x2, p2, identity_skip=True))
    assert out2.shape == (N, D, H, W, C)
    _check("identity", out2, res3d_block_ref(x2, p2, identity_skip=True))

    print("KERNEL_OK")
</pallas_src>

<mosaic_0001>
module attributes {stable_mosaic.version = 11 : i64} {
  func.func @body(%arg0: i32, %arg1: memref<64x1xf32, #tpu.memory_space<vmem>>, %arg2: memref<1x6x96x4xbf16, #tpu.memory_space<vmem>>, %arg3: memref<3x36x8xbf16, #tpu.memory_space<vmem>>, %arg4: memref<1x8xf32, #tpu.memory_space<vmem>>, %arg5: memref<3x72x8xbf16, #tpu.memory_space<vmem>>, %arg6: memref<1x8xf32, #tpu.memory_space<vmem>>, %arg7: memref<4x8xbf16, #tpu.memory_space<vmem>>, %arg8: memref<1x6x64x8xf32, #tpu.memory_space<vmem>>, %arg9: memref<96x8xbf16, #tpu.memory_space<vmem>>, %arg10: memref<3x64x8xf32, #tpu.memory_space<vmem>>, %arg11: memref<3x64x8xf32, #tpu.memory_space<vmem>>) attributes {dimension_semantics = [#tpu.dimension_semantics<parallel>], iteration_bounds = array<i64: 2>, scalar_prefetch = 0 : i64, scratch_operands = 3 : i64, tpu.core_type = #tpu.core_type<tc>, window_params = [{pipeline_mode = #tpu.pipeline_mode<synchronous>, transform_indices = @transform_0, window_bounds = array<i64: 64, 1>}, {transform_indices = @transform_1, window_bounds = array<i64: 1, 6, 96, 4>}, {pipeline_mode = #tpu.pipeline_mode<synchronous>, transform_indices = @transform_2, window_bounds = array<i64: 3, 36, 8>}, {pipeline_mode = #tpu.pipeline_mode<synchronous>, transform_indices = @transform_3, window_bounds = array<i64: 1, 8>}, {pipeline_mode = #tpu.pipeline_mode<synchronous>, transform_indices = @transform_4, window_bounds = array<i64: 3, 72, 8>}, {pipeline_mode = #tpu.pipeline_mode<synchronous>, transform_indices = @transform_5, window_bounds = array<i64: 1, 8>}, {pipeline_mode = #tpu.pipeline_mode<synchronous>, transform_indices = @transform_6, window_bounds = array<i64: 4, 8>}, {transform_indices = @transform_7, window_bounds = array<i64: 1, 6, 64, 8>}]} {
    %c0 = arith.constant 0 : index
    %c0_0 = arith.constant 0 : index
    %0 = vector.load %arg1[%c0, %c0_0] : memref<64x1xf32, #tpu.memory_space<vmem>>, vector<64x1xf32>
    %1 = vector.shape_cast %0 : vector<64x1xf32> to vector<64x1xf32>
    %2 = vector.broadcast %1 : vector<64x1xf32> to vector<64x8xf32>
    %c0_1 = arith.constant 0 : index
    %c0_2 = arith.constant 0 : index
    %3 = vector.load %arg4[%c0_1, %c0_2] : memref<1x8xf32, #tpu.memory_space<vmem>>, vector<1x8xf32>
    %4 = vector.shape_cast %3 : vector<1x8xf32> to vector<1x8xf32>
    %5 = vector.broadcast %4 : vector<1x8xf32> to vector<64x8xf32>
    %c0_3 = arith.constant 0 : index
    %c0_4 = arith.constant 0 : index
    %6 = vector.load %arg6[%c0_3, %c0_4] : memref<1x8xf32, #tpu.memory_space<vmem>>, vector<1x8xf32>
    %7 = vector.shape_cast %6 : vector<1x8xf32> to vector<1x8xf32>
    %8 = vector.broadcast %7 : vector<1x8xf32> to vector<64x8xf32>
    %cst = arith.constant 0.000000e+00 : f32
    %9 = vector.broadcast %cst : f32 to vector<3x64x8xf32>
    %c0_5 = arith.constant 0 : index
    %c0_6 = arith.constant 0 : index
    %c0_7 = arith.constant 0 : index
    %10 = vector.load %arg10[%c0_5, %c0_6, %c0_7] : memref<3x64x8xf32, #tpu.memory_space<vmem>>, vector<3x64x8xf32>
    tpu.vector_store %arg10[%c0_5, %c0_6, %c0_7], %9 {strides = array<i32>} : memref<3x64x8xf32, #tpu.memory_space<vmem>>, vector<3x64x8xf32>,
    %cst_8 = arith.constant 0.000000e+00 : f32
    %11 = vector.broadcast %cst_8 : f32 to vector<3x64x8xf32>
    %c0_9 = arith.constant 0 : index
    %c0_10 = arith.constant 0 : index
    %c0_11 = arith.constant 0 : index
    %12 = vector.load %arg11[%c0_9, %c0_10, %c0_11] : memref<3x64x8xf32, #tpu.memory_space<vmem>>, vector<3x64x8xf32>
    tpu.vector_store %arg11[%c0_9, %c0_10, %c0_11], %11 {strides = array<i32>} : memref<3x64x8xf32, #tpu.memory_space<vmem>>, vector<3x64x8xf32>,
    %cst_12 = arith.constant 0.000000e+00 : bf16
    %13 = vector.broadcast %cst_12 : bf16 to vector<16x8xbf16>
    %c0_13 = arith.constant 0 : index
    %c0_14 = arith.constant 0 : index
    %14 = vector.load %arg9[%c0_13, %c0_14] : memref<96x8xbf16, #tpu.memory_space<vmem>>, vector<16x8xbf16>
    tpu.vector_store %arg9[%c0_13, %c0_14], %13 {strides = array<i32>} : memref<96x8xbf16, #tpu.memory_space<vmem>>, vector<16x8xbf16>,
    %c80 = arith.constant 80 : index
    %c0_15 = arith.constant 0 : index
    %15 = vector.load %arg9[%c80, %c0_15] : memref<96x8xbf16, #tpu.memory_space<vmem>>, vector<16x8xbf16>
    tpu.vector_store %arg9[%c80, %c0_15], %13 {strides = array<i32>} : memref<96x8xbf16, #tpu.memory_space<vmem>>, vector<16x8xbf16>,
    %c0_16 = arith.constant 0 : index
    %c0_17 = arith.constant 0 : index
    %c0_18 = arith.constant 0 : index
    %16 = vector.load %arg3[%c0_16, %c0_17, %c0_18] : memref<3x36x8xbf16, #tpu.memory_space<vmem>>, vector<1x36x8xbf16>
    %17 = vector.shape_cast %16 : vector<1x36x8xbf16> to vector<36x8xbf16>
    %c1 = arith.constant 1 : index
    %c0_19 = arith.constant 0 : index
    %c0_20 = arith.constant 0 : index
    %18 = vector.load %arg3[%c1, %c0_19, %c0_20] : memref<3x36x8xbf16, #tpu.memory_space<vmem>>, vector<1x36x8xbf16>
    %19 = vector.shape_cast %18 : vector<1x36x8xbf16> to vector<36x8xbf16>
    %c2 = arith.constant 2 : index
    %c0_21 = arith.constant 0 : index
    %c0_22 = arith.constant 0 : index
    %20 = vector.load %arg3[%c2, %c0_21, %c0_22] : memref<3x36x8xbf16, #tpu.memory_space<vmem>>, vector<1x36x8xbf16>
    %21 = vector.shape_cast %20 : vector<1x36x8xbf16> to vector<36x8xbf16>
    %c0_23 = arith.constant 0 : index
    %c0_24 = arith.constant 0 : index
    %c0_25 = arith.constant 0 : index
    %22 = vector.load %arg5[%c0_23, %c0_24, %c0_25] : memref<3x72x8xbf16, #tpu.memory_space<vmem>>, vector<1x72x8xbf16>
    %23 = vector.shape_cast %22 : vector<1x72x8xbf16> to vector<72x8xbf16>
    %c1_26 = arith.constant 1 : index
    %c0_27 = arith.constant 0 : index
    %c0_28 = arith.constant 0 : index
    %24 = vector.load %arg5[%c1_26, %c0_27, %c0_28] : memref<3x72x8xbf16, #tpu.memory_space<vmem>>, vector<1x72x8xbf16>
    %25 = vector.shape_cast %24 : vector<1x72x8xbf16> to vector<72x8xbf16>
    %c2_29 = arith.constant 2 : index
    %c0_30 = arith.constant 0 : index
    %c0_31 = arith.constant 0 : index
    %26 = vector.load %arg5[%c2_29, %c0_30, %c0_31] : memref<3x72x8xbf16, #tpu.memory_space<vmem>>, vector<1x72x8xbf16>
    %27 = vector.shape_cast %26 : vector<1x72x8xbf16> to vector<72x8xbf16>
    %c0_32 = arith.constant 0 : index
    %c0_33 = arith.constant 0 : index
    %c0_34 = arith.constant 0 : index
    %c0_35 = arith.constant 0 : index
    %28 = vector.load %arg2[%c0_32, %c0_33, %c0_34, %c0_35] : memref<1x6x96x4xbf16, #tpu.memory_space<vmem>>, vector<1x1x96x4xbf16>
    %29 = vector.shape_cast %28 : vector<1x1x96x4xbf16> to vector<96x4xbf16>
    %30 = vector.extract_strided_slice %29 {offsets = [7, 0], sizes = [64, 4], strides = [1, 1]} : vector<96x4xbf16> to vector<64x4xbf16>
    %31 = vector.extract_strided_slice %29 {offsets = [8, 0], sizes = [64, 4], strides = [1, 1]} : vector<96x4xbf16> to vector<64x4xbf16>
    %32 = vector.extract_strided_slice %29 {offsets = [9, 0], sizes = [64, 4], strides = [1, 1]} : vector<96x4xbf16> to vector<64x4xbf16>
    %33 = vector.extract_strided_slice %29 {offsets = [15, 0], sizes = [64, 4], strides = [1, 1]} : vector<96x4xbf16> to vector<64x4xbf16>
    %34 = vector.extract_strided_slice %29 {offsets = [16, 0], sizes = [64, 4], strides = [1, 1]} : vector<96x4xbf16> to vector<64x4xbf16>
    %35 = vector.extract_strided_slice %29 {offsets = [17, 0], sizes = [64, 4], strides = [1, 1]} : vector<96x4xbf16> to vector<64x4xbf16>
    %36 = vector.extract_strided_slice %29 {offsets = [23, 0], sizes = [64, 4], strides = [1, 1]} : vector<96x4xbf16> to vector<64x4xbf16>
    %37 = vector.extract_strided_slice %29 {offsets = [24, 0], sizes = [64, 4], strides = [1, 1]} : vector<96x4xbf16> to vector<64x4xbf16>
    %38 = vector.extract_strided_slice %29 {offsets = [25, 0], sizes = [64, 4], strides = [1, 1]} : vector<96x4xbf16> to vector<64x4xbf16>
    %39 = tpu.concatenate %30, %31, %32, %33, %34, %35, %36, %37, %38 in 1 : vector<64x4xbf16>, vector<64x4xbf16>, vector<64x4xbf16>, vector<64x4xbf16>, vector<64x4xbf16>, vector<64x4xbf16>, vector<64x4xbf16>, vector<64x4xbf16>, vector<64x4xbf16> -> vector<64x36xbf16>
    %cst_36 = arith.constant dense<0.000000e+00> : vector<64x8xf32>
    %40 = tpu.matmul %39, %17, %cst_36 {dimension_numbers = #tpu.dot_dimension_numbers<[1], [0], [0], [1], [0, 0, 1, 1], [], []>} : vector<64x36xbf16>, vector<36x8xbf16>, vector<64x8xf32> -> vector<64x8xf32>
    %c1_37 = arith.constant 1 : index
    %c0_38 = arith.constant 0 : index
    %c0_39 = arith.constant 0 : index
    %41 = vector.load %arg10[%c1_37, %c0_38, %c0_39] : memref<3x64x8xf32, #tpu.memory_space<vmem>>, vector<1x64x8xf32>
    %42 = vector.shape_cast %41 : vector<1x64x8xf32> to vector<64x8xf32>
    %43 = vector.shape_cast %40 : vector<64x8xf32> to vector<1x64x8xf32>
    tpu.vector_store %arg10[%c1_37, %c0_38, %c0_39], %43 {strides = array<i32>} : memref<3x64x8xf32, #tpu.memory_space<vmem>>, vector<1x64x8xf32>,
    %c0_40 = arith.constant 0 : index
    %c0_41 = arith.constant 0 : index
    %c0_42 = arith.constant 0 : index
    %44 = vector.load %arg10[%c0_40, %c0_41, %c0_42] : memref<3x64x8xf32, #tpu.memory_space<vmem>>, vector<1x64x8xf32>
    %45 = vector.shape_cast %44 : vector<1x64x8xf32> to vector<64x8xf32>
    %cst_43 = arith.constant dense<0.000000e+00> : vector<64x8xf32>
    %46 = tpu.matmul %39, %19, %cst_43 {dimension_numbers = #tpu.dot_dimension_numbers<[1], [0], [0], [1], [0, 0, 1, 1], [], []>} : vector<64x36xbf16>, vector<36x8xbf16>, vector<64x8xf32> -> vector<64x8xf32>
    %47 = arith.addf %45, %46 : vector<64x8xf32>
    %c0_44 = arith.constant 0 : index
    %c0_45 = arith.constant 0 : index
    %c0_46 = arith.constant 0 : index
    %48 = vector.load %arg10[%c0_44, %c0_45, %c0_46] : memref<3x64x8xf32, #tpu.memory_space<vmem>>, vector<1x64x8xf32>
    %49 = vector.shape_cast %48 : vector<1x64x8xf32> to vector<64x8xf32>
    %50 = vector.shape_cast %47 : vector<64x8xf32> to vector<1x64x8xf32>
    tpu.vector_store %arg10[%c0_44, %c0_45, %c0_46], %50 {strides = array<i32>} : memref<3x64x8xf32, #tpu.memory_space<vmem>>, vector<1x64x8xf32>,
    %c0_47 = arith.constant 0 : index
    %c1_48 = arith.constant 1 : index
    %c0_49 = arith.constant 0 : index
    %c0_50 = arith.constant 0 : index
    %51 = vector.load %arg2[%c0_47, %c1_48, %c0_49, %c0_50] : memref<1x6x96x4xbf16, #tpu.memory_space<vmem>>, vector<1x1x96x4xbf16>
    %52 = vector.shape_cast %51 : vector<1x1x96x4xbf16> to vector<96x4xbf16>
    %53 = vector.extract_strided_slice %52 {offsets = [7, 0], sizes = [64, 4], strides = [1, 1]} : vector<96x4xbf16> to vector<64x4xbf16>
    %54 = vector.extract_strided_slice %52 {offsets = [8, 0], sizes = [64, 4], strides = [1, 1]} : vector<96x4xbf16> to vector<64x4xbf16>
    %55 = vector.extract_strided_slice %52 {offsets = [9, 0], sizes = [64, 4], strides = [1, 1]} : vector<96x4xbf16> to vector<64x4xbf16>
    %56 = vector.extract_strided_slice %52 {offsets = [15, 0], sizes = [64, 4], strides = [1, 1]} : vector<96x4xbf16> to vector<64x4xbf16>
    %57 = vector.extract_strided_slice %52 {offsets = [16, 0], sizes = [64, 4], strides = [1, 1]} : vector<96x4xbf16> to vector<64x4xbf16>
    %58 = vector.extract_strided_slice %52 {offsets = [17, 0], sizes = [64, 4], strides = [1, 1]} : vector<96x4xbf16> to vector<64x4xbf16>
    %59 = vector.extract_strided_slice %52 {offsets = [23, 0], sizes = [64, 4], strides = [1, 1]} : vector<96x4xbf16> to vector<64x4xbf16>
    %60 = vector.extract_strided_slice %52 {offsets = [24, 0], sizes = [64, 4], strides = [1, 1]} : vector<96x4xbf16> to vector<64x4xbf16>
    %61 = vector.extract_strided_slice %52 {offsets = [25, 0], sizes = [64, 4], strides = [1, 1]} : vector<96x4xbf16> to vector<64x4xbf16>
    %62 = tpu.concatenate %53, %54, %55, %56, %57, %58, %59, %60, %61 in 1 : vector<64x4xbf16>, vector<64x4xbf16>, vector<64x4xbf16>, vector<64x4xbf16>, vector<64x4xbf16>, vector<64x4xbf16>, vector<64x4xbf16>, vector<64x4xbf16>, vector<64x4xbf16> -> vector<64x36xbf16>
    %cst_51 = arith.constant dense<0.000000e+00> : vector<64x8xf32>
    %63 = tpu.matmul %62, %17, %cst_51 {dimension_numbers = #tpu.dot_dimension_numbers<[1], [0], [0], [1], [0, 0, 1, 1], [], []>} : vector<64x36xbf16>, vector<36x8xbf16>, vector<64x8xf32> -> vector<64x8xf32>
    %c2_52 = arith.constant 2 : index
    %c0_53 = arith.constant 0 : index
    %c0_54 = arith.constant 0 : index
    %64 = vector.load %arg10[%c2_52, %c0_53, %c0_54] : memref<3x64x8xf32, #tpu.memory_space<vmem>>, vector<1x64x8xf32>
    %65 = vector.shape_cast %64 : vector<1x64x8xf32> to vector<64x8xf32>
    %66 = vector.shape_cast %63 : vector<64x8xf32> to vector<1x64x8xf32>
    tpu.vector_store %arg10[%c2_52, %c0_53, %c0_54], %66 {strides = array<i32>} : memref<3x64x8xf32, #tpu.memory_space<vmem>>, vector<1x64x8xf32>,
    %c1_55 = arith.constant 1 : index
    %c0_56 = arith.constant 0 : index
    %c0_57 = arith.constant 0 : index
    %67 = vector.load %arg10[%c1_55, %c0_56, %c0_57] : memref<3x64x8xf32, #tpu.memory_space<vmem>>, vector<1x64x8xf32>
    %68 = vector.shape_cast %67 : vector<1x64x8xf32> to vector<64x8xf32>
    %cst_58 = arith.constant dense<0.000000e+00> : vector<64x8xf32>
    %69 = tpu.matmul %62, %19, %cst_58 {dimension_numbers = #tpu.dot_dimension_numbers<[1], [0], [0], [1], [0, 0, 1, 1], [], []>} : vector<64x36xbf16>, vector<36x8xbf16>, vector<64x8xf32> -> vector<64x8xf32>
    %70 = arith.addf %68, %69 : vector<64x8xf32>
    %c1_59 = arith.constant 1 : index
    %c0_60 = arith.constant 0 : index
    %c0_61 = arith.constant 0 : index
    %71 = vector.load %arg10[%c1_59, %c0_60, %c0_61] : memref<3x64x8xf32, #tpu.memory_space<vmem>>, vector<1x64x8xf32>
    %72 = vector.shape_cast %71 : vector<1x64x8xf32> to vector<64x8xf32>
    %73 = vector.shape_cast %70 : vector<64x8xf32> to vector<1x64x8xf32>
    tpu.vector_store %arg10[%c1_59, %c0_60, %c0_61], %73 {strides = array<i32>} : memref<3x64x8xf32, #tpu.memory_space<vmem>>, vector<1x64x8xf32>,
    %c0_62 = arith.constant 0 : index
    %c0_63 = arith.constant 0 : index
    %c0_64 = arith.constant 0 : index
    %74 = vector.load %arg10[%c0_62, %c0_63, %c0_64] : memref<3x64x8xf32, #tpu.memory_space<vmem>>, vector<1x64x8xf32>
    %75 = vector.shape_cast %74 : vector<1x64x8xf32> to vector<64x8xf32>
    %cst_65 = arith.constant dense<0.000000e+00> : vector<64x8xf32>
    %76 = tpu.matmul %62, %21, %cst_65 {dimension_numbers = #tpu.dot_dimension_numbers<[1], [0], [0], [1], [0, 0, 1, 1], [], []>} : vector<64x36xbf16>, vector<36x8xbf16>, vector<64x8xf32> -> vector<64x8xf32>
    %77 = arith.addf %75, %76 : vector<64x8xf32>
    %c0_66 = arith.constant 0 : index
    %c0_67 = arith.constant 0 : index
    %c0_68 = arith.constant 0 : index
    %78 = vector.load %arg10[%c0_66, %c0_67, %c0_68] : memref<3x64x8xf32, #tpu.memory_space<vmem>>, vector<1x64x8xf32>
    %79 = vector.shape_cast %78 : vector<1x64x8xf32> to vector<64x8xf32>
    %80 = vector.shape_cast %77 : vector<64x8xf32> to vector<1x64x8xf32>
    tpu.vector_store %arg10[%c0_66, %c0_67, %c0_68], %80 {strides = array<i32>} : memref<3x64x8xf32, #tpu.memory_space<vmem>>, vector<1x64x8xf32>,
    %c0_69 = arith.constant 0 : index
    %c0_70 = arith.constant 0 : index
    %c0_71 = arith.constant 0 : index
    %81 = vector.load %arg10[%c0_69, %c0_70, %c0_71] : memref<3x64x8xf32, #tpu.memory_space<vmem>>, vector<1x64x8xf32>
    %82 = vector.shape_cast %81 : vector<1x64x8xf32> to vector<64x8xf32>
    %83 = arith.addf %82, %5 : vector<64x8xf32>
    %cst_72 = arith.constant 0.000000e+00 : f32
    %84 = vector.broadcast %cst_72 : f32 to vector<64x8xf32>
    %85 = arith.maximumf %83, %84 : vector<64x8xf32>
    %86 = arith.mulf %85, %2 : vector<64x8xf32>
    %87 = arith.truncf %86 : vector<64x8xf32> to vector<64x8xbf16>
    %c16 = arith.constant 16 : index
    %c0_73 = arith.constant 0 : index
    %88 = vector.load %arg9[%c16, %c0_73] : memref<96x8xbf16, #tpu.memory_space<vmem>>, vector<64x8xbf16>
    tpu.vector_store %arg9[%c16, %c0_73], %87 {strides = array<i32>} : memref<96x8xbf16, #tpu.memory_space<vmem>>, vector<64x8xbf16>,
    %c0_74 = arith.constant 0 : index
    %c0_75 = arith.constant 0 : index
    %89 = vector.load %arg9[%c0_74, %c0_75] : memref<96x8xbf16, #tpu.memory_space<vmem>>, vector<96x8xbf16>
    %90 = vector.extract_strided_slice %89 {offsets = [7, 0], sizes = [64, 8], strides = [1, 1]} : vector<96x8xbf16> to vector<64x8xbf16>
    %91 = vector.extract_strided_slice %89 {offsets = [8, 0], sizes = [64, 8], strides = [1, 1]} : vector<96x8xbf16> to vector<64x8xbf16>
    %92 = vector.extract_strided_slice %89 {offsets = [9, 0], sizes = [64, 8], strides = [1, 1]} : vector<96x8xbf16> to vector<64x8xbf16>
    %93 = vector.extract_strided_slice %89 {offsets = [15, 0], sizes = [64, 8], strides = [1, 1]} : vector<96x8xbf16> to vector<64x8xbf16>
    %94 = vector.extract_strided_slice %89 {offsets = [16, 0], sizes = [64, 8], strides = [1, 1]} : vector<96x8xbf16> to vector<64x8xbf16>
    %95 = vector.extract_strided_slice %89 {offsets = [17, 0], sizes = [64, 8], strides = [1, 1]} : vector<96x8xbf16> to vector<64x8xbf16>
    %96 = vector.extract_strided_slice %89 {offsets = [23, 0], sizes = [64, 8], strides = [1, 1]} : vector<96x8xbf16> to vector<64x8xbf16>
    %97 = vector.extract_strided_slice %89 {offsets = [24, 0], sizes = [64, 8], strides = [1, 1]} : vector<96x8xbf16> to vector<64x8xbf16>
    %98 = vector.extract_strided_slice %89 {offsets = [25, 0], sizes = [64, 8], strides = [1, 1]} : vector<96x8xbf16> to vector<64x8xbf16>
    %99 = tpu.concatenate %90, %91, %92, %93, %94, %95, %96, %97, %98 in 1 : vector<64x8xbf16>, vector<64x8xbf16>, vector<64x8xbf16>, vector<64x8xbf16>, vector<64x8xbf16>, vector<64x8xbf16>, vector<64x8xbf16>, vector<64x8xbf16>, vector<64x8xbf16> -> vector<64x72xbf16>
    %cst_76 = arith.constant dense<0.000000e+00> : vector<64x8xf32>
    %100 = tpu.matmul %99, %23, %cst_76 {dimension_numbers = #tpu.dot_dimension_numbers<[1], [0], [0], [1], [0, 0, 1, 1], [], []>} : vector<64x72xbf16>, vector<72x8xbf16>, vector<64x8xf32> -> vector<64x8xf32>
    %c1_77 = arith.constant 1 : index
    %c0_78 = arith.constant 0 : index
    %c0_79 = arith.constant 0 : index
    %101 = vector.load %arg11[%c1_77, %c0_78, %c0_79] : memref<3x64x8xf32, #tpu.memory_space<vmem>>, vector<1x64x8xf32>
    %102 = vector.shape_cast %101 : vector<1x64x8xf32> to vector<64x8xf32>
    %103 = vector.shape_cast %100 : vector<64x8xf32> to vector<1x64x8xf32>
    tpu.vector_store %arg11[%c1_77, %c0_78, %c0_79], %103 {strides = array<i32>} : memref<3x64x8xf32, #tpu.memory_space<vmem>>, vector<1x64x8xf32>,
    %c0_80 = arith.constant 0 : index
    %c0_81 = arith.constant 0 : index
    %c0_82 = arith.constant 0 : index
    %104 = vector.load %arg11[%c0_80, %c0_81, %c0_82] : memref<3x64x8xf32, #tpu.memory_space<vmem>>, vector<1x64x8xf32>
    %105 = vector.shape_cast %104 : vector<1x64x8xf32> to vector<64x8xf32>
    %cst_83 = arith.constant dense<0.000000e+00> : vector<64x8xf32>
    %106 = tpu.matmul %99, %25, %cst_83 {dimension_numbers = #tpu.dot_dimension_numbers<[1], [0], [0], [1], [0, 0, 1, 1], [], []>} : vector<64x72xbf16>, vector<72x8xbf16>, vector<64x8xf32> -> vector<64x8xf32>
    %107 = arith.addf %105, %106 : vector<64x8xf32>
    %c0_84 = arith.constant 0 : index
    %c0_85 = arith.constant 0 : index
    %c0_86 = arith.constant 0 : index
    %108 = vector.load %arg11[%c0_84, %c0_85, %c0_86] : memref<3x64x8xf32, #tpu.memory_space<vmem>>, vector<1x64x8xf32>
    %109 = vector.shape_cast %108 : vector<1x64x8xf32> to vector<64x8xf32>
    %110 = vector.shape_cast %107 : vector<64x8xf32> to vector<1x64x8xf32>
    tpu.vector_store %arg11[%c0_84, %c0_85, %c0_86], %110 {strides = array<i32>} : memref<3x64x8xf32, #tpu.memory_space<vmem>>, vector<1x64x8xf32>,
    %c0_87 = arith.constant 0 : index
    %c2_88 = arith.constant 2 : index
    %c0_89 = arith.constant 0 : index
    %c0_90 = arith.constant 0 : index
    %111 = vector.load %arg2[%c0_87, %c2_88, %c0_89, %c0_90] : memref<1x6x96x4xbf16, #tpu.memory_space<vmem>>, vector<1x1x96x4xbf16>
    %112 = vector.shape_cast %111 : vector<1x1x96x4xbf16> to vector<96x4xbf16>
    %113 = vector.extract_strided_slice %112 {offsets = [7, 0], sizes = [64, 4], strides = [1, 1]} : vector<96x4xbf16> to vector<64x4xbf16>
    %114 = vector.extract_strided_slice %112 {offsets = [8, 0], sizes = [64, 4], strides = [1, 1]} : vector<96x4xbf16> to vector<64x4xbf16>
    %115 = vector.extract_strided_slice %112 {offsets = [9, 0], sizes = [64, 4], strides = [1, 1]} : vector<96x4xbf16> to vector<64x4xbf16>
    %116 = vector.extract_strided_slice %112 {offsets = [15, 0], sizes = [64, 4], strides = [1, 1]} : vector<96x4xbf16> to vector<64x4xbf16>
    %117 = vector.extract_strided_slice %112 {offsets = [16, 0], sizes = [64, 4], strides = [1, 1]} : vector<96x4xbf16> to vector<64x4xbf16>
    %118 = vector.extract_strided_slice %112 {offsets = [17, 0], sizes = [64, 4], strides = [1, 1]} : vector<96x4xbf16> to vector<64x4xbf16>
    %119 = vector.extract_strided_slice %112 {offsets = [23, 0], sizes = [64, 4], strides = [1, 1]} : vector<96x4xbf16> to vector<64x4xbf16>
    %120 = vector.extract_strided_slice %112 {offsets = [24, 0], sizes = [64, 4], strides = [1, 1]} : vector<96x4xbf16> to vector<64x4xbf16>
    %121 = vector.extract_strided_slice %112 {offsets = [25, 0], sizes = [64, 4], strides = [1, 1]} : vector<96x4xbf16> to vector<64x4xbf16>
    %122 = tpu.concatenate %113, %114, %115, %116, %117, %118, %119, %120, %121 in 1 : vector<64x4xbf16>, vector<64x4xbf16>, vector<64x4xbf16>, vector<64x4xbf16>, vector<64x4xbf16>, vector<64x4xbf16>, vector<64x4xbf16>, vector<64x4xbf16>, vector<64x4xbf16> -> vector<64x36xbf16>
    %cst_91 = arith.constant dense<0.000000e+00> : vector<64x8xf32>
    %123 = tpu.matmul %122, %17, %cst_91 {dimension_numbers = #tpu.dot_dimension_numbers<[1], [0], [0], [1], [0, 0, 1, 1], [], []>} : vector<64x36xbf16>, vector<36x8xbf16>, vector<64x8xf32> -> vector<64x8xf32>
    %c0_92 = arith.constant 0 : index
    %c0_93 = arith.constant 0 : index
    %c0_94 = arith.constant 0 : index
    %124 = vector.load %arg10[%c0_92, %c0_93, %c0_94] : memref<3x64x8xf32, #tpu.memory_space<vmem>>, vector<1x64x8xf32>
    %125 = vector.shape_cast %124 : vector<1x64x8xf32> to vector<64x8xf32>
    %126 = vector.shape_cast %123 : vector<64x8xf32> to vector<1x64x8xf32>
    tpu.vector_store %arg10[%c0_92, %c0_93, %c0_94], %126 {strides = array<i32>} : memref<3x64x8xf32, #tpu.memory_space<vmem>>, vector<1x64x8xf32>,
    %c2_95 = arith.constant 2 : index
    %c0_96 = arith.constant 0 : index
    %c0_97 = arith.constant 0 : index
    %127 = vector.load %arg10[%c2_95, %c0_96, %c0_97] : memref<3x64x8xf32, #tpu.memory_space<vmem>>, vector<1x64x8xf32>
    %128 = vector.shape_cast %127 : vector<1x64x8xf32> to vector<64x8xf32>
    %cst_98 = arith.constant dense<0.000000e+00> : vector<64x8xf32>
    %129 = tpu.matmul %122, %19, %cst_98 {dimension_numbers = #tpu.dot_dimension_numbers<[1], [0], [0], [1], [0, 0, 1, 1], [], []>} : vector<64x36xbf16>, vector<36x8xbf16>, vector<64x8xf32> -> vector<64x8xf32>
    %130 = arith.addf %128, %129 : vector<64x8xf32>
    %c2_99 = arith.constant 2 : index
    %c0_100 = arith.constant 0 : index
    %c0_101 = arith.constant 0 : index
    %131 = vector.load %arg10[%c2_99, %c0_100, %c0_101] : memref<3x64x8xf32, #tpu.memory_space<vmem>>, vector<1x64x8xf32>
    %132 = vector.shape_cast %131 : vector<1x64x8xf32> to vector<64x8xf32>
    %133 = vector.shape_cast %130 : vector<64x8xf32> to vector<1x64x8xf32>
    tpu.vector_store %arg10[%c2_99, %c0_100, %c0_101], %133 {strides = array<i32>} : memref<3x64x8xf32, #tpu.memory_space<vmem>>, vector<1x64x8xf32>,
    %c1_102 = arith.constant 1 : index
    %c0_103 = arith.constant 0 : index
    %c0_104 = arith.constant 0 : index
    %134 = vector.load %arg10[%c1_102, %c0_103, %c0_104] : memref<3x64x8xf32, #tpu.memory_space<vmem>>, vector<1x64x8xf32>
    %135 = vector.shape_cast %134 : vector<1x64x8xf32> to vector<64x8xf32>
    %cst_105 = arith.constant dense<0.000000e+00> : vector<64x8xf32>
    %136 = tpu.matmul %122, %21, %cst_105 {dimension_numbers = #tpu.dot_dimension_numbers<[1], [0], [0], [1], [0, 0, 1, 1], [], []>} : vector<64x36xbf16>, vector<36x8xbf16>, vector<64x8xf32> -> vector<64x8xf32>
    %137 = arith.addf %135, %136 : vector<64x8xf32>
    %c1_106 = arith.constant 1 : index
    %c0_107 = arith.constant 0 : index
    %c0_108 = arith.constant 0 : index
    %138 = vector.load %arg10[%c1_106, %c0_107, %c0_108] : memref<3x64x8xf32, #tpu.memory_space<vmem>>, vector<1x64x8xf32>
    %139 = vector.shape_cast %138 : vector<1x64x8xf32> to vector<64x8xf32>
    %140 = vector.shape_cast %137 : vector<64x8xf32> to vector<1x64x8xf32>
    tpu.vector_store %arg10[%c1_106, %c0_107, %c0_108], %140 {strides = array<i32>} : memref<3x64x8xf32, #tpu.memory_space<vmem>>, vector<1x64x8xf32>,
    %c1_109 = arith.constant 1 : index
    %c0_110 = arith.constant 0 : index
    %c0_111 = arith.constant 0 : index
    %141 = vector.load %arg10[%c1_109, %c0_110, %c0_111] : memref<3x64x8xf32, #tpu.memory_space<vmem>>, vector<1x64x8xf32>
    %142 = vector.shape_cast %141 : vector<1x64x8xf32> to vector<64x8xf32>
    %143 = arith.addf %142, %5 : vector<64x8xf32>
    %cst_112 = arith.constant 0.000000e+00 : f32
    %144 = vector.broadcast %cst_112 : f32 to vector<64x8xf32>
    %145 = arith.maximumf %143, %144 : vector<64x8xf32>
    %146 = arith.mulf %145, %2 : vector<64x8xf32>
    %147 = arith.truncf %146 : vector<64x8xf32> to vector<64x8xbf16>
    %c16_113 = arith.constant 16 : index
    %c0_114 = arith.constant 0 : index
    %148 = vector.load %arg9[%c16_113, %c0_114] : memref<96x8xbf16, #tpu.memory_space<vmem>>, vector<64x8xbf16>
    tpu.vector_store %arg9[%c16_113, %c0_114], %147 {strides = array<i32>} : memref<96x8xbf16, #tpu.memory_space<vmem>>, vector<64x8xbf16>,
    %c0_115 = arith.constant 0 : index
    %c0_116 = arith.constant 0 : index
    %149 = vector.load %arg9[%c0_115, %c0_116] : memref<96x8xbf16, #tpu.memory_space<vmem>>, vector<96x8xbf16>
    %150 = vector.extract_strided_slice %149 {offsets = [7, 0], sizes = [64, 8], strides = [1, 1]} : vector<96x8xbf16> to vector<64x8xbf16>
    %151 = vector.extract_strided_slice %149 {offsets = [8, 0], sizes = [64, 8], strides = [1, 1]} : vector<96x8xbf16> to vector<64x8xbf16>
    %152 = vector.extract_strided_slice %149 {offsets = [9, 0], sizes = [64, 8], strides = [1, 1]} : vector<96x8xbf16> to vector<64x8xbf16>
    %153 = vector.extract_strided_slice %149 {offsets = [15, 0], sizes = [64, 8], strides = [1, 1]} : vector<96x8xbf16> to vector<64x8xbf16>
    %154 = vector.extract_strided_slice %149 {offsets = [16, 0], sizes = [64, 8], strides = [1, 1]} : vector<96x8xbf16> to vector<64x8xbf16>
    %155 = vector.extract_strided_slice %149 {offsets = [17, 0], sizes = [64, 8], strides = [1, 1]} : vector<96x8xbf16> to vector<64x8xbf16>
    %156 = vector.extract_strided_slice %149 {offsets = [23, 0], sizes = [64, 8], strides = [1, 1]} : vector<96x8xbf16> to vector<64x8xbf16>
    %157 = vector.extract_strided_slice %149 {offsets = [24, 0], sizes = [64, 8], strides = [1, 1]} : vector<96x8xbf16> to vector<64x8xbf16>
    %158 = vector.extract_strided_slice %149 {offsets = [25, 0], sizes = [64, 8], strides = [1, 1]} : vector<96x8xbf16> to vector<64x8xbf16>
    %159 = tpu.concatenate %150, %151, %152, %153, %154, %155, %156, %157, %158 in 1 : vector<64x8xbf16>, vector<64x8xbf16>, vector<64x8xbf16>, vector<64x8xbf16>, vector<64x8xbf16>, vector<64x8xbf16>, vector<64x8xbf16>, vector<64x8xbf16>, vector<64x8xbf16> -> vector<64x72xbf16>
    %cst_117 = arith.constant dense<0.000000e+00> : vector<64x8xf32>
    %160 = tpu.matmul %159, %23, %cst_117 {dimension_numbers = #tpu.dot_dimension_numbers<[1], [0], [0], [1], [0, 0, 1, 1], [], []>} : vector<64x72xbf16>, vector<72x8xbf16>, vector<64x8xf32> -> vector<64x8xf32>
    %c2_118 = arith.constant 2 : index
    %c0_119 = arith.constant 0 : index
    %c0_120 = arith.constant 0 : index
    %161 = vector.load %arg11[%c2_118, %c0_119, %c0_120] : memref<3x64x8xf32, #tpu.memory_space<vmem>>, vector<1x64x8xf32>
    %162 = vector.shape_cast %161 : vector<1x64x8xf32> to vector<64x8xf32>
    %163 = vector.shape_cast %160 : vector<64x8xf32> to vector<1x64x8xf32>
    tpu.vector_store %arg11[%c2_118, %c0_119, %c0_120], %163 {strides = array<i32>} : memref<3x64x8xf32, #tpu.memory_space<vmem>>, vector<1x64x8xf32>,
    %c1_121 = arith.constant 1 : index
    %c0_122 = arith.constant 0 : index
    %c0_123 = arith.constant 0 : index
    %164 = vector.load %arg11[%c1_121, %c0_122, %c0_123] : memref<3x64x8xf32, #tpu.memory_space<vmem>>, vector<1x64x8xf32>
    %165 = vector.shape_cast %164 : vector<1x64x8xf32> to vector<64x8xf32>
    %cst_124 = arith.constant dense<0.000000e+00> : vector<64x8xf32>
    %166 = tpu.matmul %159, %25, %cst_124 {dimension_numbers = #tpu.dot_dimension_numbers<[1], [0], [0], [1], [0, 0, 1, 1], [], []>} : vector<64x72xbf16>, vector<72x8xbf16>, vector<64x8xf32> -> vector<64x8xf32>
    %167 = arith.addf %165, %166 : vector<64x8xf32>
    %c1_125 = arith.constant 1 : index
    %c0_126 = arith.constant 0 : index
    %c0_127 = arith.constant 0 : index
    %168 = vector.load %arg11[%c1_125, %c0_126, %c0_127] : memref<3x64x8xf32, #tpu.memory_space<vmem>>, vector<1x64x8xf32>
    %169 = vector.shape_cast %168 : vector<1x64x8xf32> to vector<64x8xf32>
    %170 = vector.shape_cast %167 : vector<64x8xf32> to vector<1x64x8xf32>
    tpu.vector_store %arg11[%c1_125, %c0_126, %c0_127], %170 {strides = array<i32>} : memref<3x64x8xf32, #tpu.memory_space<vmem>>, vector<1x64x8xf32>,
    %c0_128 = arith.constant 0 : index
    %c0_129 = arith.constant 0 : index
    %c0_130 = arith.constant 0 : index
    %171 = vector.load %arg11[%c0_128, %c0_129, %c0_130] : memref<3x64x8xf32, #tpu.memory_space<vmem>>, vector<1x64x8xf32>
    %172 = vector.shape_cast %171 : vector<1x64x8xf32> to vector<64x8xf32>
    %cst_131 = arith.constant dense<0.000000e+00> : vector<64x8xf32>
    %173 = tpu.matmul %159, %27, %cst_131 {dimension_numbers = #tpu.dot_dimension_numbers<[1], [0], [0], [1], [0, 0, 1, 1], [], []>} : vector<64x72xbf16>, vector<72x8xbf16>, vector<64x8xf32> -> vector<64x8xf32>
    %174 = arith.addf %172, %173 : vector<64x8xf32>
    %c0_132 = arith.constant 0 : index
    %c0_133 = arith.constant 0 : index
    %c0_134 = arith.constant 0 : index
    %175 = vector.load %arg11[%c0_132, %c0_133, %c0_134] : memref<3x64x8xf32, #tpu.memory_space<vmem>>, vector<1x64x8xf32>
    %176 = vector.shape_cast %175 : vector<1x64x8xf32> to vector<64x8xf32>
    %177 = vector.shape_cast %174 : vector<64x8xf32> to vector<1x64x8xf32>
    tpu.vector_store %arg11[%c0_132, %c0_133, %c0_134], %177 {strides = array<i32>} : memref<3x64x8xf32, #tpu.memory_space<vmem>>, vector<1x64x8xf32>,
    %c0_135 = arith.constant 0 : index
    %c0_136 = arith.constant 0 : index
    %c0_137 = arith.constant 0 : index
    %178 = vector.load %arg11[%c0_135, %c0_136, %c0_137] : memref<3x64x8xf32, #tpu.memory_space<vmem>>, vector<1x64x8xf32>
    %179 = vector.shape_cast %178 : vector<1x64x8xf32> to vector<64x8xf32>
    %180 = arith.addf %179, %8 : vector<64x8xf32>
    %c0_138 = arith.constant 0 : index
    %c0_139 = arith.constant 0 : index
    %c16_140 = arith.constant 16 : index
    %c0_141 = arith.constant 0 : index
    %181 = vector.load %arg2[%c0_138, %c0_139, %c16_140, %c0_141] : memref<1x6x96x4xbf16, #tpu.memory_space<vmem>>, vector<1x1x64x4xbf16>
    %182 = vector.shape_cast %181 : vector<1x1x64x4xbf16> to vector<64x4xbf16>
    %c0_142 = arith.constant 0 : index
    %c0_143 = arith.constant 0 : index
    %183 = vector.load %arg7[%c0_142, %c0_143] : memref<4x8xbf16, #tpu.memory_space<vmem>>, vector<4x8xbf16>
    %cst_144 = arith.constant dense<0.000000e+00> : vector<64x8xf32>
    %184 = tpu.matmul %182, %183, %cst_144 {dimension_numbers = #tpu.dot_dimension_numbers<[1], [0], [0], [1], [0, 0, 1, 1], [], []>} : vector<64x4xbf16>, vector<4x8xbf16>, vector<64x8xf32> -> vector<64x8xf32>
    %185 = arith.addf %180, %184 : vector<64x8xf32>
    %cst_145 = arith.constant 0.000000e+00 : f32
    %186 = vector.broadcast %cst_145 : f32 to vector<64x8xf32>
    %187 = arith.maximumf %185, %186 : vector<64x8xf32>
    %c0_146 = arith.constant 0 : index
    %c0_147 = arith.constant 0 : index
    %c0_148 = arith.constant 0 : index
    %c0_149 = arith.constant 0 : index
    %188 = vector.load %arg8[%c0_146, %c0_147, %c0_148, %c0_149] : memref<1x6x64x8xf32, #tpu.memory_space<vmem>>, vector<1x1x64x8xf32>
    %189 = vector.shape_cast %188 : vector<1x1x64x8xf32> to vector<64x8xf32>
    %190 = vector.shape_cast %187 : vector<64x8xf32> to vector<1x1x64x8xf32>
    tpu.vector_store %arg8[%c0_146, %c0_147, %c0_148, %c0_149], %190 {strides = array<i32>} : memref<1x6x64x8xf32, #tpu.memory_space<vmem>>, vector<1x1x64x8xf32>,
    %c0_150 = arith.constant 0 : index
    %c3 = arith.constant 3 : index
    %c0_151 = arith.constant 0 : index
    %c0_152 = arith.constant 0 : index
    %191 = vector.load %arg2[%c0_150, %c3, %c0_151, %c0_152] : memref<1x6x96x4xbf16, #tpu.memory_space<vmem>>, vector<1x1x96x4xbf16>
    %192 = vector.shape_cast %191 : vector<1x1x96x4xbf16> to vector<96x4xbf16>
    %193 = vector.extract_strided_slice %192 {offsets = [7, 0], sizes = [64, 4], strides = [1, 1]} : vector<96x4xbf16> to vector<64x4xbf16>
    %194 = vector.extract_strided_slice %192 {offsets = [8, 0], sizes = [64, 4], strides = [1, 1]} : vector<96x4xbf16> to vector<64x4xbf16>
    %195 = vector.extract_strided_slice %192 {offsets = [9, 0], sizes = [64, 4], strides = [1, 1]} : vector<96x4xbf16> to vector<64x4xbf16>
    %196 = vector.extract_strided_slice %192 {offsets = [15, 0], sizes = [64, 4], strides = [1, 1]} : vector<96x4xbf16> to vector<64x4xbf16>
    %197 = vector.extract_strided_slice %192 {offsets = [16, 0], sizes = [64, 4], strides = [1, 1]} : vector<96x4xbf16> to vector<64x4xbf16>
    %198 = vector.extract_strided_slice %192 {offsets = [17, 0], sizes = [64, 4], strides = [1, 1]} : vector<96x4xbf16> to vector<64x4xbf16>
    %199 = vector.extract_strided_slice %192 {offsets = [23, 0], sizes = [64, 4], strides = [1, 1]} : vector<96x4xbf16> to vector<64x4xbf16>
    %200 = vector.extract_strided_slice %192 {offsets = [24, 0], sizes = [64, 4], strides = [1, 1]} : vector<96x4xbf16> to vector<64x4xbf16>
    %201 = vector.extract_strided_slice %192 {offsets = [25, 0], sizes = [64, 4], strides = [1, 1]} : vector<96x4xbf16> to vector<64x4xbf16>
    %202 = tpu.concatenate %193, %194, %195, %196, %197, %198, %199, %200, %201 in 1 : vector<64x4xbf16>, vector<64x4xbf16>, vector<64x4xbf16>, vector<64x4xbf16>, vector<64x4xbf16>, vector<64x4xbf16>, vector<64x4xbf16>, vector<64x4xbf16>, vector<64x4xbf16> -> vector<64x36xbf16>
    %cst_153 = arith.constant dense<0.000000e+00> : vector<64x8xf32>
    %203 = tpu.matmul %202, %17, %cst_153 {dimension_numbers = #tpu.dot_dimension_numbers<[1], [0], [0], [1], [0, 0, 1, 1], [], []>} : vector<64x36xbf16>, vector<36x8xbf16>, vector<64x8xf32> -> vector<64x8xf32>
    %c1_154 = arith.constant 1 : index
    %c0_155 = arith.constant 0 : index
    %c0_156 = arith.constant 0 : index
    %204 = vector.load %arg10[%c1_154, %c0_155, %c0_156] : memref<3x64x8xf32, #tpu.memory_space<vmem>>, vector<1x64x8xf32>
    %205 = vector.shape_cast %204 : vector<1x64x8xf32> to vector<64x8xf32>
    %206 = vector.shape_cast %203 : vector<64x8xf32> to vector<1x64x8xf32>
    tpu.vector_store %arg10[%c1_154, %c0_155, %c0_156], %206 {strides = array<i32>} : memref<3x64x8xf32, #tpu.memory_space<vmem>>, vector<1x64x8xf32>,
    %c0_157 = arith.constant 0 : index
    %c0_158 = arith.constant 0 : index
    %c0_159 = arith.constant 0 : index
    %207 = vector.load %arg10[%c0_157, %c0_158, %c0_159] : memref<3x64x8xf32, #tpu.memory_space<vmem>>, vector<1x64x8xf32>
    %208 = vector.shape_cast %207 : vector<1x64x8xf32> to vector<64x8xf32>
    %cst_160 = arith.constant dense<0.000000e+00> : vector<64x8xf32>
    %209 = tpu.matmul %202, %19, %cst_160 {dimension_numbers = #tpu.dot_dimension_numbers<[1], [0], [0], [1], [0, 0, 1, 1], [], []>} : vector<64x36xbf16>, vector<36x8xbf16>, vector<64x8xf32> -> vector<64x8xf32>
    %210 = arith.addf %208, %209 : vector<64x8xf32>
    %c0_161 = arith.constant 0 : index
    %c0_162 = arith.constant 0 : index
    %c0_163 = arith.constant 0 : index
    %211 = vector.load %arg10[%c0_161, %c0_162, %c0_163] : memref<3x64x8xf32, #tpu.memory_space<vmem>>, vector<1x64x8xf32>
    %212 = vector.shape_cast %211 : vector<1x64x8xf32> to vector<64x8xf32>
    %213 = vector.shape_cast %210 : vector<64x8xf32> to vector<1x64x8xf32>
    tpu.vector_store %arg10[%c0_161, %c0_162, %c0_163], %213 {strides = array<i32>} : memref<3x64x8xf32, #tpu.memory_space<vmem>>, vector<1x64x8xf32>,
    %c2_164 = arith.constant 2 : index
    %c0_165 = arith.constant 0 : index
    %c0_166 = arith.constant 0 : index
    %214 = vector.load %arg10[%c2_164, %c0_165, %c0_166] : memref<3x64x8xf32, #tpu.memory_space<vmem>>, vector<1x64x8xf32>
    %215 = vector.shape_cast %214 : vector<1x64x8xf32> to vector<64x8xf32>
    %cst_167 = arith.constant dense<0.000000e+00> : vector<64x8xf32>
    %216 = tpu.matmul %202, %21, %cst_167 {dimension_numbers = #tpu.dot_dimension_numbers<[1], [0], [0], [1], [0, 0, 1, 1], [], []>} : vector<64x36xbf16>, vector<36x8xbf16>, vector<64x8xf32> -> vector<64x8xf32>
    %217 = arith.addf %215, %216 : vector<64x8xf32>
    %c2_168 = arith.constant 2 : index
    %c0_169 = arith.constant 0 : index
    %c0_170 = arith.constant 0 : index
    %218 = vector.load %arg10[%c2_168, %c0_169, %c0_170] : memref<3x64x8xf32, #tpu.memory_space<vmem>>, vector<1x64x8xf32>
    %219 = vector.shape_cast %218 : vector<1x64x8xf32> to vector<64x8xf32>
    %220 = vector.shape_cast %217 : vector<64x8xf32> to vector<1x64x8xf32>
    tpu.vector_store %arg10[%c2_168, %c0_169, %c0_170], %220 {strides = array<i32>} : memref<3x64x8xf32, #tpu.memory_space<vmem>>, vector<1x64x8xf32>,
    %c2_171 = arith.constant 2 : index
    %c0_172 = arith.constant 0 : index
    %c0_173 = arith.constant 0 : index
    %221 = vector.load %arg10[%c2_171, %c0_172, %c0_173] : memref<3x64x8xf32, #tpu.memory_space<vmem>>, vector<1x64x8xf32>
    %222 = vector.shape_cast %221 : vector<1x64x8xf32> to vector<64x8xf32>
    %223 = arith.addf %222, %5 : vector<64x8xf32>
    %cst_174 = arith.constant 0.000000e+00 : f32
    %224 = vector.broadcast %cst_174 : f32 to vector<64x8xf32>
    %225 = arith.maximumf %223, %224 : vector<64x8xf32>
    %226 = arith.mulf %225, %2 : vector<64x8xf32>
    %227 = arith.truncf %226 : vector<64x8xf32> to vector<64x8xbf16>
    %c16_175 = arith.constant 16 : index
    %c0_176 = arith.constant 0 : index
    %228 = vector.load %arg9[%c16_175, %c0_176] : memref<96x8xbf16, #tpu.memory_space<vmem>>, vector<64x8xbf16>
    tpu.vector_store %arg9[%c16_175, %c0_176], %227 {strides = array<i32>} : memref<96x8xbf16, #tpu.memory_space<vmem>>, vector<64x8xbf16>,
    %c0_177 = arith.constant 0 : index
    %c0_178 = arith.constant 0 : index
    %229 = vector.load %arg9[%c0_177, %c0_178] : memref<96x8xbf16, #tpu.memory_space<vmem>>, vector<96x8xbf16>
    %230 = vector.extract_strided_slice %229 {offsets = [7, 0], sizes = [64, 8], strides = [1, 1]} : vector<96x8xbf16> to vector<64x8xbf16>
    %231 = vector.extract_strided_slice %229 {offsets = [8, 0], sizes = [64, 8], strides = [1, 1]} : vector<96x8xbf16> to vector<64x8xbf16>
    %232 = vector.extract_strided_slice %229 {offsets = [9, 0], sizes = [64, 8], strides = [1, 1]} : vector<96x8xbf16> to vector<64x8xbf16>
    %233 = vector.extract_strided_slice %229 {offsets = [15, 0], sizes = [64, 8], strides = [1, 1]} : vector<96x8xbf16> to vector<64x8xbf16>
    %234 = vector.extract_strided_slice %229 {offsets = [16, 0], sizes = [64, 8], strides = [1, 1]} : vector<96x8xbf16> to vector<64x8xbf16>
    %235 = vector.extract_strided_slice %229 {offsets = [17, 0], sizes = [64, 8], strides = [1, 1]} : vector<96x8xbf16> to vector<64x8xbf16>
    %236 = vector.extract_strided_slice %229 {offsets = [23, 0], sizes = [64, 8], strides = [1, 1]} : vector<96x8xbf16> to vector<64x8xbf16>
    %237 = vector.extract_strided_slice %229 {offsets = [24, 0], sizes = [64, 8], strides = [1, 1]} : vector<96x8xbf16> to vector<64x8xbf16>
    %238 = vector.extract_strided_slice %229 {offsets = [25, 0], sizes = [64, 8], strides = [1, 1]} : vector<96x8xbf16> to vector<64x8xbf16>
    %239 = tpu.concatenate %230, %231, %232, %233, %234, %235, %236, %237, %238 in 1 : vector<64x8xbf16>, vector<64x8xbf16>, vector<64x8xbf16>, vector<64x8xbf16>, vector<64x8xbf16>, vector<64x8xbf16>, vector<64x8xbf16>, vector<64x8xbf16>, vector<64x8xbf16> -> vector<64x72xbf16>
    %cst_179 = arith.constant dense<0.000000e+00> : vector<64x8xf32>
    %240 = tpu.matmul %239, %23, %cst_179 {dimension_numbers = #tpu.dot_dimension_numbers<[1], [0], [0], [1], [0, 0, 1, 1], [], []>} : vector<64x72xbf16>, vector<72x8xbf16>, vector<64x8xf32> -> vector<64x8xf32>
    %c0_180 = arith.constant 0 : index
    %c0_181 = arith.constant 0 : index
    %c0_182 = arith.constant 0 : index
    %241 = vector.load %arg11[%c0_180, %c0_181, %c0_182] : memref<3x64x8xf32, #tpu.memory_space<vmem>>, vector<1x64x8xf32>
    %242 = vector.shape_cast %241 : vector<1x64x8xf32> to vector<64x8xf32>
    %243 = vector.shape_cast %240 : vector<64x8xf32> to vector<1x64x8xf32>
    tpu.vector_store %arg11[%c0_180, %c0_181, %c0_182], %243 {strides = array<i32>} : memref<3x64x8xf32, #tpu.memory_space<vmem>>, vector<1x64x8xf32>,
    %c2_183 = arith.constant 2 : index
    %c0_184 = arith.constant 0 : index
    %c0_185 = arith.constant 0 : index
    %244 = vector.load %arg11[%c2_183, %c0_184, %c0_185] : memref<3x64x8xf32, #tpu.memory_space<vmem>>, vector<1x64x8xf32>
    %245 = vector.shape_cast %244 : vector<1x64x8xf32> to vector<64x8xf32>
    %cst_186 = arith.constant dense<0.000000e+00> : vector<64x8xf32>
    %246 = tpu.matmul %239, %25, %cst_186 {dimension_numbers = #tpu.dot_dimension_numbers<[1], [0], [0], [1], [0, 0, 1, 1], [], []>} : vector<64x72xbf16>, vector<72x8xbf16>, vector<64x8xf32> -> vector<64x8xf32>
    %247 = arith.addf %245, %246 : vector<64x8xf32>
    %c2_187 = arith.constant 2 : index
    %c0_188 = arith.constant 0 : index
    %c0_189 = arith.constant 0 : index
    %248 = vector.load %arg11[%c2_187, %c0_188, %c0_189] : memref<3x64x8xf32, #tpu.memory_space<vmem>>, vector<1x64x8xf32>
    %249 = vector.shape_cast %248 : vector<1x64x8xf32> to vector<64x8xf32>
    %250 = vector.shape_cast %247 : vector<64x8xf32> to vector<1x64x8xf32>
    tpu.vector_store %arg11[%c2_187, %c0_188, %c0_189], %250 {strides = array<i32>} : memref<3x64x8xf32, #tpu.memory_space<vmem>>, vector<1x64x8xf32>,
    %c1_190 = arith.constant 1 : index
    %c0_191 = arith.constant 0 : index
    %c0_192 = arith.constant 0 : index
    %251 = vector.load %arg11[%c1_190, %c0_191, %c0_192] : memref<3x64x8xf32, #tpu.memory_space<vmem>>, vector<1x64x8xf32>
    %252 = vector.shape_cast %251 : vector<1x64x8xf32> to vector<64x8xf32>
    %cst_193 = arith.constant dense<0.000000e+00> : vector<64x8xf32>
    %253 = tpu.matmul %239, %27, %cst_193 {dimension_numbers = #tpu.dot_dimension_numbers<[1], [0], [0], [1], [0, 0, 1, 1], [], []>} : vector<64x72xbf16>, vector<72x8xbf16>, vector<64x8xf32> -> vector<64x8xf32>
    %254 = arith.addf %252, %253 : vector<64x8xf32>
    %c1_194 = arith.constant 1 : index
    %c0_195 = arith.constant 0 : index
    %c0_196 = arith.constant 0 : index
    %255 = vector.load %arg11[%c1_194, %c0_195, %c0_196] : memref<3x64x8xf32, #tpu.memory_space<vmem>>, vector<1x64x8xf32>
    %256 = vector.shape_cast %255 : vector<1x64x8xf32> to vector<64x8xf32>
    %257 = vector.shape_cast %254 : vector<64x8xf32> to vector<1x64x8xf32>
    tpu.vector_store %arg11[%c1_194, %c0_195, %c0_196], %257 {strides = array<i32>} : memref<3x64x8xf32, #tpu.memory_space<vmem>>, vector<1x64x8xf32>,
    %c1_197 = arith.constant 1 : index
    %c0_198 = arith.constant 0 : index
    %c0_199 = arith.constant 0 : index
    %258 = vector.load %arg11[%c1_197, %c0_198, %c0_199] : memref<3x64x8xf32, #tpu.memory_space<vmem>>, vector<1x64x8xf32>
    %259 = vector.shape_cast %258 : vector<1x64x8xf32> to vector<64x8xf32>
    %260 = arith.addf %259, %8 : vector<64x8xf32>
    %c0_200 = arith.constant 0 : index
    %c1_201 = arith.constant 1 : index
    %c16_202 = arith.constant 16 : index
    %c0_203 = arith.constant 0 : index
    %261 = vector.load %arg2[%c0_200, %c1_201, %c16_202, %c0_203] : memref<1x6x96x4xbf16, #tpu.memory_space<vmem>>, vector<1x1x64x4xbf16>
    %262 = vector.shape_cast %261 : vector<1x1x64x4xbf16> to vector<64x4xbf16>
    %c0_204 = arith.constant 0 : index
    %c0_205 = arith.constant 0 : index
    %263 = vector.load %arg7[%c0_204, %c0_205] : memref<4x8xbf16, #tpu.memory_space<vmem>>, vector<4x8xbf16>
    %cst_206 = arith.constant dense<0.000000e+00> : vector<64x8xf32>
    %264 = tpu.matmul %262, %263, %cst_206 {dimension_numbers = #tpu.dot_dimension_numbers<[1], [0], [0], [1], [0, 0, 1, 1], [], []>} : vector<64x4xbf16>, vector<4x8xbf16>, vector<64x8xf32> -> vector<64x8xf32>
    %265 = arith.addf %260, %264 : vector<64x8xf32>
    %cst_207 = arith.constant 0.000000e+00 : f32
    %266 = vector.broadcast %cst_207 : f32 to vector<64x8xf32>
    %267 = arith.maximumf %265, %266 : vector<64x8xf32>
    %c0_208 = arith.constant 0 : index
    %c1_209 = arith.constant 1 : index
    %c0_210 = arith.constant 0 : index
    %c0_211 = arith.constant 0 : index
    %268 = vector.load %arg8[%c0_208, %c1_209, %c0_210, %c0_211] : memref<1x6x64x8xf32, #tpu.memory_space<vmem>>, vector<1x1x64x8xf32>
    %269 = vector.shape_cast %268 : vector<1x1x64x8xf32> to vector<64x8xf32>
    %270 = vector.shape_cast %267 : vector<64x8xf32> to vector<1x1x64x8xf32>
    tpu.vector_store %arg8[%c0_208, %c1_209, %c0_210, %c0_211], %270 {strides = array<i32>} : memref<1x6x64x8xf32, #tpu.memory_space<vmem>>, vector<1x1x64x8xf32>,
    %c0_212 = arith.constant 0 : index
    %c4 = arith.constant 4 : index
    %c0_213 = arith.constant 0 : index
    %c0_214 = arith.constant 0 : index
    %271 = vector.load %arg2[%c0_212, %c4, %c0_213, %c0_214] : memref<1x6x96x4xbf16, #tpu.memory_space<vmem>>, vector<1x1x96x4xbf16>
    %272 = vector.shape_cast %271 : vector<1x1x96x4xbf16> to vector<96x4xbf16>
    %273 = vector.extract_strided_slice %272 {offsets = [7, 0], sizes = [64, 4], strides = [1, 1]} : vector<96x4xbf16> to vector<64x4xbf16>
    %274 = vector.extract_strided_slice %272 {offsets = [8, 0], sizes = [64, 4], strides = [1, 1]} : vector<96x4xbf16> to vector<64x4xbf16>
    %275 = vector.extract_strided_slice %272 {offsets = [9, 0], sizes = [64, 4], strides = [1, 1]} : vector<96x4xbf16> to vector<64x4xbf16>
    %276 = vector.extract_strided_slice %272 {offsets = [15, 0], sizes = [64, 4], strides = [1, 1]} : vector<96x4xbf16> to vector<64x4xbf16>
    %277 = vector.extract_strided_slice %272 {offsets = [16, 0], sizes = [64, 4], strides = [1, 1]} : vector<96x4xbf16> to vector<64x4xbf16>
    %278 = vector.extract_strided_slice %272 {offsets = [17, 0], sizes = [64, 4], strides = [1, 1]} : vector<96x4xbf16> to vector<64x4xbf16>
    %279 = vector.extract_strided_slice %272 {offsets = [23, 0], sizes = [64, 4], strides = [1, 1]} : vector<96x4xbf16> to vector<64x4xbf16>
    %280 = vector.extract_strided_slice %272 {offsets = [24, 0], sizes = [64, 4], strides = [1, 1]} : vector<96x4xbf16> to vector<64x4xbf16>
    %281 = vector.extract_strided_slice %272 {offsets = [25, 0], sizes = [64, 4], strides = [1, 1]} : vector<96x4xbf16> to vector<64x4xbf16>
    %282 = tpu.concatenate %273, %274, %275, %276, %277, %278, %279, %280, %281 in 1 : vector<64x4xbf16>, vector<64x4xbf16>, vector<64x4xbf16>, vector<64x4xbf16>, vector<64x4xbf16>, vector<64x4xbf16>, vector<64x4xbf16>, vector<64x4xbf16>, vector<64x4xbf16> -> vector<64x36xbf16>
    %cst_215 = arith.constant dense<0.000000e+00> : vector<64x8xf32>
    %283 = tpu.matmul %282, %17, %cst_215 {dimension_numbers = #tpu.dot_dimension_numbers<[1], [0], [0], [1], [0, 0, 1, 1], [], []>} : vector<64x36xbf16>, vector<36x8xbf16>, vector<64x8xf32> -> vector<64x8xf32>
    %c2_216 = arith.constant 2 : index
    %c0_217 = arith.constant 0 : index
    %c0_218 = arith.constant 0 : index
    %284 = vector.load %arg10[%c2_216, %c0_217, %c0_218] : memref<3x64x8xf32, #tpu.memory_space<vmem>>, vector<1x64x8xf32>
    %285 = vector.shape_cast %284 : vector<1x64x8xf32> to vector<64x8xf32>
    %286 = vector.shape_cast %283 : vector<64x8xf32> to vector<1x64x8xf32>
    tpu.vector_store %arg10[%c2_216, %c0_217, %c0_218], %286 {strides = array<i32>} : memref<3x64x8xf32, #tpu.memory_space<vmem>>, vector<1x64x8xf32>,
    %c1_219 = arith.constant 1 : index
    %c0_220 = arith.constant 0 : index
    %c0_221 = arith.constant 0 : index
    %287 = vector.load %arg10[%c1_219, %c0_220, %c0_221] : memref<3x64x8xf32, #tpu.memory_space<vmem>>, vector<1x64x8xf32>
    %288 = vector.shape_cast %287 : vector<1x64x8xf32> to vector<64x8xf32>
    %cst_222 = arith.constant dense<0.000000e+00> : vector<64x8xf32>
    %289 = tpu.matmul %282, %19, %cst_222 {dimension_numbers = #tpu.dot_dimension_numbers<[1], [0], [0], [1], [0, 0, 1, 1], [], []>} : vector<64x36xbf16>, vector<36x8xbf16>, vector<64x8xf32> -> vector<64x8xf32>
    %290 = arith.addf %288, %289 : vector<64x8xf32>
    %c1_223 = arith.constant 1 : index
    %c0_224 = arith.constant 0 : index
    %c0_225 = arith.constant 0 : index
    %291 = vector.load %arg10[%c1_223, %c0_224, %c0_225] : memref<3x64x8xf32, #tpu.memory_space<vmem>>, vector<1x64x8xf32>
    %292 = vector.shape_cast %291 : vector<1x64x8xf32> to vector<64x8xf32>
    %293 = vector.shape_cast %290 : vector<64x8xf32> to vector<1x64x8xf32>
    tpu.vector_store %arg10[%c1_223, %c0_224, %c0_225], %293 {strides = array<i32>} : memref<3x64x8xf32, #tpu.memory_space<vmem>>, vector<1x64x8xf32>,
    %c0_226 = arith.constant 0 : index
    %c0_227 = arith.constant 0 : index
    %c0_228 = arith.constant 0 : index
    %294 = vector.load %arg10[%c0_226, %c0_227, %c0_228] : memref<3x64x8xf32, #tpu.memory_space<vmem>>, vector<1x64x8xf32>
    %295 = vector.shape_cast %294 : vector<1x64x8xf32> to vector<64x8xf32>
    %cst_229 = arith.constant dense<0.000000e+00> : vector<64x8xf32>
    %296 = tpu.matmul %282, %21, %cst_229 {dimension_numbers = #tpu.dot_dimension_numbers<[1], [0], [0], [1], [0, 0, 1, 1], [], []>} : vector<64x36xbf16>, vector<36x8xbf16>, vector<64x8xf32> -> vector<64x8xf32>
    %297 = arith.addf %295, %296 : vector<64x8xf32>
    %c0_230 = arith.constant 0 : index
    %c0_231 = arith.constant 0 : index
    %c0_232 = arith.constant 0 : index
    %298 = vector.load %arg10[%c0_230, %c0_231, %c0_232] : memref<3x64x8xf32, #tpu.memory_space<vmem>>, vector<1x64x8xf32>
    %299 = vector.shape_cast %298 : vector<1x64x8xf32> to vector<64x8xf32>
    %300 = vector.shape_cast %297 : vector<64x8xf32> to vector<1x64x8xf32>
    tpu.vector_store %arg10[%c0_230, %c0_231, %c0_232], %300 {strides = array<i32>} : memref<3x64x8xf32, #tpu.memory_space<vmem>>, vector<1x64x8xf32>,
    %c0_233 = arith.constant 0 : index
    %c0_234 = arith.constant 0 : index
    %c0_235 = arith.constant 0 : index
    %301 = vector.load %arg10[%c0_233, %c0_234, %c0_235] : memref<3x64x8xf32, #tpu.memory_space<vmem>>, vector<1x64x8xf32>
    %302 = vector.shape_cast %301 : vector<1x64x8xf32> to vector<64x8xf32>
    %303 = arith.addf %302, %5 : vector<64x8xf32>
    %cst_236 = arith.constant 0.000000e+00 : f32
    %304 = vector.broadcast %cst_236 : f32 to vector<64x8xf32>
    %305 = arith.maximumf %303, %304 : vector<64x8xf32>
    %306 = arith.mulf %305, %2 : vector<64x8xf32>
    %307 = arith.truncf %306 : vector<64x8xf32> to vector<64x8xbf16>
    %c16_237 = arith.constant 16 : index
    %c0_238 = arith.constant 0 : index
    %308 = vector.load %arg9[%c16_237, %c0_238] : memref<96x8xbf16, #tpu.memory_space<vmem>>, vector<64x8xbf16>
    tpu.vector_store %arg9[%c16_237, %c0_238], %307 {strides = array<i32>} : memref<96x8xbf16, #tpu.memory_space<vmem>>, vector<64x8xbf16>,
    %c0_239 = arith.constant 0 : index
    %c0_240 = arith.constant 0 : index
    %309 = vector.load %arg9[%c0_239, %c0_240] : memref<96x8xbf16, #tpu.memory_space<vmem>>, vector<96x8xbf16>
    %310 = vector.extract_strided_slice %309 {offsets = [7, 0], sizes = [64, 8], strides = [1, 1]} : vector<96x8xbf16> to vector<64x8xbf16>
    %311 = vector.extract_strided_slice %309 {offsets = [8, 0], sizes = [64, 8], strides = [1, 1]} : vector<96x8xbf16> to vector<64x8xbf16>
    %312 = vector.extract_strided_slice %309 {offsets = [9, 0], sizes = [64, 8], strides = [1, 1]} : vector<96x8xbf16> to vector<64x8xbf16>
    %313 = vector.extract_strided_slice %309 {offsets = [15, 0], sizes = [64, 8], strides = [1, 1]} : vector<96x8xbf16> to vector<64x8xbf16>
    %314 = vector.extract_strided_slice %309 {offsets = [16, 0], sizes = [64, 8], strides = [1, 1]} : vector<96x8xbf16> to vector<64x8xbf16>
    %315 = vector.extract_strided_slice %309 {offsets = [17, 0], sizes = [64, 8], strides = [1, 1]} : vector<96x8xbf16> to vector<64x8xbf16>
    %316 = vector.extract_strided_slice %309 {offsets = [23, 0], sizes = [64, 8], strides = [1, 1]} : vector<96x8xbf16> to vector<64x8xbf16>
    %317 = vector.extract_strided_slice %309 {offsets = [24, 0], sizes = [64, 8], strides = [1, 1]} : vector<96x8xbf16> to vector<64x8xbf16>
    %318 = vector.extract_strided_slice %309 {offsets = [25, 0], sizes = [64, 8], strides = [1, 1]} : vector<96x8xbf16> to vector<64x8xbf16>
    %319 = tpu.concatenate %310, %311, %312, %313, %314, %315, %316, %317, %318 in 1 : vector<64x8xbf16>, vector<64x8xbf16>, vector<64x8xbf16>, vector<64x8xbf16>, vector<64x8xbf16>, vector<64x8xbf16>, vector<64x8xbf16>, vector<64x8xbf16>, vector<64x8xbf16> -> vector<64x72xbf16>
    %cst_241 = arith.constant dense<0.000000e+00> : vector<64x8xf32>
    %320 = tpu.matmul %319, %23, %cst_241 {dimension_numbers = #tpu.dot_dimension_numbers<[1], [0], [0], [1], [0, 0, 1, 1], [], []>} : vector<64x72xbf16>, vector<72x8xbf16>, vector<64x8xf32> -> vector<64x8xf32>
    %c1_242 = arith.constant 1 : index
    %c0_243 = arith.constant 0 : index
    %c0_244 = arith.constant 0 : index
    %321 = vector.load %arg11[%c1_242, %c0_243, %c0_244] : memref<3x64x8xf32, #tpu.memory_space<vmem>>, vector<1x64x8xf32>
    %322 = vector.shape_cast %321 : vector<1x64x8xf32> to vector<64x8xf32>
    %323 = vector.shape_cast %320 : vector<64x8xf32> to vector<1x64x8xf32>
    tpu.vector_store %arg11[%c1_242, %c0_243, %c0_244], %323 {strides = array<i32>} : memref<3x64x8xf32, #tpu.memory_space<vmem>>, vector<1x64x8xf32>,
    %c0_245 = arith.constant 0 : index
    %c0_246 = arith.constant 0 : index
    %c0_247 = arith.constant 0 : index
    %324 = vector.load %arg11[%c0_245, %c0_246, %c0_247] : memref<3x64x8xf32, #tpu.memory_space<vmem>>, vector<1x64x8xf32>
    %325 = vector.shape_cast %324 : vector<1x64x8xf32> to vector<64x8xf32>
    %cst_248 = arith.constant dense<0.000000e+00> : vector<64x8xf32>
    %326 = tpu.matmul %319, %25, %cst_248 {dimension_numbers = #tpu.dot_dimension_numbers<[1], [0], [0], [1], [0, 0, 1, 1], [], []>} : vector<64x72xbf16>, vector<72x8xbf16>, vector<64x8xf32> -> vector<64x8xf32>
    %327 = arith.addf %325, %326 : vector<64x8xf32>
    %c0_249 = arith.constant 0 : index
    %c0_250 = arith.constant 0 : index
    %c0_251 = arith.constant 0 : index
    %328 = vector.load %arg11[%c0_249, %c0_250, %c0_251] : memref<3x64x8xf32, #tpu.memory_space<vmem>>, vector<1x64x8xf32>
    %329 = vector.shape_cast %328 : vector<1x64x8xf32> to vector<64x8xf32>
    %330 = vector.shape_cast %327 : vector<64x8xf32> to vector<1x64x8xf32>
    tpu.vector_store %arg11[%c0_249, %c0_250, %c0_251], %330 {strides = array<i32>} : memref<3x64x8xf32, #tpu.memory_space<vmem>>, vector<1x64x8xf32>,
    %c2_252 = arith.constant 2 : index
    %c0_253 = arith.constant 0 : index
    %c0_254 = arith.constant 0 : index
    %331 = vector.load %arg11[%c2_252, %c0_253, %c0_254] : memref<3x64x8xf32, #tpu.memory_space<vmem>>, vector<1x64x8xf32>
    %332 = vector.shape_cast %331 : vector<1x64x8xf32> to vector<64x8xf32>
    %cst_255 = arith.constant dense<0.000000e+00> : vector<64x8xf32>
    %333 = tpu.matmul %319, %27, %cst_255 {dimension_numbers = #tpu.dot_dimension_numbers<[1], [0], [0], [1], [0, 0, 1, 1], [], []>} : vector<64x72xbf16>, vector<72x8xbf16>, vector<64x8xf32> -> vector<64x8xf32>
    %334 = arith.addf %332, %333 : vector<64x8xf32>
    %c2_256 = arith.constant 2 : index
    %c0_257 = arith.constant 0 : index
    %c0_258 = arith.constant 0 : index
    %335 = vector.load %arg11[%c2_256, %c0_257, %c0_258] : memref<3x64x8xf32, #tpu.memory_space<vmem>>, vector<1x64x8xf32>
    %336 = vector.shape_cast %335 : vector<1x64x8xf32> to vector<64x8xf32>
    %337 = vector.shape_cast %334 : vector<64x8xf32> to vector<1x64x8xf32>
    tpu.vector_store %arg11[%c2_256, %c0_257, %c0_258], %337 {strides = array<i32>} : memref<3x64x8xf32, #tpu.memory_space<vmem>>, vector<1x64x8xf32>,
    %c2_259 = arith.constant 2 : index
    %c0_260 = arith.constant 0 : index
    %c0_261 = arith.constant 0 : index
    %338 = vector.load %arg11[%c2_259, %c0_260, %c0_261] : memref<3x64x8xf32, #tpu.memory_space<vmem>>, vector<1x64x8xf32>
    %339 = vector.shape_cast %338 : vector<1x64x8xf32> to vector<64x8xf32>
    %340 = arith.addf %339, %8 : vector<64x8xf32>
    %c0_262 = arith.constant 0 : index
    %c2_263 = arith.constant 2 : index
    %c16_264 = arith.constant 16 : index
    %c0_265 = arith.constant 0 : index
    %341 = vector.load %arg2[%c0_262, %c2_263, %c16_264, %c0_265] : memref<1x6x96x4xbf16, #tpu.memory_space<vmem>>, vector<1x1x64x4xbf16>
    %342 = vector.shape_cast %341 : vector<1x1x64x4xbf16> to vector<64x4xbf16>
    %c0_266 = arith.constant 0 : index
    %c0_267 = arith.constant 0 : index
    %343 = vector.load %arg7[%c0_266, %c0_267] : memref<4x8xbf16, #tpu.memory_space<vmem>>, vector<4x8xbf16>
    %cst_268 = arith.constant dense<0.000000e+00> : vector<64x8xf32>
    %344 = tpu.matmul %342, %343, %cst_268 {dimension_numbers = #tpu.dot_dimension_numbers<[1], [0], [0], [1], [0, 0, 1, 1], [], []>} : vector<64x4xbf16>, vector<4x8xbf16>, vector<64x8xf32> -> vector<64x8xf32>
    %345 = arith.addf %340, %344 : vector<64x8xf32>
    %cst_269 = arith.constant 0.000000e+00 : f32
    %346 = vector.broadcast %cst_269 : f32 to vector<64x8xf32>
    %347 = arith.maximumf %345, %346 : vector<64x8xf32>
    %c0_270 = arith.constant 0 : index
    %c2_271 = arith.constant 2 : index
    %c0_272 = arith.constant 0 : index
    %c0_273 = arith.constant 0 : index
    %348 = vector.load %arg8[%c0_270, %c2_271, %c0_272, %c0_273] : memref<1x6x64x8xf32, #tpu.memory_space<vmem>>, vector<1x1x64x8xf32>
    %349 = vector.shape_cast %348 : vector<1x1x64x8xf32> to vector<64x8xf32>
    %350 = vector.shape_cast %347 : vector<64x8xf32> to vector<1x1x64x8xf32>
    tpu.vector_store %arg8[%c0_270, %c2_271, %c0_272, %c0_273], %350 {strides = array<i32>} : memref<1x6x64x8xf32, #tpu.memory_space<vmem>>, vector<1x1x64x8xf32>,
    %c0_274 = arith.constant 0 : index
    %c5 = arith.constant 5 : index
    %c0_275 = arith.constant 0 : index
    %c0_276 = arith.constant 0 : index
    %351 = vector.load %arg2[%c0_274, %c5, %c0_275, %c0_276] : memref<1x6x96x4xbf16, #tpu.memory_space<vmem>>, vector<1x1x96x4xbf16>
    %352 = vector.shape_cast %351 : vector<1x1x96x4xbf16> to vector<96x4xbf16>
    %353 = vector.extract_strided_slice %352 {offsets = [7, 0], sizes = [64, 4], strides = [1, 1]} : vector<96x4xbf16> to vector<64x4xbf16>
    %354 = vector.extract_strided_slice %352 {offsets = [8, 0], sizes = [64, 4], strides = [1, 1]} : vector<96x4xbf16> to vector<64x4xbf16>
    %355 = vector.extract_strided_slice %352 {offsets = [9, 0], sizes = [64, 4], strides = [1, 1]} : vector<96x4xbf16> to vector<64x4xbf16>
    %356 = vector.extract_strided_slice %352 {offsets = [15, 0], sizes = [64, 4], strides = [1, 1]} : vector<96x4xbf16> to vector<64x4xbf16>
    %357 = vector.extract_strided_slice %352 {offsets = [16, 0], sizes = [64, 4], strides = [1, 1]} : vector<96x4xbf16> to vector<64x4xbf16>
    %358 = vector.extract_strided_slice %352 {offsets = [17, 0], sizes = [64, 4], strides = [1, 1]} : vector<96x4xbf16> to vector<64x4xbf16>
    %359 = vector.extract_strided_slice %352 {offsets = [23, 0], sizes = [64, 4], strides = [1, 1]} : vector<96x4xbf16> to vector<64x4xbf16>
    %360 = vector.extract_strided_slice %352 {offsets = [24, 0], sizes = [64, 4], strides = [1, 1]} : vector<96x4xbf16> to vector<64x4xbf16>
    %361 = vector.extract_strided_slice %352 {offsets = [25, 0], sizes = [64, 4], strides = [1, 1]} : vector<96x4xbf16> to vector<64x4xbf16>
    %362 = tpu.concatenate %353, %354, %355, %356, %357, %358, %359, %360, %361 in 1 : vector<64x4xbf16>, vector<64x4xbf16>, vector<64x4xbf16>, vector<64x4xbf16>, vector<64x4xbf16>, vector<64x4xbf16>, vector<64x4xbf16>, vector<64x4xbf16>, vector<64x4xbf16> -> vector<64x36xbf16>
    %c2_277 = arith.constant 2 : index
    %c0_278 = arith.constant 0 : index
    %c0_279 = arith.constant 0 : index
    %363 = vector.load %arg10[%c2_277, %c0_278, %c0_279] : memref<3x64x8xf32, #tpu.memory_space<vmem>>, vector<1x64x8xf32>
    %364 = vector.shape_cast %363 : vector<1x64x8xf32> to vector<64x8xf32>
    %cst_280 = arith.constant dense<0.000000e+00> : vector<64x8xf32>
    %365 = tpu.matmul %362, %19, %cst_280 {dimension_numbers = #tpu.dot_dimension_numbers<[1], [0], [0], [1], [0, 0, 1, 1], [], []>} : vector<64x36xbf16>, vector<36x8xbf16>, vector<64x8xf32> -> vector<64x8xf32>
    %366 = arith.addf %364, %365 : vector<64x8xf32>
    %c2_281 = arith.constant 2 : index
    %c0_282 = arith.constant 0 : index
    %c0_283 = arith.constant 0 : index
    %367 = vector.load %arg10[%c2_281, %c0_282, %c0_283] : memref<3x64x8xf32, #tpu.memory_space<vmem>>, vector<1x64x8xf32>
    %368 = vector.shape_cast %367 : vector<1x64x8xf32> to vector<64x8xf32>
    %369 = vector.shape_cast %366 : vector<64x8xf32> to vector<1x64x8xf32>
    tpu.vector_store %arg10[%c2_281, %c0_282, %c0_283], %369 {strides = array<i32>} : memref<3x64x8xf32, #tpu.memory_space<vmem>>, vector<1x64x8xf32>,
    %c1_284 = arith.constant 1 : index
    %c0_285 = arith.constant 0 : index
    %c0_286 = arith.constant 0 : index
    %370 = vector.load %arg10[%c1_284, %c0_285, %c0_286] : memref<3x64x8xf32, #tpu.memory_space<vmem>>, vector<1x64x8xf32>
    %371 = vector.shape_cast %370 : vector<1x64x8xf32> to vector<64x8xf32>
    %cst_287 = arith.constant dense<0.000000e+00> : vector<64x8xf32>
    %372 = tpu.matmul %362, %21, %cst_287 {dimension_numbers = #tpu.dot_dimension_numbers<[1], [0], [0], [1], [0, 0, 1, 1], [], []>} : vector<64x36xbf16>, vector<36x8xbf16>, vector<64x8xf32> -> vector<64x8xf32>
    %373 = arith.addf %371, %372 : vector<64x8xf32>
    %c1_288 = arith.constant 1 : index
    %c0_289 = arith.constant 0 : index
    %c0_290 = arith.constant 0 : index
    %374 = vector.load %arg10[%c1_288, %c0_289, %c0_290] : memref<3x64x8xf32, #tpu.memory_space<vmem>>, vector<1x64x8xf32>
    %375 = vector.shape_cast %374 : vector<1x64x8xf32> to vector<64x8xf32>
    %376 = vector.shape_cast %373 : vector<64x8xf32> to vector<1x64x8xf32>
    tpu.vector_store %arg10[%c1_288, %c0_289, %c0_290], %376 {strides = array<i32>} : memref<3x64x8xf32, #tpu.memory_space<vmem>>, vector<1x64x8xf32>,
    %c1_291 = arith.constant 1 : index
    %c0_292 = arith.constant 0 : index
    %c0_293 = arith.constant 0 : index
    %377 = vector.load %arg10[%c1_291, %c0_292, %c0_293] : memref<3x64x8xf32, #tpu.memory_space<vmem>>, vector<1x64x8xf32>
    %378 = vector.shape_cast %377 : vector<1x64x8xf32> to vector<64x8xf32>
    %379 = arith.addf %378, %5 : vector<64x8xf32>
    %cst_294 = arith.constant 0.000000e+00 : f32
    %380 = vector.broadcast %cst_294 : f32 to vector<64x8xf32>
    %381 = arith.maximumf %379, %380 : vector<64x8xf32>
    %382 = arith.mulf %381, %2 : vector<64x8xf32>
    %383 = arith.truncf %382 : vector<64x8xf32> to vector<64x8xbf16>
    %c16_295 = arith.constant 16 : index
    %c0_296 = arith.constant 0 : index
    %384 = vector.load %arg9[%c16_295, %c0_296] : memref<96x8xbf16, #tpu.memory_space<vmem>>, vector<64x8xbf16>
    tpu.vector_store %arg9[%c16_295, %c0_296], %383 {strides = array<i32>} : memref<96x8xbf16, #tpu.memory_space<vmem>>, vector<64x8xbf16>,
    %c0_297 = arith.constant 0 : index
    %c0_298 = arith.constant 0 : index
    %385 = vector.load %arg9[%c0_297, %c0_298] : memref<96x8xbf16, #tpu.memory_space<vmem>>, vector<96x8xbf16>
    %386 = vector.extract_strided_slice %385 {offsets = [7, 0], sizes = [64, 8], strides = [1, 1]} : vector<96x8xbf16> to vector<64x8xbf16>
    %387 = vector.extract_strided_slice %385 {offsets = [8, 0], sizes = [64, 8], strides = [1, 1]} : vector<96x8xbf16> to vector<64x8xbf16>
    %388 = vector.extract_strided_slice %385 {offsets = [9, 0], sizes = [64, 8], strides = [1, 1]} : vector<96x8xbf16> to vector<64x8xbf16>
    %389 = vector.extract_strided_slice %385 {offsets = [15, 0], sizes = [64, 8], strides = [1, 1]} : vector<96x8xbf16> to vector<64x8xbf16>
    %390 = vector.extract_strided_slice %385 {offsets = [16, 0], sizes = [64, 8], strides = [1, 1]} : vector<96x8xbf16> to vector<64x8xbf16>
    %391 = vector.extract_strided_slice %385 {offsets = [17, 0], sizes = [64, 8], strides = [1, 1]} : vector<96x8xbf16> to vector<64x8xbf16>
    %392 = vector.extract_strided_slice %385 {offsets = [23, 0], sizes = [64, 8], strides = [1, 1]} : vector<96x8xbf16> to vector<64x8xbf16>
    %393 = vector.extract_strided_slice %385 {offsets = [24, 0], sizes = [64, 8], strides = [1, 1]} : vector<96x8xbf16> to vector<64x8xbf16>
    %394 = vector.extract_strided_slice %385 {offsets = [25, 0], sizes = [64, 8], strides = [1, 1]} : vector<96x8xbf16> to vector<64x8xbf16>
    %395 = tpu.concatenate %386, %387, %388, %389, %390, %391, %392, %393, %394 in 1 : vector<64x8xbf16>, vector<64x8xbf16>, vector<64x8xbf16>, vector<64x8xbf16>, vector<64x8xbf16>, vector<64x8xbf16>, vector<64x8xbf16>, vector<64x8xbf16>, vector<64x8xbf16> -> vector<64x72xbf16>
    %cst_299 = arith.constant dense<0.000000e+00> : vector<64x8xf32>
    %396 = tpu.matmul %395, %23, %cst_299 {dimension_numbers = #tpu.dot_dimension_numbers<[1], [0], [0], [1], [0, 0, 1, 1], [], []>} : vector<64x72xbf16>, vector<72x8xbf16>, vector<64x8xf32> -> vector<64x8xf32>
    %c2_300 = arith.constant 2 : index
    %c0_301 = arith.constant 0 : index
    %c0_302 = arith.constant 0 : index
    %397 = vector.load %arg11[%c2_300, %c0_301, %c0_302] : memref<3x64x8xf32, #tpu.memory_space<vmem>>, vector<1x64x8xf32>
    %398 = vector.shape_cast %397 : vector<1x64x8xf32> to vector<64x8xf32>
    %399 = vector.shape_cast %396 : vector<64x8xf32> to vector<1x64x8xf32>
    tpu.vector_store %arg11[%c2_300, %c0_301, %c0_302], %399 {strides = array<i32>} : memref<3x64x8xf32, #tpu.memory_space<vmem>>, vector<1x64x8xf32>,
    %c1_303 = arith.constant 1 : index
    %c0_304 = arith.constant 0 : index
    %c0_305 = arith.constant 0 : index
    %400 = vector.load %arg11[%c1_303, %c0_304, %c0_305] : memref<3x64x8xf32, #tpu.memory_space<vmem>>, vector<1x64x8xf32>
    %401 = vector.shape_cast %400 : vector<1x64x8xf32> to vector<64x8xf32>
    %cst_306 = arith.constant dense<0.000000e+00> : vector<64x8xf32>
    %402 = tpu.matmul %395, %25, %cst_306 {dimension_numbers = #tpu.dot_dimension_numbers<[1], [0], [0], [1], [0, 0, 1, 1], [], []>} : vector<64x72xbf16>, vector<72x8xbf16>, vector<64x8xf32> -> vector<64x8xf32>
    %403 = arith.addf %401, %402 : vector<64x8xf32>
    %c1_307 = arith.constant 1 : index
    %c0_308 = arith.constant 0 : index
    %c0_309 = arith.constant 0 : index
    %404 = vector.load %arg11[%c1_307, %c0_308, %c0_309] : memref<3x64x8xf32, #tpu.memory_space<vmem>>, vector<1x64x8xf32>
    %405 = vector.shape_cast %404 : vector<1x64x8xf32> to vector<64x8xf32>
    %406 = vector.shape_cast %403 : vector<64x8xf32> to vector<1x64x8xf32>
    tpu.vector_store %arg11[%c1_307, %c0_308, %c0_309], %406 {strides = array<i32>} : memref<3x64x8xf32, #tpu.memory_space<vmem>>, vector<1x64x8xf32>,
    %c0_310 = arith.constant 0 : index
    %c0_311 = arith.constant 0 : index
    %c0_312 = arith.constant 0 : index
    %407 = vector.load %arg11[%c0_310, %c0_311, %c0_312] : memref<3x64x8xf32, #tpu.memory_space<vmem>>, vector<1x64x8xf32>
    %408 = vector.shape_cast %407 : vector<1x64x8xf32> to vector<64x8xf32>
    %cst_313 = arith.constant dense<0.000000e+00> : vector<64x8xf32>
    %409 = tpu.matmul %395, %27, %cst_313 {dimension_numbers = #tpu.dot_dimension_numbers<[1], [0], [0], [1], [0, 0, 1, 1], [], []>} : vector<64x72xbf16>, vector<72x8xbf16>, vector<64x8xf32> -> vector<64x8xf32>
    %410 = arith.addf %408, %409 : vector<64x8xf32>
    %c0_314 = arith.constant 0 : index
    %c0_315 = arith.constant 0 : index
    %c0_316 = arith.constant 0 : index
    %411 = vector.load %arg11[%c0_314, %c0_315, %c0_316] : memref<3x64x8xf32, #tpu.memory_space<vmem>>, vector<1x64x8xf32>
    %412 = vector.shape_cast %411 : vector<1x64x8xf32> to vector<64x8xf32>
    %413 = vector.shape_cast %410 : vector<64x8xf32> to vector<1x64x8xf32>
    tpu.vector_store %arg11[%c0_314, %c0_315, %c0_316], %413 {strides = array<i32>} : memref<3x64x8xf32, #tpu.memory_space<vmem>>, vector<1x64x8xf32>,
    %c0_317 = arith.constant 0 : index
    %c0_318 = arith.constant 0 : index
    %c0_319 = arith.constant 0 : index
    %414 = vector.load %arg11[%c0_317, %c0_318, %c0_319] : memref<3x64x8xf32, #tpu.memory_space<vmem>>, vector<1x64x8xf32>
    %415 = vector.shape_cast %414 : vector<1x64x8xf32> to vector<64x8xf32>
    %416 = arith.addf %415, %8 : vector<64x8xf32>
    %c0_320 = arith.constant 0 : index
    %c3_321 = arith.constant 3 : index
    %c16_322 = arith.constant 16 : index
    %c0_323 = arith.constant 0 : index
    %417 = vector.load %arg2[%c0_320, %c3_321, %c16_322, %c0_323] : memref<1x6x96x4xbf16, #tpu.memory_space<vmem>>, vector<1x1x64x4xbf16>
    %418 = vector.shape_cast %417 : vector<1x1x64x4xbf16> to vector<64x4xbf16>
    %c0_324 = arith.constant 0 : index
    %c0_325 = arith.constant 0 : index
    %419 = vector.load %arg7[%c0_324, %c0_325] : memref<4x8xbf16, #tpu.memory_space<vmem>>, vector<4x8xbf16>
    %cst_326 = arith.constant dense<0.000000e+00> : vector<64x8xf32>
    %420 = tpu.matmul %418, %419, %cst_326 {dimension_numbers = #tpu.dot_dimension_numbers<[1], [0], [0], [1], [0, 0, 1, 1], [], []>} : vector<64x4xbf16>, vector<4x8xbf16>, vector<64x8xf32> -> vector<64x8xf32>
    %421 = arith.addf %416, %420 : vector<64x8xf32>
    %cst_327 = arith.constant 0.000000e+00 : f32
    %422 = vector.broadcast %cst_327 : f32 to vector<64x8xf32>
    %423 = arith.maximumf %421, %422 : vector<64x8xf32>
    %c0_328 = arith.constant 0 : index
    %c3_329 = arith.constant 3 : index
    %c0_330 = arith.constant 0 : index
    %c0_331 = arith.constant 0 : index
    %424 = vector.load %arg8[%c0_328, %c3_329, %c0_330, %c0_331] : memref<1x6x64x8xf32, #tpu.memory_space<vmem>>, vector<1x1x64x8xf32>
    %425 = vector.shape_cast %424 : vector<1x1x64x8xf32> to vector<64x8xf32>
    %426 = vector.shape_cast %423 : vector<64x8xf32> to vector<1x1x64x8xf32>
    tpu.vector_store %arg8[%c0_328, %c3_329, %c0_330, %c0_331], %426 {strides = array<i32>} : memref<1x6x64x8xf32, #tpu.memory_space<vmem>>, vector<1x1x64x8xf32>,
    %c2_332 = arith.constant 2 : index
    %c0_333 = arith.constant 0 : index
    %c0_334 = arith.constant 0 : index
    %427 = vector.load %arg10[%c2_332, %c0_333, %c0_334] : memref<3x64x8xf32, #tpu.memory_space<vmem>>, vector<1x64x8xf32>
    %428 = vector.shape_cast %427 : vector<1x64x8xf32> to vector<64x8xf32>
    %429 = arith.addf %428, %5 : vector<64x8xf32>
    %cst_335 = arith.constant 0.000000e+00 : f32
    %430 = vector.broadcast %cst_335 : f32 to vector<64x8xf32>
    %431 = arith.maximumf %429, %430 : vector<64x8xf32>
    %432 = arith.mulf %431, %2 : vector<64x8xf32>
    %433 = arith.truncf %432 : vector<64x8xf32> to vector<64x8xbf16>
    %c16_336 = arith.constant 16 : index
    %c0_337 = arith.constant 0 : index
    %434 = vector.load %arg9[%c16_336, %c0_337] : memref<96x8xbf16, #tpu.memory_space<vmem>>, vector<64x8xbf16>
    tpu.vector_store %arg9[%c16_336, %c0_337], %433 {strides = array<i32>} : memref<96x8xbf16, #tpu.memory_space<vmem>>, vector<64x8xbf16>,
    %c0_338 = arith.constant 0 : index
    %c0_339 = arith.constant 0 : index
    %435 = vector.load %arg9[%c0_338, %c0_339] : memref<96x8xbf16, #tpu.memory_space<vmem>>, vector<96x8xbf16>
    %436 = vector.extract_strided_slice %435 {offsets = [7, 0], sizes = [64, 8], strides = [1, 1]} : vector<96x8xbf16> to vector<64x8xbf16>
    %437 = vector.extract_strided_slice %435 {offsets = [8, 0], sizes = [64, 8], strides = [1, 1]} : vector<96x8xbf16> to vector<64x8xbf16>
    %438 = vector.extract_strided_slice %435 {offsets = [9, 0], sizes = [64, 8], strides = [1, 1]} : vector<96x8xbf16> to vector<64x8xbf16>
    %439 = vector.extract_strided_slice %435 {offsets = [15, 0], sizes = [64, 8], strides = [1, 1]} : vector<96x8xbf16> to vector<64x8xbf16>
    %440 = vector.extract_strided_slice %435 {offsets = [16, 0], sizes = [64, 8], strides = [1, 1]} : vector<96x8xbf16> to vector<64x8xbf16>
    %441 = vector.extract_strided_slice %435 {offsets = [17, 0], sizes = [64, 8], strides = [1, 1]} : vector<96x8xbf16> to vector<64x8xbf16>
    %442 = vector.extract_strided_slice %435 {offsets = [23, 0], sizes = [64, 8], strides = [1, 1]} : vector<96x8xbf16> to vector<64x8xbf16>
    %443 = vector.extract_strided_slice %435 {offsets = [24, 0], sizes = [64, 8], strides = [1, 1]} : vector<96x8xbf16> to vector<64x8xbf16>
    %444 = vector.extract_strided_slice %435 {offsets = [25, 0], sizes = [64, 8], strides = [1, 1]} : vector<96x8xbf16> to vector<64x8xbf16>
    %445 = tpu.concatenate %436, %437, %438, %439, %440, %441, %442, %443, %444 in 1 : vector<64x8xbf16>, vector<64x8xbf16>, vector<64x8xbf16>, vector<64x8xbf16>, vector<64x8xbf16>, vector<64x8xbf16>, vector<64x8xbf16>, vector<64x8xbf16>, vector<64x8xbf16> -> vector<64x72xbf16>
    %c2_340 = arith.constant 2 : index
    %c0_341 = arith.constant 0 : index
    %c0_342 = arith.constant 0 : index
    %446 = vector.load %arg11[%c2_340, %c0_341, %c0_342] : memref<3x64x8xf32, #tpu.memory_space<vmem>>, vector<1x64x8xf32>
    %447 = vector.shape_cast %446 : vector<1x64x8xf32> to vector<64x8xf32>
    %cst_343 = arith.constant dense<0.000000e+00> : vector<64x8xf32>
    %448 = tpu.matmul %445, %25, %cst_343 {dimension_numbers = #tpu.dot_dimension_numbers<[1], [0], [0], [1], [0, 0, 1, 1], [], []>} : vector<64x72xbf16>, vector<72x8xbf16>, vector<64x8xf32> -> vector<64x8xf32>
    %449 = arith.addf %447, %448 : vector<64x8xf32>
    %c2_344 = arith.constant 2 : index
    %c0_345 = arith.constant 0 : index
    %c0_346 = arith.constant 0 : index
    %450 = vector.load %arg11[%c2_344, %c0_345, %c0_346] : memref<3x64x8xf32, #tpu.memory_space<vmem>>, vector<1x64x8xf32>
    %451 = vector.shape_cast %450 : vector<1x64x8xf32> to vector<64x8xf32>
    %452 = vector.shape_cast %449 : vector<64x8xf32> to vector<1x64x8xf32>
    tpu.vector_store %arg11[%c2_344, %c0_345, %c0_346], %452 {strides = array<i32>} : memref<3x64x8xf32, #tpu.memory_space<vmem>>, vector<1x64x8xf32>,
    %c1_347 = arith.constant 1 : index
    %c0_348 = arith.constant 0 : index
    %c0_349 = arith.constant 0 : index
    %453 = vector.load %arg11[%c1_347, %c0_348, %c0_349] : memref<3x64x8xf32, #tpu.memory_space<vmem>>, vector<1x64x8xf32>
    %454 = vector.shape_cast %453 : vector<1x64x8xf32> to vector<64x8xf32>
    %cst_350 = arith.constant dense<0.000000e+00> : vector<64x8xf32>
    %455 = tpu.matmul %445, %27, %cst_350 {dimension_numbers = #tpu.dot_dimension_numbers<[1], [0], [0], [1], [0, 0, 1, 1], [], []>} : vector<64x72xbf16>, vector<72x8xbf16>, vector<64x8xf32> -> vector<64x8xf32>
    %456 = arith.addf %454, %455 : vector<64x8xf32>
    %c1_351 = arith.constant 1 : index
    %c0_352 = arith.constant 0 : index
    %c0_353 = arith.constant 0 : index
    %457 = vector.load %arg11[%c1_351, %c0_352, %c0_353] : memref<3x64x8xf32, #tpu.memory_space<vmem>>, vector<1x64x8xf32>
    %458 = vector.shape_cast %457 : vector<1x64x8xf32> to vector<64x8xf32>
    %459 = vector.shape_cast %456 : vector<64x8xf32> to vector<1x64x8xf32>
    tpu.vector_store %arg11[%c1_351, %c0_352, %c0_353], %459 {strides = array<i32>} : memref<3x64x8xf32, #tpu.memory_space<vmem>>, vector<1x64x8xf32>,
    %c1_354 = arith.constant 1 : index
    %c0_355 = arith.constant 0 : index
    %c0_356 = arith.constant 0 : index
    %460 = vector.load %arg11[%c1_354, %c0_355, %c0_356] : memref<3x64x8xf32, #tpu.memory_space<vmem>>, vector<1x64x8xf32>
    %461 = vector.shape_cast %460 : vector<1x64x8xf32> to vector<64x8xf32>
    %462 = arith.addf %461, %8 : vector<64x8xf32>
    %c0_357 = arith.constant 0 : index
    %c4_358 = arith.constant 4 : index
    %c16_359 = arith.constant 16 : index
    %c0_360 = arith.constant 0 : index
    %463 = vector.load %arg2[%c0_357, %c4_358, %c16_359, %c0_360] : memref<1x6x96x4xbf16, #tpu.memory_space<vmem>>, vector<1x1x64x4xbf16>
    %464 = vector.shape_cast %463 : vector<1x1x64x4xbf16> to vector<64x4xbf16>
    %c0_361 = arith.constant 0 : index
    %c0_362 = arith.constant 0 : index
    %465 = vector.load %arg7[%c0_361, %c0_362] : memref<4x8xbf16, #tpu.memory_space<vmem>>, vector<4x8xbf16>
    %cst_363 = arith.constant dense<0.000000e+00> : vector<64x8xf32>
    %466 = tpu.matmul %464, %465, %cst_363 {dimension_numbers = #tpu.dot_dimension_numbers<[1], [0], [0], [1], [0, 0, 1, 1], [], []>} : vector<64x4xbf16>, vector<4x8xbf16>, vector<64x8xf32> -> vector<64x8xf32>
    %467 = arith.addf %462, %466 : vector<64x8xf32>
    %cst_364 = arith.constant 0.000000e+00 : f32
    %468 = vector.broadcast %cst_364 : f32 to vector<64x8xf32>
    %469 = arith.maximumf %467, %468 : vector<64x8xf32>
    %c0_365 = arith.constant 0 : index
    %c4_366 = arith.constant 4 : index
    %c0_367 = arith.constant 0 : index
    %c0_368 = arith.constant 0 : index
    %470 = vector.load %arg8[%c0_365, %c4_366, %c0_367, %c0_368] : memref<1x6x64x8xf32, #tpu.memory_space<vmem>>, vector<1x1x64x8xf32>
    %471 = vector.shape_cast %470 : vector<1x1x64x8xf32> to vector<64x8xf32>
    %472 = vector.shape_cast %469 : vector<64x8xf32> to vector<1x1x64x8xf32>
    tpu.vector_store %arg8[%c0_365, %c4_366, %c0_367, %c0_368], %472 {strides = array<i32>} : memref<1x6x64x8xf32, #tpu.memory_space<vmem>>, vector<1x1x64x8xf32>,
    %c2_369 = arith.constant 2 : index
    %c0_370 = arith.constant 0 : index
    %c0_371 = arith.constant 0 : index
    %473 = vector.load %arg11[%c2_369, %c0_370, %c0_371] : memref<3x64x8xf32, #tpu.memory_space<vmem>>, vector<1x64x8xf32>
    %474 = vector.shape_cast %473 : vector<1x64x8xf32> to vector<64x8xf32>
    %475 = arith.addf %474, %8 : vector<64x8xf32>
    %c0_372 = arith.constant 0 : index
    %c5_373 = arith.constant 5 : index
    %c16_374 = arith.constant 16 : index
    %c0_375 = arith.constant 0 : index
    %476 = vector.load %arg2[%c0_372, %c5_373, %c16_374, %c0_375] : memref<1x6x96x4xbf16, #tpu.memory_space<vmem>>, vector<1x1x64x4xbf16>
    %477 = vector.shape_cast %476 : vector<1x1x64x4xbf16> to vector<64x4xbf16>
    %c0_376 = arith.constant 0 : index
    %c0_377 = arith.constant 0 : index
    %478 = vector.load %arg7[%c0_376, %c0_377] : memref<4x8xbf16, #tpu.memory_space<vmem>>, vector<4x8xbf16>
    %cst_378 = arith.constant dense<0.000000e+00> : vector<64x8xf32>
    %479 = tpu.matmul %477, %478, %cst_378 {dimension_numbers = #tpu.dot_dimension_numbers<[1], [0], [0], [1], [0, 0, 1, 1], [], []>} : vector<64x4xbf16>, vector<4x8xbf16>, vector<64x8xf32> -> vector<64x8xf32>
    %480 = arith.addf %475, %479 : vector<64x8xf32>
    %cst_379 = arith.constant 0.000000e+00 : f32
    %481 = vector.broadcast %cst_379 : f32 to vector<64x8xf32>
    %482 = arith.maximumf %480, %481 : vector<64x8xf32>
    %c0_380 = arith.constant 0 : index
    %c5_381 = arith.constant 5 : index
    %c0_382 = arith.constant 0 : index
    %c0_383 = arith.constant 0 : index
    %483 = vector.load %arg8[%c0_380, %c5_381, %c0_382, %c0_383] : memref<1x6x64x8xf32, #tpu.memory_space<vmem>>, vector<1x1x64x8xf32>
    %484 = vector.shape_cast %483 : vector<1x1x64x8xf32> to vector<64x8xf32>
    %485 = vector.shape_cast %482 : vector<64x8xf32> to vector<1x1x64x8xf32>
    tpu.vector_store %arg8[%c0_380, %c5_381, %c0_382, %c0_383], %485 {strides = array<i32>} : memref<1x6x64x8xf32, #tpu.memory_space<vmem>>, vector<1x1x64x8xf32>,
    return
  }
  func.func @transform_0(%arg0: i32) -> (i32, i32) {
    %c0_i32 = arith.constant 0 : i32
    %c0_i32_0 = arith.constant 0 : i32
    %c0_i32_1 = arith.constant 0 : i32
    return %c0_i32, %c0_i32_0 : i32, i32
  }
  func.func @transform_1(%arg0: i32) -> (i32, i32, i32, i32) {
    %c0_i32 = arith.constant 0 : i32
    %c0_i32_0 = arith.constant 0 : i32
    %c0_i32_1 = arith.constant 0 : i32
    %c0_i32_2 = arith.constant 0 : i32
    return %arg0, %c0_i32, %c0_i32_0, %c0_i32_1 : i32, i32, i32, i32
  }
  func.func @transform_2(%arg0: i32) -> (i32, i32, i32) {
    %c0_i32 = arith.constant 0 : i32
    %c0_i32_0 = arith.constant 0 : i32
    %c0_i32_1 = arith.constant 0 : i32
    %c0_i32_2 = arith.constant 0 : i32
    return %c0_i32, %c0_i32_0, %c0_i32_1 : i32, i32, i32
  }
  func.func @transform_3(%arg0: i32) -> (i32, i32) {
    %c0_i32 = arith.constant 0 : i32
    %c0_i32_0 = arith.constant 0 : i32
    %c0_i32_1 = arith.constant 0 : i32
    return %c0_i32, %c0_i32_0 : i32, i32
  }
  func.func @transform_4(%arg0: i32) -> (i32, i32, i32) {
    %c0_i32 = arith.constant 0 : i32
    %c0_i32_0 = arith.constant 0 : i32
    %c0_i32_1 = arith.constant 0 : i32
    %c0_i32_2 = arith.constant 0 : i32
    return %c0_i32, %c0_i32_0, %c0_i32_1 : i32, i32, i32
  }
  func.func @transform_5(%arg0: i32) -> (i32, i32) {
    %c0_i32 = arith.constant 0 : i32
    %c0_i32_0 = arith.constant 0 : i32
    %c0_i32_1 = arith.constant 0 : i32
    return %c0_i32, %c0_i32_0 : i32, i32
  }
  func.func @transform_6(%arg0: i32) -> (i32, i32) {
    %c0_i32 = arith.constant 0 : i32
    %c0_i32_0 = arith.constant 0 : i32
    %c0_i32_1 = arith.constant 0 : i32
    return %c0_i32, %c0_i32_0 : i32, i32
  }
  func.func @transform_7(%arg0: i32) -> (i32, i32, i32, i32) {
    %c0_i32 = arith.constant 0 : i32
    %c0_i32_0 = arith.constant 0 : i32
    %c0_i32_1 = arith.constant 0 : i32
    %c0_i32_2 = arith.constant 0 : i32
    return %arg0, %c0_i32, %c0_i32_0, %c0_i32_1 : i32, i32, i32, i32
  }
}

</mosaic_0001>

<bundles_post_ra>
// kernel: res3d_block_forward.1
= control target key start
LH: loop header
LB: loop body
LE: loop exit
PB: predicated region body
PF: predicated region fallthrough
CT: control target
= control target key end

     0   :  { %s10225_s24 = smov 0   ;;  %s14469_s0 = inlined_call_operand.vmem [shape: f32[64,1], index: 0, kind: input, shape index: {}]   ;;  %s14470_s1 = inlined_call_operand.vmem [shape: bf16[2,6,96,4], index: 1, kind: input, shape index: {}]   ;;  %s14471_s2 = inlined_call_operand.vmem [shape: bf16[3,36,8], index: 2, kind: input, shape index: {}]   ;;  %s14472_s3 = inlined_call_operand.vmem [shape: f32[1,8], index: 3, kind: input, shape index: {}]   ;;  %s14473_s4 = inlined_call_operand.vmem [shape: bf16[3,72,8], index: 4, kind: input, shape index: {}]   ;;  %s14474_s5 = inlined_call_operand.vmem [shape: f32[1,8], index: 5, kind: input, shape index: {}]   ;;  %s14475_s6 = inlined_call_operand.vmem [shape: bf16[4,8], index: 6, kind: input, shape index: {}]   ;;  %s14476_s7 = inlined_call_operand.vmem [shape: f32[2,6,64,8], index: 7, kind: output, shape index: {}]  }
   0x1 LB: > { %s8563_s25 = sadd.s32 4294967295, %s10169_s24   ;;  %p8567_p0 = scmp.ge.s32.totalorder %s10169_s24, 1  ;;  %s10169_s24 = sphi %s10225_s24, %s17_s24  }
   0x2   : > { %p237_p1 = scmp.lt.s32.totalorder %s10169_s24, 3 }
   0x4   : > { %p238_p2 = pnand %p8567_p0, %p237_p1 }
   0x6   : > { %241 = sbr.rel (%p238_p2) target bundleno = 2979 (0xba3), region = 48 }
   0xd   : > { %p269_p3 = scmp.lt.s32.totalorder %s8563_s25, 1  ;;  %s10171_s30 = smov 12   ;;  %vm14536_vm0 = vcmask 1042432   ;;  %vm14535_vm1 = vsmask.f32 3328  ;;  %v10326_v63 = vld [vmem:[%s14471_s2] sm:$0xff]  }
   0xe   : > { %s10172_s8 = smov 8   ;;  %s10173_s9 = smov 16   ;;  %9312 = vmatprep.subr.bf16.mxu0 %v10326_v63  ;;  %vm829_vm2 = vcmask 1041408   ;;  %vm14546_vm3 = vcmask 31744   ;;  %vm342_vm4 = vcmask 64512   ;;  %vm14545_vm5 = vcmask 97280  }
   0xf   : > { %s14895_s25 = smov (!%p269_p3, %s8563_s25), 1  ;;  %s10174_s10 = smov 4   ;;  %9313 = vmatpush3.bf16.msra.mxu0 %v10326_v63  ;;  %vm706_vm6 = vcmask 130048   ;;  %vm14544_vm7 = vcmask 162816   ;;  %vm728_vm8 = vcmask 195584   ;;  %vm14542_vm9 = vcmask 228352  }
  0x10   : > { %s9922_s26 = smul.u32 288, %s14895_s25  ;;  %s10175_s11 = smov 20   ;;  %vm750_vm10 = vcmask 261120   ;;  %vm761_vm11 = vsmask.f32 4352  ;;  %vm14543_vm12 = vcmask 293888  }
  0x11   : > { %s10176_s12 = smov 24   ;;  %s10177_s21 = smov 28   ;;  %vm14534_vm13 = vcmask 1046528   ;;  %vm14541_vm14 = vcmask 1043456   ;;  %vm14530_vm15 = vsmask.f32 7424 }
  0x12   : > { %s10239_s29 = scalar_lea.vmem %s14470_s1, %s9922_s26  ;;  %s10178_s28 = smov 32  }
  0x13   : > { %v442_v0 = vld [vmem:[%s10239_s29 + $0xc] sm:$0xf]  ;;  %v443_v1 = vld [vmem:[%s10239_s29 + $0x10] sm:$0xf]  ;;  %v10244_v2 = vld [vmem:[%s10239_s29 + $0x4] sm:$0xf] }
  0x14   : > { %v8606_v3 = vcombine.low %v442_v0, %v443_v1  ;;  %v441_v4 = vld [vmem:[%s10239_s29 + $0x8] sm:$0xf]  ;;  %v444_v5 = vld [vmem:[%s10239_s29 + $0x14] sm:$0xf]  ;;  %v445_v6 = vld [vmem:[%s10239_s29 + $0x18] sm:$0xf] }
  0x15   : > { %v10249_v7 = vcombine.low %v441_v4, %v442_v0  ;;  %v8605_v8 = vcombine.low %v10244_v2, %v441_v4  ;;  %v10253_v9 = vld [vmem:[%s10239_s29 + $0x1c] sm:$0xf]  ;;  %v10255_v10 = vcombine.low %v444_v5, %v445_v6  ;;  %v10258_v11 = vcombine.low %v443_v1, %v444_v5  ;;  %v10302_v53 = vld [vmem:[%s10239_s29 + $0x20] sm:$0xf]  ;;  %v10331_v0 = vld [vmem:[%s14471_s2 + $0x14] sm:$0xff]   ;;  %s10181_s26 = smov 48  }
  0x16   : > { %549 = vrot.lane.b32.xlu1 %v8606_v3, %s10171_s30  ;;  %v10260_v12 = vrot.slane %v8606_v3, 5  ;;  %v488_v13 = vshrl.u32 %v8606_v3, 16  ;;  %v10267_v18 = vcombine.low %v445_v6, %v10253_v9  ;;  %v491_v21 = vshll.u32 %v8606_v3, 16  ;;  %v448_v1 = vld [vmem:[%s10239_s29 + $0x24] sm:$0xf]  ;;  %9326 = vmatprep.subr.bf16.mxu1 %v10331_v0  ;;  %v10350_v5 = vld [vmem:[%s14471_s2 + $0x8] sm:$0xff]  }
  0x17   : > { %547 = vrot.lane.b32.xlu0 %v8605_v8, %s10171_s30  ;;  %v528_v14 = vrot.slane %v8605_v8, 5  ;;  %v531_v15 = vrot.slane %v10255_v10, 5  ;;  %v559_v16 = vshrl.u32 %v10249_v7, 16  ;;  %v562_v17 = vshll.u32 %v10249_v7, 16  ;;  %9327 = vmatpush3.bf16.msra.mxu1 %v10331_v0  ;;  %v10355_v6 = vld [vmem:[%s14471_s2 + $0x1c] sm:$0xff]   ;;  %s10182_s27 = smov 56  }
  0x18   : > { %v480_v19 = vshrl.u32 %v8605_v8, 16  ;;  %v483_v20 = vshll.u32 %v8605_v8, 16  ;;  %v490_v24 = vrot.slane %v488_v13, 4  ;;  %v493_v27 = vrot.slane %v491_v21, 5  ;;  %9314 = vmatprep.subr.bf16.mxu0 %v10350_v5  ;;  %9328 = vmatprep.subr.bf16.mxu1 %v10355_v6  ;;  %s10183_s13 = smov 64   ;;  %s10184_s16 = smov 40  }
  0x19   : > { %v561_v22 = vrot.slane %v559_v16, 4  ;;  %v564_v23 = vrot.slane %v562_v17, 5  ;;  %v497_v28 = vshrl.u32 %v10255_v10, 16  ;;  %v10277_v29 = vsel %vm14536_vm0, %v10260_v12, %v531_v15  ;;  %9315 = vmatpush3.bf16.msra.mxu0 %v10350_v5  ;;  %v10370_v16 = vld [vmem:[%s14471_s2 + $0x10] ss:$0 sps:$4 sm:$0x33]  }
  0x1a   : > { %537 = vrot.lane.b32.xlu1 %v528_v14, %s10172_s8  ;;  %v482_v25 = vrot.slane %v480_v19, 4  ;;  %v485_v26 = vrot.slane %v483_v20, 5  ;;  %v500_v30 = vshll.u32 %v10255_v10, 16  ;;  %v567_v31 = vshrl.u32 %v10258_v11, 16  ;;  %9884 = vmatprep.subr.msk.bf16.mxu0 %vm829_vm2, %v10370_v16  ;;  %s9923_s22 = smul.u32 384, %s14895_s25 }
  0x1b   : > { %551 = vrot.lane.b32.xlu0 %v10255_v10, %s10171_s30  ;;  %v570_v32 = vshll.u32 %v10258_v11, 16  ;;  %v530_v33 = vsel %vm14536_vm0, %v528_v14, %v10260_v12  ;;  %v499_v34 = vrot.slane %v497_v28, 4  ;;  %v576_v35 = vshrl.u32 %v10267_v18, 16  ;;  %9329 = vmatpush3.bf16.msra.mxu1 %v10355_v6  ;;  %v10375_v17 = vld [vmem:[%s14471_s2 + $0x24] ss:$0 sps:$4 sm:$0x33]  }
  0x1c   : > { %v502_v36 = vrot.slane %v500_v30, 5  ;;  %v579_v37 = vshll.u32 %v10267_v18, 16  ;;  %v565_v38 = vor.u32 %v564_v23, %v561_v22  ;;  %v486_v39 = vor.u32 %v485_v26, %v482_v25  ;;  %9885 = vmatprep.subr.msk.bf16.mxu1 %vm829_vm2, %v10375_v17  ;;  %v449_v25 = vld [vmem:[%s10239_s29 + $0x28] sm:$0xf]  ;;  %v10419_v30 = vld [vmem:[%s10239_s29 + $0x34] sm:$0xf]  ;;  %s12396_s14 = scalar_lea.vmem %s14476_s7, %s9923_s22 }
  0x1d   : > { %v494_v40 = vor.u32 %v493_v27, %v490_v24  ;;  %v569_v41 = vrot.slane %v567_v31, 4  ;;  %v572_v43 = vrot.slane %v570_v32, 5  ;;  %v578_v44 = vrot.slane %v576_v35, 4  ;;  %v8630_v31 = vld [vmem:[%s10239_s29 + $0x38] sm:$0xf] }
  0x1e   : > { %541 = vrot.lane.b32.xlu1 %v10277_v29, %s10172_s8  ;;  %v503_v42 = vor.u32 %v502_v36, %v499_v34  ;;  %v581_v45 = vrot.slane %v579_v37, 5  ;;  %v606_v51 = vrot.slane %v10249_v7, 5  ;;  %v607_v52 = vrot.slane %v10258_v11, 5  ;;  %v8631_v35 = vld [vmem:[%s10239_s29 + $0x3c] sm:$0xf] }
  0x1f   : > { %539 = vrot.lane.b32.xlu0 %v530_v33, %s10172_s8  ;;  %v573_v47 = vor.u32 %v572_v43, %v569_v41  ;;  %v495_v49 = vsel %vm14535_vm1, %v486_v39, %v494_v40  ;;  %v10310_v56 = vcombine.low %v10253_v9, %v10302_v53  ;;  %v609_v57 = vrot.slane %v10267_v18, 5  ;;  %v8632_v36 = vld [vmem:[%s10239_s29 + $0x40] sm:$0xf]  ;;  %v8633_v43 = vld [vmem:[%s10239_s29 + $0x44] sm:$0xf] }
  0x20   : > { %v504_v46 = vsel %vm14535_vm1, %v494_v40, %v503_v42  ;;  %v10292_v48 = vor.u32 %v581_v45, %v578_v44  ;;  %v608_v55 = vsel %vm14536_vm0, %v606_v51, %v607_v52  ;;  %v10343_v4 = vcombine.low %v10302_v53, %v448_v1  ;;  %v8634_v44 = vld [vmem:[%s10239_s29 + $0x48] sm:$0xf]  ;;  %v9959_v45 = vld [vmem:[%s10239_s29 + $0x2c] ss:$0 sps:$4 sm:$0xff]  }
  0x21   : > { %v574_v54 = vsel %vm14535_vm1, %v565_v38, %v573_v47  ;;  %v610_v58 = vsel %vm14536_vm0, %v607_v52, %v609_v57  ;;  %v506_v59 = vshrl.u32 %v10310_v56, 16  ;;  %v509_v60 = vshll.u32 %v10310_v56, 16 }
  0x22   : > { %593 = vrot.lane.b32.xlu1 %v565_v38, %s10173_s9  ;;  %v583_v50 = vsel %vm14535_vm1, %v573_v47, %v10292_v48  ;;  %v585_v9 = vshrl.u32 %v10343_v4, 16  ;;  %v588_v13 = vshll.u32 %v10343_v4, 16  ;;  %v8609_v14 = vcombine.low %v448_v1, %v448_v1 }
  0x23   : > { %514 = vrot.lane.b32.xlu0 %v486_v39, %s10174_s10  ;;  %v508_v61 = vrot.slane %v506_v59, 4  ;;  %v511_v62 = vrot.slane %v509_v60, 5  ;;  %v10381_v19 = vrot.slane %v10310_v56, 5  ;;  %v10394_v23 = vsel %vm829_vm2, %v10375_v17, 0 }
  0x24   : > { %v535_v20 = vrot.slane %v8609_v14, 5  ;;  %v587_v21 = vrot.slane %v585_v9, 4  ;;  %v590_v22 = vrot.slane %v588_v13, 5  ;;  %14548 = vst [vmem:[#allocation6_spill] sm:$0xff] %v10394_v23  ;;  %9331 = vmatpush3.bf16.msra.mxu1 %v10394_v23  ;;  %v8612_v27 = vcombine.low %v448_v1, %v449_v25 }
  0x25   : > { %v10340_v3 = vor.u32 %v511_v62, %v508_v61  ;;  %v534_v24 = vsel %vm14536_vm0, %v531_v15, %v10381_v19  ;;  %9354 = vmatprep.subr.bf16.mxu1 %v10331_v0  ;;  %v8611_v15 = vcombine.low %v449_v25, %v449_v25  ;;  %v611_v28 = vrot.slane %v10343_v4, 5 }
  0x26   : > { %518 = vrot.lane.b32.xlu1 %v504_v46, %s10174_s10  ;;  %v536_v10 = vsel %vm14536_vm0, %v10381_v19, %v535_v20  ;;  %v591_v26 = vor.u32 %v590_v22, %v587_v21  ;;  %v637_v33 = vshrl.u32 %v8612_v27, 16  ;;  %v640_v34 = vshll.u32 %v8612_v27, 16 }
  0x27   : > { %516 = vrot.lane.b32.xlu0 %v495_v49, %s10174_s10  ;;  %v513_v8 = vsel %vm14535_vm1, %v503_v42, %v10340_v3  ;;  %v10430_v38 = vcombine.low %v10419_v30, %v8630_v31  ;;  %v10432_v39 = vcombine.low %v8631_v35, %v8632_v36  ;;  %v658_v52 = vrot.slane %v8612_v27, 5 }
  0x28   : > { %v592_v32 = vsel %vm14535_vm1, %v10292_v48, %v591_v26  ;;  %v639_v41 = vrot.slane %v637_v33, 4  ;;  %v642_v42 = vrot.slane %v640_v34, 5  ;;  %v10469_v21 = vcombine.low %v8630_v31, %v8631_v35 }
  0x29   : > { %v1058_v47 = vshll.u32 %v10430_v38, 16  ;;  %v1063_v48 = vshrl.u32 %v10432_v39, 16  ;;  %v1066_v49 = vshll.u32 %v10432_v39, 16  ;;  %v1102_v22 = vrot.slane %v10430_v38, 5 }
  0x2a   : > { %597 = vrot.lane.b32.xlu1 %v583_v50, %s10173_s9  ;;  %v643_v50 = vor.u32 %v642_v42, %v639_v41  ;;  %v10476_v25 = vcombine.low %v8632_v36, %v8633_v43  ;;  %v1133_v27 = vshrl.u32 %v10469_v21, 16 }
  0x2b   : > { %595 = vrot.lane.b32.xlu0 %v574_v54, %s10173_s9  ;;  %v660_v54 = vrot.slane %v9959_v45, 5 }
  0x2c   : > { %v644_v59 = vsel %vm14535_vm1, %v10340_v3, %v643_v50  ;;  %v1144_v31 = vshll.u32 %v10476_v25, 16  ;;  %v1135_v35 = vrot.slane %v1133_v27, 4 }
  0x2d   : > { %v661_v62 = vsel %vm14536_vm0, %v658_v52, %v660_v54 }
  0x2e   : > { %617 = vrot.lane.b32.xlu1 %v608_v55, %s10175_s11 }
  0x2f   : > { %615 = vrot.lane.b32.xlu0 %v606_v51, %s10175_s11  ;;  %v10446_v51 = vcombine.low %v8633_v43, %v8634_v44 }
  0x31   : > { %v1072_v60 = vshrl.u32 %v10446_v51, 16  ;;  %v1075_v61 = vshll.u32 %v10446_v51, 16 }
  0x32   : > { %625 = vrot.lane.b32.xlu1 %v10249_v7, %s10176_s12 }
  0x33   : > { %619 = vrot.lane.b32.xlu0 %v610_v58, %s10175_s11  ;;  %v1068_v58 = vrot.slane %v1066_v49, 5  ;;  %v1074_v9 = vrot.slane %v1072_v60, 4  ;;  %v1077_v13 = vrot.slane %v1075_v61, 5  ;;  %v10512_v49 = vld [vmem:[%s10239_s29 + $0x50] sm:$0xf] }
  0x35   : > { %v10467_v20 = vor.u32 %v1077_v13, %v1074_v9 }
  0x36   : > { %629 = vrot.lane.b32.xlu1 %v10267_v18, %s10176_s12 }
  0x37   : > { %627 = vrot.lane.b32.xlu0 %v10258_v11, %s10176_s12 }
  0x3a   : > { %647 = vrot.lane.b32.xlu1 %v504_v46, %s10177_s21  ;;  %v1055_v46 = vshrl.u32 %v10430_v38, 16 }
  0x3b   : > { %645 = vrot.lane.b32.xlu0 %v494_v40, %s10177_s21  ;;  %v612_v40 = vsel %vm14536_vm0, %v609_v57, %v611_v28  ;;  %v1065_v57 = vrot.slane %v1063_v48, 4  ;;  %v1181_v48 = vrot.slane %v10476_v25, 5 }
  0x3c   : > { %v1057_v55 = vrot.slane %v1055_v46, 4 }
  0x3e   : > { %662 = vrot.lane.b32.xlu1 %v10260_v12, %s10178_s28  ;;  %v10390_v12 = vsel %vm829_vm2, %v10370_v16, 0 }
  0x3f   : > { %649 = vrot.lane.b32.xlu0 %v513_v8, %s10177_s21  ;;  %14547 = vst [vmem:[#allocation5_spill] sm:$0xff] %v10390_v12  ;;  %9317 = vmatpush3.bf16.msra.mxu0 %v10390_v12 }
  0x40   : > { %9340 = vmatprep.subr.bf16.mxu0 %v10326_v63 }
  0x42   : > { %520 = vrot.lane.b32.xlu1 %v513_v8, %s10174_s10  ;;  %v659_v8 = vsel %vm14536_vm0, %v10381_v19, %v658_v52  ;;  %v1103_v19 = vrot.slane %v10432_v39, 5 }
  0x43   : > { %664 = vrot.lane.b32.xlu0 %v10277_v29, %s10178_s28  ;;  %v613_v29 = vrot.slane %v8611_v15, 5 }
  0x44   : > { %v1104_v34 = vsel %vm14536_vm0, %v1102_v22, %v1103_v19 }
  0x45   : > { %v614_v37 = vsel %vm14536_vm0, %v611_v28, %v613_v29  ;;  %v1136_v28 = vshll.u32 %v10469_v21, 16  ;;  %v1141_v29 = vshrl.u32 %v10476_v25, 16 }
  0x46   : > { %522 = vrot.lane.b32.xlu1 %v10340_v3, %s10174_s10 }
  0x47   : > { %666 = vrot.lane.b32.xlu0 %v534_v24, %s10178_s28  ;;  %v1138_v36 = vrot.slane %v1136_v28, 5 }
  0x49   : > { %v1139_v43 = vor.u32 %v1138_v36, %v1135_v35 }
  0x4a   : > { %545 = vrot.lane.b32.xlu1 %v536_v10, %s10172_s8 }
  0x4b   : > { %543 = vrot.lane.b32.xlu0 %v534_v24, %s10172_s8  ;;  %v1105_v24 = vrot.slane %v10446_v51, 5 }
  0x4e   : > { %555 = vrot.lane.b32.xlu1 %v8609_v14, %s10171_s30  ;;  %v8635_v14 = vld [vmem:[%s10239_s29 + $0x4c] sm:$0xf] }
  0x4f   : > { %553 = vrot.lane.b32.xlu0 %v10310_v56, %s10171_s30  ;;  %v1060_v56 = vrot.slane %v1058_v47, 5  ;;  %v10478_v10 = vcombine.low %v8634_v44, %v8635_v14  ;;  %v1180_v47 = vrot.slane %v10469_v21, 5  ;;  %v8648_v52 = vcombine.low %v8635_v14, %v10512_v49 }
  0x51   : > { %v1061_v1 = vor.u32 %v1060_v56, %v1057_v55  ;;  %v1153_v33 = vshll.u32 %v10478_v10, 16  ;;  %v1081_v55 = vshrl.u32 %v8648_v52, 16  ;;  %v1084_v56 = vshll.u32 %v8648_v52, 16 }
  0x52   : > { %601 = vrot.lane.b32.xlu1 %v591_v26, %s10173_s9  ;;  %v1106_v26 = vsel %vm14536_vm0, %v1103_v19, %v1105_v24  ;;  %v10550_v14 = vrot.slane %v8648_v52, 5 }
  0x53   : > { %599 = vrot.lane.b32.xlu0 %v592_v32, %s10173_s9  ;;  %v1150_v32 = vshrl.u32 %v10478_v10, 16  ;;  %v1155_v42 = vrot.slane %v1153_v33, 5 }
  0x55   : > { %v1152_v41 = vrot.slane %v1150_v32, 4 }
  0x56   : > { %623 = vrot.lane.b32.xlu1 %v614_v37, %s10175_s11  ;;  %v1143_v37 = vrot.slane %v1141_v29, 4 }
  0x57   : > { %621 = vrot.lane.b32.xlu0 %v612_v40, %s10175_s11  ;;  %v1146_v40 = vrot.slane %v1144_v31, 5  ;;  %v10501_v45 = vor.u32 %v1155_v42, %v1152_v41 }
  0x59   : > { %v1147_v44 = vor.u32 %v1146_v40, %v1143_v37  ;;  %v439_v40 = vld [vmem:[%s10239_s29] sm:$0xf] }
  0x5a   : > { %633 = vrot.lane.b32.xlu1 %v8611_v15, %s10176_s12 }
  0x5b   : > { %631 = vrot.lane.b32.xlu0 %v10343_v4, %s10176_s12  ;;  %v10458_v4 = vor.u32 %v1068_v58, %v1065_v57  ;;  %v1157_v46 = vsel %vm14535_vm1, %v1147_v44, %v10501_v45  ;;  %v1083_v57 = vrot.slane %v1081_v55, 4  ;;  %v1086_v58 = vrot.slane %v1084_v56, 5 }
  0x5d   : > { %v1070_v3 = vsel %vm14535_vm1, %v1061_v1, %v10458_v4  ;;  %v1079_v15 = vsel %vm14535_vm1, %v10458_v4, %v10467_v20  ;;  %v10533_v60 = vor.u32 %v1086_v58, %v1083_v57 }
  0x5e   : > { %653 = vrot.lane.b32.xlu1 %v643_v50, %s10177_s21  ;;  %v1183_v50 = vrot.slane %v10478_v10, 5 }
  0x5f   : > { %651 = vrot.lane.b32.xlu0 %v644_v59, %s10177_s21 }
  0x60   : > { %v1184_v54 = vsel %vm14536_vm0, %v1181_v48, %v1183_v50 }
  0x62   : > { %670 = vrot.lane.b32.xlu1 %v661_v62, %s10178_s28 }
  0x63   : > { %668 = vrot.lane.b32.xlu0 %v659_v8, %s10178_s28  ;;  %v8637_v8 = vld [vmem:[%s10239_s29 + $0x54] sm:$0xf] }
  0x64   : > { %v8649_v13 = vcombine.low %v8637_v8, %v8637_v8 }
  0x66   : > { %1091 = vrot.lane.b32.xlu1 %v1070_v3, %s10174_s10 }
  0x67   : > { %1089 = vrot.lane.b32.xlu0 %v1061_v1, %s10174_s10  ;;  %v1088_v1 = vsel %vm14535_vm1, %v10467_v20, %v10533_v60  ;;  %v1109_v20 = vrot.slane %v8649_v13, 5 }
  0x6a   : > { %1111 = vrot.lane.b32.xlu1 %v1102_v22, %s10172_s8  ;;  %v8650_v22 = vcombine.low %v10512_v49, %v8637_v8 }
  0x6b   : > { %1093 = vrot.lane.b32.xlu0 %v1079_v15, %s10174_s10 }
  0x6c   : > { %v1159_v27 = vshrl.u32 %v8650_v22, 16  ;;  %v1162_v28 = vshll.u32 %v8650_v22, 16  ;;  %v1185_v42 = vrot.slane %v8650_v22, 5 }
  0x6e   : > { %1115 = vrot.lane.b32.xlu1 %v1106_v26, %s10172_s8  ;;  %v1161_v32 = vrot.slane %v1159_v27, 4  ;;  %v1164_v33 = vrot.slane %v1162_v28, 5 }
  0x6f   : > { %1113 = vrot.lane.b32.xlu0 %v1104_v34, %s10172_s8  ;;  %v8638_v34 = vld [vmem:[%s10239_s29 + $0x58] sm:$0xf] }
  0x70   : > { %v1165_v36 = vor.u32 %v1164_v33, %v1161_v32  ;;  %v8652_v37 = vcombine.low %v8637_v8, %v8638_v34 }
  0x72   : > { %1123 = vrot.lane.b32.xlu1 %v10432_v39, %s10171_s30  ;;  %v1148_v39 = vsel %vm14535_vm1, %v1139_v43, %v1147_v44  ;;  %v8600_v44 = vcombine.low %v439_v40, %v10244_v2  ;;  %v1186_v2 = vsel %vm14536_vm0, %v1183_v50, %v1185_v42 }
  0x73   : > { %1121 = vrot.lane.b32.xlu0 %v10430_v38, %s10171_s30  ;;  %v1182_v38 = vsel %vm14536_vm0, %v1180_v47, %v1181_v48  ;;  %v1211_v48 = vshrl.u32 %v8652_v37, 16 }
  0x76   : > { %1167 = vrot.lane.b32.xlu1 %v1139_v43, %s10173_s9 }
  0x77   : > { %1125 = vrot.lane.b32.xlu0 %v10446_v51, %s10171_s30  ;;  %v8651_v51 = vcombine.low %v8638_v34, %v8638_v34 }
  0x79   : > { %v1187_v43 = vrot.slane %v8651_v51, 5 }
  0x7a   : > { %1171 = vrot.lane.b32.xlu1 %v1157_v46, %s10173_s9 }
  0x7b   : > { %1169 = vrot.lane.b32.xlu0 %v1148_v39, %s10173_s9  ;;  %v1214_v39 = vshll.u32 %v8652_v37, 16 }
  0x7d   : > { %v1216_v56 = vrot.slane %v1214_v39, 5 }
  0x7e   : > { %1191 = vrot.lane.b32.xlu1 %v1182_v38, %s10175_s11 }
  0x7f   : > { %1189 = vrot.lane.b32.xlu0 %v1180_v47, %s10175_s11  ;;  %v1166_v47 = vsel %vm14535_vm1, %v10501_v45, %v1165_v36  ;;  %v1213_v45 = vrot.slane %v1211_v48, 4 }
  0x82   : > { %1199 = vrot.lane.b32.xlu1 %v10469_v21, %s10176_s12 }
  0x83   : > { %1193 = vrot.lane.b32.xlu0 %v1184_v54, %s10175_s11 }
  0x86   : > { %1203 = vrot.lane.b32.xlu1 %v10478_v10, %s10176_s12 }
  0x87   : > { %1201 = vrot.lane.b32.xlu0 %v10476_v25, %s10176_s12 }
  0x88   : > { %v10531_v59 = vpop.permute.xlu1 %549 }
  0x89   : > { %v10535_v61 = vpop.permute.xlu0 %547 }
  0x8a   : > { %1221 = vrot.lane.b32.xlu1 %v1079_v15, %s10177_s21 }
  0x8b   : > { %1219 = vrot.lane.b32.xlu0 %v10458_v4, %s10177_s21 }
  0x8c   : > { %v538_v62 = vpop.permute.xlu1 %537 }
  0x8d   : > { %v10544_v9 = vpop.permute.xlu0 %551 }
  0x8e   : > { %1236 = vrot.lane.b32.xlu1 %v1103_v19, %s10178_s28  ;;  %v1108_v19 = vsel %vm14536_vm0, %v1105_v24, %v10550_v14 }
  0x8f   : > { %1223 = vrot.lane.b32.xlu0 %v1088_v1, %s10177_s21 }
  0x90   : > { %v10548_v3 = vpop.permute.xlu1 %541 }
  0x91   : > { %v10553_v4 = vpop.permute.xlu0 %539 }
  0x92   : > { %1095 = vrot.lane.b32.xlu1 %v1088_v1, %s10174_s10  ;;  %v9972_v1 = vld [vmem:[%s10239_s29 + $0x5c] ss:$0 sps:$4 sm:$0xff]  }
  0x93   : > { %1238 = vrot.lane.b32.xlu0 %v1106_v26, %s10178_s28  ;;  %v1110_v26 = vsel %vm14536_vm0, %v10550_v14, %v1109_v20  ;;  %v1234_v27 = vrot.slane %v9972_v1, 5 }
  0x94   : > { %v10557_v15 = vpop.permute.xlu1 %593 }
  0x95   : > { %v515_v29 = vpop.permute.xlu0 %514 }
  0x96   : > { %1097 = vrot.lane.b32.xlu1 %v10533_v60, %s10174_s10  ;;  %v675_v54 = vsel %vm14546_vm3, %v8600_v44, %v515_v29 }
  0x97   : > { %1240 = vrot.lane.b32.xlu0 %v1108_v19, %s10178_s28  ;;  %v686_v58 = vsel %vm342_vm4, %v675_v54, %v538_v62  ;;  %v1232_v62 = vrot.slane %v8652_v37, 5 }
  0x98   : > { %v519_v31 = vpop.permute.xlu1 %518  ;;  %v697_v50 = vsel %vm14545_vm5, %v686_v58, %v10535_v61 }
  0x99   : > { %v517_v35 = vpop.permute.xlu0 %516  ;;  %v679_v28 = vsel %vm14546_vm3, %v10258_v11, %v519_v31  ;;  %v708_v61 = vsel %vm706_vm6, %v697_v50, %v10557_v15  ;;  %v1233_v34 = vsel %vm14536_vm0, %v10550_v14, %v1232_v62 }
  0x9a   : > { %1119 = vrot.lane.b32.xlu1 %v1110_v26, %s10172_s8  ;;  %v677_v20 = vsel %vm14546_vm3, %v10249_v7, %v517_v35  ;;  %v690_v11 = vsel %vm342_vm4, %v679_v28, %v10548_v3  ;;  %v281_v28 = vld [vmem:[%s14469_s0 + $0x8] sm:$0xff] }
  0x9b   : > { %1117 = vrot.lane.b32.xlu0 %v1108_v19, %s10172_s8  ;;  %v688_v29 = vsel %vm342_vm4, %v677_v20, %v10553_v4  ;;  %v701_v3 = vsel %vm14545_vm5, %v690_v11, %v10544_v9  ;;  %v282_v11 = vld [vmem:[%s14469_s0 + $0x10] sm:$0xff] }
  0x9c   : > { %v10571_v24 = vpop.permute.xlu1 %597  ;;  %v699_v4 = vsel %vm14545_vm5, %v688_v29, %v10531_v59  ;;  %v280_v29 = vld [vmem:[%s14469_s0] sm:$0xff] }
  0x9d   : > { %v596_v41 = vpop.permute.xlu0 %595  ;;  %v712_v14 = vsel %vm706_vm6, %v701_v3, %v10571_v24 }
  0x9e   : > { %1129 = vrot.lane.b32.xlu1 %v8649_v13, %s10171_s30  ;;  %v1217_v13 = vor.u32 %v1216_v56, %v1213_v45  ;;  %v710_v59 = vsel %vm706_vm6, %v699_v4, %v596_v41  ;;  %v283_v4 = vld [vmem:[%s14469_s0 + $0x18] sm:$0xff] }
  0x9f   : > { %1127 = vrot.lane.b32.xlu0 %v8648_v52, %s10171_s30  ;;  %v1188_v52 = vsel %vm14536_vm0, %v1185_v42, %v1187_v43 }
  0xa0   : > { %v618_v46 = vpop.permute.xlu1 %617  ;;  %v1218_v26 = vsel %vm14535_vm1, %v10533_v60, %v1217_v13  ;;  %v1235_v60 = vsel %vm14536_vm0, %v1232_v62, %v1234_v27 }
  0xa1   : > { %v616_v38 = vpop.permute.xlu0 %615 }
  0xa2   : > { %1175 = vrot.lane.b32.xlu1 %v1165_v36, %s10173_s9  ;;  %v721_v36 = vsel %vm14544_vm7, %v710_v59, %v618_v46 }
  0xa3   : > { %1173 = vrot.lane.b32.xlu0 %v1166_v47, %s10173_s9 }
  0xa4   : > { %v626_v55 = vpop.permute.xlu1 %625 }
  0xa5   : > { %v620_v57 = vpop.permute.xlu0 %619 }
  0xa6   : > { %1197 = vrot.lane.b32.xlu1 %v1188_v52, %s10175_s11  ;;  %v723_v41 = vsel %vm14544_vm7, %v712_v14, %v620_v57 }
  0xa7   : > { %1195 = vrot.lane.b32.xlu0 %v1186_v2, %s10175_s11 }
  0xa8   : > { %v630_v8 = vpop.permute.xlu1 %629 }
  0xa9   : > { %v628_v19 = vpop.permute.xlu0 %627  ;;  %v734_v52 = vsel %vm728_vm8, %v723_v41, %v630_v8 }
  0xaa   : > { %1207 = vrot.lane.b32.xlu1 %v8651_v51, %s10176_s12  ;;  %v732_v42 = vsel %vm728_vm8, %v721_v36, %v628_v19 }
  0xab   : > { %1205 = vrot.lane.b32.xlu0 %v8650_v22, %s10176_s12  ;;  %v719_v22 = vsel %vm14544_vm7, %v708_v61, %v616_v38  ;;  %v10180_v61 = vmov 0.0  }
  0xac   : > { %v648_v7 = vpop.permute.xlu1 %647  ;;  %v730_v31 = vsel %vm728_vm8, %v719_v22, %v626_v55  ;;  %353 = vst.msk [vmem:[#allocation3 + $0x50] sm:$0xff] %vm342_vm4, %v10180_v61  ;;  %343 = vst.msk [vmem:[#allocation3] sm:$0xff] %vm342_vm4, %v10180_v61 }
  0xad   : > { %v646_v32 = vpop.permute.xlu0 %645  ;;  %v743_v44 = vsel %vm14542_vm9, %v732_v42, %v648_v7  ;;  %344 = vst.msk [vmem:[#allocation3 + $0x8] sm:$0xff] %vm342_vm4, %v10180_v61  ;;  %345 = vst.msk [vmem:[#allocation3 + $0x10] sm:$0xff] %vm342_vm4, %v10180_v61 }
  0xae   : > { %1227 = vrot.lane.b32.xlu1 %v1217_v13, %s10177_s21  ;;  %v741_v15 = vsel %vm14542_vm9, %v730_v31, %v646_v32  ;;  %346 = vst.msk [vmem:[#allocation3 + $0x18] sm:$0xff] %vm342_vm4, %v10180_v61  ;;  %347 = vst.msk [vmem:[#allocation3 + $0x20] sm:$0xff] %vm342_vm4, %v10180_v61 }
  0xaf   : > { %1225 = vrot.lane.b32.xlu0 %v1218_v26, %s10177_s21  ;;  %v10179_v26 = vmov 0   ;;  %348 = vst.msk [vmem:[#allocation3 + $0x28] sm:$0xff] %vm342_vm4, %v10180_v61  ;;  %349 = vst.msk [vmem:[#allocation3 + $0x30] sm:$0xff] %vm342_vm4, %v10180_v61 }
  0xb0   : > { %v663_v33 = vpop.permute.xlu1 %662  ;;  %9947 = vset.pattern.permute.xlu1 %v10179_v26  ;;  %391 = vst.msk [vmem:[#allocation2] sm:$0xff] %vm342_vm4, %v10179_v26  ;;  %392 = vst.msk [vmem:[#allocation2 + $0x28] sm:$0xff] %vm342_vm4, %v10179_v26  ;;  %9946 = vset.pattern.permute.xlu0 %v10179_v26 }
  0xb1   : > { %v752_v35 = vsel %vm750_vm10, %v741_v15, %v663_v33  ;;  %v650_v51 = vpop.permute.xlu0 %649  ;;  %350 = vst.msk [vmem:[#allocation3 + $0x38] sm:$0xff] %vm342_vm4, %v10180_v61  ;;  %351 = vst.msk [vmem:[#allocation3 + $0x40] sm:$0xff] %vm342_vm4, %v10180_v61  ;;  %v284_v15 = vld [vmem:[%s14469_s0 + $0x20] sm:$0xff]  ;;  %v285_v33 = vld [vmem:[%s14469_s0 + $0x28] sm:$0xff] }
  0xb2   : > { %1244 = vrot.lane.b32.xlu1 %v1235_v60, %s10178_s28  ;;  %v762_v37 = vshrl.u32 %v752_v35, 16  ;;  %v765_v40 = vshll.u32 %v752_v35, 16  ;;  %v745_v55 = vsel %vm14542_vm9, %v734_v52, %v650_v51  ;;  %352 = vst.msk [vmem:[#allocation3 + $0x48] sm:$0xff] %vm342_vm4, %v10180_v61  ;;  %354 = vst.msk [vmem:[#allocation3 + $0x58] sm:$0xff] %vm342_vm4, %v10180_v61 }
  0xb3   : > { %1242 = vrot.lane.b32.xlu0 %v1233_v34, %s10178_s28  ;;  %355 = vst.msk [vmem:[#allocation3 + $0x60] sm:$0xff] %vm342_vm4, %v10180_v61  ;;  %356 = vst.msk [vmem:[#allocation3 + $0x68] sm:$0xff] %vm342_vm4, %v10180_v61 }
  0xb4   : > { %v10624_v43 = vpop.permute.xlu1 %520  ;;  %v764_v48 = vrot.slane %v762_v37, 3  ;;  %v767_v46 = vrot.slane %v765_v40, 4  ;;  %357 = vst.msk [vmem:[#allocation3 + $0x70] sm:$0xff] %vm342_vm4, %v10180_v61  ;;  %358 = vst.msk [vmem:[#allocation3 + $0x78] sm:$0xff] %vm342_vm4, %v10180_v61 }
  0xb5   : > { %v665_v9 = vpop.permute.xlu0 %664  ;;  %359 = vst.msk [vmem:[#allocation3 + $0x80] sm:$0xff] %vm342_vm4, %v10180_v61  ;;  %360 = vst.msk [vmem:[#allocation3 + $0x88] sm:$0xff] %vm342_vm4, %v10180_v61  ;;  %v681_v35 = vsel %vm14546_vm3, %v10267_v18, %v10624_v43 }
  0xb6   : > { %v754_v47 = vsel %vm750_vm10, %v743_v44, %v665_v9  ;;  %v768_v1 = vor.u32 %v767_v46, %v764_v48  ;;  %361 = vst.msk [vmem:[#allocation3 + $0x90] sm:$0xff] %vm342_vm4, %v10180_v61  ;;  %362 = vst.msk [vmem:[#allocation3 + $0x98] sm:$0xff] %vm342_vm4, %v10180_v61  ;;  %295 = vperm.xlu1 %9947, %v281_v28  }
  0xb7   : > { %v769_v39 = vshrl.u32 %v754_v47, 16  ;;  %v772_v38 = vshll.u32 %v754_v47, 16  ;;  %363 = vst.msk [vmem:[#allocation3 + $0xa0] sm:$0xff] %vm342_vm4, %v10180_v61  ;;  %364 = vst.msk [vmem:[#allocation3 + $0xa8] sm:$0xff] %vm342_vm4, %v10180_v61  ;;  %290 = vperm.xlu0 %9946, %v280_v29  }
  0xb8   : > { %v10632_v54 = vpop.permute.xlu1 %522  ;;  %365 = vst.msk [vmem:[#allocation3 + $0xb0] sm:$0xff] %vm342_vm4, %v10180_v61  ;;  %366 = vst.msk [vmem:[#allocation3 + $0xb8] sm:$0xff] %vm342_vm4, %v10180_v61 }
  0xb9   : > { %v771_v2 = vrot.slane %v769_v39, 3  ;;  %v774_v45 = vrot.slane %v772_v38, 4  ;;  %v667_v24 = vpop.permute.xlu0 %666  ;;  %367 = vst.msk [vmem:[#allocation4] sm:$0xff] %vm342_vm4, %v10180_v61  ;;  %368 = vst.msk [vmem:[#allocation4 + $0x8] sm:$0xff] %vm342_vm4, %v10180_v61 }
  0xba   : > { %v756_v56 = vsel %vm750_vm10, %v745_v55, %v667_v24  ;;  %369 = vst.msk [vmem:[#allocation4 + $0x10] sm:$0xff] %vm342_vm4, %v10180_v61  ;;  %370 = vst.msk [vmem:[#allocation4 + $0x18] sm:$0xff] %vm342_vm4, %v10180_v61  ;;  %300 = vperm.xlu1 %9947, %v282_v11  }
  0xbb   : > { %v777_v57 = vshrl.u32 %v756_v56, 16  ;;  %v780_v58 = vshll.u32 %v756_v56, 16  ;;  %v10636_v13 = vor.u32 %v774_v45, %v771_v2  ;;  %371 = vst.msk [vmem:[#allocation4 + $0x20] sm:$0xff] %vm342_vm4, %v10180_v61  ;;  %372 = vst.msk [vmem:[#allocation4 + $0x28] sm:$0xff] %vm342_vm4, %v10180_v61  ;;  %305 = vperm.xlu0 %9946, %v283_v4   ;;  %v8628_v4 = vld [vmem:[%s10239_s29 + $0x30] sm:$0xf] }
  0xbc   : > { %v10638_v20 = vpop.permute.xlu1 %545  ;;  %373 = vst.msk [vmem:[#allocation4 + $0x30] sm:$0xff] %vm342_vm4, %v10180_v61  ;;  %374 = vst.msk [vmem:[#allocation4 + $0x38] sm:$0xff] %vm342_vm4, %v10180_v61 }
  0xbd   : > { %v779_v19 = vrot.slane %v777_v57, 3  ;;  %v782_v8 = vrot.slane %v780_v58, 4  ;;  %v10640_v50 = vpop.permute.xlu0 %543  ;;  %v776_v62 = vsel %vm761_vm11, %v768_v1, %v10636_v13  ;;  %375 = vst.msk [vmem:[#allocation4 + $0x40] sm:$0xff] %vm342_vm4, %v10180_v61  ;;  %376 = vst.msk [vmem:[#allocation4 + $0x48] sm:$0xff] %vm342_vm4, %v10180_v61 }
  0xbe   : > { %9318 = vmatprep.mubr.msk.bf16.mxu0 %vm14543_vm12, %v776_v62  ;;  %9332 = vmatprep.mubr.msk.bf16.mxu1 %vm14543_vm12, %v776_v62  ;;  %377 = vst.msk [vmem:[#allocation4 + $0x50] sm:$0xff] %vm342_vm4, %v10180_v61  ;;  %378 = vst.msk [vmem:[#allocation4 + $0x58] sm:$0xff] %vm342_vm4, %v10180_v61 }
  0xbf   : > { %v10646_v27 = vor.u32 %v782_v8, %v779_v19  ;;  %379 = vst.msk [vmem:[#allocation4 + $0x60] sm:$0xff] %vm342_vm4, %v10180_v61  ;;  %380 = vst.msk [vmem:[#allocation4 + $0x68] sm:$0xff] %vm342_vm4, %v10180_v61  ;;  %310 = vperm.xlu1 %9947, %v284_v15   ;;  %315 = vperm.xlu0 %9946, %v285_v33   ;;  %v8640_v15 = vcombine.low %v8628_v4, %v10419_v30 }
  0xc0   : > { %v10654_v7 = vpop.permute.xlu1 %555  ;;  %381 = vst.msk [vmem:[#allocation4 + $0x70] sm:$0xff] %vm342_vm4, %v10180_v61  ;;  %382 = vst.msk [vmem:[#allocation4 + $0x78] sm:$0xff] %vm342_vm4, %v10180_v61 }
  0xc1   : > { %383 = vst.msk [vmem:[#allocation4 + $0x80] sm:$0xff] %vm342_vm4, %v10180_v61  ;;  %384 = vst.msk [vmem:[#allocation4 + $0x88] sm:$0xff] %vm342_vm4, %v10180_v61  ;;  %v554_v32 = vpop.permute.xlu0 %553  ;;  %v784_v22 = vsel %vm761_vm11, %v10636_v13, %v10646_v27 }
  0xc2   : > { %385 = vst.msk [vmem:[#allocation4 + $0x90] sm:$0xff] %vm342_vm4, %v10180_v61  ;;  %386 = vst.msk [vmem:[#allocation4 + $0x98] sm:$0xff] %vm342_vm4, %v10180_v61  ;;  %9319 = vmatmul.mubr.msk.bf16.vlgmr.msra.gmra.mrb[0].mxu0 %vm14543_vm12, %v784_v22  ;;  %9333 = vmatmul.mubr.msk.bf16.vlgmr.msra.gmra.mrb[0].mxu1 %vm14543_vm12, %v784_v22 }
  0xc3   : > { %387 = vst.msk [vmem:[#allocation4 + $0xa0] sm:$0xff] %vm342_vm4, %v10180_v61  ;;  %388 = vst.msk [vmem:[#allocation4 + $0xa8] sm:$0xff] %vm342_vm4, %v10180_v61  ;;  %9341 = vmatpush3.bf16.msra.mxu0 %v10326_v63  ;;  %9355 = vmatpush3.bf16.msra.mxu1 %v10331_v0  ;;  %v10736_v0 = vld [vmem:[%s14471_s2 + $0x28] sm:$0xff]  }
  0xc4   : > { %389 = vst.msk [vmem:[#allocation4 + $0xb0] sm:$0xff] %vm342_vm4, %v10180_v61  ;;  %390 = vst.msk [vmem:[#allocation4 + $0xb8] sm:$0xff] %vm342_vm4, %v10180_v61  ;;  %v602_v31 = vpop.permute.xlu1 %601  ;;  %9342 = vmatprep.subr.bf16.mxu0 %v10350_v5  ;;  %9356 = vmatprep.subr.bf16.mxu1 %v10355_v6 }
  0xc5   : > { %v600_v60 = vpop.permute.xlu0 %599 }
  0xc7   : > { %9343 = vmatpush3.bf16.msra.mxu0 %v10350_v5  ;;  %9357 = vmatpush3.bf16.msra.mxu1 %v10355_v6  ;;  %v8604_v5 = vcombine.low %v10302_v53, %v10302_v53  ;;  %v692_v53 = vsel %vm342_vm4, %v681_v35, %v10640_v50 }
  0xc8   : > { %v624_v63 = vpop.permute.xlu1 %623  ;;  %9886 = vmatprep.subr.msk.bf16.mxu0 %vm829_vm2, %v10370_v16  ;;  %9887 = vmatprep.subr.msk.bf16.mxu1 %vm829_vm2, %v10375_v17  ;;  %v703_v36 = vsel %vm14545_vm5, %v692_v53, %v554_v32 }
  0xc9   : > { %v622_v34 = vpop.permute.xlu0 %621  ;;  %v684_v17 = vsel %vm14546_vm3, %v8604_v5, %v10632_v54  ;;  %v714_v42 = vsel %vm706_vm6, %v703_v36, %v600_v60 }
  0xca   : > { %v694_v51 = vsel %vm342_vm4, %v684_v17, %v10638_v20  ;;  %v725_v18 = vsel %vm14544_vm7, %v714_v42, %v622_v34 }
  0xcb   : > { %9345 = vmatpush3.bf16.msra.mxu0 %v10390_v12  ;;  %9359 = vmatpush3.bf16.msra.mxu1 %v10394_v23  ;;  %v705_v3 = vsel %vm14545_vm5, %v694_v51, %v10654_v7 }
  0xcc   : > { %v634_v6 = vpop.permute.xlu1 %633  ;;  %9368 = vmatprep.subr.bf16.mxu0 %v10736_v0  ;;  %v716_v37 = vsel %vm706_vm6, %v705_v3, %v602_v31 }
  0xcd   : > { %v632_v16 = vpop.permute.xlu0 %631  ;;  %v727_v14 = vsel %vm14544_vm7, %v716_v37, %v624_v63 }
  0xce   : > { %v738_v43 = vsel %vm728_vm8, %v727_v14, %v634_v6  ;;  %v736_v44 = vsel %vm728_vm8, %v725_v18, %v632_v16 }
  0xd0   : > { %v654_v59 = vpop.permute.xlu1 %653 }
  0xd1   : > { %v652_v40 = vpop.permute.xlu0 %651  ;;  %v749_v9 = vsel %vm14542_vm9, %v738_v43, %v654_v59 }
  0xd2   : > { %v747_v47 = vsel %vm14542_vm9, %v736_v44, %v652_v40 }
  0xd4   : > { %v671_v41 = vpop.permute.xlu1 %670 }
  0xd5   : > { %v760_v48 = vsel %vm750_vm10, %v749_v9, %v671_v41  ;;  %v669_v46 = vpop.permute.xlu0 %668 }
  0xd6   : > { %v793_v39 = vshrl.u32 %v760_v48, 16  ;;  %v796_v38 = vshll.u32 %v760_v48, 16  ;;  %v758_v52 = vsel %vm750_vm10, %v747_v47, %v669_v46 }
  0xd7   : > { %v785_v54 = vshrl.u32 %v758_v52, 16  ;;  %v788_v55 = vshll.u32 %v758_v52, 16 }
  0xd8   : > { %v795_v2 = vrot.slane %v793_v39, 3  ;;  %v798_v45 = vrot.slane %v796_v38, 4  ;;  %v1092_v24 = vpop.permute.xlu1 %1091 }
  0xd9   : > { %v787_v56 = vrot.slane %v785_v54, 3  ;;  %v790_v57 = vrot.slane %v788_v55, 4  ;;  %v1090_v58 = vpop.permute.xlu0 %1089  ;;  %v1250_v53 = vsel %vm14546_vm3, %v10469_v21, %v1092_v24 }
  0xda   : > { %v799_v1 = vor.u32 %v798_v45, %v795_v2  ;;  %v1248_v34 = vsel %vm14546_vm3, %v8640_v15, %v1090_v58 }
  0xdb   : > { %v791_v13 = vor.u32 %v790_v57, %v787_v56 }
  0xdc   : > { %v1112_v20 = vpop.permute.xlu1 %1111 }
  0xdd   : > { %v1094_v19 = vpop.permute.xlu0 %1093  ;;  %v792_v8 = vsel %vm761_vm11, %v10646_v27, %v791_v13  ;;  %v800_v50 = vsel %vm761_vm11, %v791_v13, %v799_v1  ;;  %v1259_v5 = vsel %vm342_vm4, %v1248_v34, %v1112_v20 }
  0xde   : > { %9322 = vmatprep.mubr.msk.bf16.mxu0 %vm14543_vm12, %v792_v8  ;;  %9336 = vmatprep.mubr.msk.bf16.mxu1 %vm14543_vm12, %v792_v8  ;;  %v1252_v14 = vsel %vm14546_vm3, %v10476_v25, %v1094_v19 }
  0xdf   : > { %9323 = vmatmul.mubr.msk.bf16.gmra.mrb[4].mxu0 %vm14543_vm12, %v800_v50  ;;  %9337 = vmatmul.mubr.msk.bf16.gmra.mrb[4].mxu1 %vm14543_vm12, %v800_v50 }
  0xe0   : > { %v1116_v62 = vpop.permute.xlu1 %1115 }
  0xe1   : > { %v1114_v28 = vpop.permute.xlu0 %1113  ;;  %v1263_v43 = vsel %vm342_vm4, %v1252_v14, %v1116_v62 }
  0xe2   : > { %v1261_v30 = vsel %vm342_vm4, %v1250_v53, %v1114_v28 }
  0xe4   : > { %v1124_v29 = vpop.permute.xlu1 %1123 }
  0xe5   : > { %v1122_v7 = vpop.permute.xlu0 %1121  ;;  %v1271_v37 = vsel %vm14545_vm5, %v1261_v30, %v1124_v29 }
  0xe6   : > { %v1269_v6 = vsel %vm14545_vm5, %v1259_v5, %v1122_v7 }
  0xe8   : > { %v1168_v26 = vpop.permute.xlu1 %1167 }
  0xe9   : > { %v1126_v61 = vpop.permute.xlu0 %1125  ;;  %v1279_v17 = vsel %vm706_vm6, %v1269_v6, %v1168_v26  ;;  %v8644_v6 = vcombine.low %v10512_v49, %v10512_v49 }
  0xea   : > { %v1273_v41 = vsel %vm14545_vm5, %v1263_v43, %v1126_v61 }
  0xec   : > { %v1172_v32 = vpop.permute.xlu1 %1171 }
  0xed   : > { %v1170_v22 = vpop.permute.xlu0 %1169  ;;  %v1283_v46 = vsel %vm706_vm6, %v1273_v41, %v1172_v32 }
  0xee   : > { %v1281_v18 = vsel %vm706_vm6, %v1271_v37, %v1170_v22 }
  0xf0   : > { %v1192_v27 = vpop.permute.xlu1 %1191 }
  0xf1   : > { %v1190_v11 = vpop.permute.xlu0 %1189  ;;  %v1291_v21 = vsel %vm14544_vm7, %v1281_v18, %v1192_v27  ;;  %v9983_v27 = vld [vmem:[%s14471_s2 + $0x30] sm:$0xff]  }
  0xf2   : > { %v1289_v51 = vsel %vm14544_vm7, %v1279_v17, %v1190_v11 }
  0xf4   : > { %v1200_v31 = vpop.permute.xlu1 %1199 }
  0xf5   : > { %v1194_v60 = vpop.permute.xlu0 %1193  ;;  %v1299_v3 = vsel %vm728_vm8, %v1289_v51, %v1200_v31 }
  0xf6   : > { %v1293_v25 = vsel %vm14544_vm7, %v1283_v46, %v1194_v60  ;;  %v9984_v60 = vld [vmem:[%s14471_s2 + $0x38] ss:$0 sps:$4 sm:$0x33]  }
  0xf8   : > { %v1204_v33 = vpop.permute.xlu1 %1203 }
  0xf9   : > { %v1202_v63 = vpop.permute.xlu0 %1201  ;;  %v1303_v24 = vsel %vm728_vm8, %v1293_v25, %v1204_v33  ;;  %v286_v33 = vld [vmem:[%s14469_s0 + $0x30] sm:$0xff] }
  0xfa   : > { %v1301_v47 = vsel %vm728_vm8, %v1291_v21, %v1202_v63  ;;  %v287_v63 = vld [vmem:[%s14469_s0 + $0x38] sm:$0xff]  ;;  %320 = vperm.xlu1 %9947, %v286_v33  }
  0xfb   : > { %325 = vperm.xlu0 %9946, %v287_v63  }
  0xfc   : > { %v1222_v16 = vpop.permute.xlu1 %1221 }
  0xfd   : > { %v1220_v35 = vpop.permute.xlu0 %1219  ;;  %v1311_v39 = vsel %vm14542_vm9, %v1301_v47, %v1222_v16 }
  0xfe   : > { %v1309_v59 = vsel %vm14542_vm9, %v1299_v3, %v1220_v35 }
 0x100   : > { %v1237_v36 = vpop.permute.xlu1 %1236 }
 0x101   : > { %v1319_v40 = vsel %vm750_vm10, %v1309_v59, %v1237_v36  ;;  %v1224_v42 = vpop.permute.xlu0 %1223 }
 0x102   : > { %v1328_v44 = vshrl.u32 %v1319_v40, 16  ;;  %v1331_v9 = vshll.u32 %v1319_v40, 16  ;;  %v1313_v57 = vsel %vm14542_vm9, %v1303_v24, %v1224_v42 }
 0x104   : > { %v1096_v48 = vpop.permute.xlu1 %1095  ;;  %v1330_v54 = vrot.slane %v1328_v44, 3  ;;  %v1333_v55 = vrot.slane %v1331_v9, 4 }
 0x105   : > { %v1239_v38 = vpop.permute.xlu0 %1238  ;;  %v1254_v51 = vsel %vm14546_vm3, %v10478_v10, %v1096_v48 }
 0x106   : > { %v1321_v52 = vsel %vm750_vm10, %v1311_v39, %v1239_v38  ;;  %v1334_v19 = vor.u32 %v1333_v55, %v1330_v54 }
 0x107   : > { %v1335_v2 = vshrl.u32 %v1321_v52, 16  ;;  %v1338_v45 = vshll.u32 %v1321_v52, 16 }
 0x108   : > { %v1098_v56 = vpop.permute.xlu1 %1097 }
 0x109   : > { %v1337_v58 = vrot.slane %v1335_v2, 3  ;;  %v1340_v1 = vrot.slane %v1338_v45, 4  ;;  %v1241_v13 = vpop.permute.xlu0 %1240  ;;  %v1257_v35 = vsel %vm14546_vm3, %v8644_v6, %v1098_v56 }
 0x10a   : > { %v1323_v20 = vsel %vm750_vm10, %v1313_v57, %v1241_v13  ;;  %v10857_v57 = vld [vmem:[#allocation2 + $0x28] sm:$0xff] }
 0x10b   : > { %v1341_v8 = vor.u32 %v1340_v1, %v1337_v58  ;;  %v1343_v50 = vshrl.u32 %v1323_v20, 16  ;;  %v1346_v62 = vshll.u32 %v1323_v20, 16  ;;  %v8688_v58 = vld [vmem:[%s10239_s29 + $0x64] sm:$0xf]  ;;  %1843 = vrot.lane.b32.xlu0 %v10857_v57, %s10181_s26  ;;  %v1846_v1 = vshll.u32 %v10857_v57, 16 }
 0x10c   : > { %v1120_v28 = vpop.permute.xlu1 %1119  ;;  %v1850_v13 = vshrl.u32 %v10857_v57, 16  ;;  %v8689_v20 = vld [vmem:[%s10239_s29 + $0x68] sm:$0xf]  ;;  %v1863_v33 = vrot.slane %v10857_v57, 1 }
 0x10d   : > { %v1345_v29 = vrot.slane %v1343_v50, 3  ;;  %v1348_v7 = vrot.slane %v1346_v62, 4  ;;  %v1118_v26 = vpop.permute.xlu0 %1117  ;;  %v10801_v61 = vsel %vm761_vm11, %v1334_v19, %v1341_v8  ;;  %v1267_v53 = vsel %vm342_vm4, %v1257_v35, %v1120_v28  ;;  %v8690_v19 = vld [vmem:[%s10239_s29 + $0x6c] sm:$0xf]  ;;  %v8691_v50 = vld [vmem:[%s10239_s29 + $0x70] sm:$0xf] }
 0x10e   : > { %9346 = vmatprep.mubr.msk.bf16.mxu0 %vm14543_vm12, %v10801_v61  ;;  %9360 = vmatprep.mubr.msk.bf16.mxu1 %vm14543_vm12, %v10801_v61  ;;  %v1265_v3 = vsel %vm342_vm4, %v1254_v51, %v1118_v26  ;;  %v8692_v62 = vld [vmem:[%s10239_s29 + $0x74] sm:$0xf]  ;;  %v10868_v28 = vrot.slane %v1846_v1, 1  ;;  %v10879_v35 = vcombine.low %v8689_v20, %v8690_v19 }
 0x10f   : > { %v1349_v32 = vor.u32 %v1348_v7, %v1345_v29  ;;  %v8693_v29 = vld [vmem:[%s10239_s29 + $0x78] sm:$0xf]  ;;  %v8705_v7 = vcombine.low %v8690_v19, %v8691_v50 }
 0x110   : > { %v1130_v22 = vpop.permute.xlu1 %1129 }
 0x111   : > { %v1128_v11 = vpop.permute.xlu0 %1127  ;;  %v1350_v4 = vsel %vm761_vm11, %v1341_v8, %v1349_v32  ;;  %v1277_v30 = vsel %vm14545_vm5, %v1267_v53, %v1130_v22  ;;  %v8704_v8 = vcombine.low %v8688_v58, %v8689_v20  ;;  %v1852_v22 = vor.u32 %v1850_v13, %v10868_v28  ;;  %v10933_v13 = vld [vmem:[%s10239_s29 + $0x80] sm:$0xf] }
 0x112   : > { %9347 = vmatmul.mubr.msk.bf16.vlgmr.msra.gmra.mrb[8].mxu0 %vm14543_vm12, %v1350_v4  ;;  %9361 = vmatmul.mubr.msk.bf16.vlgmr.msra.gmra.mrb[8].mxu1 %vm14543_vm12, %v1350_v4  ;;  %v1275_v36 = vsel %vm14545_vm5, %v1265_v3, %v1128_v11  ;;  %v2287_v11 = vshll.u32 %v8705_v7, 16  ;;  %v10885_v53 = vcombine.low %v8691_v50, %v8692_v62 }
 0x113   : > { %9369 = vmatpush3.bf16.msra.mxu0 %v10736_v0  ;;  %v10825_v0 = vsel %vm829_vm2, %v9984_v60, 0  ;;  %v2276_v26 = vshrl.u32 %v8704_v8, 16  ;;  %1861 = vrot.lane.b32.xlu0 %v1852_v22, %s10182_s27  ;;  %v2323_v3 = vrot.slane %v8704_v8, 5  ;;  %v907_v22 = vld [vmem:[#allocation3] sm:$0xff] }
 0x114   : > { %v1176_v31 = vpop.permute.xlu1 %1175  ;;  %9370 = vmatprep.subr.bf16.mxu0 %v9983_v27  ;;  %14549 = vst [vmem:[#allocation7_spill] sm:$0xff] %v10825_v0 }
 0x115   : > { %v1174_v15 = vpop.permute.xlu0 %1173  ;;  %v1287_v49 = vsel %vm706_vm6, %v1277_v30, %v1176_v31  ;;  %v2324_v30 = vrot.slane %v8705_v7, 5 }
 0x116   : > { %v1285_v40 = vsel %vm706_vm6, %v1275_v36, %v1174_v15 }
 0x117   : > { %9371 = vmatpush3.bf16.msra.mxu0 %v9983_v27  ;;  %v2284_v27 = vshrl.u32 %v8705_v7, 16  ;;  %1873 = vrot.lane.b32.xlu0 %v1863_v33, %s10183_s13 }
 0x118   : > { %v1198_v34 = vpop.permute.xlu1 %1197  ;;  %9888 = vmatprep.subr.msk.bf16.mxu0 %vm829_vm2, %v9984_v60 }
 0x119   : > { %v1196_v5 = vpop.permute.xlu0 %1195  ;;  %v1297_v42 = vsel %vm14544_vm7, %v1287_v49, %v1198_v34  ;;  %v2286_v63 = vrot.slane %v2284_v27, 4  ;;  %v2289_v34 = vrot.slane %v2287_v11, 5  ;;  %v8694_v49 = vld [vmem:[%s10239_s29 + $0x7c] sm:$0xf] }
 0x11a   : > { %v1295_v14 = vsel %vm14544_vm7, %v1285_v40, %v1196_v5  ;;  %v2325_v40 = vsel %vm14536_vm0, %v2323_v3, %v2324_v30  ;;  %v8707_v20 = vcombine.low %v8694_v49, %v10933_v13 }
 0x11b   : > { %9373 = vmatpush3.bf16.msra.mxu0 %v10825_v0 }
 0x11c   : > { %v1208_v16 = vpop.permute.xlu1 %1207  ;;  %v2302_v19 = vshrl.u32 %v8707_v20, 16 }
 0x11d   : > { %v1206_v17 = vpop.permute.xlu0 %1205  ;;  %v1307_v10 = vsel %vm728_vm8, %v1297_v42, %v1208_v16  ;;  %v2357_v42 = vshll.u32 %v10879_v35, 16 }
 0x11e   : > { %v1305_v18 = vsel %vm728_vm8, %v1295_v14, %v1206_v17  ;;  %v2290_v17 = vor.u32 %v2289_v34, %v2286_v63  ;;  %v2362_v14 = vshrl.u32 %v10885_v53, 16  ;;  %v2304_v50 = vrot.slane %v2302_v19, 4  ;;  %v908_v63 = vld [vmem:[#allocation3 + $0x8] sm:$0xff] }
 0x120   : > { %v1228_v59 = vpop.permute.xlu1 %1227 }
 0x121   : > { %v1226_v37 = vpop.permute.xlu0 %1225  ;;  %v1317_v43 = vsel %vm14542_vm9, %v1307_v10, %v1228_v59  ;;  %v2365_v10 = vshll.u32 %v10885_v53, 16 }
 0x122   : > { %v1315_v44 = vsel %vm14542_vm9, %v1305_v18, %v1226_v37  ;;  %v2354_v37 = vshrl.u32 %v10879_v35, 16  ;;  %v10897_v18 = vcombine.low %v8693_v29, %v8694_v49 }
 0x124   : > { %v1245_v21 = vpop.permute.xlu1 %1244  ;;  %14550 = vst [vmem:[#allocation8_spill] sm:$0xff] %v10897_v18 }
 0x125   : > { %v1327_v9 = vsel %vm750_vm10, %v1317_v43, %v1245_v21  ;;  %v1243_v41 = vpop.permute.xlu0 %1242  ;;  %v2356_v21 = vrot.slane %v2354_v37, 4  ;;  %v913_v37 = vld [vmem:[#allocation3 + $0x30] sm:$0xff] }
 0x126   : > { %v1359_v47 = vshrl.u32 %v1327_v9, 16  ;;  %v1362_v48 = vshll.u32 %v1327_v9, 16  ;;  %v1325_v46 = vsel %vm750_vm10, %v1315_v44, %v1243_v41  ;;  %v2359_v44 = vrot.slane %v2357_v42, 5 }
 0x127   : > { %v1351_v39 = vshrl.u32 %v1325_v46, 16  ;;  %v1354_v38 = vshll.u32 %v1325_v46, 16  ;;  %v2364_v9 = vrot.slane %v2362_v14, 4  ;;  %v2367_v41 = vrot.slane %v2365_v10, 5  ;;  %v914_v10 = vld [vmem:[#allocation3 + $0x38] sm:$0xff] }
 0x128   : > { %v1361_v25 = vrot.slane %v1359_v47, 3  ;;  %v1364_v52 = vrot.slane %v1362_v48, 4  ;;  %v2371_v48 = vshrl.u32 %v10897_v18, 16  ;;  %v2374_v46 = vshll.u32 %v10897_v18, 16 }
 0x129   : > { %v1353_v54 = vrot.slane %v1351_v39, 3  ;;  %v1356_v55 = vrot.slane %v1354_v38, 4  ;;  %v2360_v39 = vor.u32 %v2359_v44, %v2356_v21  ;;  %v2368_v38 = vor.u32 %v2367_v41, %v2364_v9  ;;  %v912_v9 = vld [vmem:[#allocation3 + $0x28] sm:$0xff] }
 0x12a   : > { %v1365_v2 = vor.u32 %v1364_v52, %v1361_v25  ;;  %v2373_v25 = vrot.slane %v2371_v48, 4  ;;  %v2376_v52 = vrot.slane %v2374_v46, 5 }
 0x12b   : > { %v1357_v45 = vor.u32 %v1356_v55, %v1353_v54  ;;  %v2369_v54 = vsel %vm14535_vm1, %v2360_v39, %v2368_v38 }
 0x12c   : > { %v10911_v55 = vor.u32 %v2376_v52, %v2373_v25 }
 0x12d   : > { %v1358_v24 = vsel %vm761_vm11, %v1349_v32, %v1357_v45  ;;  %v1366_v56 = vsel %vm761_vm11, %v1357_v45, %v1365_v2  ;;  %v10871_v32 = vcombine.low %v8692_v62, %v8693_v29  ;;  %v2401_v2 = vrot.slane %v10879_v35, 5 }
 0x12e   : > { %9350 = vmatprep.mubr.msk.bf16.mxu0 %vm14543_vm12, %v1358_v24  ;;  %9364 = vmatprep.mubr.msk.bf16.mxu1 %vm14543_vm12, %v1358_v24  ;;  %v2402_v45 = vrot.slane %v10885_v53, 5 }
 0x12f   : > { %9351 = vmatmul.mubr.msk.bf16.gmra.mrb[12].mxu0 %vm14543_vm12, %v1366_v56  ;;  %9365 = vmatmul.mubr.msk.bf16.gmra.mrb[12].mxu1 %vm14543_vm12, %v1366_v56  ;;  %v2293_v60 = vshrl.u32 %v10871_v32, 16  ;;  %v2296_v15 = vshll.u32 %v10871_v32, 16  ;;  %v2326_v43 = vrot.slane %v10871_v32, 5 }
 0x130   : > { %9374 = vmatprep.mubr.msk.bf16.mxu0 %vm14543_vm12, %v10801_v61  ;;  %v2279_v61 = vshll.u32 %v8704_v8, 16  ;;  %v2403_v1 = vsel %vm14536_vm0, %v2401_v2, %v2402_v45 }
 0x131   : > { %v2295_v6 = vrot.slane %v2293_v60, 4  ;;  %v2298_v16 = vrot.slane %v2296_v15, 5  ;;  %v2327_v47 = vsel %vm14536_vm0, %v2324_v30, %v2326_v43 }
 0x132   : > { %v2281_v31 = vrot.slane %v2279_v61, 5 }
 0x133   : > { %v2299_v51 = vor.u32 %v2298_v16, %v2295_v6 }
 0x135   : > { %v2300_v59 = vsel %vm14535_vm1, %v2290_v17, %v2299_v51 }
 0x137   : > { %9375 = vmatmul.mubr.msk.bf16.vlgmr.msra.gmra.mrb[16].mxu0 %vm14543_vm12, %v1350_v4  ;;  %v2278_v4 = vrot.slane %v2276_v26, 4  ;;  %v10946_v26 = vrot.slane %v8707_v20, 5 }
 0x138   : > { %9378 = vmatprep.mubr.msk.bf16.mxu0 %vm14543_vm12, %v1358_v24  ;;  %v14477_v24 = vrot.slane %v10897_v18, 5 }
 0x139   : > { %v2282_v5 = vor.u32 %v2281_v31, %v2278_v4  ;;  %v2329_v61 = vsel %vm14536_vm0, %v2326_v43, %v10946_v26  ;;  %v910_v4 = vld [vmem:[#allocation3 + $0x18] sm:$0xff] }
 0x13a   : > { %v2405_v58 = vsel %vm14536_vm0, %v2402_v45, %v14477_v24  ;;  %v11245_v24 = vld [vmem:[%s14473_s4 + $0x20] ss:$0 sps:$4 sm:$0xff]  }
 0x13b   : > { %2310 = vrot.lane.b32.xlu1 %v2282_v5, %s10174_s10  ;;  %v2291_v36 = vsel %vm14535_vm1, %v2282_v5, %v2290_v17  ;;  %14567 = vst [vmem:[#allocation25_spill] sm:$0xff] %v11245_v24 }
 0x13c   : > { %2312 = vrot.lane.b32.xlu0 %v2291_v36, %s10174_s10 }
 0x13f   : > { %9379 = vmatmul.mubr.msk.bf16.gmra.mrb[20].mxu0 %vm14543_vm12, %v1366_v56  ;;  %2314 = vrot.lane.b32.xlu1 %v2300_v59, %s10174_s10  ;;  %v2378_v56 = vsel %vm14535_vm1, %v2368_v38, %v10911_v55 }
 0x140   : > { %2332 = vrot.lane.b32.xlu0 %v2323_v3, %s10172_s8 }
 0x143   : > { %2334 = vrot.lane.b32.xlu1 %v2325_v40, %s10172_s8  ;;  %v911_v40 = vld [vmem:[#allocation3 + $0x20] sm:$0xff] }
 0x144   : > { %2336 = vrot.lane.b32.xlu0 %v2327_v47, %s10172_s8 }
 0x147   : > { %2342 = vrot.lane.b32.xlu1 %v8704_v8, %s10171_s30  ;;  %v2305_v8 = vshll.u32 %v8707_v20, 16 }
 0x148   : > { %2344 = vrot.lane.b32.xlu0 %v8705_v7, %s10171_s30 }
 0x149   : > { %v2307_v62 = vrot.slane %v2305_v8, 5 }
 0x14b   : > { %2346 = vrot.lane.b32.xlu1 %v10871_v32, %s10171_s30  ;;  %v10939_v29 = vor.u32 %v2307_v62, %v2304_v50  ;;  %v909_v32 = vld [vmem:[#allocation3 + $0x10] sm:$0xff] }
 0x14c   : > { %2388 = vrot.lane.b32.xlu0 %v2360_v39, %s10173_s9 }
 0x14d   : > { %v2309_v7 = vsel %vm14535_vm1, %v2299_v51, %v10939_v29 }
 0x14f   : > { %2390 = vrot.lane.b32.xlu1 %v2369_v54, %s10173_s9 }
 0x150   : > { %2392 = vrot.lane.b32.xlu0 %v2378_v56, %s10173_s9 }
 0x153   : > { %2410 = vrot.lane.b32.xlu1 %v2401_v2, %s10175_s11 }
 0x154   : > { %2412 = vrot.lane.b32.xlu0 %v2403_v1, %s10175_s11 }
 0x157   : > { %2414 = vrot.lane.b32.xlu1 %v2405_v58, %s10175_s11 }
 0x158   : > { %2420 = vrot.lane.b32.xlu0 %v10879_v35, %s10176_s12 }
 0x15b   : > { %2422 = vrot.lane.b32.xlu1 %v10885_v53, %s10176_s12 }
 0x15c   : > { %2424 = vrot.lane.b32.xlu0 %v10897_v18, %s10176_s12 }
 0x15f   : > { %2440 = vrot.lane.b32.xlu1 %v2290_v17, %s10177_s21 }
 0x160   : > { %2442 = vrot.lane.b32.xlu0 %v2300_v59, %s10177_s21 }
 0x163   : > { %2444 = vrot.lane.b32.xlu1 %v2309_v7, %s10177_s21 }
 0x164   : > { %2457 = vrot.lane.b32.xlu0 %v2324_v30, %s10178_s28  ;;  %v10966_v30 = vld [vmem:[%s10239_s29 + $0x84] sm:$0xf] }
 0x165   : > { %v10970_v59 = vcombine.low %v10966_v30, %v10966_v30 }
 0x167   : > { %2459 = vrot.lane.b32.xlu1 %v2327_v47, %s10178_s28  ;;  %v2330_v36 = vrot.slane %v10970_v59, 5 }
 0x168   : > { %2316 = vrot.lane.b32.xlu0 %v2309_v7, %s10174_s10 }
 0x169   : > { %v2331_v49 = vsel %vm14536_vm0, %v10946_v26, %v2330_v36 }
 0x16b   : > { %2461 = vrot.lane.b32.xlu1 %v2329_v61, %s10178_s28 }
 0x16c   : > { %2318 = vrot.lane.b32.xlu0 %v10939_v29, %s10174_s10 }
 0x16f   : > { %2338 = vrot.lane.b32.xlu1 %v2329_v61, %s10172_s8 }
 0x170   : > { %2340 = vrot.lane.b32.xlu0 %v2331_v49, %s10172_s8 }
 0x173   : > { %2348 = vrot.lane.b32.xlu1 %v8707_v20, %s10171_s30 }
 0x195   : > { %v9320_v27 = vpop.f32.mrb[0].mxu0  ;;  %v9334_v11 = vpop.f32.mrb[0].mxu1 }
 0x196   : > { %901 = vst.msk [vmem:[#allocation3 + $0x50] sm:$0xff] %vm342_vm4, %v9320_v27  ;;  %v1000_v31 = vadd.f32 %v9334_v11, %v909_v32  ;;  %v867_v60 = vpop.f32.mrb[1].mxu0  ;;  %v967_v15 = vpop.f32.mrb[1].mxu1 }
 0x197   : > { %899 = vst.msk [vmem:[#allocation3 + $0x40] sm:$0xff] %vm342_vm4, %v867_v60  ;;  %v998_v34 = vadd.f32 %v967_v15, %v907_v22  ;;  %v9321_v5 = vpop.f32.mrb[2].mxu0  ;;  %v9335_v6 = vpop.f32.mrb[2].mxu1 }
 0x198   : > { %1008 = vst.msk [vmem:[#allocation3 + $0x10] sm:$0xff] %vm342_vm4, %v1000_v31  ;;  %902 = vst.msk [vmem:[#allocation3 + $0x58] sm:$0xff] %vm342_vm4, %v9321_v5  ;;  %v1001_v16 = vadd.f32 %v9335_v6, %v910_v4  ;;  %v870_v17 = vpop.f32.mrb[3].mxu0  ;;  %v970_v51 = vpop.f32.mrb[3].mxu1 }
 0x199   : > { %1006 = vst.msk [vmem:[#allocation3] sm:$0xff] %vm342_vm4, %v998_v34  ;;  %900 = vst.msk [vmem:[#allocation3 + $0x48] sm:$0xff] %vm342_vm4, %v870_v17  ;;  %v999_v3 = vadd.f32 %v970_v51, %v908_v63 }
 0x19a   : > { %1009 = vst.msk [vmem:[#allocation3 + $0x18] sm:$0xff] %vm342_vm4, %v1001_v16 }
 0x19b   : > { %1007 = vst.msk [vmem:[#allocation3 + $0x8] sm:$0xff] %vm342_vm4, %v999_v3 }
 0x19d   : > { %v1455_v54 = vld [vmem:[#allocation3 + $0x50] sm:$0xff] }
 0x19e   : > { %v1453_v58 = vld [vmem:[#allocation3 + $0x40] sm:$0xff] }
 0x19f   : > { %v1456_v8 = vld [vmem:[#allocation3 + $0x58] sm:$0xff] }
 0x1a0   : > { %v1454_v61 = vld [vmem:[#allocation3 + $0x48] sm:$0xff] }
 0x1b2   : > { %v9324_v42 = vpop.f32.mrb[4].mxu0  ;;  %v9338_v14 = vpop.f32.mrb[4].mxu1 }
 0x1b3   : > { %905 = vst.msk [vmem:[#allocation3 + $0x70] sm:$0xff] %vm342_vm4, %v9324_v42  ;;  %v1004_v43 = vadd.f32 %v9338_v14, %v913_v37  ;;  %v883_v21 = vpop.f32.mrb[5].mxu0  ;;  %v983_v44 = vpop.f32.mrb[5].mxu1  ;;  %v1544_v37 = vld [vmem:[#allocation3 + $0x10] sm:$0xff]  ;;  %v1542_v14 = vld [vmem:[#allocation3] sm:$0xff] }
 0x1b4   : > { %903 = vst.msk [vmem:[#allocation3 + $0x60] sm:$0xff] %vm342_vm4, %v883_v21  ;;  %v1002_v41 = vadd.f32 %v983_v44, %v911_v40  ;;  %v9325_v47 = vpop.f32.mrb[6].mxu0  ;;  %v9339_v48 = vpop.f32.mrb[6].mxu1  ;;  %v1545_v21 = vld [vmem:[#allocation3 + $0x18] sm:$0xff] }
 0x1b5   : > { %1012 = vst.msk [vmem:[#allocation3 + $0x30] sm:$0xff] %vm342_vm4, %v1004_v43  ;;  %906 = vst.msk [vmem:[#allocation3 + $0x78] sm:$0xff] %vm342_vm4, %v9325_v47  ;;  %v1005_v46 = vadd.f32 %v9339_v48, %v914_v10  ;;  %v886_v39 = vpop.f32.mrb[7].mxu0  ;;  %v986_v38 = vpop.f32.mrb[7].mxu1 }
 0x1b6   : > { %1010 = vst.msk [vmem:[#allocation3 + $0x20] sm:$0xff] %vm342_vm4, %v1002_v41  ;;  %904 = vst.msk [vmem:[#allocation3 + $0x68] sm:$0xff] %vm342_vm4, %v886_v39  ;;  %v1003_v25 = vadd.f32 %v986_v38, %v912_v9  ;;  %v1543_v41 = vld [vmem:[#allocation3 + $0x8] sm:$0xff]  ;;  %v11005_v39 = vpop.permute.xlu0 %290  ;;  %v8570_v38 = vld [vmem:[%s14472_s3] ss:$0 sm:$0xff] }
 0x1b7   : > { %1013 = vst.msk [vmem:[#allocation3 + $0x38] sm:$0xff] %vm342_vm4, %v1005_v46  ;;  %v11003_v46 = vpop.permute.xlu1 %295  ;;  %14552 = vst [vmem:[#allocation10_spill] sm:$0xff] %v11005_v39 }
 0x1b8   : > { %1011 = vst.msk [vmem:[#allocation3 + $0x28] sm:$0xff] %vm342_vm4, %v1003_v25  ;;  %14551 = vst [vmem:[#allocation9_spill] sm:$0xff] %v11003_v46 }
 0x1ba   : > { %v1459_v11 = vld [vmem:[#allocation3 + $0x70] sm:$0xff] }
 0x1bb   : > { %v1457_v15 = vld [vmem:[#allocation3 + $0x60] sm:$0xff] }
 0x1bc   : > { %v1460_v6 = vld [vmem:[#allocation3 + $0x78] sm:$0xff]  ;;  %v1548_v25 = vld [vmem:[#allocation3 + $0x30] sm:$0xff] }
 0x1bd   : > { %v1458_v3 = vld [vmem:[#allocation3 + $0x68] sm:$0xff] }
 0x1e5   : > { %v9348_v52 = vpop.f32.mrb[8].mxu0  ;;  %v9362_v2 = vpop.f32.mrb[8].mxu1 }
 0x1e6   : > { %1447 = vst.msk [vmem:[#allocation3 + $0x90] sm:$0xff] %vm342_vm4, %v9348_v52  ;;  %v1528_v45 = vadd.f32 %v9362_v2, %v1455_v54  ;;  %v1413_v56 = vpop.f32.mrb[9].mxu0  ;;  %v1495_v1 = vpop.f32.mrb[9].mxu1  ;;  %v1546_v2 = vld [vmem:[#allocation3 + $0x20] sm:$0xff] }
 0x1e7   : > { %1445 = vst.msk [vmem:[#allocation3 + $0x80] sm:$0xff] %vm342_vm4, %v1413_v56  ;;  %v1526_v20 = vadd.f32 %v1495_v1, %v1453_v58  ;;  %v9349_v19 = vpop.f32.mrb[10].mxu0  ;;  %v9363_v50 = vpop.f32.mrb[10].mxu1  ;;  %v1549_v1 = vld [vmem:[#allocation3 + $0x38] sm:$0xff] }
 0x1e8   : > { %1536 = vst.msk [vmem:[#allocation3 + $0x50] sm:$0xff] %vm342_vm4, %v1528_v45  ;;  %1448 = vst.msk [vmem:[#allocation3 + $0x98] sm:$0xff] %vm342_vm4, %v9349_v19  ;;  %v1529_v62 = vadd.f32 %v9363_v50, %v1456_v8  ;;  %v1416_v7 = vpop.f32.mrb[11].mxu0  ;;  %v1498_v32 = vpop.f32.mrb[11].mxu1 }
 0x1e9   : > { %1534 = vst.msk [vmem:[#allocation3 + $0x40] sm:$0xff] %vm342_vm4, %v1526_v20  ;;  %1446 = vst.msk [vmem:[#allocation3 + $0x88] sm:$0xff] %vm342_vm4, %v1416_v7  ;;  %v1527_v22 = vadd.f32 %v1498_v32, %v1454_v61  ;;  %v11012_v32 = vpop.permute.xlu1 %300 }
 0x1ea   : > { %1537 = vst.msk [vmem:[#allocation3 + $0x58] sm:$0xff] %vm342_vm4, %v1529_v62  ;;  %v1547_v62 = vld [vmem:[#allocation3 + $0x28] sm:$0xff]  ;;  %14553 = vst [vmem:[#allocation11_spill] sm:$0xff] %v11012_v32 }
 0x1eb   : > { %1535 = vst.msk [vmem:[#allocation3 + $0x48] sm:$0xff] %vm342_vm4, %v1527_v22  ;;  %v11014_v22 = vpop.permute.xlu0 %305 }
 0x1ec   : > { %14554 = vst [vmem:[#allocation12_spill] sm:$0xff] %v11014_v22 }
 0x202   : > { %v9352_v27 = vpop.f32.mrb[12].mxu0  ;;  %v9366_v4 = vpop.f32.mrb[12].mxu1 }
 0x203   : > { %1451 = vst.msk [vmem:[#allocation3 + $0xb0] sm:$0xff] %vm342_vm4, %v9352_v27  ;;  %v1532_v31 = vadd.f32 %v9366_v4, %v1459_v11  ;;  %v1429_v60 = vpop.f32.mrb[13].mxu0  ;;  %v1511_v63 = vpop.f32.mrb[13].mxu1 }
 0x204   : > { %1449 = vst.msk [vmem:[#allocation3 + $0xa0] sm:$0xff] %vm342_vm4, %v1429_v60  ;;  %v1530_v34 = vadd.f32 %v1511_v63, %v1457_v15  ;;  %v9353_v5 = vpop.f32.mrb[14].mxu0  ;;  %v9367_v16 = vpop.f32.mrb[14].mxu1 }
 0x205   : > { %1540 = vst.msk [vmem:[#allocation3 + $0x70] sm:$0xff] %vm342_vm4, %v1532_v31  ;;  %1452 = vst.msk [vmem:[#allocation3 + $0xb8] sm:$0xff] %vm342_vm4, %v9353_v5  ;;  %v1533_v17 = vadd.f32 %v9367_v16, %v1460_v6  ;;  %v1432_v51 = vpop.f32.mrb[15].mxu0  ;;  %v1514_v36 = vpop.f32.mrb[15].mxu1 }
 0x206   : > { %1538 = vst.msk [vmem:[#allocation3 + $0x60] sm:$0xff] %vm342_vm4, %v1530_v34  ;;  %1450 = vst.msk [vmem:[#allocation3 + $0xa8] sm:$0xff] %vm342_vm4, %v1432_v51  ;;  %v1531_v49 = vadd.f32 %v1514_v36, %v1458_v3  ;;  %v11023_v3 = vpop.permute.xlu1 %310  ;;  %v11025_v36 = vpop.permute.xlu0 %315 }
 0x207   : > { %1541 = vst.msk [vmem:[#allocation3 + $0x78] sm:$0xff] %vm342_vm4, %v1533_v17  ;;  %14555 = vst [vmem:[#allocation13_spill] sm:$0xff] %v11023_v3 }
 0x208   : > { %1539 = vst.msk [vmem:[#allocation3 + $0x68] sm:$0xff] %vm342_vm4, %v1531_v49  ;;  %14556 = vst [vmem:[#allocation14_spill] sm:$0xff] %v11025_v36 }
 0x20a   : > { %v9376_v40 = vpop.f32.mrb[16].mxu0 }
 0x20b   : > { %v1635_v42 = vadd.f32 %v9376_v40, %v1544_v37  ;;  %v1602_v10 = vpop.f32.mrb[17].mxu0 }
 0x20c   : > { %v1633_v43 = vadd.f32 %v1602_v10, %v1542_v14  ;;  %v9377_v44 = vpop.f32.mrb[18].mxu0 }
 0x20d   : > { %1643 = vst.msk [vmem:[#allocation3 + $0x10] sm:$0xff] %vm342_vm4, %v1635_v42  ;;  %v1636_v9 = vadd.f32 %v9377_v44, %v1545_v21  ;;  %v1605_v47 = vpop.f32.mrb[19].mxu0 }
 0x20e   : > { %1641 = vst.msk [vmem:[#allocation3] sm:$0xff] %vm342_vm4, %v1633_v43  ;;  %v1634_v48 = vadd.f32 %v1605_v47, %v1543_v41 }
 0x20f   : > { %1644 = vst.msk [vmem:[#allocation3 + $0x18] sm:$0xff] %vm342_vm4, %v1636_v9 }
 0x210   : > { %1642 = vst.msk [vmem:[#allocation3 + $0x8] sm:$0xff] %vm342_vm4, %v1634_v48 }
 0x212   : > { %v9380_v52 = vpop.f32.mrb[20].mxu0 }
 0x213   : > { %v1639_v54 = vadd.f32 %v9380_v52, %v1548_v25  ;;  %v1618_v45 = vpop.f32.mrb[21].mxu0  ;;  %v11029_v52 = vpop.permute.xlu1 %320 }
 0x214   : > { %v1651_v56 = vld [vmem:[#allocation3 + $0x10] sm:$0xff]  ;;  %v1637_v58 = vadd.f32 %v1618_v45, %v1546_v2  ;;  %v9381_v20 = vpop.f32.mrb[22].mxu0  ;;  %14557 = vst [vmem:[#allocation15_spill] sm:$0xff] %v11029_v52 }
 0x215   : > { %v1649_v19 = vld [vmem:[#allocation3] sm:$0xff]  ;;  %v1659_v8 = vadd.f32 %v8570_v38, %v1651_v56  ;;  %1647 = vst.msk [vmem:[#allocation3 + $0x30] sm:$0xff] %vm342_vm4, %v1639_v54  ;;  %v1640_v50 = vadd.f32 %v9381_v20, %v1549_v1  ;;  %v1621_v7 = vpop.f32.mrb[23].mxu0  ;;  %v11031_v54 = vpop.permute.xlu0 %325  ;;  %v11037_v20 = vld [vmem:[#allocation2] sm:$0xff] }
 0x216   : > { %v1657_v61 = vadd.f32 %v8570_v38, %v1649_v19  ;;  %v1652_v27 = vld [vmem:[#allocation3 + $0x18] sm:$0xff]  ;;  %1645 = vst.msk [vmem:[#allocation3 + $0x20] sm:$0xff] %vm342_vm4, %v1637_v58  ;;  %v1638_v11 = vadd.f32 %v1621_v7, %v1547_v62  ;;  %14558 = vst [vmem:[#allocation16_spill] sm:$0xff] %v11031_v54 }
 0x217   : > { %v1650_v4 = vld [vmem:[#allocation3 + $0x8] sm:$0xff]  ;;  %v1667_v31 = vmax.f32 %v1659_v8, 0.0  ;;  %v1660_v60 = vadd.f32 %v8570_v38, %v1652_v27  ;;  %1648 = vst.msk [vmem:[#allocation3 + $0x38] sm:$0xff] %vm342_vm4, %v1640_v50 }
 0x218   : > { %v1665_v15 = vmax.f32 %v1657_v61, 0.0  ;;  %v1658_v63 = vadd.f32 %v8570_v38, %v1650_v4  ;;  %1646 = vst.msk [vmem:[#allocation3 + $0x28] sm:$0xff] %vm342_vm4, %v1638_v11  ;;  %v1699_v61 = vshll.u32 %v11037_v20, 16 }
 0x219   : > { %v1668_v34 = vmax.f32 %v1660_v60, 0.0  ;;  %v1675_v6 = vmul.f32 %v1667_v31, %v11012_v32  ;;  %v1771_v60 = vrot.slane %v11037_v20, 4  ;;  %v9994_v32 = vld [vmem:[%s10239_s29 + $0x8c] ss:$0 sps:$4 sm:$0xff]  }
 0x21a   : > { %v1666_v5 = vmax.f32 %v1658_v63, 0.0  ;;  %v1673_v17 = vmul.f32 %v1665_v15, %v11005_v39  ;;  %v1697_v15 = vshrl.u32 %v11037_v20, 16  ;;  %v1701_v63 = vrot.slane %v1699_v61, 1 }
 0x21b   : > { %v1676_v16 = vmul.f32 %v1668_v34, %v11014_v22 }
 0x21c   : > { %v1674_v51 = vmul.f32 %v1666_v5, %v11003_v46  ;;  %v1655_v49 = vld [vmem:[#allocation3 + $0x30] sm:$0xff] }
 0x21d   : > { %v1682_v37 = vpack.c.bf16 %v1676_v16, %v1675_v6  ;;  %v1653_v40 = vld [vmem:[#allocation3 + $0x20] sm:$0xff]  ;;  %v1663_v42 = vadd.f32 %v8570_v38, %v1655_v49 }
 0x21e   : > { %v1681_v14 = vpack.c.bf16 %v1674_v51, %v1673_v17  ;;  %v1661_v10 = vadd.f32 %v8570_v38, %v1653_v40  ;;  %v1656_v43 = vld [vmem:[#allocation3 + $0x38] sm:$0xff]  ;;  %v1702_v40 = vor.u32 %v1701_v63, %v1697_v15 }
 0x21f   : > { %1686 = vst.msk [vmem:[#allocation2 + $0x10] sm:$0xff] %vm342_vm4, %v1682_v37  ;;  %v1654_v21 = vld [vmem:[#allocation3 + $0x28] sm:$0xff]  ;;  %v1671_v44 = vmax.f32 %v1663_v42, 0.0  ;;  %v1664_v9 = vadd.f32 %v8570_v38, %v1656_v43 }
 0x220   : > { %1685 = vst.msk [vmem:[#allocation2 + $0x8] sm:$0xff] %vm342_vm4, %v1681_v14  ;;  %v1669_v41 = vmax.f32 %v1661_v10, 0.0  ;;  %v1662_v47 = vadd.f32 %v8570_v38, %v1654_v21  ;;  %v1751_v38 = vrot.slane %v11037_v20, 1 }
 0x221   : > { %v1672_v48 = vmax.f32 %v1664_v9, 0.0  ;;  %v1679_v2 = vmul.f32 %v1671_v44, %v11029_v52  ;;  %v11078_v9 = vpop.permute.xlu0 %1843 }
 0x222   : > { %v1670_v25 = vmax.f32 %v1662_v47, 0.0  ;;  %v1677_v56 = vmul.f32 %v1669_v41, %v11023_v3 }
 0x223   : > { %v1680_v45 = vmul.f32 %v1672_v48, %v11031_v54  ;;  %v11280_v54 = vld [vmem:[%s14471_s2] sm:$0xff]  }
 0x224   : > { %v1678_v58 = vmul.f32 %v1670_v25, %v11025_v36 }
 0x225   : > { %v1684_v1 = vpack.c.bf16 %v1680_v45, %v1679_v2  ;;  %v11088_v45 = vpop.permute.xlu0 %1861 }
 0x226   : > { %v1683_v19 = vpack.c.bf16 %v1678_v58, %v1677_v56  ;;  %v11039_v8 = vld [vmem:[#allocation2 + $0x10] sm:$0xff] }
 0x227   : > { %1688 = vst.msk [vmem:[#allocation2 + $0x20] sm:$0xff] %vm342_vm4, %v1684_v1  ;;  %1837 = vrot.lane.b32.xlu1 %v11039_v8, %s10181_s26  ;;  %v11045_v50 = vld [vmem:[#allocation2 + $0x8] sm:$0xff]  ;;  %v1754_v11 = vrot.slane %v11039_v8, 1  ;;  %v1774_v31 = vrot.slane %v11039_v8, 4  ;;  %v1712_v34 = vshll.u32 %v11039_v8, 16  ;;  %v1716_v17 = vshrl.u32 %v11039_v8, 16 }
 0x228   : > { %1687 = vst.msk [vmem:[#allocation2 + $0x18] sm:$0xff] %vm342_vm4, %v1683_v19  ;;  %1835 = vrot.lane.b32.xlu0 %v11045_v50, %s10181_s26  ;;  %v1816_v62 = vrot.slane %v11045_v50, 5  ;;  %v1752_v7 = vrot.slane %v11045_v50, 1  ;;  %v1772_v4 = vrot.slane %v11045_v50, 4  ;;  %v1704_v6 = vshll.u32 %v11045_v50, 16 }
 0x229   : > { %v1708_v16 = vshrl.u32 %v11045_v50, 16  ;;  %v1817_v49 = vrot.slane %v11039_v8, 5  ;;  %v1794_v42 = vrot.slane %v1712_v34, 5  ;;  %v1793_v21 = vrot.slane %v1716_v17, 4  ;;  %v11096_v19 = vpop.permute.xlu0 %1873 }
 0x22a   : > { %v1753_v27 = vsel %vm14534_vm13, %v1751_v38, %v1752_v7  ;;  %v1755_v5 = vsel %vm14534_vm13, %v1752_v7, %v1754_v11  ;;  %v1775_v51 = vsel %vm14541_vm14, %v1772_v4, %v1774_v31  ;;  %v1773_v37 = vsel %vm14541_vm14, %v1771_v60, %v1772_v4 }
 0x22b   : > { %1825 = vrot.lane.b32.xlu1 %v1816_v62, %s10184_s16  ;;  %v1706_v14 = vrot.slane %v1704_v6, 1  ;;  %v1790_v10 = vrot.slane %v1708_v16, 4  ;;  %v1791_v43 = vrot.slane %v1704_v6, 5  ;;  %v1818_v44 = vsel %vm14536_vm0, %v1816_v62, %v1817_v49  ;;  %v11099_v62 = vpop.permute.xlu1 %2310 }
 0x22c   : > { %1760 = vrot.lane.b32.xlu0 %v1753_v27, %s10173_s9  ;;  %v11081_v48 = vor.u32 %v1794_v42, %v1793_v21  ;;  %v1714_v56 = vrot.slane %v1712_v34, 1 }
 0x22d   : > { %v1707_v41 = vsel %vm14530_vm15, %v1702_v40, %v1706_v14  ;;  %v1792_v47 = vor.u32 %v1791_v43, %v1790_v10  ;;  %v1710_v2 = vor.u32 %v1708_v16, %v1706_v14  ;;  %v11112_v4 = vpop.permute.xlu0 %2312 }
 0x22e   : > { %v11093_v1 = vld [vmem:[#allocation2 + $0x20] sm:$0xff]  ;;  %v1718_v43 = vor.u32 %v1716_v17, %v1714_v56 }
 0x22f   : > { %1762 = vrot.lane.b32.xlu1 %v1755_v5, %s10173_s9  ;;  %v1796_v25 = vsel %vm14535_vm1, %v1792_v47, %v11081_v48  ;;  %v1715_v58 = vsel %vm14530_vm15, %v1710_v2, %v1714_v56  ;;  %v1758_v38 = vrot.slane %v11093_v1, 1  ;;  %v11103_v7 = vld [vmem:[#allocation2 + $0x18] sm:$0xff]  ;;  %v11115_v60 = vpop.permute.xlu1 %2314  ;;  %v1778_v63 = vrot.slane %v11093_v1, 4  ;;  %v11159_v17 = vld [vmem:[%s14473_s4 + $0x24] sm:$0xff]  }
 0x230   : > { %1782 = vrot.lane.b32.xlu0 %v1775_v51, %s10176_s12  ;;  %v1776_v27 = vrot.slane %v11103_v7, 4  ;;  %v1819_v34 = vrot.slane %v11103_v7, 5  ;;  %v1756_v51 = vrot.slane %v11103_v7, 1  ;;  %v1720_v40 = vshll.u32 %v11103_v7, 16  ;;  %14560 = vst [vmem:[#allocation18_spill] sm:$0xff] %v11159_v17  ;;  %9400 = vmatprep.subr.bf16.mxu0 %v11159_v17 }
 0x231   : > { %v1864_v61 = vsel %vm14534_vm13, %v1758_v38, %v1863_v33  ;;  %v1821_v33 = vrot.slane %v11093_v1, 5  ;;  %v11124_v6 = vpop.permute.xlu0 %2332  ;;  %v1728_v42 = vshll.u32 %v11093_v1, 16  ;;  %9401 = vmatpush3.bf16.msra.mxu0 %v11159_v17 }
 0x232   : > { %v1777_v15 = vsel %vm14541_vm14, %v1774_v31, %v1776_v27  ;;  %v1820_v16 = vsel %vm14536_vm0, %v1817_v49, %v1819_v34  ;;  %v1722_v49 = vrot.slane %v1720_v40, 1  ;;  %v1759_v21 = vsel %vm14534_vm13, %v1756_v51, %v1758_v38 }
 0x233   : > { %1780 = vrot.lane.b32.xlu1 %v1773_v37, %s10176_s12  ;;  %v11128_v37 = vpop.permute.xlu1 %2334 }
 0x234   : > { %1827 = vrot.lane.b32.xlu0 %v1818_v44, %s10184_s16  ;;  %v1730_v44 = vrot.slane %v1728_v42, 1 }
 0x235   : > { %v11139_v14 = vpop.permute.xlu0 %2336 }
 0x237   : > { %1735 = vrot.lane.b32.xlu1 %v1707_v41, %s10172_s8  ;;  %v11142_v10 = vpop.permute.xlu1 %2342  ;;  %v1732_v41 = vshrl.u32 %v11093_v1, 16 }
 0x238   : > { %1865 = vrot.lane.b32.xlu0 %v1755_v5, %s10183_s13  ;;  %v1823_v5 = vrot.slane %v10857_v57, 5  ;;  %v1757_v57 = vsel %vm14534_vm13, %v1754_v11, %v1756_v51  ;;  %v1723_v11 = vsel %vm14530_vm15, %v1718_v43, %v1722_v49  ;;  %v11180_v51 = vld [vmem:[%s14473_s4 + $0x2c] sm:$0xff]   ;;  %v11197_v43 = vld [vmem:[%s14473_s4 + $0x34] sm:$0xff]   ;;  %vm1926_vm13 = vcmask 392192  }
 0x239   : > { %v11164_v2 = vpop.permute.xlu0 %2344  ;;  %v1734_v56 = vor.u32 %v1732_v41, %v1730_v44  ;;  %14562 = vst [vmem:[#allocation20_spill] sm:$0xff] %v11180_v51  ;;  %9402 = vmatprep.subr.bf16.mxu0 %v11180_v51  ;;  %14564 = vst [vmem:[#allocation22_spill] sm:$0xff] %v11197_v43 }
 0x23a   : > { %v1824_v31 = vsel %vm14536_vm0, %v1821_v33, %v1823_v5  ;;  %v1798_v5 = vrot.slane %v1720_v40, 5  ;;  %9403 = vmatpush3.bf16.msra.mxu0 %v11180_v51 }
 0x23b   : > { %1807 = vrot.lane.b32.xlu1 %v1796_v25, %s10178_s28  ;;  %v11154_v25 = vld [vmem:[%s14473_s4] sm:$0xff]   ;;  %9404 = vmatprep.subr.bf16.mxu0 %v11197_v43 }
 0x23c   : > { %1805 = vrot.lane.b32.xlu0 %v1792_v47, %s10178_s28  ;;  %v1724_v47 = vshrl.u32 %v11103_v7, 16  ;;  %14559 = vst [vmem:[#allocation17_spill] sm:$0xff] %v11154_v25  ;;  %9382 = vmatprep.subr.bf16.mxu1 %v11154_v25 }
 0x23d   : > { %9383 = vmatpush3.bf16.msra.mxu1 %v11154_v25 }
 0x23e   : > { %9405 = vmatpush3.bf16.msra.mxu0 %v11197_v43 }
 0x23f   : > { %1853 = vrot.lane.b32.xlu1 %v1715_v58, %s10182_s27 }
 0x240   : > { %1737 = vrot.lane.b32.xlu0 %v1715_v58, %s10172_s8  ;;  %v1801_v58 = vrot.slane %v1732_v41, 4  ;;  %v1822_v41 = vsel %vm14536_vm0, %v1819_v34, %v1821_v33  ;;  %v11224_v34 = vld [vmem:[%s14473_s4 + $0x18] sm:$0xff]  }
 0x241   : > { %14565 = vst [vmem:[#allocation23_spill] sm:$0xff] %v11224_v34 }
 0x243   : > { %1841 = vrot.lane.b32.xlu1 %v11093_v1, %s10181_s26 }
 0x244   : > { %1839 = vrot.lane.b32.xlu0 %v11103_v7, %s10181_s26 }
 0x247   : > { %1871 = vrot.lane.b32.xlu1 %v1864_v61, %s10183_s13  ;;  %v11168_v61 = vpop.permute.xlu1 %2346 }
 0x248   : > { %1768 = vrot.lane.b32.xlu0 %v1758_v38, %s10173_s9  ;;  %v1802_v38 = vrot.slane %v1728_v42, 5 }
 0x24a   : > { %v11188_v40 = vor.u32 %v1802_v38, %v1801_v58  ;;  %v1726_v58 = vor.u32 %v1724_v47, %v1722_v49  ;;  %v8697_v49 = vld [vmem:[%s10239_s29 + $0x88] sm:$0xf] }
 0x24b   : > { %1784 = vrot.lane.b32.xlu1 %v1777_v15, %s10176_s12  ;;  %v1797_v15 = vrot.slane %v1724_v47, 4 }
 0x24c   : > { %1788 = vrot.lane.b32.xlu0 %v1778_v63, %s10176_s12 }
 0x24d   : > { %v1799_v42 = vor.u32 %v1798_v5, %v1797_v15  ;;  %v1731_v5 = vsel %vm14530_vm15, %v1726_v58, %v1730_v44  ;;  %v11250_v44 = vld [vmem:[%s14473_s4 + $0x44] ss:$0 sps:$4 sm:$0xff]   ;;  %v11260_v58 = vsel %vm14541_vm14, %v11245_v24, 0 }
 0x24e   : > { %14568 = vst [vmem:[#allocation26_spill] sm:$0xff] %v11250_v44  ;;  %14569 = vst [vmem:[#allocation27_spill] sm:$0xff] %v11260_v58 }
 0x24f   : > { %1829 = vrot.lane.b32.xlu1 %v1820_v16, %s10184_s16  ;;  %v11175_v16 = vld [vmem:[%s14473_s4 + $0x8] sm:$0xff]   ;;  %v1804_v52 = vsel %vm14535_vm1, %v1799_v42, %v11188_v40 }
 0x250   : > { %1833 = vrot.lane.b32.xlu0 %v1824_v31, %s10184_s16  ;;  %14561 = vst [vmem:[#allocation19_spill] sm:$0xff] %v11175_v16  ;;  %v11185_v31 = vld [vmem:[%s14473_s4 + $0x10] sm:$0xff]   ;;  %9384 = vmatprep.subr.bf16.mxu1 %v11175_v16 }
 0x251   : > { %14563 = vst [vmem:[#allocation21_spill] sm:$0xff] %v11185_v31  ;;  %9385 = vmatpush3.bf16.msra.mxu1 %v11175_v16 }
 0x252   : > { %9386 = vmatprep.subr.bf16.mxu1 %v11185_v31 }
 0x253   : > { %1867 = vrot.lane.b32.xlu1 %v1757_v57, %s10183_s13 }
 0x254   : > { %1764 = vrot.lane.b32.xlu0 %v1757_v57, %s10173_s9  ;;  %v1779_v57 = vsel %vm14541_vm14, %v1776_v27, %v1778_v63  ;;  %v11203_v27 = vpop.permute.xlu0 %2388  ;;  %v11208_v63 = vpop.permute.xlu1 %2390 }
 0x255   : > { %9387 = vmatpush3.bf16.msra.mxu1 %v11185_v31 }
 0x256   : > { %9388 = vmatprep.subr.bf16.mxu1 %v11224_v34 }
 0x257   : > { %1869 = vrot.lane.b32.xlu1 %v1759_v21, %s10183_s13 }
 0x258   : > { %1855 = vrot.lane.b32.xlu0 %v1723_v11, %s10182_s27  ;;  %v11231_v33 = vpop.permute.xlu0 %2392  ;;  %v11234_v47 = vpop.permute.xlu1 %2410 }
 0x259   : > { %9389 = vmatpush3.bf16.msra.mxu1 %v11224_v34 }
 0x25a   : > { %9889 = vmatprep.subr.msk.bf16.mxu1 %vm14541_vm14, %v11245_v24 }
 0x25b   : > { %1766 = vrot.lane.b32.xlu1 %v1759_v21, %s10173_s9  ;;  %v11201_v21 = vcombine.low %v10933_v13, %v10966_v30  ;;  %v1800_v13 = vsel %vm14535_vm1, %v11081_v48, %v1799_v42  ;;  %v11229_v48 = vld [vmem:[%s14473_s4 + $0x3c] sm:$0xff]  }
 0x25c   : > { %1743 = vrot.lane.b32.xlu0 %v1734_v56, %s10172_s8  ;;  %14566 = vst [vmem:[#allocation24_spill] sm:$0xff] %v11229_v48  ;;  %9406 = vmatprep.subr.bf16.mxu0 %v11229_v48 }
 0x25d   : > { %v2380_v38 = vshrl.u32 %v11201_v21, 16  ;;  %v2383_v15 = vshll.u32 %v11201_v21, 16  ;;  %9407 = vmatpush3.bf16.msra.mxu0 %v11229_v48  ;;  %9391 = vmatpush3.bf16.msra.mxu1 %v11260_v58  ;;  %v2406_v36 = vrot.slane %v11201_v21, 5  ;;  %v11357_v48 = vld [vmem:[%s10239_s29 + $0xa8] sm:$0xf] }
 0x25e   : > { %9890 = vmatprep.subr.msk.bf16.mxu0 %vm14541_vm14, %v11250_v44  ;;  %9418 = vmatprep.subr.bf16.mxu1 %v11280_v54  ;;  %14577 = vst [vmem:[#allocation34_spill] sm:$0xff] %v11357_v48 }
 0x25f   : > { %1786 = vrot.lane.b32.xlu1 %v1779_v57, %s10176_s12  ;;  %v2382_v57 = vrot.slane %v2380_v38, 4  ;;  %v11264_v38 = vsel %vm14541_vm14, %v11250_v44, 0  ;;  %v2455_v44 = vrot.slane %v9994_v32, 5  ;;  %vm2025_vm14 = vcmask 588800  }
 0x260   : > { %1813 = vrot.lane.b32.xlu0 %v11188_v40, %s10178_s28  ;;  %14570 = vst [vmem:[#allocation28_spill] sm:$0xff] %v11264_v38  ;;  %v14571_v40 = vrot.slane %v10897_v18, 5 }
 0x261   : > { %9409 = vmatpush3.bf16.msra.mxu0 %v11264_v38 }
 0x262   : > { %v2407_v42 = vsel %vm14536_vm0, %v14571_v40, %v2406_v36 }
 0x263   : > { %1831 = vrot.lane.b32.xlu1 %v1822_v41, %s10184_s16  ;;  %v2385_v41 = vrot.slane %v2383_v15, 5  ;;  %v11266_v15 = vpop.permute.xlu0 %2412 }
 0x264   : > { %1809 = vrot.lane.b32.xlu0 %v1800_v13, %s10178_s28  ;;  %v8710_v13 = vcombine.low %v8697_v49, %v8697_v49 }
 0x266   : > { %v2408_v3 = vrot.slane %v8710_v13, 5 }
 0x267   : > { %1739 = vrot.lane.b32.xlu1 %v1723_v11, %s10172_s8  ;;  %v1849_v11 = vsel %vm14530_vm15, %v1734_v56, %v10868_v28  ;;  %v2386_v28 = vor.u32 %v2385_v41, %v2382_v57  ;;  %v8711_v56 = vcombine.low %v10966_v30, %v8697_v49  ;;  %v11288_v30 = vld [vmem:[%s14471_s2 + $0x14] sm:$0xff]   ;;  %v11293_v41 = vpop.permute.xlu0 %2420  ;;  %vm1915_vm15 = vcmask 326656  }
 0x268   : > { %1741 = vrot.lane.b32.xlu0 %v1731_v5, %s10172_s8  ;;  %9432 = vmatprep.subr.bf16.mxu0 %v11288_v30  ;;  %v2409_v57 = vsel %vm14536_vm0, %v2406_v36, %v2408_v3 }
 0x269   : > { %v2435_v49 = vshll.u32 %v8711_v56, 16 }
 0x26b   : > { %1859 = vrot.lane.b32.xlu1 %v1849_v11, %s10182_s27  ;;  %v11272_v11 = vpop.permute.xlu1 %2414  ;;  %v2437_v22 = vrot.slane %v2435_v49, 5  ;;  %v11305_v3 = vpop.permute.xlu0 %2424  ;;  %v8752_v49 = vld [vmem:[%s10239_s29 + $0x98] sm:$0xf] }
 0x26c   : > { %2350 = vrot.lane.b32.xlu0 %v10970_v59, %s10171_s30  ;;  %v2432_v59 = vshrl.u32 %v8711_v56, 16 }
 0x26e   : > { %v2434_v39 = vrot.slane %v2432_v59, 4  ;;  %v8751_v59 = vld [vmem:[%s10239_s29 + $0x94] sm:$0xf] }
 0x26f   : > { %1857 = vrot.lane.b32.xlu1 %v1731_v5, %s10182_s27  ;;  %v11297_v46 = vpop.permute.xlu1 %2422  ;;  %v2387_v5 = vsel %vm14535_vm1, %v10911_v55, %v2386_v28 }
 0x270   : > { %2396 = vrot.lane.b32.xlu0 %v2386_v28, %s10173_s9  ;;  %v2438_v38 = vor.u32 %v2437_v22, %v2434_v39  ;;  %v11316_v28 = vpop.permute.xlu0 %2442 }
 0x272   : > { %v2439_v39 = vsel %vm14535_vm1, %v10939_v29, %v2438_v38 }
 0x273   : > { %1811 = vrot.lane.b32.xlu1 %v1804_v52, %s10178_s28  ;;  %v11311_v52 = vpop.permute.xlu1 %2440 }
 0x274   : > { %2418 = vrot.lane.b32.xlu0 %v2409_v57, %s10175_s11  ;;  %v2453_v57 = vrot.slane %v8711_v56, 5  ;;  %v11326_v32 = vpop.permute.xlu0 %2457  ;;  %v11341_v56 = vld [vmem:[#allocation2 + $0x28] sm:$0xff] }
 0x275   : > { %14574 = vst [vmem:[#allocation31_spill] sm:$0xff] %v11341_v56  ;;  %v3049_v40 = vshrl.u32 %v11341_v56, 16 }
 0x276   : > { %v2456_v55 = vsel %vm14536_vm0, %v2453_v57, %v2455_v44  ;;  %v2454_v22 = vsel %vm14536_vm0, %v10946_v26, %v2453_v57  ;;  %v8753_v57 = vld [vmem:[%s10239_s29 + $0x9c] sm:$0xf] }
 0x277   : > { %2394 = vrot.lane.b32.xlu1 %v2387_v5, %s10173_s9  ;;  %v3045_v5 = vshll.u32 %v11341_v56, 16  ;;  %v11359_v43 = vcombine.low %v8752_v49, %v8753_v57 }
 0x278   : > { %2428 = vrot.lane.b32.xlu0 %v8710_v13, %s10176_s12  ;;  %v11318_v13 = vpop.permute.xlu1 %2444 }
 0x279   : > { %14578 = vst [vmem:[#allocation35_spill] sm:$0xff] %v11359_v43  ;;  %v11361_v58 = vrot.slane %v3045_v5, 1 }
 0x27b   : > { %2416 = vrot.lane.b32.xlu1 %v2407_v42, %s10175_s11  ;;  %v8767_v42 = vcombine.low %v8751_v59, %v8752_v49  ;;  %14579 = vst [vmem:[#allocation36_spill] sm:$0xff] %v11361_v58  ;;  %v3051_v59 = vor.u32 %v3049_v40, %v11361_v58 }
 0x27c   : > { %2448 = vrot.lane.b32.xlu0 %v2438_v38, %s10177_s21  ;;  %v11330_v36 = vpop.permute.xlu1 %2459 }
 0x27d   : > { %v3677_v51 = vshrl.u32 %v8767_v42, 16  ;;  %v3680_v24 = vshll.u32 %v8767_v42, 16 }
 0x27f   : > { %2426 = vrot.lane.b32.xlu1 %v11201_v21, %s10176_s12  ;;  %v11333_v21 = vpop.permute.xlu0 %2316  ;;  %v3679_v31 = vrot.slane %v3677_v51, 4  ;;  %v3682_v16 = vrot.slane %v3680_v24, 5 }
 0x280   : > { %2465 = vrot.lane.b32.xlu0 %v2456_v55, %s10178_s28  ;;  %14572 = vst [vmem:[#allocation29_spill] sm:$0xff] %v11333_v21  ;;  %v11335_v44 = vpop.permute.xlu1 %2461 }
 0x283   : > { %2446 = vrot.lane.b32.xlu1 %v2439_v39, %s10177_s21  ;;  %v11337_v29 = vpop.permute.xlu0 %2318  ;;  %v8754_v39 = vld [vmem:[%s10239_s29 + $0xa0] sm:$0xf] }
 0x284   : > { %v11339_v38 = vpop.permute.xlu1 %2338  ;;  %3042 = vrot.lane.b32.xlu0 %v11341_v56, %s10181_s26  ;;  %v11365_v17 = vcombine.low %v8753_v57, %v8754_v39  ;;  %v3683_v57 = vor.u32 %v3682_v16, %v3679_v31 }
 0x285   : > { %14573 = vst [vmem:[#allocation30_spill] sm:$0xff] %v11339_v38 }
 0x286   : > { %14581 = vst [vmem:[#allocation38_spill] sm:$0xff] %v11365_v17  ;;  %v3685_v49 = vshrl.u32 %v11365_v17, 16  ;;  %v3688_v5 = vshll.u32 %v11365_v17, 16  ;;  %v11385_v38 = vrot.slane %v11365_v17, 5 }
 0x287   : > { %2463 = vrot.lane.b32.xlu1 %v2454_v22, %s10178_s28  ;;  %v11345_v26 = vpop.permute.xlu0 %2340  ;;  %v8755_v22 = vld [vmem:[%s10239_s29 + $0xa4] sm:$0xf] }
 0x288   : > { %14575 = vst [vmem:[#allocation32_spill] sm:$0xff] %v11345_v26  ;;  %v11352_v55 = vpop.permute.xlu1 %2348  ;;  %v11363_v34 = vcombine.low %v8754_v39, %v8755_v22  ;;  %v11368_v0 = vcombine.low %v8755_v22, %v11357_v48  ;;  %3060 = vrot.lane.b32.xlu0 %v3051_v59, %s10182_s27  ;;  %v14527_v39 = vrot.slane %v11341_v56, 1  ;;  %v3687_v22 = vrot.slane %v3685_v49, 4  ;;  %14585 = vst [vmem:[#allocation42_spill] sm:$0xff] %v11385_v38 }
 0x289   : > { %14576 = vst [vmem:[#allocation33_spill] sm:$0xff] %v11352_v55  ;;  %v3690_v40 = vrot.slane %v3688_v5, 5  ;;  %v3724_v55 = vrot.slane %v8767_v42, 5 }
 0x28a   : > { %14580 = vst [vmem:[#allocation37_spill] sm:$0xff] %v11363_v34  ;;  %14582 = vst [vmem:[#allocation39_spill] sm:$0xff] %v11368_v0  ;;  %v3694_v43 = vshrl.u32 %v11368_v0, 16  ;;  %v3697_v23 = vshll.u32 %v11368_v0, 16 }
 0x28b   : > { %3711 = vrot.lane.b32.xlu1 %v3683_v57, %s10174_s10  ;;  %v11380_v48 = vor.u32 %v3690_v40, %v3687_v22 }
 0x28c   : > { %v3696_v51 = vrot.slane %v3694_v43, 4  ;;  %v3699_v24 = vrot.slane %v3697_v23, 5  ;;  %3072 = vrot.lane.b32.xlu0 %v14527_v39, %s10183_s13  ;;  %v3726_v43 = vsel %vm14536_vm0, %v3724_v55, %v11385_v38  ;;  %vm1948_vm0 = vcmask 523264  }
 0x28d   : > { %14583 = vst [vmem:[#allocation40_spill] sm:$0xff] %v11380_v48  ;;  %v3692_v16 = vsel %vm14535_vm1, %v3683_v57, %v11380_v48 }
 0x28e   : > { %v11382_v12 = vor.u32 %v3699_v24, %v3696_v51 }
 0x290   : > { %14584 = vst [vmem:[#allocation41_spill] sm:$0xff] %v11382_v12  ;;  %v11393_v23 = vsel %vm14535_vm1, %v11380_v48, %v11382_v12  ;;  %3713 = vrot.lane.b32.xlu0 %v3692_v16, %s10174_s10  ;;  %vm1937_vm1 = vcmask 457728  }
 0x291   : > { %14586 = vst [vmem:[#allocation43_spill] sm:$0xff] %v11393_v23  ;;  %3715 = vrot.lane.b32.xlu1 %v11393_v23, %s10174_s10 }
 0x294   : > { %3733 = vrot.lane.b32.xlu0 %v3724_v55, %s10172_s8 }
 0x295   : > { %3735 = vrot.lane.b32.xlu1 %v3726_v43, %s10172_s8 }
 0x299   : > { %v11371_v25 = vpop.permute.xlu1 %1837  ;;  %3743 = vrot.lane.b32.xlu1 %v8767_v42, %s10171_s30 }
 0x29a   : > { %v1836_v34 = vpop.permute.xlu0 %1835 }
 0x29d   : > { %v1826_v58 = vpop.permute.xlu1 %1825  ;;  %3747 = vrot.lane.b32.xlu1 %v11368_v0, %s10171_s30 }
 0x29e   : > { %v1761_v18 = vpop.permute.xlu0 %1760 }
 0x2a1   : > { %v1763_v31 = vpop.permute.xlu1 %1762 }
 0x2a2   : > { %v1783_v59 = vpop.permute.xlu0 %1782 }
 0x2a5   : > { %v1781_v49 = vpop.permute.xlu1 %1780 }
 0x2a6   : > { %v1828_v5 = vpop.permute.xlu0 %1827 }
 0x2a9   : > { %v1736_v22 = vpop.permute.xlu1 %1735 }
 0x2aa   : > { %v1866_v57 = vpop.permute.xlu0 %1865  ;;  %v1876_v16 = vsel %vm342_vm4, %v11037_v20, %v1736_v22 }
 0x2ab   : > { %v1886_v43 = vsel %vm706_vm6, %v1876_v16, %v1761_v18 }
 0x2ac   : > { %v1896_v42 = vsel %vm728_vm8, %v1886_v43, %v1781_v49 }
 0x2ad   : > { %v1808_v40 = vpop.permute.xlu1 %1807 }
 0x2ae   : > { %v1806_v51 = vpop.permute.xlu0 %1805 }
 0x2af   : > { %v1906_v12 = vsel %vm750_vm10, %v1896_v42, %v1806_v51 }
 0x2b0   : > { %v1917_v20 = vsel %vm1915_vm15, %v1906_v12, %v1826_v58  ;;  %v8687_v58 = vld [vmem:[%s10239_s29 + $0x60] sm:$0xf] }
 0x2b1   : > { %v1854_v24 = vpop.permute.xlu1 %1853  ;;  %v1928_v49 = vsel %vm1926_vm13, %v1917_v20, %v1836_v34 }
 0x2b2   : > { %v1738_v39 = vpop.permute.xlu0 %1737 }
 0x2b3   : > { %v1878_v17 = vsel %vm342_vm4, %v11045_v50, %v1738_v39  ;;  %v1939_v50 = vsel %vm1937_vm1, %v1928_v49, %v1854_v24 }
 0x2b4   : > { %v1888_v18 = vsel %vm706_vm6, %v1878_v17, %v1763_v31  ;;  %v1950_v38 = vsel %vm1948_vm0, %v1939_v50, %v1866_v57  ;;  %v10067_v31 = vld [vmem:[%s10239_s29 + $0x64] sm:$0xf]  ;;  %v2471_v57 = vsel %vm14546_vm3, %v10879_v35, %v11112_v4  ;;  %v2473_v35 = vsel %vm14546_vm3, %v10885_v53, %v11115_v60 }
 0x2b5   : > { %v11409_v56 = vpop.permute.xlu1 %1841  ;;  %v1898_v43 = vsel %vm728_vm8, %v1888_v18, %v1783_v59  ;;  %v8699_v34 = vcombine.low %v8687_v58, %v10067_v31  ;;  %v1959_v20 = vshrl.u32 %v1950_v38, 16  ;;  %v1962_v21 = vshll.u32 %v1950_v38, 16 }
 0x2b6   : > { %v11412_v23 = vpop.permute.xlu0 %1839  ;;  %v1908_v12 = vsel %vm750_vm10, %v1898_v43, %v1808_v40  ;;  %v2484_v53 = vsel %vm342_vm4, %v2473_v35, %v11139_v14 }
 0x2b7   : > { %v1919_v17 = vsel %vm1915_vm15, %v1908_v12, %v1828_v5  ;;  %v2469_v40 = vsel %vm14546_vm3, %v8699_v34, %v11099_v62  ;;  %v1961_v49 = vrot.slane %v1959_v20, 3  ;;  %v1964_v43 = vrot.slane %v1962_v21, 4 }
 0x2b8   : > { %v1930_v18 = vsel %vm1926_vm13, %v1919_v17, %v11371_v25  ;;  %v2482_v25 = vsel %vm342_vm4, %v2471_v57, %v11128_v37  ;;  %v2480_v31 = vsel %vm342_vm4, %v2469_v40, %v11124_v6 }
 0x2b9   : > { %v11415_v55 = vpop.permute.xlu1 %1871  ;;  %v1965_v4 = vor.u32 %v1964_v43, %v1961_v49  ;;  %v2492_v37 = vsel %vm14545_vm5, %v2482_v25, %v11164_v2 }
 0x2ba   : > { %v1769_v48 = vpop.permute.xlu0 %1768  ;;  %v2502_v60 = vsel %vm706_vm6, %v2492_v37, %v11208_v63  ;;  %v10068_v37 = vld [vmem:[%s10239_s29 + $0x80] sm:$0xf] }
 0x2bb   : > { %v2512_v14 = vsel %vm14544_vm7, %v2502_v60, %v11266_v15 }
 0x2bc   : > { %v2522_v49 = vsel %vm728_vm8, %v2512_v14, %v11297_v46 }
 0x2bd   : > { %v11421_v22 = vpop.permute.xlu1 %1784 }
 0x2be   : > { %v1789_v16 = vpop.permute.xlu0 %1788 }
 0x2c1   : > { %v11426_v51 = vpop.permute.xlu1 %1829 }
 0x2c2   : > { %v1834_v42 = vpop.permute.xlu0 %1833 }
 0x2c5   : > { %v1868_v39 = vpop.permute.xlu1 %1867 }
 0x2c6   : > { %v1765_v0 = vpop.permute.xlu0 %1764 }
 0x2c9   : > { %v11434_v59 = vpop.permute.xlu1 %1869 }
 0x2ca   : > { %v1856_v26 = vpop.permute.xlu0 %1855 }
 0x2cb   : > { %v1941_v24 = vsel %vm1937_vm1, %v1930_v18, %v1856_v26 }
 0x2cc   : > { %v1952_v5 = vsel %vm1948_vm0, %v1941_v24, %v1868_v39  ;;  %v2494_v24 = vsel %vm14545_vm5, %v2484_v53, %v11168_v61 }
 0x2cd   : > { %v1966_v38 = vshrl.u32 %v1952_v5, 16  ;;  %v1969_v50 = vshll.u32 %v1952_v5, 16  ;;  %v1767_v12 = vpop.permute.xlu1 %1766  ;;  %v2504_v63 = vsel %vm706_vm6, %v2494_v24, %v11231_v33 }
 0x2ce   : > { %v1744_v58 = vpop.permute.xlu0 %1743  ;;  %v2514_v33 = vsel %vm14544_vm7, %v2504_v63, %v11272_v11 }
 0x2cf   : > { %v1968_v17 = vrot.slane %v1966_v38, 3  ;;  %v1971_v26 = vrot.slane %v1969_v50, 4  ;;  %v1884_v62 = vsel %vm342_vm4, %v11093_v1, %v1744_v58  ;;  %v2490_v1 = vsel %vm14545_vm5, %v2480_v31, %v11142_v10 }
 0x2d0   : > { %v1894_v34 = vsel %vm706_vm6, %v1884_v62, %v1769_v48  ;;  %v2500_v18 = vsel %vm706_vm6, %v2490_v1, %v11203_v27  ;;  %v2532_v50 = vsel %vm14542_vm9, %v2522_v49, %v11316_v28 }
 0x2d1   : > { %v11454_v21 = vor.u32 %v1971_v26, %v1968_v17  ;;  %v1787_v39 = vpop.permute.xlu1 %1786  ;;  %v1904_v2 = vsel %vm728_vm8, %v1894_v34, %v1789_v16  ;;  %v2510_v57 = vsel %vm14544_vm7, %v2500_v18, %v11234_v47  ;;  %v2542_v28 = vsel %vm750_vm10, %v2532_v50, %v11330_v36  ;;  %v14588_v50 = vld [vmem:[#allocation29_spill] sm:$0xff] }
 0x2d2   : > { %v1814_v20 = vpop.permute.xlu0 %1813  ;;  %v2520_v43 = vsel %vm728_vm8, %v2510_v57, %v11293_v41  ;;  %v2559_v31 = vshll.u32 %v2542_v28, 16  ;;  %v8703_v34 = vcombine.low %v10068_v37, %v10068_v37  ;;  %v14593_v37 = vld [vmem:[#allocation6_spill] sm:$0xff] }
 0x2d3   : > { %v1973_v6 = vsel %vm761_vm11, %v1965_v4, %v11454_v21  ;;  %v1914_v40 = vsel %vm750_vm10, %v1904_v2, %v1814_v20  ;;  %v2530_v41 = vsel %vm14542_vm9, %v2520_v43, %v11311_v52  ;;  %v10070_v43 = vld [vmem:[%s14471_s2 + $0x1c] sm:$0xff]  }
 0x2d4   : > { %9392 = vmatprep.mubr.msk.bf16.mxu1 %vm2025_vm14, %v1973_v6  ;;  %9410 = vmatprep.mubr.msk.bf16.mxu0 %vm2025_vm14, %v1973_v6  ;;  %v1925_v61 = vsel %vm1915_vm15, %v1914_v40, %v1834_v42  ;;  %v2540_v52 = vsel %vm750_vm10, %v2530_v41, %v11326_v32 }
 0x2d5   : > { %v1832_v48 = vpop.permute.xlu1 %1831  ;;  %v1936_v46 = vsel %vm1926_vm13, %v1925_v61, %v11078_v9  ;;  %v2549_v35 = vshrl.u32 %v2540_v52, 16  ;;  %v2552_v32 = vshll.u32 %v2540_v52, 16 }
 0x2d6   : > { %v1810_v10 = vpop.permute.xlu0 %1809  ;;  %v1947_v9 = vsel %vm1937_vm1, %v1936_v46, %v11088_v45  ;;  %v2556_v45 = vshrl.u32 %v2542_v28, 16  ;;  %v14589_v46 = vld [vmem:[#allocation8_spill] sm:$0xff] }
 0x2d7   : > { %v2551_v24 = vrot.slane %v2549_v35, 3  ;;  %v2554_v57 = vrot.slane %v2552_v32, 4  ;;  %v14591_v35 = vld [vmem:[#allocation33_spill] sm:$0xff] }
 0x2d9   : > { %v1740_v5 = vpop.permute.xlu1 %1739 }
 0x2da   : > { %v1880_v16 = vsel %vm342_vm4, %v11039_v8, %v1740_v5  ;;  %v1742_v27 = vpop.permute.xlu0 %1741  ;;  %v2478_v5 = vsel %vm14546_vm3, %v8703_v34, %v11337_v29 }
 0x2db   : > { %v1890_v15 = vsel %vm706_vm6, %v1880_v16, %v1765_v0  ;;  %v1882_v11 = vsel %vm342_vm4, %v11103_v7, %v1742_v27 }
 0x2dc   : > { %v1900_v47 = vsel %vm728_vm8, %v1890_v15, %v11421_v22  ;;  %v2524_v22 = vsel %vm728_vm8, %v2514_v33, %v11305_v3 }
 0x2dd   : > { %v1860_v38 = vpop.permute.xlu1 %1859  ;;  %v1910_v8 = vsel %vm750_vm10, %v1900_v47, %v1810_v10  ;;  %v2534_v3 = vsel %vm14542_vm9, %v2524_v22, %v11318_v13  ;;  %v2561_v10 = vrot.slane %v2559_v31, 4  ;;  %v2555_v47 = vor.u32 %v2554_v57, %v2551_v24 }
 0x2de   : > { %v11498_v42 = vpop.permute.xlu0 %2350  ;;  %v1921_v0 = vsel %vm1915_vm15, %v1910_v8, %v11426_v51  ;;  %v1892_v51 = vsel %vm706_vm6, %v1882_v11, %v1767_v12 }
 0x2df   : > { %v1932_v58 = vsel %vm1926_vm13, %v1921_v0, %v11412_v23  ;;  %v1958_v23 = vsel %vm1948_vm0, %v1947_v9, %v11096_v19  ;;  %v1902_v12 = vsel %vm728_vm8, %v1892_v51, %v1787_v39  ;;  %v2558_v19 = vrot.slane %v2556_v45, 3  ;;  %v10071_v51 = vld [vmem:[%s14471_s2 + $0x10] ss:$0 sps:$4 sm:$0x33]  }
 0x2e0   : > { %v1990_v53 = vshrl.u32 %v1958_v23, 16  ;;  %v1993_v60 = vshll.u32 %v1958_v23, 16  ;;  %v2544_v39 = vsel %vm750_vm10, %v2534_v3, %v11335_v44  ;;  %v2475_v0 = vsel %vm14546_vm3, %v14589_v46, %v14588_v50  ;;  %v14590_v3 = vld [vmem:[#allocation30_spill] sm:$0xff]  ;;  %v8757_v46 = vld [vmem:[%s10239_s29 + $0xac] sm:$0xf] }
 0x2e1   : > { %v1858_v25 = vpop.permute.xlu1 %1857  ;;  %v2562_v29 = vor.u32 %v2561_v10, %v2558_v19  ;;  %v2564_v33 = vshrl.u32 %v2544_v39, 16 }
 0x2e2   : > { %v1943_v7 = vsel %vm1937_vm1, %v1932_v58, %v1858_v25  ;;  %v2397_v17 = vpop.permute.xlu0 %2396  ;;  %v1992_v27 = vrot.slane %v1990_v53, 3  ;;  %v1995_v49 = vrot.slane %v1993_v60, 4 }
 0x2e3   : > { %v1954_v36 = vsel %vm1948_vm0, %v1943_v7, %v11434_v59  ;;  %v2566_v7 = vrot.slane %v2564_v33, 3  ;;  %v14604_v33 = vld [vmem:[#allocation22_spill] sm:$0xff] }
 0x2e4   : > { %v1974_v26 = vshrl.u32 %v1954_v36, 16  ;;  %v1977_v62 = vshll.u32 %v1954_v36, 16  ;;  %v1996_v22 = vor.u32 %v1995_v49, %v1992_v27  ;;  %v2486_v36 = vsel %vm342_vm4, %v2475_v0, %v14590_v3  ;;  %v10075_v49 = vld [vmem:[%s14471_s2 + $0x38] ss:$0 sps:$4 sm:$0x33]   ;;  %v14609_v0 = vld [vmem:[#allocation35_spill] sm:$0xff] }
 0x2e5   : > { %v1812_v4 = vpop.permute.xlu1 %1811  ;;  %v2496_v32 = vsel %vm14545_vm5, %v2486_v36, %v14591_v35  ;;  %v3802_v35 = vrot.slane %v14609_v0, 5 }
 0x2e6   : > { %v1976_v20 = vrot.slane %v1974_v26, 3  ;;  %v1979_v1 = vrot.slane %v1977_v62, 4  ;;  %v1912_v13 = vsel %vm750_vm10, %v1902_v12, %v1812_v4  ;;  %v2419_v6 = vpop.permute.xlu0 %2418  ;;  %v2563_v62 = vsel %vm761_vm11, %v2555_v47, %v2562_v29  ;;  %v14592_v4 = vld [vmem:[#allocation5_spill] sm:$0xff]  ;;  %v14603_v47 = vld [vmem:[#allocation27_spill] sm:$0xff] }
 0x2e7   : > { %v1923_v59 = vsel %vm1915_vm15, %v1912_v13, %v1832_v48  ;;  %v14594_v13 = vld [vmem:[#allocation17_spill] sm:$0xff] }
 0x2e8   : > { %v1980_v2 = vor.u32 %v1979_v1, %v1976_v20  ;;  %v1934_v18 = vsel %vm1926_vm13, %v1923_v59, %v11409_v56  ;;  %v10073_v1 = vld [vmem:[%s14471_s2 + $0x28] sm:$0xff]  }
 0x2e9   : > { %v1945_v14 = vsel %vm1937_vm1, %v1934_v18, %v1860_v38  ;;  %v2395_v40 = vpop.permute.xlu1 %2394  ;;  %v2567_v38 = vshll.u32 %v2544_v39, 16 }
 0x2ea   : > { %v1956_v48 = vsel %vm1948_vm0, %v1945_v14, %v11415_v55  ;;  %v2429_v63 = vpop.permute.xlu0 %2428  ;;  %v1981_v16 = vsel %vm761_vm11, %v11454_v21, %v1980_v2  ;;  %v10069_v55 = vld [vmem:[%s14471_s2 + $0x8] sm:$0xff]   ;;  %v2506_v20 = vsel %vm706_vm6, %v2496_v32, %v2395_v40 }
 0x2eb   : > { %9393 = vmatmul.mubr.msk.bf16.vlgmr.msra.gmra.mrb[16].mxu1 %vm2025_vm14, %v1981_v16  ;;  %9411 = vmatmul.mubr.msk.bf16.vlgmr.msra.gmra.mrb[24].mxu0 %vm2025_vm14, %v1981_v16  ;;  %v1982_v56 = vshrl.u32 %v1956_v48, 16  ;;  %v1985_v44 = vshll.u32 %v1956_v48, 16  ;;  %v10074_v48 = vld [vmem:[%s14471_s2 + $0x30] sm:$0xff]  }
 0x2ec   : > { %9419 = vmatpush3.bf16.msra.mxu1 %v11280_v54  ;;  %9433 = vmatpush3.bf16.msra.mxu0 %v11288_v30  ;;  %v14587_v54 = vld [vmem:[#allocation32_spill] sm:$0xff] }
 0x2ed   : > { %v2417_v61 = vpop.permute.xlu1 %2416  ;;  %9420 = vmatprep.subr.bf16.mxu1 %v10069_v55  ;;  %v1984_v21 = vrot.slane %v1982_v56, 3  ;;  %v1987_v15 = vrot.slane %v1985_v44, 4  ;;  %9434 = vmatprep.subr.bf16.mxu0 %v10070_v43  ;;  %v2488_v30 = vsel %vm342_vm4, %v2478_v5, %v14587_v54  ;;  %v14606_v54 = vld [vmem:[#allocation26_spill] sm:$0xff] }
 0x2ee   : > { %v2449_v8 = vpop.permute.xlu0 %2448  ;;  %v2498_v41 = vsel %vm14545_vm5, %v2488_v30, %v11498_v42  ;;  %v10072_v42 = vld [vmem:[%s14471_s2 + $0x24] ss:$0 sps:$4 sm:$0x33]   ;;  %v14607_v30 = vld [vmem:[#allocation28_spill] sm:$0xff]  ;;  %vm14634_vm5 = vsmask.f32 7424 }
 0x2ef   : > { %v1988_v11 = vor.u32 %v1987_v15, %v1984_v21  ;;  %v2508_v28 = vsel %vm706_vm6, %v2498_v41, %v2397_v17  ;;  %v2569_v17 = vrot.slane %v2567_v38, 4  ;;  %v14599_v21 = vld [vmem:[#allocation23_spill] sm:$0xff]  ;;  %v14600_v15 = vld [vmem:[#allocation25_spill] sm:$0xff]  ;;  %v14605_v38 = vld [vmem:[#allocation24_spill] sm:$0xff]  ;;  %v3755_v41 = vshrl.u32 %v14609_v0, 16 }
 0x2f0   : > { %9421 = vmatpush3.bf16.msra.mxu1 %v10069_v55  ;;  %9435 = vmatpush3.bf16.msra.mxu0 %v10070_v43  ;;  %v2518_v9 = vsel %vm14544_vm7, %v2508_v28, %v2419_v6  ;;  %v2516_v6 = vsel %vm14544_vm7, %v2506_v20, %v2417_v61  ;;  %v14597_v61 = vld [vmem:[#allocation7_spill] sm:$0xff]  ;;  %v14598_v55 = vld [vmem:[#allocation18_spill] sm:$0xff]  ;;  %v14602_v43 = vld [vmem:[#allocation20_spill] sm:$0xff] }
 0x2f1   : > { %v2427_v58 = vpop.permute.xlu1 %2426  ;;  %v1989_v25 = vsel %vm761_vm11, %v1980_v2, %v1988_v11  ;;  %v1997_v52 = vsel %vm761_vm11, %v1988_v11, %v1996_v22  ;;  %9891 = vmatprep.subr.msk.bf16.mxu1 %vm829_vm2, %v10071_v51  ;;  %9892 = vmatprep.subr.msk.bf16.mxu0 %vm829_vm2, %v10072_v42  ;;  %v2528_v45 = vsel %vm728_vm8, %v2518_v9, %v2429_v63  ;;  %v14595_v63 = vld [vmem:[#allocation19_spill] sm:$0xff]  ;;  %v3758_v11 = vshll.u32 %v14609_v0, 16  ;;  %v14610_v22 = vld [vmem:[#allocation37_spill] sm:$0xff] }
 0x2f2   : > { %v2466_v23 = vpop.permute.xlu0 %2465  ;;  %9396 = vmatprep.mubr.msk.bf16.mxu1 %vm2025_vm14, %v1989_v25  ;;  %9414 = vmatprep.mubr.msk.bf16.mxu0 %vm2025_vm14, %v1989_v25  ;;  %v2538_v26 = vsel %vm14542_vm9, %v2528_v45, %v2449_v8  ;;  %v2570_v34 = vor.u32 %v2569_v17, %v2566_v7  ;;  %v2526_v60 = vsel %vm728_vm8, %v2516_v6, %v2427_v58  ;;  %v14608_v8 = vld [vmem:[#allocation39_spill] sm:$0xff]  ;;  %v3763_v28 = vshrl.u32 %v14610_v22, 16  ;;  %v14611_v58 = vld [vmem:[#allocation42_spill] sm:$0xff] }
 0x2f3   : > { %9397 = vmatmul.mubr.msk.bf16.gmra.mrb[20].mxu1 %vm2025_vm14, %v1997_v52  ;;  %9415 = vmatmul.mubr.msk.bf16.gmra.mrb[28].mxu0 %vm2025_vm14, %v1997_v52  ;;  %v2548_v31 = vsel %vm750_vm10, %v2538_v26, %v2466_v23  ;;  %v3727_v50 = vrot.slane %v14608_v8, 5  ;;  %v3766_v9 = vshll.u32 %v14610_v22, 16  ;;  %v3757_v52 = vrot.slane %v3755_v41, 4  ;;  %v14613_v17 = vld [vmem:[#allocation34_spill] sm:$0xff]  ;;  %v2120_v41 = vld [vmem:[#allocation4 + $0x20] sm:$0xff] }
 0x2f4   : > { %9424 = vmatprep.mubr.msk.bf16.mxu1 %vm14543_vm12, %v2563_v62  ;;  %9438 = vmatprep.mubr.msk.bf16.mxu0 %vm14543_vm12, %v2563_v62  ;;  %v2580_v59 = vshrl.u32 %v2548_v31, 16  ;;  %v2583_v53 = vshll.u32 %v2548_v31, 16  ;;  %v2571_v10 = vsel %vm761_vm11, %v2562_v29, %v2570_v34  ;;  %v14596_v29 = vld [vmem:[#allocation21_spill] sm:$0xff]  ;;  %v3760_v51 = vrot.slane %v3758_v11, 5  ;;  %v14614_v23 = vld [vmem:[#allocation38_spill] sm:$0xff] }
 0x2f5   : > { %v2447_v12 = vpop.permute.xlu1 %2446  ;;  %9423 = vmatpush3.bf16.msra.mxu1 %v14592_v4  ;;  %9437 = vmatpush3.bf16.msra.mxu0 %v14593_v37  ;;  %v3765_v42 = vrot.slane %v3763_v28, 4  ;;  %v3768_v7 = vrot.slane %v3766_v9, 5  ;;  %v11650_v3 = vcombine.low %v14613_v17, %v8757_v46  ;;  %v2123_v9 = vld [vmem:[#allocation4 + $0x38] sm:$0xff] }
 0x2f6   : > { %9446 = vmatprep.subr.bf16.mxu1 %v10073_v1  ;;  %9460 = vmatprep.subr.bf16.mxu0 %v14594_v13  ;;  %v2536_v19 = vsel %vm14542_vm9, %v2526_v60, %v2447_v12  ;;  %v2582_v24 = vrot.slane %v2580_v59, 3  ;;  %v2585_v39 = vrot.slane %v2583_v53, 4  ;;  %vm14601_vm9 = vcmask 1043456   ;;  %v11674_v53 = vld [vmem:[%s10239_s29 + $0xb0] sm:$0xf] }
 0x2f7   : > { %v3761_v36 = vor.u32 %v3760_v51, %v3757_v52  ;;  %v3769_v45 = vor.u32 %v3768_v7, %v3765_v42  ;;  %v3775_v31 = vshll.u32 %v11650_v3, 16  ;;  %v3805_v20 = vrot.slane %v11650_v3, 5  ;;  %v2121_v7 = vld [vmem:[#allocation4 + $0x28] sm:$0xff] }
 0x2f8   : > { %v2586_v16 = vor.u32 %v2585_v39, %v2582_v24  ;;  %v11678_v60 = vcombine.low %v8757_v46, %v11674_v53  ;;  %v14617_v24 = vld [vmem:[#allocation40_spill] sm:$0xff]  ;;  %v2122_v46 = vld [vmem:[#allocation4 + $0x30] sm:$0xff] }
 0x2f9   : > { %v2464_v2 = vpop.permute.xlu1 %2463  ;;  %v3777_v12 = vrot.slane %v3775_v31, 5 }
 0x2fa   : > { %v2546_v18 = vsel %vm750_vm10, %v2536_v19, %v2464_v2  ;;  %v3703_v19 = vshrl.u32 %v11678_v60, 16  ;;  %v3706_v2 = vshll.u32 %v11678_v60, 16 }
 0x2fb   : > { %v2572_v14 = vshrl.u32 %v2546_v18, 16  ;;  %v2575_v40 = vshll.u32 %v2546_v18, 16  ;;  %9425 = vmatmul.mubr.msk.bf16.vlgmr.msra.gmra.mrb[24].mxu1 %vm14543_vm12, %v2571_v10  ;;  %9439 = vmatmul.mubr.msk.bf16.vlgmr.msra.gmra.mrb[32].mxu0 %vm14543_vm12, %v2571_v10 }
 0x2fc   : > { %9447 = vmatpush3.bf16.msra.mxu1 %v10073_v1  ;;  %9461 = vmatpush3.bf16.msra.mxu0 %v14594_v13  ;;  %v3705_v18 = vrot.slane %v3703_v19, 4 }
 0x2fd   : > { %v2574_v57 = vrot.slane %v2572_v14, 3  ;;  %v2577_v5 = vrot.slane %v2575_v40, 4  ;;  %9448 = vmatprep.subr.bf16.mxu1 %v10074_v48  ;;  %9462 = vmatprep.subr.bf16.mxu0 %v14595_v63  ;;  %v14618_v14 = vld [vmem:[#allocation41_spill] sm:$0xff] }
 0x2ff   : > { %v2578_v56 = vor.u32 %v2577_v5, %v2574_v57  ;;  %v14620_v57 = vld [vmem:[#allocation43_spill] sm:$0xff] }
 0x300   : > { %9449 = vmatpush3.bf16.msra.mxu1 %v10074_v48  ;;  %9463 = vmatpush3.bf16.msra.mxu0 %v14595_v63  ;;  %v2118_v5 = vld [vmem:[#allocation4 + $0x10] sm:$0xff]  ;;  %v2116_v48 = vld [vmem:[#allocation4] sm:$0xff] }
 0x301   : > { %v2579_v44 = vsel %vm761_vm11, %v2570_v34, %v2578_v56  ;;  %v2587_v27 = vsel %vm761_vm11, %v2578_v56, %v2586_v16  ;;  %9893 = vmatprep.subr.msk.bf16.mxu1 %vm829_vm2, %v10075_v49  ;;  %9464 = vmatprep.subr.bf16.mxu0 %v14596_v29  ;;  %v3803_v34 = vrot.slane %v14610_v22, 5  ;;  %v2119_v56 = vld [vmem:[#allocation4 + $0x18] sm:$0xff] }
 0x302   : > { %9428 = vmatprep.mubr.msk.bf16.mxu1 %vm14543_vm12, %v2579_v44  ;;  %9442 = vmatprep.mubr.msk.bf16.mxu0 %vm14543_vm12, %v2579_v44 }
 0x303   : > { %9429 = vmatmul.mubr.msk.bf16.gmra.mrb[28].mxu1 %vm14543_vm12, %v2587_v27  ;;  %9443 = vmatmul.mubr.msk.bf16.gmra.mrb[36].mxu0 %vm14543_vm12, %v2587_v27 }
 0x304   : > { %9452 = vmatprep.mubr.msk.bf16.mxu1 %vm14543_vm12, %v2563_v62  ;;  %9451 = vmatpush3.bf16.msra.mxu1 %v14597_v61  ;;  %v3772_v62 = vshrl.u32 %v11650_v3, 16 }
 0x305   : > { %9478 = vmatprep.subr.bf16.mxu1 %v14598_v55  ;;  %9465 = vmatpush3.bf16.msra.mxu0 %v14596_v29  ;;  %v2117_v29 = vld [vmem:[#allocation4 + $0x8] sm:$0xff] }
 0x306   : > { %9466 = vmatprep.subr.bf16.mxu0 %v14599_v21  ;;  %v3774_v32 = vrot.slane %v3772_v62, 4 }
 0x308   : > { %v11663_v1 = vor.u32 %v3777_v12, %v3774_v32  ;;  %v2675_v32 = vld [vmem:[#allocation3 + $0x90] sm:$0xff] }
 0x309   : > { %9467 = vmatpush3.bf16.msra.mxu0 %v14599_v21 }
 0x30a   : > { %9894 = vmatprep.subr.msk.bf16.mxu0 %vm14601_vm9, %v14600_v15 }
 0x30b   : > { %9453 = vmatmul.mubr.msk.bf16.vlgmr.msra.gmra.mrb[32].mxu1 %vm14543_vm12, %v2571_v10  ;;  %v3708_v10 = vrot.slane %v3706_v2, 5 }
 0x30c   : > { %9456 = vmatprep.mubr.msk.bf16.mxu1 %vm14543_vm12, %v2579_v44  ;;  %9479 = vmatpush3.bf16.msra.mxu1 %v14598_v55 }
 0x30d   : > { %9480 = vmatprep.subr.bf16.mxu1 %v14602_v43  ;;  %9469 = vmatpush3.bf16.msra.mxu0 %v14603_v47  ;;  %v11688_v39 = vor.u32 %v3708_v10, %v3705_v18  ;;  %v2676_v18 = vld [vmem:[#allocation3 + $0x98] sm:$0xff] }
 0x310   : > { %9481 = vmatpush3.bf16.msra.mxu1 %v14602_v43 }
 0x311   : > { %9482 = vmatprep.subr.bf16.mxu1 %v14604_v33 }
 0x313   : > { %9457 = vmatmul.mubr.msk.bf16.gmra.mrb[36].mxu1 %vm14543_vm12, %v2587_v27  ;;  %vm14612_vm12 = vcmask 1042432  }
 0x314   : > { %9483 = vmatpush3.bf16.msra.mxu1 %v14604_v33  ;;  %v11645_v25 = vsel %vm14612_vm12, %v14611_v58, %v3727_v50  ;;  %v3806_v13 = vsel %vm14612_vm12, %v3803_v34, %v3805_v20  ;;  %vm14616_vm7 = vmmov %vm14612_vm12  ;;  %vm14629_vm12 = vcmask 1046528  }
 0x315   : > { %9484 = vmatprep.subr.bf16.mxu1 %v14605_v38  ;;  %3737 = vrot.lane.b32.xlu0 %v11645_v25, %s10172_s8  ;;  %v3804_v59 = vsel %vm14616_vm7, %v3802_v35, %v3803_v34 }
 0x318   : > { %9485 = vmatpush3.bf16.msra.mxu1 %v14605_v38 }
 0x319   : > { %9895 = vmatprep.subr.msk.bf16.mxu1 %vm14601_vm9, %v14606_v54  ;;  %3745 = vrot.lane.b32.xlu0 %v14614_v23, %s10171_s30  ;;  %vm14615_vm9 = vsmask.f32 3328 }
 0x31a   : > { %v3770_v26 = vsel %vm14615_vm9, %v3761_v36, %v3769_v45  ;;  %v3779_v6 = vsel %vm14615_vm9, %v3769_v45, %v11663_v1  ;;  %vm14619_vm7 = vmmov %vm14615_vm9 }
 0x31b   : > { %3791 = vrot.lane.b32.xlu1 %v3770_v26, %s10173_s9  ;;  %v11695_v40 = vsel %vm14619_vm7, %v14618_v14, %v11688_v39  ;;  %vm14630_vm9 = vmmov %vm14629_vm12  ;;  %vm14631_vm7 = vcmask 1043456  }
 0x31c   : > { %9487 = vmatpush3.bf16.msra.mxu1 %v14607_v30 }
 0x31d   : > { %3789 = vrot.lane.b32.xlu0 %v3761_v36, %s10173_s9 }
 0x31f   : > { %3811 = vrot.lane.b32.xlu1 %v3802_v35, %s10175_s11 }
 0x321   : > { %3793 = vrot.lane.b32.xlu0 %v3779_v6, %s10173_s9  ;;  %v2673_v6 = vld [vmem:[#allocation3 + $0x80] sm:$0xff] }
 0x323   : > { %3815 = vrot.lane.b32.xlu1 %v3806_v13, %s10175_s11 }
 0x325   : > { %3813 = vrot.lane.b32.xlu0 %v3804_v59, %s10175_s11 }
 0x327   : > { %3823 = vrot.lane.b32.xlu1 %v14610_v22, %s10176_s12 }
 0x329   : > { %3821 = vrot.lane.b32.xlu0 %v14609_v0, %s10176_s12 }
 0x32b   : > { %3841 = vrot.lane.b32.xlu1 %v14617_v24, %s10177_s21 }
 0x32d   : > { %3825 = vrot.lane.b32.xlu0 %v11650_v3, %s10176_s12 }
 0x32f   : > { %3845 = vrot.lane.b32.xlu1 %v11695_v40, %s10177_s21 }
 0x331   : > { %3843 = vrot.lane.b32.xlu0 %v14620_v57, %s10177_s21  ;;  %v2674_v57 = vld [vmem:[#allocation3 + $0x88] sm:$0xff] }
 0x3be   : > { %v9394_v63 = vpop.f32.mrb[16].mxu1  ;;  %v9412_v16 = vpop.f32.mrb[24].mxu0 }
 0x3bf   : > { %2110 = vst.msk [vmem:[#allocation4 + $0x50] sm:$0xff] %vm342_vm4, %v9394_v63  ;;  %v2221_v44 = vadd.f32 %v9412_v16, %v2118_v5  ;;  %v2076_v27 = vpop.f32.mrb[17].mxu1  ;;  %v2188_v49 = vpop.f32.mrb[25].mxu0  ;;  %v2679_v16 = vld [vmem:[#allocation3 + $0xb0] sm:$0xff] }
 0x3c0   : > { %2108 = vst.msk [vmem:[#allocation4 + $0x40] sm:$0xff] %vm342_vm4, %v2076_v27  ;;  %v2219_v55 = vadd.f32 %v2188_v49, %v2116_v48  ;;  %v9395_v21 = vpop.f32.mrb[18].mxu1  ;;  %v9413_v15 = vpop.f32.mrb[26].mxu0  ;;  %v2677_v49 = vld [vmem:[#allocation3 + $0xa0] sm:$0xff] }
 0x3c1   : > { %2229 = vst.msk [vmem:[#allocation4 + $0x10] sm:$0xff] %vm342_vm4, %v2221_v44  ;;  %2111 = vst.msk [vmem:[#allocation4 + $0x58] sm:$0xff] %vm342_vm4, %v9395_v21  ;;  %v2222_v43 = vadd.f32 %v9413_v15, %v2119_v56  ;;  %v2079_v33 = vpop.f32.mrb[19].mxu1  ;;  %v2191_v38 = vpop.f32.mrb[27].mxu0  ;;  %v2680_v15 = vld [vmem:[#allocation3 + $0xb8] sm:$0xff] }
 0x3c2   : > { %2227 = vst.msk [vmem:[#allocation4] sm:$0xff] %vm342_vm4, %v2219_v55  ;;  %2109 = vst.msk [vmem:[#allocation4 + $0x48] sm:$0xff] %vm342_vm4, %v2079_v33  ;;  %v2220_v54 = vadd.f32 %v2191_v38, %v2117_v29 }
 0x3c3   : > { %2230 = vst.msk [vmem:[#allocation4 + $0x18] sm:$0xff] %vm342_vm4, %v2222_v43 }
 0x3c4   : > { %2228 = vst.msk [vmem:[#allocation4 + $0x8] sm:$0xff] %vm342_vm4, %v2220_v54  ;;  %v2678_v54 = vld [vmem:[#allocation3 + $0xa8] sm:$0xff] }
 0x3c6   : > { %v9398_v11 = vpop.f32.mrb[20].mxu1  ;;  %v9416_v28 = vpop.f32.mrb[28].mxu0 }
 0x3c7   : > { %2114 = vst.msk [vmem:[#allocation4 + $0x70] sm:$0xff] %vm342_vm4, %v9398_v11  ;;  %v2225_v52 = vadd.f32 %v9416_v28, %v2122_v46  ;;  %v2092_v51 = vpop.f32.mrb[21].mxu1  ;;  %v2204_v42 = vpop.f32.mrb[29].mxu0  ;;  %v2764_v11 = vld [vmem:[#allocation3 + $0x50] sm:$0xff] }
 0x3c8   : > { %2112 = vst.msk [vmem:[#allocation4 + $0x60] sm:$0xff] %vm342_vm4, %v2092_v51  ;;  %v2223_v17 = vadd.f32 %v2204_v42, %v2120_v41  ;;  %v9399_v36 = vpop.f32.mrb[22].mxu1  ;;  %v9417_v45 = vpop.f32.mrb[30].mxu0 }
 0x3c9   : > { %2233 = vst.msk [vmem:[#allocation4 + $0x30] sm:$0xff] %vm342_vm4, %v2225_v52  ;;  %2115 = vst.msk [vmem:[#allocation4 + $0x78] sm:$0xff] %vm342_vm4, %v9399_v36  ;;  %v2226_v23 = vadd.f32 %v9417_v45, %v2123_v9  ;;  %v2095_v26 = vpop.f32.mrb[23].mxu1  ;;  %v2207_v62 = vpop.f32.mrb[31].mxu0  ;;  %v2762_v52 = vld [vmem:[#allocation3 + $0x40] sm:$0xff]  ;;  %v2763_v45 = vld [vmem:[#allocation3 + $0x48] sm:$0xff] }
 0x3ca   : > { %2231 = vst.msk [vmem:[#allocation4 + $0x20] sm:$0xff] %vm342_vm4, %v2223_v17  ;;  %2113 = vst.msk [vmem:[#allocation4 + $0x68] sm:$0xff] %vm342_vm4, %v2095_v26  ;;  %v2224_v31 = vadd.f32 %v2207_v62, %v2121_v7  ;;  %v2765_v7 = vld [vmem:[#allocation3 + $0x58] sm:$0xff]  ;;  %v2768_v62 = vld [vmem:[#allocation3 + $0x70] sm:$0xff] }
 0x3cb   : > { %2234 = vst.msk [vmem:[#allocation4 + $0x38] sm:$0xff] %vm342_vm4, %v2226_v23 }
 0x3cc   : > { %2232 = vst.msk [vmem:[#allocation4 + $0x28] sm:$0xff] %vm342_vm4, %v2224_v31 }
 0x3ce   : > { %v9426_v35 = vpop.f32.mrb[24].mxu1  ;;  %v9440_v12 = vpop.f32.mrb[32].mxu0 }
 0x3cf   : > { %2667 = vst.msk [vmem:[#allocation3 + $0x10] sm:$0xff] %vm342_vm4, %v9426_v35  ;;  %v2748_v34 = vadd.f32 %v9440_v12, %v2675_v32  ;;  %v2634_v13 = vpop.f32.mrb[25].mxu1  ;;  %v2715_v59 = vpop.f32.mrb[33].mxu0  ;;  %v2766_v32 = vld [vmem:[#allocation3 + $0x60] sm:$0xff] }
 0x3d0   : > { %2665 = vst.msk [vmem:[#allocation3] sm:$0xff] %vm342_vm4, %v2634_v13  ;;  %v2746_v19 = vadd.f32 %v2715_v59, %v2673_v6  ;;  %v9427_v2 = vpop.f32.mrb[26].mxu1  ;;  %v9441_v10 = vpop.f32.mrb[34].mxu0  ;;  %v2769_v6 = vld [vmem:[#allocation3 + $0x78] sm:$0xff] }
 0x3d1   : > { %2756 = vst.msk [vmem:[#allocation3 + $0x90] sm:$0xff] %vm342_vm4, %v2748_v34  ;;  %2668 = vst.msk [vmem:[#allocation3 + $0x18] sm:$0xff] %vm342_vm4, %v9427_v2  ;;  %v2749_v24 = vadd.f32 %v9441_v10, %v2676_v18  ;;  %v2637_v14 = vpop.f32.mrb[27].mxu1  ;;  %v2718_v5 = vpop.f32.mrb[35].mxu0 }
 0x3d2   : > { %2754 = vst.msk [vmem:[#allocation3 + $0x80] sm:$0xff] %vm342_vm4, %v2746_v19  ;;  %2666 = vst.msk [vmem:[#allocation3 + $0x8] sm:$0xff] %vm342_vm4, %v2637_v14  ;;  %v2747_v48 = vadd.f32 %v2718_v5, %v2674_v57  ;;  %v10076_v19 = vld [vmem:[%s14472_s3] ss:$0 sm:$0xff] }
 0x3d3   : > { %2757 = vst.msk [vmem:[#allocation3 + $0x98] sm:$0xff] %vm342_vm4, %v2749_v24  ;;  %v2767_v24 = vld [vmem:[#allocation3 + $0x68] sm:$0xff] }
 0x3d4   : > { %2755 = vst.msk [vmem:[#allocation3 + $0x88] sm:$0xff] %vm342_vm4, %v2747_v48 }
 0x3d6   : > { %v9430_v63 = vpop.f32.mrb[28].mxu1  ;;  %v9444_v56 = vpop.f32.mrb[36].mxu0 }
 0x3d7   : > { %2671 = vst.msk [vmem:[#allocation3 + $0x30] sm:$0xff] %vm342_vm4, %v9430_v63  ;;  %v2752_v44 = vadd.f32 %v9444_v56, %v2679_v16  ;;  %v2650_v27 = vpop.f32.mrb[29].mxu1  ;;  %v2731_v29 = vpop.f32.mrb[37].mxu0 }
 0x3d8   : > { %2669 = vst.msk [vmem:[#allocation3 + $0x20] sm:$0xff] %vm342_vm4, %v2650_v27  ;;  %v2750_v55 = vadd.f32 %v2731_v29, %v2677_v49  ;;  %v9431_v21 = vpop.f32.mrb[30].mxu1  ;;  %v9445_v43 = vpop.f32.mrb[38].mxu0 }
 0x3d9   : > { %2760 = vst.msk [vmem:[#allocation3 + $0xb0] sm:$0xff] %vm342_vm4, %v2752_v44  ;;  %2672 = vst.msk [vmem:[#allocation3 + $0x38] sm:$0xff] %vm342_vm4, %v9431_v21  ;;  %v2753_v33 = vadd.f32 %v9445_v43, %v2680_v15  ;;  %v2653_v38 = vpop.f32.mrb[31].mxu1  ;;  %v2734_v46 = vpop.f32.mrb[39].mxu0  ;;  %v14622_v15 = vld [vmem:[#allocation12_spill] sm:$0xff] }
 0x3da   : > { %2758 = vst.msk [vmem:[#allocation3 + $0xa0] sm:$0xff] %vm342_vm4, %v2750_v55  ;;  %2670 = vst.msk [vmem:[#allocation3 + $0x28] sm:$0xff] %vm342_vm4, %v2653_v38  ;;  %v2751_v41 = vadd.f32 %v2734_v46, %v2678_v54  ;;  %v14621_v55 = vld [vmem:[#allocation11_spill] sm:$0xff]  ;;  %v14624_v54 = vld [vmem:[#allocation9_spill] sm:$0xff] }
 0x3db   : > { %2761 = vst.msk [vmem:[#allocation3 + $0xb8] sm:$0xff] %vm342_vm4, %v2753_v33  ;;  %v14623_v33 = vld [vmem:[#allocation10_spill] sm:$0xff] }
 0x3dc   : > { %2759 = vst.msk [vmem:[#allocation3 + $0xa8] sm:$0xff] %vm342_vm4, %v2751_v41 }
 0x3de   : > { %v9454_v28 = vpop.f32.mrb[32].mxu1 }
 0x3df   : > { %v2837_v9 = vadd.f32 %v9454_v28, %v2764_v11  ;;  %v2804_v51 = vpop.f32.mrb[33].mxu1 }
 0x3e0   : > { %v2835_v42 = vadd.f32 %v2804_v51, %v2762_v52  ;;  %v9455_v17 = vpop.f32.mrb[34].mxu1 }
 0x3e1   : > { %2845 = vst.msk [vmem:[#allocation3 + $0x50] sm:$0xff] %vm342_vm4, %v2837_v9  ;;  %v2838_v36 = vadd.f32 %v9455_v17, %v2765_v7  ;;  %v2807_v23 = vpop.f32.mrb[35].mxu1 }
 0x3e2   : > { %2843 = vst.msk [vmem:[#allocation3 + $0x40] sm:$0xff] %vm342_vm4, %v2835_v42  ;;  %v2836_v26 = vadd.f32 %v2807_v23, %v2763_v45 }
 0x3e3   : > { %2846 = vst.msk [vmem:[#allocation3 + $0x58] sm:$0xff] %vm342_vm4, %v2838_v36 }
 0x3e4   : > { %2844 = vst.msk [vmem:[#allocation3 + $0x48] sm:$0xff] %vm342_vm4, %v2836_v26 }
 0x3e6   : > { %v9458_v31 = vpop.f32.mrb[36].mxu1 }
 0x3e7   : > { %v2841_v35 = vadd.f32 %v9458_v31, %v2768_v62  ;;  %v2820_v12 = vpop.f32.mrb[37].mxu1  ;;  %v14625_v31 = vld [vmem:[#allocation15_spill] sm:$0xff] }
 0x3e8   : > { %v2853_v34 = vld [vmem:[#allocation3 + $0x50] sm:$0xff]  ;;  %v2839_v13 = vadd.f32 %v2820_v12, %v2766_v32  ;;  %v9459_v59 = vpop.f32.mrb[38].mxu1  ;;  %v14626_v32 = vld [vmem:[#allocation16_spill] sm:$0xff] }
 0x3e9   : > { %v2861_v2 = vadd.f32 %v10076_v19, %v2853_v34  ;;  %v2851_v18 = vld [vmem:[#allocation3 + $0x40] sm:$0xff]  ;;  %2849 = vst.msk [vmem:[#allocation3 + $0x70] sm:$0xff] %vm342_vm4, %v2841_v35  ;;  %v2842_v10 = vadd.f32 %v9459_v59, %v2769_v6  ;;  %v2823_v14 = vpop.f32.mrb[39].mxu1  ;;  %v14628_v6 = vld [vmem:[#allocation14_spill] sm:$0xff] }
 0x3ea   : > { %v2859_v57 = vadd.f32 %v10076_v19, %v2851_v18  ;;  %v2854_v5 = vld [vmem:[#allocation3 + $0x58] sm:$0xff]  ;;  %2847 = vst.msk [vmem:[#allocation3 + $0x60] sm:$0xff] %vm342_vm4, %v2839_v13  ;;  %v2840_v48 = vadd.f32 %v2823_v14, %v2767_v24  ;;  %v14627_v34 = vld [vmem:[#allocation13_spill] sm:$0xff]  ;;  %v11754_v18 = vld [vmem:[#allocation2] sm:$0xff] }
 0x3eb   : > { %v2869_v63 = vmax.f32 %v2861_v2, 0.0  ;;  %v2862_v16 = vadd.f32 %v10076_v19, %v2854_v5  ;;  %v2852_v56 = vld [vmem:[#allocation3 + $0x48] sm:$0xff]  ;;  %2850 = vst.msk [vmem:[#allocation3 + $0x78] sm:$0xff] %vm342_vm4, %v2842_v10  ;;  %v2951_v14 = vrot.slane %v11754_v18, 1 }
 0x3ec   : > { %v2867_v44 = vmax.f32 %v2859_v57, 0.0  ;;  %v2860_v27 = vadd.f32 %v10076_v19, %v2852_v56  ;;  %2848 = vst.msk [vmem:[#allocation3 + $0x68] sm:$0xff] %vm342_vm4, %v2840_v48  ;;  %v2900_v48 = vshll.u32 %v11754_v18, 16 }
 0x3ed   : > { %v2870_v49 = vmax.f32 %v2862_v16, 0.0  ;;  %v2877_v21 = vmul.f32 %v2869_v63, %v14621_v55 }
 0x3ee   : > { %v2868_v29 = vmax.f32 %v2860_v27, 0.0  ;;  %v2875_v38 = vmul.f32 %v2867_v44, %v14623_v33  ;;  %v2970_v27 = vrot.slane %v11754_v18, 4 }
 0x3ef   : > { %v2878_v43 = vmul.f32 %v2870_v49, %v14622_v15  ;;  %v2898_v49 = vshrl.u32 %v11754_v18, 16 }
 0x3f0   : > { %v2876_v46 = vmul.f32 %v2868_v29, %v14624_v54  ;;  %v2857_v41 = vld [vmem:[#allocation3 + $0x70] sm:$0xff]  ;;  %v2902_v29 = vrot.slane %v2900_v48, 1 }
 0x3f1   : > { %v2884_v11 = vpack.c.bf16 %v2878_v43, %v2877_v21  ;;  %v2865_v28 = vadd.f32 %v10076_v19, %v2857_v41  ;;  %v2855_v9 = vld [vmem:[#allocation3 + $0x60] sm:$0xff] }
 0x3f2   : > { %v2883_v52 = vpack.c.bf16 %v2876_v46, %v2875_v38  ;;  %v2863_v51 = vadd.f32 %v10076_v19, %v2855_v9  ;;  %v2858_v42 = vld [vmem:[#allocation3 + $0x78] sm:$0xff] }
 0x3f3   : > { %2888 = vst.msk [vmem:[#allocation2 + $0x10] sm:$0xff] %vm342_vm4, %v2884_v11  ;;  %v2873_v7 = vmax.f32 %v2865_v28, 0.0  ;;  %v2866_v17 = vadd.f32 %v10076_v19, %v2858_v42  ;;  %v2856_v36 = vld [vmem:[#allocation3 + $0x68] sm:$0xff] }
 0x3f4   : > { %2887 = vst.msk [vmem:[#allocation2 + $0x8] sm:$0xff] %vm342_vm4, %v2883_v52  ;;  %v2871_v45 = vmax.f32 %v2863_v51, 0.0  ;;  %v2864_v23 = vadd.f32 %v10076_v19, %v2856_v36  ;;  %v2903_v52 = vor.u32 %v2902_v29, %v2898_v49 }
 0x3f5   : > { %v2874_v26 = vmax.f32 %v2866_v17, 0.0  ;;  %v2881_v35 = vmul.f32 %v2873_v7, %v14625_v31 }
 0x3f6   : > { %v2872_v62 = vmax.f32 %v2864_v23, 0.0  ;;  %v2879_v13 = vmul.f32 %v2871_v45, %v14627_v34 }
 0x3f7   : > { %v2882_v12 = vmul.f32 %v2874_v26, %v14626_v32 }
 0x3f8   : > { %v2880_v59 = vmul.f32 %v2872_v62, %v14628_v6 }
 0x3f9   : > { %v2886_v2 = vpack.c.bf16 %v2882_v12, %v2881_v35 }
 0x3fa   : > { %v2885_v10 = vpack.c.bf16 %v2880_v59, %v2879_v13  ;;  %v11756_v24 = vld [vmem:[#allocation2 + $0x10] sm:$0xff] }
 0x3fb   : > { %2890 = vst.msk [vmem:[#allocation2 + $0x20] sm:$0xff] %vm342_vm4, %v2886_v2  ;;  %3036 = vrot.lane.b32.xlu1 %v11756_v24, %s10181_s26  ;;  %v11762_v19 = vld [vmem:[#allocation2 + $0x8] sm:$0xff]  ;;  %v2954_v16 = vrot.slane %v11756_v24, 1  ;;  %v2973_v44 = vrot.slane %v11756_v24, 4  ;;  %v2913_v21 = vshll.u32 %v11756_v24, 16  ;;  %v2917_v41 = vshrl.u32 %v11756_v24, 16 }
 0x3fc   : > { %2889 = vst.msk [vmem:[#allocation2 + $0x18] sm:$0xff] %vm342_vm4, %v2885_v10  ;;  %3034 = vrot.lane.b32.xlu0 %v11762_v19, %s10181_s26  ;;  %v3015_v57 = vrot.slane %v11762_v19, 5  ;;  %v2952_v5 = vrot.slane %v11762_v19, 1  ;;  %v2971_v56 = vrot.slane %v11762_v19, 4  ;;  %v2905_v38 = vshll.u32 %v11762_v19, 16 }
 0x3fd   : > { %v2909_v46 = vshrl.u32 %v11762_v19, 16  ;;  %v3016_v28 = vrot.slane %v11756_v24, 5  ;;  %v2993_v51 = vrot.slane %v2913_v21, 5  ;;  %v2992_v36 = vrot.slane %v2917_v41, 4 }
 0x3fe   : > { %v2953_v63 = vsel %vm14629_vm12, %v2951_v14, %v2952_v5  ;;  %v2955_v43 = vsel %vm14630_vm9, %v2952_v5, %v2954_v16  ;;  %v2974_v11 = vsel %vm14631_vm7, %v2971_v56, %v2973_v44  ;;  %vm14632_vm12 = vmmov %vm14631_vm7  ;;  %v2907_v42 = vrot.slane %v2905_v38, 1 }
 0x3ff   : > { %3024 = vrot.lane.b32.xlu1 %v3015_v57, %s10184_s16  ;;  %v2972_v9 = vsel %vm14632_vm12, %v2970_v27, %v2971_v56  ;;  %v2989_v7 = vrot.slane %v2909_v46, 4  ;;  %v2990_v17 = vrot.slane %v2905_v38, 5  ;;  %vm14633_vm9 = vcmask 1042432   ;;  %vm14636_vm12 = vmmov %vm14634_vm5  ;;  %v11826_v38 = vpop.permute.xlu0 %3042 }
 0x400   : > { %2960 = vrot.lane.b32.xlu0 %v2953_v63, %s10173_s9  ;;  %v3017_v45 = vsel %vm14633_vm9, %v3015_v57, %v3016_v28  ;;  %v2908_v23 = vsel %vm14634_vm5, %v2903_v52, %v2907_v42  ;;  %v11794_v62 = vor.u32 %v2993_v51, %v2992_v36  ;;  %vm14635_vm7 = vsmask.f32 3328  ;;  %v14637_v57 = vld [vmem:[#allocation31_spill] sm:$0xff] }
 0x401   : > { %v2991_v26 = vor.u32 %v2990_v17, %v2989_v7  ;;  %v2911_v12 = vor.u32 %v2909_v46, %v2907_v42  ;;  %v2915_v13 = vrot.slane %v2913_v21, 1  ;;  %v14638_v5 = vrot.slane %v14637_v57, 1  ;;  %v10077_v21 = vld [vmem:[#allocation2 + $0x28] sm:$0xff] }
 0x402   : > { %v11804_v2 = vld [vmem:[#allocation2 + $0x20] sm:$0xff]  ;;  %vm14639_vm5 = vcmask 1046528   ;;  %vm14640_vm9 = vcmask 1043456  }
 0x403   : > { %2962 = vrot.lane.b32.xlu1 %v2955_v43, %s10173_s9  ;;  %v2995_v35 = vsel %vm14635_vm7, %v2991_v26, %v11794_v62  ;;  %v2916_v59 = vsel %vm14636_vm12, %v2911_v12, %v2915_v13  ;;  %v2958_v10 = vrot.slane %v11804_v2, 1  ;;  %v11810_v14 = vld [vmem:[#allocation2 + $0x18] sm:$0xff]  ;;  %v2977_v27 = vrot.slane %v11804_v2, 4 }
 0x404   : > { %2981 = vrot.lane.b32.xlu0 %v2974_v11, %s10176_s12  ;;  %v2975_v63 = vrot.slane %v11810_v14, 4  ;;  %v3018_v49 = vrot.slane %v11810_v14, 5  ;;  %v3020_v29 = vrot.slane %v11804_v2, 5  ;;  %vm14641_vm7 = vcmask 1042432  }
 0x405   : > { %v3063_v48 = vsel %vm14639_vm5, %v2958_v10, %v14638_v5  ;;  %v2956_v11 = vrot.slane %v11810_v14, 1  ;;  %vm14642_vm12 = vmmov %vm14641_vm7  ;;  %v2929_v51 = vshll.u32 %v11804_v2, 16  ;;  %v2919_v7 = vor.u32 %v2917_v41, %v2915_v13 }
 0x406   : > { %v2976_v56 = vsel %vm14640_vm9, %v2973_v44, %v2975_v63  ;;  %v3019_v46 = vsel %vm14641_vm7, %v3016_v28, %v3018_v49  ;;  %v11839_v28 = vpop.permute.xlu0 %3060  ;;  %vm14643_vm9 = vmmov %vm14639_vm5  ;;  %vm14644_vm7 = vsmask.f32 7424 }
 0x407   : > { %2979 = vrot.lane.b32.xlu1 %v2972_v9, %s10176_s12  ;;  %v2921_v9 = vshll.u32 %v11810_v14, 16  ;;  %v2957_v52 = vsel %vm14639_vm5, %v2954_v16, %v2956_v11  ;;  %v2959_v17 = vsel %vm14643_vm9, %v2956_v11, %v2958_v10  ;;  %v2931_v36 = vrot.slane %v2929_v51, 1 }
 0x408   : > { %3026 = vrot.lane.b32.xlu0 %v3017_v45, %s10184_s16  ;;  %v2933_v45 = vshrl.u32 %v11804_v2, 16  ;;  %v2925_v16 = vshrl.u32 %v11810_v14, 16  ;;  %v3001_v41 = vrot.slane %v2929_v51, 5  ;;  %vm14646_vm5 = vcmask 1042432   ;;  %v11886_v51 = vld [vmem:[%s14473_s4 + $0x48] sm:$0xff]  }
 0x409   : > { %v2923_v42 = vrot.slane %v2921_v9, 1  ;;  %vm14647_vm9 = vsmask.f32 3328  ;;  %9496 = vmatprep.subr.bf16.mxu0 %v11886_v51 }
 0x40a   : > { %v2935_v12 = vor.u32 %v2933_v45, %v2931_v36  ;;  %v2996_v13 = vrot.slane %v2925_v16, 4 }
 0x40b   : > { %2936 = vrot.lane.b32.xlu1 %v2908_v23, %s10172_s8  ;;  %v2924_v23 = vsel %vm14644_vm7, %v2919_v7, %v2923_v42  ;;  %v2927_v11 = vor.u32 %v2925_v16, %v2923_v42  ;;  %v11893_v7 = vld [vmem:[%s14475_s6] sm:$0x3] }
 0x40c   : > { %3064 = vrot.lane.b32.xlu0 %v2955_v43, %s10183_s13  ;;  %v3022_v43 = vrot.slane %v10077_v21, 5  ;;  %9897 = vmatprep.subr.msk.bf16.mxu1 %vm829_vm2, %v11893_v7 }
 0x40e   : > { %v3023_v44 = vsel %vm14642_vm12, %v3020_v29, %v3022_v43  ;;  %vm14645_vm12 = vcmask 1043456   ;;  %v3021_v43 = vsel %vm14646_vm5, %v3018_v49, %v3020_v29  ;;  %v8759_v29 = vld [vmem:[%s10239_s29 + $0xb4] sm:$0xf]  ;;  %vm14650_vm5 = vmmov %vm14647_vm9 }
 0x40f   : > { %3006 = vrot.lane.b32.xlu1 %v2995_v35, %s10178_s28  ;;  %v11850_v35 = vpop.permute.xlu0 %3072  ;;  %v2978_v57 = vsel %vm14645_vm12, %v2975_v63, %v2977_v27  ;;  %vm14649_vm12 = vmmov %vm14644_vm7  ;;  %v8771_v42 = vcombine.low %v8759_v29, %v8759_v29 }
 0x410   : > { %3004 = vrot.lane.b32.xlu0 %v2991_v26, %s10178_s28  ;;  %v11848_v26 = vpop.permute.xlu1 %3711 }
 0x413   : > { %3052 = vrot.lane.b32.xlu1 %v2916_v59, %s10182_s27  ;;  %v11858_v21 = vpop.permute.xlu0 %3713 }
 0x414   : > { %2938 = vrot.lane.b32.xlu0 %v2916_v59, %s10172_s8  ;;  %v3000_v59 = vrot.slane %v2933_v45, 4  ;;  %v3731_v45 = vrot.slane %v8771_v42, 5 }
 0x416   : > { %v3002_v5 = vor.u32 %v3001_v41, %v3000_v59  ;;  %v8760_v59 = vld [vmem:[%s10239_s29 + $0xb8] sm:$0xf] }
 0x417   : > { %3040 = vrot.lane.b32.xlu1 %v11804_v2, %s10181_s26 }
 0x418   : > { %3038 = vrot.lane.b32.xlu0 %v11810_v14, %s10181_s26 }
 0x41b   : > { %3070 = vrot.lane.b32.xlu1 %v3063_v48, %s10183_s13  ;;  %v11855_v48 = vpop.permute.xlu1 %3715 }
 0x41c   : > { %2968 = vrot.lane.b32.xlu0 %v2958_v10, %s10173_s9  ;;  %v2997_v10 = vrot.slane %v2921_v9, 5  ;;  %v14648_v9 = vld [vmem:[#allocation36_spill] sm:$0xff] }
 0x41d   : > { %v3048_v49 = vsel %vm14649_vm12, %v2935_v12, %v14648_v9 }
 0x41f   : > { %2983 = vrot.lane.b32.xlu1 %v2976_v56, %s10176_s12  ;;  %v2998_v56 = vor.u32 %v2997_v10, %v2996_v13  ;;  %v11866_v63 = vpop.permute.xlu1 %3735 }
 0x420   : > { %2987 = vrot.lane.b32.xlu0 %v2977_v27, %s10176_s12  ;;  %v11868_v27 = vpop.permute.xlu0 %3733 }
 0x421   : > { %v3003_v16 = vsel %vm14650_vm5, %v2998_v56, %v3002_v5 }
 0x423   : > { %3028 = vrot.lane.b32.xlu1 %v3019_v46, %s10184_s16  ;;  %v2999_v46 = vsel %vm14647_vm9, %v11794_v62, %v2998_v56  ;;  %vm14651_vm9 = vcmask 1042432   ;;  %v8773_v56 = vcombine.low %v8760_v59, %v8760_v59 }
 0x424   : > { %3032 = vrot.lane.b32.xlu0 %v3023_v44, %s10184_s16  ;;  %v2932_v44 = vsel %vm14644_vm7, %v2927_v11, %v2931_v36  ;;  %v11879_v62 = vpop.permute.xlu0 %3737  ;;  %v3729_v36 = vrot.slane %v11678_v60, 5  ;;  %vm14652_vm7 = vmmov %vm14651_vm9 }
 0x425   : > { %vm14653_vm12 = vmmov %vm14652_vm7 }
 0x426   : > { %v3730_v10 = vsel %vm14652_vm7, %v3727_v50, %v3729_v36 }
 0x427   : > { %3066 = vrot.lane.b32.xlu1 %v2957_v52, %s10183_s13 }
 0x428   : > { %2964 = vrot.lane.b32.xlu0 %v2957_v52, %s10173_s9  ;;  %v11876_v52 = vpop.permute.xlu1 %3743 }
 0x42b   : > { %3068 = vrot.lane.b32.xlu1 %v2959_v17, %s10183_s13 }
 0x42c   : > { %3054 = vrot.lane.b32.xlu0 %v2924_v23, %s10182_s27 }
 0x42f   : > { %2966 = vrot.lane.b32.xlu1 %v2959_v17, %s10173_s9  ;;  %v11900_v17 = vpop.permute.xlu1 %3747 }
 0x430   : > { %2944 = vrot.lane.b32.xlu0 %v2935_v12, %s10172_s8 }
 0x433   : > { %2985 = vrot.lane.b32.xlu1 %v2978_v57, %s10176_s12  ;;  %v11911_v41 = vpop.permute.xlu1 %3791 }
 0x434   : > { %3012 = vrot.lane.b32.xlu0 %v3002_v5, %s10178_s28 }
 0x437   : > { %3030 = vrot.lane.b32.xlu1 %v3021_v43, %s10184_s16  ;;  %v11923_v11 = vpop.permute.xlu1 %3811 }
 0x438   : > { %3008 = vrot.lane.b32.xlu0 %v2999_v46, %s10178_s28  ;;  %v8774_v46 = vcombine.low %v8759_v29, %v8760_v59 }
 0x43a   : > { %v3833_v8 = vshrl.u32 %v8774_v46, 16  ;;  %v3836_v50 = vshll.u32 %v8774_v46, 16 }
 0x43b   : > { %2940 = vrot.lane.b32.xlu1 %v2924_v23, %s10172_s8  ;;  %v11903_v23 = vpop.permute.xlu0 %3745 }
 0x43c   : > { %2942 = vrot.lane.b32.xlu0 %v2932_v44, %s10172_s8 }
 0x43f   : > { %3058 = vrot.lane.b32.xlu1 %v3048_v49, %s10182_s27  ;;  %v11915_v13 = vpop.permute.xlu0 %3789 }
 0x440   : > { %3858 = vrot.lane.b32.xlu0 %v14611_v58, %s10178_s28  ;;  %v8772_v58 = vcombine.low %v11674_v53, %v8759_v29  ;;  %v3732_v53 = vsel %vm14651_vm9, %v3729_v36, %v3731_v45  ;;  %v11930_v45 = vpop.permute.xlu1 %3815  ;;  %vm14654_vm9 = vmmov %vm14652_vm7 }
 0x442   : > { %v3784_v12 = vshll.u32 %v8772_v58, 16 }
 0x443   : > { %3056 = vrot.lane.b32.xlu1 %v2932_v44, %s10182_s27  ;;  %v3809_v44 = vrot.slane %v8773_v56, 5  ;;  %v11925_v9 = vpop.permute.xlu0 %3793 }
 0x444   : > { %3717 = vrot.lane.b32.xlu0 %v11695_v40, %s10174_s10  ;;  %v3781_v40 = vshrl.u32 %v8772_v58, 16  ;;  %v3786_v5 = vrot.slane %v3784_v12, 5  ;;  %v10014_v12 = vld [vmem:[%s10239_s29 + $0xbc] ss:$0 sps:$4 sm:$0xff]  }
 0x446   : > { %v3783_v57 = vrot.slane %v3781_v40, 4  ;;  %v3838_v40 = vrot.slane %v3836_v50, 5 }
 0x447   : > { %3010 = vrot.lane.b32.xlu1 %v3003_v16, %s10178_s28  ;;  %v11934_v29 = vpop.permute.xlu0 %3813  ;;  %v3835_v16 = vrot.slane %v3833_v8, 4 }
 0x448   : > { %3719 = vrot.lane.b32.xlu0 %v11688_v39, %s10174_s10  ;;  %v3787_v43 = vor.u32 %v3786_v5, %v3783_v57  ;;  %v3856_v57 = vrot.slane %v10014_v12, 5 }
 0x449   : > { %v3839_v59 = vor.u32 %v3838_v40, %v3835_v16 }
 0x44b   : > { %3860 = vrot.lane.b32.xlu1 %v11645_v25, %s10178_s28  ;;  %v3807_v25 = vrot.slane %v8772_v58, 5  ;;  %v11947_v5 = vpop.permute.xlu0 %3821 }
 0x44c   : > { %3741 = vrot.lane.b32.xlu0 %v3732_v53, %s10172_s8 }
 0x44d   : > { %v3810_v49 = vsel %vm14653_vm12, %v3807_v25, %v3809_v44  ;;  %v3808_v53 = vsel %vm14654_vm9, %v3805_v20, %v3807_v25  ;;  %vm14655_vm12 = vmmov %vm14650_vm5  ;;  %vm14657_vm9 = vcmask 97280  }
 0x44e   : > { %v3840_v20 = vsel %vm14655_vm12, %v11688_v39, %v3839_v59 }
 0x44f   : > { %3862 = vrot.lane.b32.xlu1 %v3730_v10, %s10178_s28 }
 0x450   : > { %3751 = vrot.lane.b32.xlu0 %v8771_v42, %s10171_s30  ;;  %v3788_v42 = vsel %vm14650_vm5, %v11663_v1, %v3787_v43  ;;  %vm14656_vm5 = vmmov %vm14652_vm7 }
 0x453   : > { %3739 = vrot.lane.b32.xlu1 %v3730_v10, %s10172_s8  ;;  %v3854_v10 = vrot.slane %v8774_v46, 5 }
 0x454   : > { %3797 = vrot.lane.b32.xlu0 %v3787_v43, %s10173_s9 }
 0x455   : > { %v3857_v1 = vsel %vm14652_vm7, %v3854_v10, %v3856_v57  ;;  %v3855_v46 = vsel %vm14656_vm5, %v3729_v36, %v3854_v10  ;;  %vm14658_vm7 = vmmov %vm14657_vm9  ;;  %vm14660_vm5 = vcmask 162816  }
 0x456   : > { %vm14659_vm12 = vmmov %vm14658_vm7 }
 0x457   : > { %3749 = vrot.lane.b32.xlu1 %v11678_v60, %s10171_s30  ;;  %v11945_v60 = vpop.permute.xlu1 %3823 }
 0x458   : > { %3819 = vrot.lane.b32.xlu0 %v3810_v49, %s10175_s11 }
 0x45b   : > { %3795 = vrot.lane.b32.xlu1 %v3788_v42, %s10173_s9  ;;  %v11952_v43 = vpop.permute.xlu1 %3841 }
 0x45c   : > { %3829 = vrot.lane.b32.xlu0 %v8773_v56, %s10176_s12  ;;  %v11955_v56 = vpop.permute.xlu0 %3825 }
 0x45f   : > { %3817 = vrot.lane.b32.xlu1 %v3808_v53, %s10175_s11  ;;  %v11962_v25 = vpop.permute.xlu1 %3845 }
 0x460   : > { %3849 = vrot.lane.b32.xlu0 %v3839_v59, %s10177_s21  ;;  %v11964_v44 = vpop.permute.xlu0 %3843 }
 0x463   : > { %3827 = vrot.lane.b32.xlu1 %v8772_v58, %s10176_s12 }
 0x464   : > { %3866 = vrot.lane.b32.xlu0 %v3857_v1, %s10178_s28 }
 0x467   : > { %3847 = vrot.lane.b32.xlu1 %v3840_v20, %s10177_s21 }
 0x46b   : > { %3864 = vrot.lane.b32.xlu1 %v3855_v46, %s10178_s28 }
 0x46d   : > { %v3037_v8 = vpop.permute.xlu1 %3036 }
 0x46e   : > { %v3035_v50 = vpop.permute.xlu0 %3034 }
 0x471   : > { %v3025_v58 = vpop.permute.xlu1 %3024 }
 0x472   : > { %v2961_v49 = vpop.permute.xlu0 %2960 }
 0x475   : > { %v2963_v42 = vpop.permute.xlu1 %2962 }
 0x476   : > { %v2982_v16 = vpop.permute.xlu0 %2981 }
 0x479   : > { %v2980_v40 = vpop.permute.xlu1 %2979 }
 0x47a   : > { %v3027_v12 = vpop.permute.xlu0 %3026 }
 0x47d   : > { %v2937_v53 = vpop.permute.xlu1 %2936 }
 0x47e   : > { %v3065_v39 = vpop.permute.xlu0 %3064  ;;  %v3075_v10 = vsel %vm342_vm4, %v11754_v18, %v2937_v53 }
 0x47f   : > { %v3085_v46 = vsel %vm706_vm6, %v3075_v10, %v2961_v49 }
 0x480   : > { %v3095_v34 = vsel %vm728_vm8, %v3085_v46, %v2980_v40 }
 0x481   : > { %v3007_v59 = vpop.permute.xlu1 %3006 }
 0x482   : > { %v3005_v57 = vpop.permute.xlu0 %3004 }
 0x483   : > { %v3105_v31 = vsel %vm750_vm10, %v3095_v34, %v3005_v57 }
 0x484   : > { %v3115_v15 = vsel %vm1915_vm15, %v3105_v31, %v3025_v58 }
 0x485   : > { %v3053_v1 = vpop.permute.xlu1 %3052  ;;  %v3125_v49 = vsel %vm1926_vm13, %v3115_v15, %v3035_v50 }
 0x486   : > { %v2939_v36 = vpop.permute.xlu0 %2938  ;;  %v3135_v46 = vsel %vm1937_vm1, %v3125_v49, %v3053_v1 }
 0x487   : > { %v3077_v33 = vsel %vm342_vm4, %v11762_v19, %v2939_v36  ;;  %v3145_v47 = vsel %vm1948_vm0, %v3135_v46, %v3065_v39 }
 0x488   : > { %v3087_v18 = vsel %vm706_vm6, %v3077_v33, %v2963_v42  ;;  %v3154_v58 = vshrl.u32 %v3145_v47, 16  ;;  %v3157_v36 = vshll.u32 %v3145_v47, 16 }
 0x489   : > { %v11969_v20 = vpop.permute.xlu1 %3040  ;;  %v3097_v10 = vsel %vm728_vm8, %v3087_v18, %v2982_v16 }
 0x48a   : > { %v11972_v6 = vpop.permute.xlu0 %3038  ;;  %v3107_v34 = vsel %vm750_vm10, %v3097_v10, %v3007_v59  ;;  %v3156_v18 = vrot.slane %v3154_v58, 3  ;;  %v3159_v1 = vrot.slane %v3157_v36, 4 }
 0x48b   : > { %v3117_v31 = vsel %vm1915_vm15, %v3107_v34, %v3027_v12 }
 0x48c   : > { %v3127_v42 = vsel %vm1926_vm13, %v3117_v31, %v3037_v8  ;;  %v3160_v47 = vor.u32 %v3159_v1, %v3156_v18  ;;  %v8750_v1 = vld [vmem:[%s10239_s29 + $0x90] sm:$0xf] }
 0x48d   : > { %v11975_v32 = vpop.permute.xlu1 %3070 }
 0x48e   : > { %v2969_v54 = vpop.permute.xlu0 %2968 }
 0x491   : > { %v2984_v55 = vpop.permute.xlu1 %2983 }
 0x492   : > { %v2988_v53 = vpop.permute.xlu0 %2987 }
 0x495   : > { %v3029_v30 = vpop.permute.xlu1 %3028 }
 0x496   : > { %v3033_v40 = vpop.permute.xlu0 %3032 }
 0x499   : > { %v3067_v57 = vpop.permute.xlu1 %3066 }
 0x49a   : > { %v2965_v19 = vpop.permute.xlu0 %2964 }
 0x49d   : > { %v3069_v33 = vpop.permute.xlu1 %3068 }
 0x49e   : > { %v3055_v15 = vpop.permute.xlu0 %3054 }
 0x49f   : > { %v3137_v50 = vsel %vm1937_vm1, %v3127_v42, %v3055_v15 }
 0x4a0   : > { %v3147_v16 = vsel %vm1948_vm0, %v3137_v50, %v3067_v57 }
 0x4a1   : > { %v3161_v49 = vshrl.u32 %v3147_v16, 16  ;;  %v3164_v59 = vshll.u32 %v3147_v16, 16  ;;  %v2967_v10 = vpop.permute.xlu1 %2966 }
 0x4a2   : > { %v2945_v61 = vpop.permute.xlu0 %2944 }
 0x4a3   : > { %v3163_v39 = vrot.slane %v3161_v49, 3  ;;  %v3166_v46 = vrot.slane %v3164_v59, 4  ;;  %v3083_v12 = vsel %vm342_vm4, %v11804_v2, %v2945_v61 }
 0x4a4   : > { %v3093_v31 = vsel %vm706_vm6, %v3083_v12, %v2969_v54  ;;  %v10078_v12 = vld [vmem:[%s10239_s29 + $0x94] sm:$0xf] }
 0x4a5   : > { %v3167_v34 = vor.u32 %v3166_v46, %v3163_v39  ;;  %v2986_v37 = vpop.permute.xlu1 %2985  ;;  %v3103_v36 = vsel %vm728_vm8, %v3093_v31, %v2988_v53 }
 0x4a6   : > { %v3013_v8 = vpop.permute.xlu0 %3012 }
 0x4a7   : > { %v11995_v57 = vsel %vm761_vm11, %v3160_v47, %v3167_v34  ;;  %v3113_v2 = vsel %vm750_vm10, %v3103_v36, %v3013_v8 }
 0x4a8   : > { %9470 = vmatprep.mubr.msk.bf16.mxu0 %vm2025_vm14, %v11995_v57  ;;  %9488 = vmatprep.mubr.msk.bf16.mxu1 %vm2025_vm14, %v11995_v57  ;;  %v3123_v16 = vsel %vm1915_vm15, %v3113_v2, %v3033_v40 }
 0x4a9   : > { %v3031_v58 = vpop.permute.xlu1 %3030  ;;  %v3133_v46 = vsel %vm1926_vm13, %v3123_v16, %v11826_v38 }
 0x4aa   : > { %v3009_v61 = vpop.permute.xlu0 %3008  ;;  %v3143_v8 = vsel %vm1937_vm1, %v3133_v46, %v11839_v28 }
 0x4ad   : > { %v2941_v42 = vpop.permute.xlu1 %2940 }
 0x4ae   : > { %v3079_v54 = vsel %vm342_vm4, %v11756_v24, %v2941_v42  ;;  %v2943_v15 = vpop.permute.xlu0 %2942 }
 0x4af   : > { %v3089_v50 = vsel %vm706_vm6, %v3079_v54, %v2965_v19  ;;  %v3081_v24 = vsel %vm342_vm4, %v11810_v14, %v2943_v15  ;;  %v8762_v19 = vcombine.low %v8750_v1, %v10078_v12  ;;  %v10017_v12 = vld [vmem:[%s14473_s4 + $0x58] sm:$0xff]  }
 0x4b0   : > { %v3099_v18 = vsel %vm728_vm8, %v3089_v50, %v2984_v55  ;;  %v3872_v55 = vsel %vm14546_vm3, %v14609_v0, %v11858_v21 }
 0x4b1   : > { %v3059_v49 = vpop.permute.xlu1 %3058  ;;  %v3109_v59 = vsel %vm750_vm10, %v3099_v18, %v3009_v61  ;;  %v3870_v36 = vsel %vm14546_vm3, %v8762_v19, %v11848_v26  ;;  %v3883_v0 = vsel %vm342_vm4, %v3872_v55, %v11866_v63  ;;  %v3153_v61 = vsel %vm1948_vm0, %v3143_v8, %v11850_v35  ;;  %v10079_v19 = vld [vmem:[%s14471_s2] sm:$0xff]  }
 0x4b2   : > { %v12010_v53 = vpop.permute.xlu0 %3858  ;;  %v3119_v39 = vsel %vm1915_vm15, %v3109_v59, %v3029_v30  ;;  %v3091_v30 = vsel %vm706_vm6, %v3081_v24, %v2967_v10  ;;  %v3874_v26 = vsel %vm14546_vm3, %v14610_v22, %v11855_v48  ;;  %v3881_v63 = vsel %vm342_vm4, %v3870_v36, %v11868_v27  ;;  %v10016_v48 = vld [vmem:[%s14473_s4 + $0x50] sm:$0xff]  }
 0x4b3   : > { %v3129_v40 = vsel %vm1926_vm13, %v3119_v39, %v11972_v6  ;;  %v3101_v28 = vsel %vm728_vm8, %v3091_v30, %v2986_v37  ;;  %v3185_v16 = vshrl.u32 %v3153_v61, 16  ;;  %v3188_v18 = vshll.u32 %v3153_v61, 16 }
 0x4b4   : > { %v3545_v22 = vsel %vm829_vm2, %v11893_v7, 0  ;;  %v3891_v27 = vsel %vm14658_vm7, %v3881_v63, %v11876_v52  ;;  %vm14662_vm7 = vmmov %vm14660_vm5  ;;  %v10021_v63 = vld [vmem:[%s10239_s29 + $0x10] sm:$0xff]  }
 0x4b5   : > { %v3057_v47 = vpop.permute.xlu1 %3056  ;;  %v3190_v39 = vrot.slane %v3188_v18, 4  ;;  %v3901_v46 = vsel %vm706_vm6, %v3891_v27, %v11915_v13 }
 0x4b6   : > { %v3139_v38 = vsel %vm1937_vm1, %v3129_v40, %v3057_v47  ;;  %v12027_v31 = vpop.permute.xlu0 %3717 }
 0x4b7   : > { %v3149_v14 = vsel %vm1948_vm0, %v3139_v38, %v3069_v33  ;;  %v3893_v33 = vsel %vm14657_vm9, %v3883_v0, %v11903_v23  ;;  %v3885_v23 = vsel %vm342_vm4, %v3874_v26, %v11879_v62  ;;  %vm14661_vm9 = vmmov %vm14660_vm5 }
 0x4b8   : > { %v3169_v21 = vshrl.u32 %v3149_v14, 16  ;;  %v3172_v6 = vshll.u32 %v3149_v14, 16  ;;  %v3903_v7 = vsel %vm706_vm6, %v3893_v33, %v11911_v41  ;;  %v3911_v13 = vsel %vm14661_vm9, %v3901_v46, %v11923_v11  ;;  %v10018_v11 = vld [vmem:[%s14473_s4 + $0x60] sm:$0xff]  }
 0x4b9   : > { %v3011_v10 = vpop.permute.xlu1 %3010  ;;  %v3913_v55 = vsel %vm14660_vm5, %v3903_v7, %v11934_v29  ;;  %v10081_v7 = vld [vmem:[%s14471_s2 + $0x8] sm:$0xff]  }
 0x4ba   : > { %v3171_v2 = vrot.slane %v3169_v21, 3  ;;  %v3174_v42 = vrot.slane %v3172_v6, 4  ;;  %v3111_v54 = vsel %vm750_vm10, %v3101_v28, %v3011_v10  ;;  %v12038_v15 = vpop.permute.xlu0 %3719  ;;  %v3923_v38 = vsel %vm728_vm8, %v3913_v55, %v11945_v60  ;;  %v10080_v6 = vld [vmem:[%s10239_s29 + $0xb0] sm:$0xf] }
 0x4bb   : > { %v3121_v35 = vsel %vm1915_vm15, %v3111_v54, %v3031_v58  ;;  %v3921_v60 = vsel %vm728_vm8, %v3911_v13, %v11947_v5  ;;  %v8766_v61 = vcombine.low %v10080_v6, %v10080_v6  ;;  %v10084_v13 = vld [vmem:[%s14471_s2 + $0x1c] sm:$0xff]  }
 0x4bc   : > { %v3175_v37 = vor.u32 %v3174_v42, %v3171_v2  ;;  %v3131_v50 = vsel %vm1926_vm13, %v3121_v35, %v11969_v20  ;;  %v10019_v42 = vld [vmem:[%s14473_s4 + $0x68] ss:$0 sps:$4 sm:$0xff]  }
 0x4bd   : > { %v3141_v1 = vsel %vm1937_vm1, %v3131_v50, %v3059_v49  ;;  %v3861_v59 = vpop.permute.xlu1 %3860  ;;  %v3879_v54 = vsel %vm14546_vm3, %v8766_v61, %v12038_v15  ;;  %v10022_v15 = vld [vmem:[%s10239_s29 + $0x18] sm:$0xff]  }
 0x4be   : > { %v3151_v20 = vsel %vm1948_vm0, %v3141_v1, %v11975_v32  ;;  %v12062_v58 = vpop.permute.xlu0 %3741  ;;  %v12065_v49 = vsel %vm761_vm11, %v3167_v34, %v3175_v37  ;;  %v3187_v32 = vrot.slane %v3185_v16, 3  ;;  %v3895_v34 = vsel %vm14659_vm12, %v3885_v23, %v11900_v17 }
 0x4bf   : > { %9471 = vmatmul.mubr.msk.bf16.vlgmr.msra.gmra.mrb[40].mxu0 %vm2025_vm14, %v12065_v49  ;;  %9489 = vmatmul.mubr.msk.bf16.vlgmr.msra.gmra.mrb[40].mxu1 %vm2025_vm14, %v12065_v49  ;;  %v3177_v52 = vshrl.u32 %v3151_v20, 16  ;;  %v3180_v62 = vshll.u32 %v3151_v20, 16  ;;  %v3905_v47 = vsel %vm706_vm6, %v3895_v34, %v11925_v9  ;;  %v10020_v9 = vld [vmem:[%s10239_s29 + $0x8] sm:$0xff]   ;;  %vm14663_vm12 = vcmask 228352  }
 0x4c0   : > { %9497 = vmatpush3.bf16.msra.mxu0 %v11886_v51  ;;  %9515 = vmatpush3.bf16.msra.mxu1 %v3545_v22  ;;  %v3191_v30 = vor.u32 %v3190_v39, %v3187_v32  ;;  %v3915_v21 = vsel %vm14662_vm7, %v3905_v47, %v11930_v45  ;;  %v3933_v28 = vsel %vm14663_vm12, %v3923_v38, %v11964_v44  ;;  %vm14664_vm5 = vmmov %vm14663_vm12  ;;  %vm14666_vm7 = vcmask 1043456   ;;  %v10023_v39 = vld [vmem:[%s10239_s29 + $0x20] sm:$0xff]  }
 0x4c1   : > { %v3863_v41 = vpop.permute.xlu1 %3862  ;;  %9498 = vmatprep.subr.bf16.mxu0 %v10016_v48  ;;  %v3179_v24 = vrot.slane %v3177_v52, 3  ;;  %9524 = vmatprep.subr.bf16.mxu1 %v10079_v19  ;;  %v3182_v40 = vrot.slane %v3180_v62, 4  ;;  %v3943_v45 = vsel %vm750_vm10, %v3933_v28, %v3861_v59  ;;  %v3931_v10 = vsel %vm14664_vm5, %v3921_v60, %v11952_v43  ;;  %vm14665_vm9 = vmmov %vm14664_vm5  ;;  %v10082_v52 = vld [vmem:[%s14471_s2 + $0x14] sm:$0xff]  }
 0x4c2   : > { %v3752_v17 = vpop.permute.xlu0 %3751  ;;  %v3925_v44 = vsel %vm728_vm8, %v3915_v21, %v11955_v56  ;;  %v3957_v26 = vshrl.u32 %v3943_v45, 16  ;;  %v3960_v43 = vshll.u32 %v3943_v45, 16  ;;  %v3889_v50 = vsel %vm342_vm4, %v3879_v54, %v12062_v58  ;;  %vm14667_vm12 = vmmov %vm14666_vm7  ;;  %v10086_v21 = vld [vmem:[%s14471_s2 + $0x24] ss:$0 sps:$4 sm:$0x33]  }
 0x4c3   : > { %v3183_v8 = vor.u32 %v3182_v40, %v3179_v24  ;;  %v3935_v56 = vsel %vm14665_vm9, %v3925_v44, %v11962_v25  ;;  %vm14668_vm5 = vcmask 97280   ;;  %vm14669_vm9 = vcmask 162816  }
 0x4c4   : > { %9499 = vmatpush3.bf16.msra.mxu0 %v10016_v48  ;;  %v3945_v18 = vsel %vm750_vm10, %v3935_v56, %v3863_v41  ;;  %v3959_v1 = vrot.slane %v3957_v26, 3  ;;  %v3962_v59 = vrot.slane %v3960_v43, 4  ;;  %v3899_v25 = vsel %vm14668_vm5, %v3889_v50, %v3752_v17  ;;  %v10083_v17 = vld [vmem:[%s14471_s2 + $0x10] ss:$0 sps:$4 sm:$0x33]   ;;  %v14679_v50 = vld [vmem:[#allocation7_spill] sm:$0xff] }
 0x4c5   : > { %v12092_v14 = vpop.permute.xlu1 %3739  ;;  %9500 = vmatprep.subr.bf16.mxu0 %v10017_v12  ;;  %v3184_v29 = vsel %vm761_vm11, %v3175_v37, %v3183_v8  ;;  %v12096_v0 = vsel %vm761_vm11, %v3183_v8, %v3191_v30  ;;  %v3965_v23 = vshrl.u32 %v3945_v18, 16  ;;  %v3968_v20 = vshll.u32 %v3945_v18, 16  ;;  %v10088_v26 = vld [vmem:[%s14471_s2 + $0x30] sm:$0xff]   ;;  %v10093_v18 = vld [vmem:[%s14473_s4 + $0x18] sm:$0xff]  }
 0x4c6   : > { %v3798_v36 = vpop.permute.xlu0 %3797  ;;  %9474 = vmatprep.mubr.msk.bf16.mxu0 %vm2025_vm14, %v3184_v29  ;;  %9492 = vmatprep.mubr.msk.bf16.mxu1 %vm2025_vm14, %v3184_v29  ;;  %v3963_v62 = vor.u32 %v3962_v59, %v3959_v1  ;;  %v10094_v1 = vld [vmem:[%s14473_s4 + $0x2c] sm:$0xff]   ;;  %v10095_v59 = vld [vmem:[%s14473_s4 + $0x20] ss:$0 sps:$4 sm:$0xff]  }
 0x4c7   : > { %9475 = vmatmul.mubr.msk.bf16.gmra.mrb[44].mxu0 %vm2025_vm14, %v12096_v0  ;;  %9493 = vmatmul.mubr.msk.bf16.gmra.mrb[44].mxu1 %vm2025_vm14, %v12096_v0  ;;  %v3909_v32 = vsel %vm706_vm6, %v3899_v25, %v3798_v36  ;;  %v3967_v24 = vrot.slane %v3965_v23, 3  ;;  %v10096_v25 = vld [vmem:[%s14473_s4 + $0x34] sm:$0xff]   ;;  %v14686_v23 = vld [vmem:[#allocation28_spill] sm:$0xff] }
 0x4c8   : > { %9501 = vmatpush3.bf16.msra.mxu0 %v10017_v12  ;;  %9506 = vmatprep.mubr.msk.bf16.mxu0 %vm2025_vm14, %v11995_v57  ;;  %v3941_v57 = vsel %vm750_vm10, %v3931_v10, %v12010_v53  ;;  %v12139_v53 = vsel %vm14667_vm12, %v10019_v42, 0  ;;  %v3970_v12 = vrot.slane %v3968_v20, 4  ;;  %vm14671_vm12 = vmmov %vm14668_vm5  ;;  %vm14672_vm5 = vcmask 293888  }
 0x4c9   : > { %v12118_v5 = vpop.permute.xlu1 %3749  ;;  %9502 = vmatprep.subr.bf16.mxu0 %v10018_v11  ;;  %9516 = vmatprep.mubr.msk.bf16.mxu1 %vm14546_vm3, %v10020_v9  ;;  %v3950_v35 = vshrl.u32 %v3941_v57, 16  ;;  %v3953_v37 = vshll.u32 %v3941_v57, 16  ;;  %v10087_v57 = vld [vmem:[%s14473_s4] sm:$0xff]  }
 0x4ca   : > { %v3820_v2 = vpop.permute.xlu0 %3819 }
 0x4cb   : > { %v3952_v48 = vrot.slane %v3950_v35, 3  ;;  %v3955_v27 = vrot.slane %v3953_v37, 4  ;;  %v3919_v34 = vsel %vm14669_vm9, %v3909_v32, %v3820_v2  ;;  %v10089_v35 = vld [vmem:[%s14471_s2 + $0x38] ss:$0 sps:$4 sm:$0x33]   ;;  %v10090_v37 = vld [vmem:[%s14473_s4 + $0x8] sm:$0xff]  }
 0x4cc   : > { %9503 = vmatpush3.bf16.msra.mxu0 %v10018_v11  ;;  %v8826_v32 = vld [vmem:[%s10239_s29 + $0xc8] sm:$0xf] }
 0x4cd   : > { %v3796_v33 = vpop.permute.xlu1 %3795  ;;  %9896 = vmatprep.subr.msk.bf16.mxu0 %vm14666_vm7, %v10019_v42  ;;  %v3956_v41 = vor.u32 %v3955_v27, %v3952_v48  ;;  %vm14670_vm7 = vcmask 228352   ;;  %v10097_v48 = vld [vmem:[%s14473_s4 + $0x3c] sm:$0xff]   ;;  %v10098_v27 = vld [vmem:[%s14473_s4 + $0x44] ss:$0 sps:$4 sm:$0xff]  }
 0x4ce   : > { %v3830_v16 = vpop.permute.xlu0 %3829 }
 0x4cf   : > { %9517 = vmatmul.mubr.msk.bf16.vlgmr.msra.gmra.mrb[48].mxu1 %vm14546_vm3, %v10021_v63  ;;  %v3964_v30 = vsel %vm761_vm11, %v3956_v41, %v3963_v62 }
 0x4d0   : > { %9505 = vmatpush3.bf16.msra.mxu0 %v12139_v53  ;;  %9525 = vmatpush3.bf16.msra.mxu1 %v10079_v19  ;;  %v3929_v19 = vsel %vm728_vm8, %v3919_v34, %v3830_v16  ;;  %v10091_v16 = vld [vmem:[%s14473_s4 + $0x24] sm:$0xff]   ;;  %v8828_v34 = vld [vmem:[%s10239_s29 + $0xd0] sm:$0xf] }
 0x4d1   : > { %v3818_v22 = vpop.permute.xlu1 %3817  ;;  %9526 = vmatprep.subr.bf16.mxu1 %v10081_v7  ;;  %9520 = vmatprep.mubr.msk.bf16.mxu1 %vm14546_vm3, %v10022_v15  ;;  %v10092_v15 = vld [vmem:[%s14473_s4 + $0x10] sm:$0xff]  }
 0x4d2   : > { %v3850_v58 = vpop.permute.xlu0 %3849  ;;  %9538 = vmatprep.subr.bf16.mxu0 %v10082_v52 }
 0x4d3   : > { %9507 = vmatmul.mubr.msk.bf16.vlgmr.msra.gmra.mrb[48].mxu0 %vm2025_vm14, %v12065_v49  ;;  %v3876_v49 = vsel %vm14546_vm3, %v11650_v3, %v12027_v31  ;;  %v3939_v40 = vsel %vm14670_vm7, %v3929_v19, %v3850_v58  ;;  %v3971_v31 = vor.u32 %v3970_v12, %v3967_v24 }
 0x4d4   : > { %9510 = vmatprep.mubr.msk.bf16.mxu0 %vm2025_vm14, %v3184_v29  ;;  %9527 = vmatpush3.bf16.msra.mxu1 %v10081_v7  ;;  %v3887_v47 = vsel %vm342_vm4, %v3876_v49, %v12092_v14  ;;  %v10085_v14 = vld [vmem:[%s14471_s2 + $0x28] sm:$0xff]  }
 0x4d5   : > { %v3828_v46 = vpop.permute.xlu1 %3827  ;;  %9539 = vmatpush3.bf16.msra.mxu0 %v10082_v52  ;;  %9898 = vmatprep.subr.msk.bf16.mxu1 %vm829_vm2, %v10083_v17  ;;  %v3897_v38 = vsel %vm14671_vm12, %v3887_v47, %v12118_v5  ;;  %vm14673_vm12 = vmmov %vm14672_vm5  ;;  %v3972_v45 = vsel %vm761_vm11, %v3963_v62, %v3971_v31  ;;  %v14674_v5 = vld [vmem:[#allocation6_spill] sm:$0xff]  ;;  %v8825_v62 = vld [vmem:[%s10239_s29 + $0xc4] sm:$0xf] }
 0x4d6   : > { %v3867_v55 = vpop.permute.xlu0 %3866  ;;  %9540 = vmatprep.subr.bf16.mxu0 %v10084_v13  ;;  %v3907_v36 = vsel %vm706_vm6, %v3897_v38, %v3796_v33  ;;  %v8830_v38 = vld [vmem:[%s10239_s29 + $0xd8] sm:$0xf] }
 0x4d7   : > { %v3949_v8 = vsel %vm750_vm10, %v3939_v40, %v3867_v55  ;;  %9521 = vmatmul.mubr.msk.bf16.gmra.mrb[52].mxu1 %vm14546_vm3, %v10023_v39  ;;  %v3917_v29 = vsel %vm14669_vm9, %v3907_v36, %v3818_v22  ;;  %vm14675_vm9 = vmmov %vm14672_vm5  ;;  %v14683_v22 = vld [vmem:[#allocation27_spill] sm:$0xff]  ;;  %v8827_v39 = vld [vmem:[%s10239_s29 + $0xcc] sm:$0xf] }
 0x4d8   : > { %9530 = vmatprep.mubr.msk.bf16.mxu1 %vm14672_vm5, %v3964_v30  ;;  %9529 = vmatpush3.bf16.msra.mxu1 %v14592_v4  ;;  %v3981_v11 = vshrl.u32 %v3949_v8, 16  ;;  %v3984_v9 = vshll.u32 %v3949_v8, 16  ;;  %v3927_v60 = vsel %vm728_vm8, %v3917_v29, %v3828_v46  ;;  %v8841_v46 = vcombine.low %v8825_v62, %v8826_v32 }
 0x4d9   : > { %v3848_v3 = vpop.permute.xlu1 %3847  ;;  %9541 = vmatpush3.bf16.msra.mxu0 %v10084_v13  ;;  %9552 = vmatprep.subr.bf16.mxu1 %v10085_v14  ;;  %v8842_v41 = vcombine.low %v8827_v39, %v8828_v34 }
 0x4da   : > { %9899 = vmatprep.subr.msk.bf16.mxu0 %vm829_vm2, %v10086_v21  ;;  %v3937_v6 = vsel %vm14670_vm7, %v3927_v60, %v3848_v3  ;;  %v3983_v10 = vrot.slane %v3981_v11, 3  ;;  %v3986_v44 = vrot.slane %v3984_v9, 4  ;;  %vm14676_vm7 = vmmov %vm14672_vm5  ;;  %v5048_v12 = vshrl.u32 %v8841_v46, 16 }
 0x4db   : > { %9511 = vmatmul.mubr.msk.bf16.gmra.mrb[52].mxu0 %vm2025_vm14, %v12096_v0  ;;  %v5051_v19 = vshll.u32 %v8841_v46, 16  ;;  %v5056_v55 = vshrl.u32 %v8842_v41, 16  ;;  %v5059_v17 = vshll.u32 %v8842_v41, 16  ;;  %v5095_v11 = vrot.slane %v8841_v46, 5 }
 0x4dc   : > { %9544 = vmatprep.mubr.msk.bf16.mxu0 %vm14673_vm12, %v3964_v30  ;;  %v3987_v43 = vor.u32 %v3986_v44, %v3983_v10  ;;  %vm14677_vm12 = vmmov %vm14672_vm5  ;;  %v5050_v49 = vrot.slane %v5048_v12, 4 }
 0x4dd   : > { %v3865_v61 = vpop.permute.xlu1 %3864  ;;  %9543 = vmatpush3.bf16.msra.mxu0 %v14674_v5  ;;  %v5053_v40 = vrot.slane %v5051_v19, 5  ;;  %v5058_v13 = vrot.slane %v5056_v55, 4  ;;  %v5061_v47 = vrot.slane %v5059_v17, 5  ;;  %v3279_v19 = vld [vmem:[#allocation4 + $0x40] sm:$0xff] }
 0x4de   : > { %v3947_v28 = vsel %vm750_vm10, %v3937_v6, %v3865_v61  ;;  %9566 = vmatprep.subr.bf16.mxu0 %v10087_v57  ;;  %v12285_v6 = vrot.slane %v8842_v41, 5 }
 0x4df   : > { %v3973_v2 = vshrl.u32 %v3947_v28, 16  ;;  %v3976_v42 = vshll.u32 %v3947_v28, 16  ;;  %9531 = vmatmul.mubr.msk.bf16.vlgmr.msra.gmra.mrb[56].mxu1 %vm14672_vm5, %v3972_v45  ;;  %v5054_v8 = vor.u32 %v5053_v40, %v5050_v49  ;;  %v12272_v3 = vor.u32 %v5061_v47, %v5058_v13  ;;  %v3282_v40 = vld [vmem:[#allocation4 + $0x58] sm:$0xff] }
 0x4e0   : > { %9553 = vmatpush3.bf16.msra.mxu1 %v10085_v14  ;;  %v12288_v28 = vcombine.low %v8826_v32, %v8827_v39 }
 0x4e1   : > { %v3975_v0 = vrot.slane %v3973_v2, 3  ;;  %v3978_v54 = vrot.slane %v3976_v42, 4  ;;  %9554 = vmatprep.subr.bf16.mxu1 %v10088_v26  ;;  %5082 = vrot.lane.b32.xlu1 %v5054_v8, %s10174_s10 }
 0x4e3   : > { %v3979_v63 = vor.u32 %v3978_v54, %v3975_v0  ;;  %9545 = vmatmul.mubr.msk.bf16.vlgmr.msra.gmra.mrb[56].mxu0 %vm14675_vm9, %v3972_v45  ;;  %vm14678_vm9 = vmmov %vm14672_vm5  ;;  %v5126_v0 = vshrl.u32 %v12288_v28, 16  ;;  %v5129_v54 = vshll.u32 %v12288_v28, 16 }
 0x4e4   : > { %9555 = vmatpush3.bf16.msra.mxu1 %v10088_v26  ;;  %9567 = vmatpush3.bf16.msra.mxu0 %v10087_v57 }
 0x4e5   : > { %v3980_v56 = vsel %vm761_vm11, %v3971_v31, %v3979_v63  ;;  %v3988_v33 = vsel %vm761_vm11, %v3979_v63, %v3987_v43  ;;  %9900 = vmatprep.subr.msk.bf16.mxu1 %vm829_vm2, %v10089_v35  ;;  %9568 = vmatprep.subr.bf16.mxu0 %v10090_v37  ;;  %v5128_v26 = vrot.slane %v5126_v0, 4  ;;  %v5131_v43 = vrot.slane %v5129_v54, 5 }
 0x4e6   : > { %9534 = vmatprep.mubr.msk.bf16.mxu1 %vm14676_vm7, %v3980_v56  ;;  %9548 = vmatprep.mubr.msk.bf16.mxu0 %vm14677_vm12, %v3980_v56  ;;  %vm14680_vm7 = vmmov %vm14672_vm5 }
 0x4e7   : > { %9535 = vmatmul.mubr.msk.bf16.gmra.mrb[60].mxu1 %vm14672_vm5, %v3988_v33  ;;  %vm14681_vm12 = vmmov %vm14672_vm5 }
 0x4e8   : > { %9558 = vmatprep.mubr.msk.bf16.mxu1 %vm14678_vm9, %v3964_v30  ;;  %9557 = vmatpush3.bf16.msra.mxu1 %v14679_v50  ;;  %vm14682_vm9 = vcmask 1043456   ;;  %v8829_v30 = vld [vmem:[%s10239_s29 + $0xd4] sm:$0xf] }
 0x4e9   : > { %9584 = vmatprep.subr.bf16.mxu1 %v10091_v16  ;;  %9569 = vmatpush3.bf16.msra.mxu0 %v10090_v37  ;;  %v12274_v31 = vcombine.low %v8829_v30, %v8830_v38  ;;  %v12306_v2 = vcombine.low %v8828_v34, %v8829_v30  ;;  %v5132_v37 = vor.u32 %v5131_v43, %v5128_v26  ;;  %v3281_v34 = vld [vmem:[#allocation4 + $0x50] sm:$0xff]  ;;  %v3280_v30 = vld [vmem:[#allocation4 + $0x48] sm:$0xff]  ;;  %v3286_v43 = vld [vmem:[#allocation4 + $0x78] sm:$0xff] }
 0x4ea   : > { %9570 = vmatprep.subr.bf16.mxu0 %v10092_v15 }
 0x4eb   : > { %9549 = vmatmul.mubr.msk.bf16.gmra.mrb[60].mxu0 %vm14680_vm7, %v3988_v33  ;;  %vm14684_vm7 = vmmov %vm14672_vm5  ;;  %v5065_v14 = vshrl.u32 %v12274_v31, 16  ;;  %v5068_v29 = vshll.u32 %v12274_v31, 16  ;;  %v5098_v61 = vrot.slane %v12274_v31, 5  ;;  %v5134_v63 = vshrl.u32 %v12306_v2, 16 }
 0x4ed   : > { %9571 = vmatpush3.bf16.msra.mxu0 %v10092_v15  ;;  %v5067_v9 = vrot.slane %v5065_v14, 4  ;;  %v5070_v21 = vrot.slane %v5068_v29, 5  ;;  %v3285_v29 = vld [vmem:[#allocation4 + $0x70] sm:$0xff] }
 0x4ee   : > { %9572 = vmatprep.subr.bf16.mxu0 %v10093_v18 }
 0x4ef   : > { %9559 = vmatmul.mubr.msk.bf16.vlgmr.msra.gmra.mrb[64].mxu1 %vm14681_vm12, %v3972_v45  ;;  %vm14685_vm12 = vmmov %vm14682_vm9  ;;  %v12282_v60 = vor.u32 %v5070_v21, %v5067_v9  ;;  %v12291_v45 = vld [vmem:[%s10239_s29 + $0xdc] sm:$0xf] }
 0x4f0   : > { %9562 = vmatprep.mubr.msk.bf16.mxu1 %vm14672_vm5, %v3980_v56  ;;  %9585 = vmatpush3.bf16.msra.mxu1 %v10091_v16  ;;  %vm14687_vm5 = vsmask.f32 3328  ;;  %v12309_v42 = vcombine.low %v8830_v38, %v12291_v45  ;;  %v5137_v56 = vshll.u32 %v12306_v2, 16  ;;  %v5136_v16 = vrot.slane %v5134_v63, 4 }
 0x4f1   : > { %9586 = vmatprep.subr.bf16.mxu1 %v10094_v1  ;;  %9573 = vmatpush3.bf16.msra.mxu0 %v10093_v18  ;;  %v5063_v36 = vsel %vm14687_vm5, %v5054_v8, %v12272_v3 }
 0x4f2   : > { %9901 = vmatprep.subr.msk.bf16.mxu0 %vm14682_vm9, %v10095_v59  ;;  %vm14688_vm9 = vmmov %vm14687_vm5  ;;  %v5146_v35 = vshll.u32 %v12309_v42, 16  ;;  %v5139_v15 = vrot.slane %v5137_v56, 5  ;;  %v5176_v62 = vrot.slane %v12309_v42, 5 }
 0x4f3   : > { %v12296_v10 = vsel %vm14688_vm9, %v12272_v3, %v12282_v60  ;;  %vm14691_vm9 = vmmov %vm14687_vm5 }
 0x4f4   : > { %9587 = vmatpush3.bf16.msra.mxu1 %v10094_v1  ;;  %5086 = vrot.lane.b32.xlu1 %v12296_v10, %s10174_s10  ;;  %v5148_v1 = vrot.slane %v5146_v35, 5  ;;  %v5140_v59 = vor.u32 %v5139_v15, %v5136_v16  ;;  %v3284_v35 = vld [vmem:[#allocation4 + $0x68] sm:$0xff] }
 0x4f5   : > { %9588 = vmatprep.subr.bf16.mxu1 %v10096_v25  ;;  %9575 = vmatpush3.bf16.msra.mxu0 %v14683_v22 }
 0x4f6   : > { %9602 = vmatprep.subr.bf16.mxu0 %v11886_v51  ;;  %v12252_v51 = vld [vmem:[#allocation2 + $0x28] sm:$0xff] }
 0x4f7   : > { %9563 = vmatmul.mubr.msk.bf16.gmra.mrb[68].mxu1 %vm14684_vm7, %v3988_v33  ;;  %4443 = vrot.lane.b32.xlu0 %v12252_v51, %s10181_s26  ;;  %v4446_v20 = vshll.u32 %v12252_v51, 16  ;;  %v4450_v7 = vshrl.u32 %v12252_v51, 16  ;;  %v4463_v24 = vrot.slane %v12252_v51, 1  ;;  %vm14689_vm7 = vcmask 1042432  }
 0x4f8   : > { %9589 = vmatpush3.bf16.msra.mxu1 %v10096_v25  ;;  %v12304_v44 = vsel %vm14689_vm7, %v12285_v6, %v5098_v61  ;;  %v5143_v33 = vshrl.u32 %v12309_v42, 16 }
 0x4f9   : > { %9590 = vmatprep.subr.bf16.mxu1 %v10097_v48  ;;  %v12257_v58 = vrot.slane %v4446_v20, 1  ;;  %v5173_v20 = vrot.slane %v12288_v28, 5 }
 0x4fa   : > { %v5145_v18 = vrot.slane %v5143_v33, 4 }
 0x4fb   : > { %v4452_v52 = vor.u32 %v4450_v7, %v12257_v58  ;;  %v5174_v7 = vrot.slane %v12306_v2, 5 }
 0x4fc   : > { %9591 = vmatpush3.bf16.msra.mxu1 %v10097_v48  ;;  %v12325_v25 = vor.u32 %v5148_v1, %v5145_v18 }
 0x4fd   : > { %9902 = vmatprep.subr.msk.bf16.mxu1 %vm14685_vm12, %v10098_v27  ;;  %4461 = vrot.lane.b32.xlu0 %v4452_v52, %s10182_s27  ;;  %vm14690_vm12 = vmmov %vm14689_vm7  ;;  %v5141_v27 = vsel %vm14691_vm9, %v5132_v37, %v5140_v59  ;;  %v5175_v52 = vsel %vm14689_vm7, %v5173_v20, %v5174_v7 }
 0x4fe   : > { %v5097_v57 = vsel %vm14690_vm12, %v5095_v11, %v12285_v6  ;;  %v5150_v48 = vsel %vm14687_vm5, %v5140_v59, %v12325_v25  ;;  %vm14692_vm12 = vmmov %vm14689_vm7  ;;  %vm14701_vm5 = vcmask 1046528   ;;  %vm14703_vm7 = vcmask 1043456  }
 0x4ff   : > { %5106 = vrot.lane.b32.xlu1 %v5097_v57, %s10172_s8  ;;  %v5177_v32 = vsel %vm14692_vm12, %v5174_v7, %v5176_v62  ;;  %v3283_v57 = vld [vmem:[#allocation4 + $0x60] sm:$0xff]  ;;  %vm14702_vm9 = vmmov %vm14701_vm5 }
 0x500   : > { %9593 = vmatpush3.bf16.msra.mxu1 %v14686_v23  ;;  %v3368_v7 = vld [vmem:[#allocation4] sm:$0xff]  ;;  %vm14704_vm12 = vmmov %vm14703_vm7 }
 0x501   : > { %4473 = vrot.lane.b32.xlu0 %v4463_v24, %s10183_s13 }
 0x503   : > { %5114 = vrot.lane.b32.xlu1 %v8841_v46, %s10171_s30 }
 0x505   : > { %5084 = vrot.lane.b32.xlu0 %v5063_v36, %s10174_s10 }
 0x507   : > { %5118 = vrot.lane.b32.xlu1 %v12274_v31, %s10171_s30 }
 0x509   : > { %5104 = vrot.lane.b32.xlu0 %v5095_v11, %s10172_s8 }
 0x50b   : > { %5162 = vrot.lane.b32.xlu1 %v5141_v27, %s10173_s9 }
 0x50d   : > { %5108 = vrot.lane.b32.xlu0 %v12304_v44, %s10172_s8 }
 0x50f   : > { %5182 = vrot.lane.b32.xlu1 %v5173_v20, %s10175_s11 }
 0x511   : > { %5116 = vrot.lane.b32.xlu0 %v8842_v41, %s10171_s30 }
 0x513   : > { %5186 = vrot.lane.b32.xlu1 %v5177_v32, %s10175_s11 }
 0x515   : > { %5160 = vrot.lane.b32.xlu0 %v5132_v37, %s10173_s9 }
 0x517   : > { %5194 = vrot.lane.b32.xlu1 %v12306_v2, %s10176_s12 }
 0x519   : > { %5164 = vrot.lane.b32.xlu0 %v5150_v48, %s10173_s9  ;;  %v3370_v48 = vld [vmem:[#allocation4 + $0x10] sm:$0xff] }
 0x51d   : > { %5184 = vrot.lane.b32.xlu0 %v5175_v52, %s10175_s11 }
 0x521   : > { %5192 = vrot.lane.b32.xlu0 %v12288_v28, %s10176_s12 }
 0x592   : > { %v9472_v39 = vpop.f32.mrb[40].mxu0  ;;  %v9490_v46 = vpop.f32.mrb[40].mxu1 }
 0x593   : > { %3273 = vst.msk [vmem:[#allocation4 + $0x90] sm:$0xff] %vm342_vm4, %v9472_v39  ;;  %v3354_v41 = vadd.f32 %v9490_v46, %v3281_v34  ;;  %v3239_v12 = vpop.f32.mrb[41].mxu0  ;;  %v3321_v55 = vpop.f32.mrb[41].mxu1  ;;  %v3371_v39 = vld [vmem:[#allocation4 + $0x18] sm:$0xff] }
 0x594   : > { %3271 = vst.msk [vmem:[#allocation4 + $0x80] sm:$0xff] %vm342_vm4, %v3239_v12  ;;  %v3352_v17 = vadd.f32 %v3321_v55, %v3279_v19  ;;  %v9473_v49 = vpop.f32.mrb[42].mxu0  ;;  %v9491_v13 = vpop.f32.mrb[42].mxu1 }
 0x595   : > { %3362 = vst.msk [vmem:[#allocation4 + $0x50] sm:$0xff] %vm342_vm4, %v3354_v41  ;;  %3274 = vst.msk [vmem:[#allocation4 + $0x98] sm:$0xff] %vm342_vm4, %v9473_v49  ;;  %v3355_v47 = vadd.f32 %v9491_v13, %v3282_v40  ;;  %v3242_v8 = vpop.f32.mrb[43].mxu0  ;;  %v3324_v38 = vpop.f32.mrb[43].mxu1  ;;  %v3369_v41 = vld [vmem:[#allocation4 + $0x8] sm:$0xff]  ;;  %v3374_v13 = vld [vmem:[#allocation4 + $0x30] sm:$0xff] }
 0x596   : > { %3360 = vst.msk [vmem:[#allocation4 + $0x40] sm:$0xff] %vm342_vm4, %v3352_v17  ;;  %3272 = vst.msk [vmem:[#allocation4 + $0x88] sm:$0xff] %vm342_vm4, %v3242_v8  ;;  %v3353_v36 = vadd.f32 %v3324_v38, %v3280_v30  ;;  %v12381_v8 = vld [vmem:[%s14474_s5] ss:$0 sm:$0xff]  ;;  %v3372_v38 = vld [vmem:[#allocation4 + $0x20] sm:$0xff] }
 0x597   : > { %3363 = vst.msk [vmem:[#allocation4 + $0x58] sm:$0xff] %vm342_vm4, %v3355_v47 }
 0x598   : > { %3361 = vst.msk [vmem:[#allocation4 + $0x48] sm:$0xff] %vm342_vm4, %v3353_v36 }
 0x59a   : > { %v9476_v14 = vpop.f32.mrb[44].mxu0  ;;  %v9494_v11 = vpop.f32.mrb[44].mxu1 }
 0x59b   : > { %3277 = vst.msk [vmem:[#allocation4 + $0xb0] sm:$0xff] %vm342_vm4, %v9476_v14  ;;  %v3358_v9 = vadd.f32 %v9494_v11, %v3285_v29  ;;  %v3255_v21 = vpop.f32.mrb[45].mxu0  ;;  %v3337_v0 = vpop.f32.mrb[45].mxu1  ;;  %v3375_v29 = vld [vmem:[#allocation4 + $0x38] sm:$0xff] }
 0x59c   : > { %3275 = vst.msk [vmem:[#allocation4 + $0xa0] sm:$0xff] %vm342_vm4, %v3255_v21  ;;  %v3356_v54 = vadd.f32 %v3337_v0, %v3283_v57  ;;  %v9477_v26 = vpop.f32.mrb[46].mxu0  ;;  %v9495_v63 = vpop.f32.mrb[46].mxu1  ;;  %v3373_v57 = vld [vmem:[#allocation4 + $0x28] sm:$0xff] }
 0x59d   : > { %3366 = vst.msk [vmem:[#allocation4 + $0x70] sm:$0xff] %vm342_vm4, %v3358_v9  ;;  %3278 = vst.msk [vmem:[#allocation4 + $0xb8] sm:$0xff] %vm342_vm4, %v9477_v26  ;;  %v3359_v56 = vadd.f32 %v9495_v63, %v3286_v43  ;;  %v3258_v33 = vpop.f32.mrb[47].mxu0  ;;  %v3340_v37 = vpop.f32.mrb[47].mxu1 }
 0x59e   : > { %3364 = vst.msk [vmem:[#allocation4 + $0x60] sm:$0xff] %vm342_vm4, %v3356_v54  ;;  %3276 = vst.msk [vmem:[#allocation4 + $0xa8] sm:$0xff] %vm342_vm4, %v3258_v33  ;;  %v3357_v16 = vadd.f32 %v3340_v37, %v3284_v35 }
 0x59f   : > { %3367 = vst.msk [vmem:[#allocation4 + $0x78] sm:$0xff] %vm342_vm4, %v3359_v56 }
 0x5a0   : > { %3365 = vst.msk [vmem:[#allocation4 + $0x68] sm:$0xff] %vm342_vm4, %v3357_v16 }
 0x5a2   : > { %v9518_v15 = vpop.f32.mrb[48].mxu1 }
 0x5a3   : > { %v3581_v18 = vpop.f32.mrb[49].mxu1 }
 0x5a4   : > { %v9519_v1 = vpop.f32.mrb[50].mxu1 }
 0x5a5   : > { %v12364_v59 = vpop.f32.mrb[51].mxu1 }
 0x5a6   : > { %v9508_v27 = vpop.f32.mrb[48].mxu0 }
 0x5a7   : > { %v3473_v20 = vadd.f32 %v9508_v27, %v3370_v48  ;;  %v3440_v52 = vpop.f32.mrb[49].mxu0 }
 0x5a8   : > { %v3471_v32 = vadd.f32 %v3440_v52, %v3368_v7  ;;  %v9509_v34 = vpop.f32.mrb[50].mxu0 }
 0x5a9   : > { %3481 = vst.msk [vmem:[#allocation4 + $0x10] sm:$0xff] %vm342_vm4, %v3473_v20  ;;  %v3474_v46 = vadd.f32 %v9509_v34, %v3371_v39  ;;  %v3443_v12 = vpop.f32.mrb[51].mxu0  ;;  %v4076_v39 = vld [vmem:[#allocation3 + $0x10] sm:$0xff] }
 0x5aa   : > { %3479 = vst.msk [vmem:[#allocation4] sm:$0xff] %vm342_vm4, %v3471_v32  ;;  %v3472_v19 = vadd.f32 %v3443_v12, %v3369_v41  ;;  %v12368_v55 = vpop.f32.mrb[52].mxu1 }
 0x5ab   : > { %3482 = vst.msk [vmem:[#allocation4 + $0x18] sm:$0xff] %vm342_vm4, %v3474_v46  ;;  %v12371_v17 = vpop.f32.mrb[53].mxu1 }
 0x5ac   : > { %3480 = vst.msk [vmem:[#allocation4 + $0x8] sm:$0xff] %vm342_vm4, %v3472_v19  ;;  %v12374_v49 = vpop.f32.mrb[54].mxu1  ;;  %v4074_v19 = vld [vmem:[#allocation3] sm:$0xff] }
 0x5ad   : > { %v12376_v40 = vpop.f32.mrb[55].mxu1 }
 0x5ae   : > { %v9512_v47 = vpop.f32.mrb[52].mxu0 }
 0x5af   : > { %v3477_v30 = vadd.f32 %v9512_v47, %v3374_v13  ;;  %v3456_v36 = vpop.f32.mrb[53].mxu0 }
 0x5b0   : > { %v3475_v14 = vadd.f32 %v3456_v36, %v3372_v38  ;;  %v9513_v11 = vpop.f32.mrb[54].mxu0  ;;  %v3489_v9 = vld [vmem:[#allocation4 + $0x10] sm:$0xff] }
 0x5b1   : > { %3485 = vst.msk [vmem:[#allocation4 + $0x30] sm:$0xff] %vm342_vm4, %v3477_v30  ;;  %v3478_v21 = vadd.f32 %v9513_v11, %v3375_v29  ;;  %v3459_v0 = vpop.f32.mrb[55].mxu0  ;;  %v3497_v54 = vadd.f32 %v12381_v8, %v3489_v9  ;;  %v3487_v26 = vld [vmem:[#allocation4] sm:$0xff]  ;;  %v4077_v30 = vld [vmem:[#allocation3 + $0x18] sm:$0xff]  ;;  %v4075_v29 = vld [vmem:[#allocation3 + $0x8] sm:$0xff] }
 0x5b2   : > { %3483 = vst.msk [vmem:[#allocation4 + $0x20] sm:$0xff] %vm342_vm4, %v3475_v14  ;;  %v3476_v43 = vadd.f32 %v3459_v0, %v3373_v57  ;;  %v9532_v63 = vpop.f32.mrb[56].mxu1  ;;  %v3495_v56 = vadd.f32 %v12381_v8, %v3487_v26  ;;  %v3490_v33 = vld [vmem:[#allocation4 + $0x18] sm:$0xff] }
 0x5b3   : > { %3486 = vst.msk [vmem:[#allocation4 + $0x38] sm:$0xff] %vm342_vm4, %v3478_v21  ;;  %4068 = vst.msk [vmem:[#allocation3 + $0x50] sm:$0xff] %vm342_vm4, %v9532_v63  ;;  %v4035_v35 = vpop.f32.mrb[57].mxu1  ;;  %v3614_v37 = vadd.f32 %v9518_v15, %v3497_v54  ;;  %v3498_v16 = vadd.f32 %v12381_v8, %v3490_v33  ;;  %v3488_v48 = vld [vmem:[#allocation4 + $0x8] sm:$0xff] }
 0x5b4   : > { %3484 = vst.msk [vmem:[#allocation4 + $0x28] sm:$0xff] %vm342_vm4, %v3476_v43  ;;  %4066 = vst.msk [vmem:[#allocation3 + $0x40] sm:$0xff] %vm342_vm4, %v4035_v35  ;;  %v9533_v27 = vpop.f32.mrb[58].mxu1  ;;  %v3612_v20 = vadd.f32 %v3581_v18, %v3495_v56  ;;  %v3496_v7 = vadd.f32 %v12381_v8, %v3488_v48 }
 0x5b5   : > { %4069 = vst.msk [vmem:[#allocation3 + $0x58] sm:$0xff] %vm342_vm4, %v9533_v27  ;;  %v4038_v15 = vpop.f32.mrb[59].mxu1  ;;  %v3622_v52 = vmax.f32 %v3614_v37, 0.0  ;;  %v3615_v32 = vadd.f32 %v9519_v1, %v3498_v16  ;;  %v4080_v27 = vld [vmem:[#allocation3 + $0x30] sm:$0xff] }
 0x5b6   : > { %4067 = vst.msk [vmem:[#allocation3 + $0x48] sm:$0xff] %vm342_vm4, %v4038_v15  ;;  %v9546_v34 = vpop.f32.mrb[56].mxu0  ;;  %v3620_v46 = vmax.f32 %v3612_v20, 0.0  ;;  %v3613_v41 = vadd.f32 %v12364_v59, %v3496_v7 }
 0x5b7   : > { %v4149_v12 = vadd.f32 %v9546_v34, %v4076_v39  ;;  %v4116_v13 = vpop.f32.mrb[57].mxu0  ;;  %3630 = vst.msk [vmem:[%s12396_s14 + $0x10] sm:$0xff] %vm342_vm4, %v3622_v52  ;;  %v3623_v18 = vmax.f32 %v3615_v32, 0.0  ;;  %v4078_v32 = vld [vmem:[#allocation3 + $0x20] sm:$0xff]  ;;  %v4081_v34 = vld [vmem:[#allocation3 + $0x38] sm:$0xff] }
 0x5b8   : > { %v4147_v47 = vadd.f32 %v4116_v13, %v4074_v19  ;;  %v9547_v38 = vpop.f32.mrb[58].mxu0  ;;  %3628 = vst.msk [vmem:[%s12396_s14] sm:$0xff] %vm342_vm4, %v3620_v46  ;;  %v3621_v1 = vmax.f32 %v3613_v41, 0.0  ;;  %v3493_v36 = vld [vmem:[#allocation4 + $0x30] sm:$0xff] }
 0x5b9   : > { %4157 = vst.msk [vmem:[#allocation3 + $0x10] sm:$0xff] %vm342_vm4, %v4149_v12  ;;  %v4150_v14 = vadd.f32 %v9547_v38, %v4077_v30  ;;  %v4119_v59 = vpop.f32.mrb[59].mxu0  ;;  %3631 = vst.msk [vmem:[%s12396_s14 + $0x18] sm:$0xff] %vm342_vm4, %v3623_v18  ;;  %v3501_v11 = vadd.f32 %v12381_v8, %v3493_v36  ;;  %v3491_v9 = vld [vmem:[#allocation4 + $0x20] sm:$0xff]  ;;  %v4079_v12 = vld [vmem:[#allocation3 + $0x28] sm:$0xff] }
 0x5ba   : > { %4155 = vst.msk [vmem:[#allocation3] sm:$0xff] %vm342_vm4, %v4147_v47  ;;  %v4148_v21 = vadd.f32 %v4119_v59, %v4075_v29  ;;  %v9536_v57 = vpop.f32.mrb[60].mxu1  ;;  %3629 = vst.msk [vmem:[%s12396_s14 + $0x8] sm:$0xff] %vm342_vm4, %v3621_v1  ;;  %v3499_v0 = vadd.f32 %v12381_v8, %v3491_v9  ;;  %v3494_v54 = vld [vmem:[#allocation4 + $0x38] sm:$0xff]  ;;  %v4165_v13 = vld [vmem:[#allocation3 + $0x90] sm:$0xff] }
 0x5bb   : > { %4158 = vst.msk [vmem:[#allocation3 + $0x18] sm:$0xff] %vm342_vm4, %v4150_v14  ;;  %4072 = vst.msk [vmem:[#allocation3 + $0x70] sm:$0xff] %vm342_vm4, %v9536_v57  ;;  %v4051_v26 = vpop.f32.mrb[61].mxu1  ;;  %v3618_v43 = vadd.f32 %v12368_v55, %v3501_v11  ;;  %v3502_v63 = vadd.f32 %v12381_v8, %v3494_v54  ;;  %v3492_v56 = vld [vmem:[#allocation4 + $0x28] sm:$0xff]  ;;  %v4163_v30 = vld [vmem:[#allocation3 + $0x80] sm:$0xff] }
 0x5bc   : > { %4156 = vst.msk [vmem:[#allocation3 + $0x8] sm:$0xff] %vm342_vm4, %v4148_v21  ;;  %4070 = vst.msk [vmem:[#allocation3 + $0x60] sm:$0xff] %vm342_vm4, %v4051_v26  ;;  %v9537_v33 = vpop.f32.mrb[62].mxu1  ;;  %v3616_v35 = vadd.f32 %v12371_v17, %v3499_v0  ;;  %v3500_v37 = vadd.f32 %v12381_v8, %v3492_v56  ;;  %v4166_v36 = vld [vmem:[#allocation3 + $0x98] sm:$0xff]  ;;  %v4164_v59 = vld [vmem:[#allocation3 + $0x88] sm:$0xff] }
 0x5bd   : > { %4073 = vst.msk [vmem:[#allocation3 + $0x78] sm:$0xff] %vm342_vm4, %v9537_v33  ;;  %v4054_v16 = vpop.f32.mrb[63].mxu1  ;;  %v3626_v48 = vmax.f32 %v3618_v43, 0.0  ;;  %v3619_v55 = vadd.f32 %v12374_v49, %v3502_v63  ;;  %v4169_v21 = vld [vmem:[#allocation3 + $0xb0] sm:$0xff]  ;;  %v4167_v54 = vld [vmem:[#allocation3 + $0xa0] sm:$0xff]  ;;  %v4170_v56 = vld [vmem:[#allocation3 + $0xb8] sm:$0xff] }
 0x5be   : > { %4071 = vst.msk [vmem:[#allocation3 + $0x68] sm:$0xff] %vm342_vm4, %v4054_v16  ;;  %v9550_v20 = vpop.f32.mrb[60].mxu0  ;;  %v3624_v7 = vmax.f32 %v3616_v35, 0.0  ;;  %v3617_v15 = vadd.f32 %v12376_v40, %v3500_v37  ;;  %v10099_v35 = vld [vmem:[%s14472_s3] ss:$0 sm:$0xff] }
 0x5bf   : > { %v4153_v52 = vadd.f32 %v9550_v20, %v4080_v27  ;;  %v4132_v17 = vpop.f32.mrb[61].mxu0  ;;  %3634 = vst.msk [vmem:[%s12396_s14 + $0x30] sm:$0xff] %vm342_vm4, %v3626_v48  ;;  %v3627_v8 = vmax.f32 %v3619_v55, 0.0  ;;  %v4168_v55 = vld [vmem:[#allocation3 + $0xa8] sm:$0xff] }
 0x5c0   : > { %v4151_v39 = vadd.f32 %v4132_v17, %v4078_v32  ;;  %v9551_v46 = vpop.f32.mrb[62].mxu0  ;;  %3632 = vst.msk [vmem:[%s12396_s14 + $0x20] sm:$0xff] %vm342_vm4, %v3624_v7  ;;  %v3625_v49 = vmax.f32 %v3617_v15, 0.0 }
 0x5c1   : > { %4161 = vst.msk [vmem:[#allocation3 + $0x30] sm:$0xff] %vm342_vm4, %v4153_v52  ;;  %v4154_v41 = vadd.f32 %v9551_v46, %v4081_v34  ;;  %v4135_v19 = vpop.f32.mrb[63].mxu0  ;;  %3635 = vst.msk [vmem:[%s12396_s14 + $0x38] sm:$0xff] %vm342_vm4, %v3627_v8 }
 0x5c2   : > { %4159 = vst.msk [vmem:[#allocation3 + $0x20] sm:$0xff] %vm342_vm4, %v4151_v39  ;;  %v4152_v40 = vadd.f32 %v4135_v19, %v4079_v12  ;;  %v9560_v18 = vpop.f32.mrb[64].mxu1  ;;  %3633 = vst.msk [vmem:[%s12396_s14 + $0x28] sm:$0xff] %vm342_vm4, %v3625_v49  ;;  %v14693_v49 = vld [vmem:[#allocation11_spill] sm:$0xff]  ;;  %v14694_v12 = vld [vmem:[#allocation12_spill] sm:$0xff] }
 0x5c3   : > { %4162 = vst.msk [vmem:[#allocation3 + $0x38] sm:$0xff] %vm342_vm4, %v4154_v41  ;;  %v4238_v47 = vadd.f32 %v9560_v18, %v4165_v13  ;;  %v4205_v38 = vpop.f32.mrb[65].mxu1  ;;  %v14696_v18 = vld [vmem:[#allocation9_spill] sm:$0xff] }
 0x5c4   : > { %4160 = vst.msk [vmem:[#allocation3 + $0x28] sm:$0xff] %vm342_vm4, %v4152_v40  ;;  %v4236_v1 = vadd.f32 %v4205_v38, %v4163_v30  ;;  %v9561_v14 = vpop.f32.mrb[66].mxu1  ;;  %v14695_v40 = vld [vmem:[#allocation10_spill] sm:$0xff] }
 0x5c5   : > { %4246 = vst.msk [vmem:[#allocation3 + $0x90] sm:$0xff] %vm342_vm4, %v4238_v47  ;;  %v4239_v29 = vadd.f32 %v9561_v14, %v4166_v36  ;;  %v4208_v11 = vpop.f32.mrb[67].mxu1 }
 0x5c6   : > { %4244 = vst.msk [vmem:[#allocation3 + $0x80] sm:$0xff] %vm342_vm4, %v4236_v1  ;;  %v4237_v9 = vadd.f32 %v4208_v11, %v4164_v59 }
 0x5c7   : > { %4247 = vst.msk [vmem:[#allocation3 + $0x98] sm:$0xff] %vm342_vm4, %v4239_v29 }
 0x5c8   : > { %4245 = vst.msk [vmem:[#allocation3 + $0x88] sm:$0xff] %vm342_vm4, %v4237_v9 }
 0x5ca   : > { %v9564_v57 = vpop.f32.mrb[68].mxu1 }
 0x5cb   : > { %v4242_v0 = vadd.f32 %v9564_v57, %v4169_v21  ;;  %v4221_v26 = vpop.f32.mrb[69].mxu1 }
 0x5cc   : > { %v4254_v43 = vld [vmem:[#allocation3 + $0x90] sm:$0xff]  ;;  %v4240_v63 = vadd.f32 %v4221_v26, %v4167_v54  ;;  %v9565_v33 = vpop.f32.mrb[70].mxu1 }
 0x5cd   : > { %v4262_v37 = vadd.f32 %v10099_v35, %v4254_v43  ;;  %v4252_v16 = vld [vmem:[#allocation3 + $0x80] sm:$0xff]  ;;  %4250 = vst.msk [vmem:[#allocation3 + $0xb0] sm:$0xff] %vm342_vm4, %v4242_v0  ;;  %v4243_v48 = vadd.f32 %v9565_v33, %v4170_v56  ;;  %v4224_v27 = vpop.f32.mrb[71].mxu1  ;;  %v14697_v43 = vld [vmem:[#allocation15_spill] sm:$0xff]  ;;  %v14698_v56 = vld [vmem:[#allocation16_spill] sm:$0xff] }
 0x5ce   : > { %v4260_v20 = vadd.f32 %v10099_v35, %v4252_v16  ;;  %v4255_v7 = vld [vmem:[#allocation3 + $0x98] sm:$0xff]  ;;  %4248 = vst.msk [vmem:[#allocation3 + $0xa0] sm:$0xff] %vm342_vm4, %v4240_v63  ;;  %v4241_v15 = vadd.f32 %v4224_v27, %v4168_v55 }
 0x5cf   : > { %v4270_v52 = vmax.f32 %v4262_v37, 0.0  ;;  %v4263_v32 = vadd.f32 %v10099_v35, %v4255_v7  ;;  %v4253_v17 = vld [vmem:[#allocation3 + $0x88] sm:$0xff]  ;;  %4251 = vst.msk [vmem:[#allocation3 + $0xb8] sm:$0xff] %vm342_vm4, %v4243_v48  ;;  %v14699_v37 = vld [vmem:[#allocation13_spill] sm:$0xff] }
 0x5d0   : > { %v4268_v8 = vmax.f32 %v4260_v20, 0.0  ;;  %v4261_v39 = vadd.f32 %v10099_v35, %v4253_v17  ;;  %4249 = vst.msk [vmem:[#allocation3 + $0xa8] sm:$0xff] %vm342_vm4, %v4241_v15  ;;  %v14700_v48 = vld [vmem:[#allocation14_spill] sm:$0xff]  ;;  %v12459_v20 = vld [vmem:[#allocation2] sm:$0xff] }
 0x5d1   : > { %v4271_v34 = vmax.f32 %v4263_v32, 0.0  ;;  %v4278_v41 = vmul.f32 %v4270_v52, %v14693_v49  ;;  %v4352_v52 = vrot.slane %v12459_v20, 1 }
 0x5d2   : > { %v4269_v46 = vmax.f32 %v4261_v39, 0.0  ;;  %v4276_v13 = vmul.f32 %v4268_v8, %v14695_v40  ;;  %v4301_v8 = vshll.u32 %v12459_v20, 16 }
 0x5d3   : > { %v4279_v19 = vmul.f32 %v4271_v34, %v14694_v12 }
 0x5d4   : > { %v4277_v47 = vmul.f32 %v4269_v46, %v14696_v18  ;;  %v4258_v30 = vld [vmem:[#allocation3 + $0xb0] sm:$0xff] }
 0x5d5   : > { %v4285_v38 = vpack.c.bf16 %v4279_v19, %v4278_v41  ;;  %v4266_v1 = vadd.f32 %v10099_v35, %v4258_v30  ;;  %v4256_v36 = vld [vmem:[#allocation3 + $0xa0] sm:$0xff]  ;;  %v4371_v19 = vrot.slane %v12459_v20, 4 }
 0x5d6   : > { %v4284_v14 = vpack.c.bf16 %v4277_v47, %v4276_v13  ;;  %v4264_v29 = vadd.f32 %v10099_v35, %v4256_v36  ;;  %v4259_v59 = vld [vmem:[#allocation3 + $0xb8] sm:$0xff]  ;;  %v4299_v13 = vshrl.u32 %v12459_v20, 16  ;;  %v4303_v47 = vrot.slane %v4301_v8, 1 }
 0x5d7   : > { %4289 = vst.msk [vmem:[#allocation2 + $0x10] sm:$0xff] %vm342_vm4, %v4285_v38  ;;  %v4274_v11 = vmax.f32 %v4266_v1, 0.0  ;;  %v4267_v9 = vadd.f32 %v10099_v35, %v4259_v59  ;;  %v4257_v21 = vld [vmem:[#allocation3 + $0xa8] sm:$0xff] }
 0x5d8   : > { %4288 = vst.msk [vmem:[#allocation2 + $0x8] sm:$0xff] %vm342_vm4, %v4284_v14  ;;  %v4272_v57 = vmax.f32 %v4264_v29, 0.0  ;;  %v4265_v0 = vadd.f32 %v10099_v35, %v4257_v21 }
 0x5d9   : > { %v4275_v54 = vmax.f32 %v4267_v9, 0.0  ;;  %v4282_v63 = vmul.f32 %v4274_v11, %v14697_v43  ;;  %v4304_v9 = vor.u32 %v4303_v47, %v4299_v13 }
 0x5da   : > { %v4273_v26 = vmax.f32 %v4265_v0, 0.0  ;;  %v4280_v16 = vmul.f32 %v4272_v57, %v14699_v37 }
 0x5db   : > { %v4283_v33 = vmul.f32 %v4275_v54, %v14698_v56 }
 0x5dc   : > { %v4281_v55 = vmul.f32 %v4273_v26, %v14700_v48 }
 0x5dd   : > { %v4287_v27 = vpack.c.bf16 %v4283_v33, %v4282_v63 }
 0x5de   : > { %v4286_v7 = vpack.c.bf16 %v4281_v55, %v4280_v16  ;;  %v12461_v15 = vld [vmem:[#allocation2 + $0x10] sm:$0xff] }
 0x5df   : > { %4291 = vst.msk [vmem:[#allocation2 + $0x20] sm:$0xff] %vm342_vm4, %v4287_v27  ;;  %4437 = vrot.lane.b32.xlu1 %v12461_v15, %s10181_s26  ;;  %v12467_v35 = vld [vmem:[#allocation2 + $0x8] sm:$0xff]  ;;  %v4355_v34 = vrot.slane %v12461_v15, 1  ;;  %v4374_v41 = vrot.slane %v12461_v15, 4  ;;  %v4314_v30 = vshll.u32 %v12461_v15, 16  ;;  %v4318_v14 = vshrl.u32 %v12461_v15, 16 }
 0x5e0   : > { %4290 = vst.msk [vmem:[#allocation2 + $0x18] sm:$0xff] %vm342_vm4, %v4286_v7  ;;  %4435 = vrot.lane.b32.xlu0 %v12467_v35, %s10181_s26  ;;  %v4416_v32 = vrot.slane %v12467_v35, 5  ;;  %v4353_v17 = vrot.slane %v12467_v35, 1  ;;  %v4372_v46 = vrot.slane %v12467_v35, 4  ;;  %v4306_v1 = vshll.u32 %v12467_v35, 16 }
 0x5e1   : > { %v4310_v36 = vshrl.u32 %v12467_v35, 16  ;;  %v4417_v59 = vrot.slane %v12461_v15, 5  ;;  %v4394_v21 = vrot.slane %v4314_v30, 5  ;;  %v4393_v26 = vrot.slane %v4318_v14, 4 }
 0x5e2   : > { %v4354_v39 = vsel %vm14701_vm5, %v4352_v52, %v4353_v17  ;;  %v4356_v38 = vsel %vm14702_vm9, %v4353_v17, %v4355_v34  ;;  %v4375_v29 = vsel %vm14703_vm7, %v4372_v46, %v4374_v41  ;;  %v4373_v11 = vsel %vm14704_vm12, %v4371_v19, %v4372_v46 }
 0x5e3   : > { %4425 = vrot.lane.b32.xlu1 %v4416_v32, %s10184_s16  ;;  %v4308_v57 = vrot.slane %v4306_v1, 1  ;;  %v4390_v0 = vrot.slane %v4310_v36, 4  ;;  %v4391_v54 = vrot.slane %v4306_v1, 5  ;;  %vm14705_vm5 = vcmask 1042432  }
 0x5e4   : > { %4361 = vrot.lane.b32.xlu0 %v4354_v39, %s10173_s9  ;;  %v4418_v63 = vsel %vm14705_vm5, %v4416_v32, %v4417_v59  ;;  %vm14706_vm9 = vsmask.f32 7424  ;;  %v12497_v55 = vor.u32 %v4394_v21, %v4393_v26  ;;  %vm14707_vm7 = vsmask.f32 3328 }
 0x5e5   : > { %v4309_v33 = vsel %vm14706_vm9, %v4304_v9, %v4308_v57  ;;  %v4392_v16 = vor.u32 %v4391_v54, %v4390_v0  ;;  %v4312_v7 = vor.u32 %v4310_v36, %v4308_v57  ;;  %v4316_v52 = vrot.slane %v4314_v30, 1  ;;  %vm14708_vm12 = vmmov %vm14706_vm9  ;;  %v12544_v57 = vld [vmem:[%s10239_s29 + $0xe0] sm:$0xf]  ;;  %v12546_v0 = vpop.permute.xlu0 %4443 }
 0x5e6   : > { %v12507_v17 = vld [vmem:[#allocation2 + $0x20] sm:$0xff]  ;;  %vm14709_vm5 = vcmask 1046528   ;;  %vm14710_vm9 = vcmask 1043456   ;;  %v4423_v1 = vrot.slane %v12252_v51, 5 }
 0x5e7   : > { %4363 = vrot.lane.b32.xlu1 %v4356_v38, %s10173_s9  ;;  %v4396_v27 = vsel %vm14707_vm7, %v4392_v16, %v12497_v55  ;;  %v4317_v32 = vsel %vm14708_vm12, %v4312_v7, %v4316_v52  ;;  %v4359_v8 = vrot.slane %v12507_v17, 1  ;;  %v12513_v39 = vld [vmem:[#allocation2 + $0x18] sm:$0xff]  ;;  %v4378_v47 = vrot.slane %v12507_v17, 4 }
 0x5e8   : > { %4382 = vrot.lane.b32.xlu0 %v4375_v29, %s10176_s12  ;;  %v4376_v19 = vrot.slane %v12513_v39, 4  ;;  %v4419_v30 = vrot.slane %v12513_v39, 5  ;;  %vm14711_vm7 = vcmask 1042432   ;;  %v4357_v36 = vrot.slane %v12513_v39, 1 }
 0x5e9   : > { %v4464_v46 = vsel %vm14709_vm5, %v4359_v8, %v4463_v24  ;;  %vm14712_vm12 = vmmov %vm14711_vm7  ;;  %v4320_v21 = vor.u32 %v4318_v14, %v4316_v52  ;;  %v4334_v26 = vshrl.u32 %v12507_v17, 16  ;;  %v12556_v14 = vcombine.low %v12291_v45, %v12544_v57 }
 0x5ea   : > { %v4377_v13 = vsel %vm14710_vm9, %v4374_v41, %v4376_v19  ;;  %v4420_v24 = vsel %vm14711_vm7, %v4417_v59, %v4419_v30  ;;  %v4358_v29 = vsel %vm14709_vm5, %v4355_v34, %v4357_v36  ;;  %vm14713_vm9 = vmmov %vm14709_vm5  ;;  %v4330_v59 = vshll.u32 %v12507_v17, 16 }
 0x5eb   : > { %4380 = vrot.lane.b32.xlu1 %v4373_v11, %s10176_s12  ;;  %v4322_v11 = vshll.u32 %v12513_v39, 16  ;;  %v4360_v51 = vsel %vm14713_vm9, %v4357_v36, %v4359_v8  ;;  %vm14714_vm7 = vcmask 1043456   ;;  %vm14716_vm5 = vcmask 1042432  }
 0x5ec   : > { %4427 = vrot.lane.b32.xlu0 %v4418_v63, %s10184_s16  ;;  %v4379_v34 = vsel %vm14714_vm7, %v4376_v19, %v4378_v47  ;;  %v4332_v54 = vrot.slane %v4330_v59, 1  ;;  %v4401_v7 = vrot.slane %v4334_v26, 4  ;;  %v4402_v52 = vrot.slane %v4330_v59, 5 }
 0x5ed   : > { %v4324_v9 = vrot.slane %v4322_v11, 1  ;;  %v5074_v19 = vshrl.u32 %v12556_v14, 16  ;;  %vm14718_vm7 = vsmask.f32 3328 }
 0x5ef   : > { %4337 = vrot.lane.b32.xlu1 %v4309_v33, %s10172_s8  ;;  %v4326_v33 = vshrl.u32 %v12513_v39, 16 }
 0x5f0   : > { %4465 = vrot.lane.b32.xlu0 %v4356_v38, %s10183_s13  ;;  %v4421_v38 = vrot.slane %v12507_v17, 5 }
 0x5f1   : > { %v4328_v59 = vor.u32 %v4326_v33, %v4324_v9 }
 0x5f2   : > { %v4424_v41 = vsel %vm14712_vm12, %v4421_v38, %v4423_v1  ;;  %vm14715_vm12 = vsmask.f32 7424  ;;  %v12567_v1 = vpop.permute.xlu1 %5082 }
 0x5f3   : > { %4407 = vrot.lane.b32.xlu1 %v4396_v27, %s10178_s28  ;;  %v4325_v63 = vsel %vm14715_vm12, %v4320_v21, %v4324_v9  ;;  %v4336_v27 = vor.u32 %v4334_v26, %v4332_v54  ;;  %vm14717_vm9 = vmmov %vm14715_vm12 }
 0x5f4   : > { %4405 = vrot.lane.b32.xlu0 %v4392_v16, %s10178_s28  ;;  %v4422_v16 = vsel %vm14716_vm5, %v4419_v30, %v4421_v38  ;;  %v5076_v30 = vrot.slane %v5074_v19, 4  ;;  %vm14719_vm12 = vmmov %vm14718_vm7 }
 0x5f5   : > { %v4449_v36 = vsel %vm14717_vm9, %v4336_v27, %v12257_v58  ;;  %vm14720_vm5 = vmmov %vm14717_vm9 }
 0x5f6   : > { %vm14721_vm9 = vmmov %vm14718_vm7 }
 0x5f7   : > { %4453 = vrot.lane.b32.xlu1 %v4317_v32, %s10182_s27 }
 0x5f8   : > { %4339 = vrot.lane.b32.xlu0 %v4317_v32, %s10172_s8  ;;  %v4397_v32 = vrot.slane %v4326_v33, 4 }
 0x5fb   : > { %4441 = vrot.lane.b32.xlu1 %v12507_v17, %s10181_s26 }
 0x5fc   : > { %4439 = vrot.lane.b32.xlu0 %v12513_v39, %s10181_s26 }
 0x5ff   : > { %4471 = vrot.lane.b32.xlu1 %v4464_v46, %s10183_s13  ;;  %v12560_v46 = vpop.permute.xlu0 %4461 }
 0x600   : > { %4369 = vrot.lane.b32.xlu0 %v4359_v8, %s10173_s9  ;;  %v4398_v8 = vrot.slane %v4322_v11, 5  ;;  %v12579_v11 = vpop.permute.xlu1 %5086 }
 0x602   : > { %v4399_v45 = vor.u32 %v4398_v8, %v4397_v32  ;;  %v8834_v32 = vld [vmem:[%s10239_s29 + $0xe8] sm:$0xf] }
 0x603   : > { %4384 = vrot.lane.b32.xlu1 %v4377_v13, %s10176_s12  ;;  %v5077_v13 = vshll.u32 %v12556_v14, 16 }
 0x604   : > { %4388 = vrot.lane.b32.xlu0 %v4378_v47, %s10176_s12  ;;  %v4403_v47 = vor.u32 %v4402_v52, %v4401_v7 }
 0x605   : > { %v5079_v38 = vrot.slane %v5077_v13, 5 }
 0x606   : > { %v4404_v33 = vsel %vm14721_vm9, %v4399_v45, %v4403_v47 }
 0x607   : > { %4429 = vrot.lane.b32.xlu1 %v4420_v24, %s10184_s16  ;;  %v12569_v24 = vpop.permute.xlu0 %4473 }
 0x608   : > { %4433 = vrot.lane.b32.xlu0 %v4424_v41, %s10184_s16  ;;  %v4400_v41 = vsel %vm14718_vm7, %v12497_v55, %v4399_v45  ;;  %v12593_v55 = vpop.permute.xlu1 %5106  ;;  %vm14722_vm7 = vcmask 1042432   ;;  %v12629_v45 = vld [vmem:[%s14475_s6] sm:$0x3] }
 0x609   : > { %9904 = vmatprep.subr.msk.bf16.mxu1 %vm829_vm2, %v12629_v45 }
 0x60b   : > { %4467 = vrot.lane.b32.xlu1 %v4358_v29, %s10183_s13 }
 0x60c   : > { %4365 = vrot.lane.b32.xlu0 %v4358_v29, %s10173_s9  ;;  %v12577_v29 = vor.u32 %v5079_v38, %v5076_v30 }
 0x60e   : > { %v5081_v58 = vsel %vm14719_vm12, %v12282_v60, %v12577_v29  ;;  %v12602_v60 = vpop.permute.xlu1 %5114  ;;  %vm14723_vm12 = vmmov %vm14722_vm7 }
 0x60f   : > { %4367 = vrot.lane.b32.xlu1 %v4360_v51, %s10173_s9 }
 0x610   : > { %4469 = vrot.lane.b32.xlu0 %v4360_v51, %s10183_s13  ;;  %v12583_v51 = vpop.permute.xlu0 %5084 }
 0x613   : > { %4386 = vrot.lane.b32.xlu1 %v4379_v34, %s10176_s12  ;;  %v8833_v34 = vld [vmem:[%s10239_s29 + $0xe4] sm:$0xf] }
 0x614   : > { %4455 = vrot.lane.b32.xlu0 %v4325_v63, %s10182_s27  ;;  %v12595_v21 = vpop.permute.xlu0 %5104  ;;  %v8845_v26 = vcombine.low %v8833_v34, %v8833_v34 }
 0x617   : > { %4431 = vrot.lane.b32.xlu1 %v4422_v16, %s10184_s16 }
 0x618   : > { %4345 = vrot.lane.b32.xlu0 %v4336_v27, %s10172_s8  ;;  %v12605_v9 = vpop.permute.xlu0 %5108  ;;  %v12614_v27 = vpop.permute.xlu1 %5118 }
 0x61b   : > { %4341 = vrot.lane.b32.xlu1 %v4325_v63, %s10172_s8  ;;  %v5102_v63 = vrot.slane %v8845_v26, 5 }
 0x61c   : > { %4413 = vrot.lane.b32.xlu0 %v4403_v47, %s10178_s28  ;;  %v12617_v52 = vpop.permute.xlu0 %5116  ;;  %v8847_v47 = vcombine.low %v8834_v32, %v8834_v32  ;;  %v12633_v30 = vpop.permute.xlu1 %5162 }
 0x61f   : > { %4459 = vrot.lane.b32.xlu1 %v4449_v36, %s10182_s27  ;;  %v5180_v36 = vrot.slane %v8847_v47, 5 }
 0x620   : > { %4409 = vrot.lane.b32.xlu0 %v4400_v41, %s10178_s28 }
 0x623   : > { %5212 = vrot.lane.b32.xlu1 %v12272_v3, %s10177_s21  ;;  %v4333_v3 = vsel %vm14720_vm5, %v4328_v59, %v4332_v54  ;;  %v5100_v54 = vrot.slane %v12556_v14, 5  ;;  %v12641_v59 = vpop.permute.xlu1 %5182  ;;  %vm14724_vm5 = vmmov %vm14722_vm7 }
 0x624   : > { %5196 = vrot.lane.b32.xlu0 %v12309_v42, %s10176_s12 }
 0x625   : > { %v5103_v7 = vsel %vm14722_vm7, %v5100_v54, %v5102_v63  ;;  %v5101_v8 = vsel %vm14723_vm12, %v5098_v61, %v5100_v54  ;;  %v8848_v61 = vcombine.low %v8833_v34, %v8834_v32  ;;  %vm14725_vm7 = vmmov %vm14724_vm5 }
 0x626   : > { %vm14726_vm12 = vmmov %vm14724_vm5 }
 0x627   : > { %5216 = vrot.lane.b32.xlu1 %v5081_v58, %s10177_s21  ;;  %v5204_v41 = vshrl.u32 %v8848_v61, 16 }
 0x628   : > { %5214 = vrot.lane.b32.xlu0 %v12296_v10, %s10177_s21  ;;  %v8846_v10 = vcombine.low %v12544_v57, %v8833_v34 }
 0x62a   : > { %v5155_v16 = vshll.u32 %v8846_v10, 16  ;;  %v5178_v38 = vrot.slane %v8846_v10, 5 }
 0x62b   : > { %4457 = vrot.lane.b32.xlu1 %v4333_v3, %s10182_s27 }
 0x62c   : > { %5229 = vrot.lane.b32.xlu0 %v12285_v6, %s10178_s28  ;;  %v5152_v6 = vshrl.u32 %v8846_v10, 16  ;;  %v5157_v13 = vrot.slane %v5155_v16, 5  ;;  %v12652_v16 = vpop.permute.xlu1 %5186 }
 0x62e   : > { %v5154_v19 = vrot.slane %v5152_v6, 4  ;;  %v10033_v6 = vld [vmem:[%s10239_s29 + $0xec] ss:$0 sps:$4 sm:$0xff]  }
 0x62f   : > { %4343 = vrot.lane.b32.xlu1 %v4333_v3, %s10172_s8  ;;  %v5181_v3 = vsel %vm14724_vm5, %v5178_v38, %v5180_v36  ;;  %vm14727_vm5 = vmmov %vm14721_vm9 }
 0x630   : > { %5088 = vrot.lane.b32.xlu0 %v5081_v58, %s10174_s10  ;;  %v5158_v31 = vor.u32 %v5157_v13, %v5154_v19  ;;  %v5207_v58 = vshll.u32 %v8848_v61, 16  ;;  %v5227_v19 = vrot.slane %v10033_v6, 5 }
 0x632   : > { %v5159_v34 = vsel %vm14721_vm9, %v12325_v25, %v5158_v31  ;;  %v12663_v25 = vpop.permute.xlu1 %5194  ;;  %vm14728_vm9 = vmmov %vm14725_vm7 }
 0x633   : > { %4411 = vrot.lane.b32.xlu1 %v4404_v33, %s10178_s28  ;;  %v5209_v33 = vrot.slane %v5207_v58, 5 }
 0x634   : > { %5090 = vrot.lane.b32.xlu0 %v12577_v29, %s10174_s10 }
 0x637   : > { %5231 = vrot.lane.b32.xlu1 %v12304_v44, %s10178_s28  ;;  %v12636_v44 = vpop.permute.xlu0 %5160 }
 0x638   : > { %5112 = vrot.lane.b32.xlu0 %v5103_v7, %s10172_s8 }
 0x63b   : > { %5233 = vrot.lane.b32.xlu1 %v5101_v8, %s10178_s28  ;;  %v12644_v63 = vpop.permute.xlu0 %5164 }
 0x63c   : > { %5122 = vrot.lane.b32.xlu0 %v8845_v26, %s10171_s30  ;;  %v5206_v26 = vrot.slane %v5204_v41, 4 }
 0x63e   : > { %v5210_v32 = vor.u32 %v5209_v33, %v5206_v26 }
 0x63f   : > { %5110 = vrot.lane.b32.xlu1 %v5101_v8, %s10172_s8  ;;  %v12655_v7 = vpop.permute.xlu0 %5184  ;;  %v5225_v8 = vrot.slane %v8848_v61, 5 }
 0x640   : > { %5168 = vrot.lane.b32.xlu0 %v5158_v31, %s10173_s9 }
 0x641   : > { %v5228_v13 = vsel %vm14726_vm12, %v5225_v8, %v5227_v19 }
 0x643   : > { %5120 = vrot.lane.b32.xlu1 %v12556_v14, %s10171_s30  ;;  %v5179_v14 = vsel %vm14725_vm7, %v5176_v62, %v5178_v38  ;;  %v12666_v31 = vpop.permute.xlu0 %5192  ;;  %v5211_v62 = vsel %vm14727_vm5, %v12577_v29, %v5210_v32  ;;  %v5226_v38 = vsel %vm14728_vm9, %v5100_v54, %v5225_v8  ;;  %vm14729_vm7 = vcmask 97280  }
 0x644   : > { %5190 = vrot.lane.b32.xlu0 %v5181_v3, %s10175_s11  ;;  %vm14730_vm12 = vmmov %vm14729_vm7  ;;  %vm14731_vm5 = vcmask 162816  }
 0x645   : > { %vm14732_vm9 = vmmov %vm14729_vm7 }
 0x647   : > { %5166 = vrot.lane.b32.xlu1 %v5159_v34, %s10173_s9 }
 0x648   : > { %5200 = vrot.lane.b32.xlu0 %v8847_v47, %s10176_s12 }
 0x64b   : > { %5188 = vrot.lane.b32.xlu1 %v5179_v14, %s10175_s11 }
 0x64c   : > { %5220 = vrot.lane.b32.xlu0 %v5210_v32, %s10177_s21 }
 0x64f   : > { %5198 = vrot.lane.b32.xlu1 %v8846_v10, %s10176_s12 }
 0x650   : > { %5237 = vrot.lane.b32.xlu0 %v5228_v13, %s10178_s28 }
 0x651   : > { %v4438_v47 = vpop.permute.xlu1 %4437 }
 0x652   : > { %v4436_v61 = vpop.permute.xlu0 %4435 }
 0x653   : > { %5218 = vrot.lane.b32.xlu1 %v5211_v62, %s10177_s21 }
 0x655   : > { %v4426_v36 = vpop.permute.xlu1 %4425 }
 0x656   : > { %v4362_v41 = vpop.permute.xlu0 %4361 }
 0x657   : > { %5235 = vrot.lane.b32.xlu1 %v5226_v38, %s10178_s28 }
 0x659   : > { %v4364_v58 = vpop.permute.xlu1 %4363 }
 0x65a   : > { %v4383_v3 = vpop.permute.xlu0 %4382 }
 0x65d   : > { %v4381_v34 = vpop.permute.xlu1 %4380 }
 0x65e   : > { %v4428_v26 = vpop.permute.xlu0 %4427 }
 0x661   : > { %v4338_v10 = vpop.permute.xlu1 %4337 }
 0x662   : > { %v4466_v33 = vpop.permute.xlu0 %4465  ;;  %v4476_v54 = vsel %vm342_vm4, %v12459_v20, %v4338_v10 }
 0x663   : > { %v4486_v62 = vsel %vm706_vm6, %v4476_v54, %v4362_v41 }
 0x664   : > { %v4496_v48 = vsel %vm728_vm8, %v4486_v62, %v4381_v34 }
 0x665   : > { %v4408_v6 = vpop.permute.xlu1 %4407 }
 0x666   : > { %v4406_v14 = vpop.permute.xlu0 %4405 }
 0x667   : > { %v4506_v56 = vsel %vm750_vm10, %v4496_v48, %v4406_v14 }
 0x668   : > { %v4516_v40 = vsel %vm1915_vm15, %v4506_v56, %v4426_v36 }
 0x669   : > { %v4454_v19 = vpop.permute.xlu1 %4453  ;;  %v4526_v10 = vsel %vm1926_vm13, %v4516_v40, %v4436_v61 }
 0x66a   : > { %v4340_v29 = vpop.permute.xlu0 %4339  ;;  %v4536_v34 = vsel %vm1937_vm1, %v4526_v10, %v4454_v19 }
 0x66b   : > { %v4478_v18 = vsel %vm342_vm4, %v12467_v35, %v4340_v29  ;;  %v4546_v62 = vsel %vm1948_vm0, %v4536_v34, %v4466_v33 }
 0x66c   : > { %v4488_v49 = vsel %vm706_vm6, %v4478_v18, %v4364_v58  ;;  %v4555_v36 = vshrl.u32 %v4546_v62, 16  ;;  %v4558_v29 = vshll.u32 %v4546_v62, 16 }
 0x66d   : > { %v12675_v32 = vpop.permute.xlu1 %4441  ;;  %v4498_v41 = vsel %vm728_vm8, %v4488_v49, %v4383_v3 }
 0x66e   : > { %v12677_v13 = vpop.permute.xlu0 %4439  ;;  %v4508_v48 = vsel %vm750_vm10, %v4498_v41, %v4408_v6  ;;  %v4557_v3 = vrot.slane %v4555_v36, 3  ;;  %v4560_v19 = vrot.slane %v4558_v29, 4 }
 0x66f   : > { %v4518_v56 = vsel %vm1915_vm15, %v4508_v48, %v4428_v26 }
 0x670   : > { %v4528_v40 = vsel %vm1926_vm13, %v4518_v56, %v4438_v47  ;;  %v4561_v50 = vor.u32 %v4560_v19, %v4557_v3 }
 0x671   : > { %v12681_v8 = vpop.permute.xlu1 %4471 }
 0x672   : > { %v4370_v38 = vpop.permute.xlu0 %4369 }
 0x675   : > { %v4385_v37 = vpop.permute.xlu1 %4384 }
 0x676   : > { %v4389_v43 = vpop.permute.xlu0 %4388 }
 0x679   : > { %v4430_v12 = vpop.permute.xlu1 %4429 }
 0x67a   : > { %v4434_v20 = vpop.permute.xlu0 %4433 }
 0x67d   : > { %v4468_v54 = vpop.permute.xlu1 %4467 }
 0x67e   : > { %v4366_v23 = vpop.permute.xlu0 %4365 }
 0x681   : > { %v4368_v14 = vpop.permute.xlu1 %4367 }
 0x682   : > { %v4470_v35 = vpop.permute.xlu0 %4469 }
 0x685   : > { %v4387_v18 = vpop.permute.xlu1 %4386 }
 0x686   : > { %v4456_v58 = vpop.permute.xlu0 %4455 }
 0x687   : > { %v4538_v49 = vsel %vm1937_vm1, %v4528_v40, %v4456_v58 }
 0x688   : > { %v4548_v61 = vsel %vm1948_vm0, %v4538_v49, %v4468_v54 }
 0x689   : > { %v4562_v10 = vshrl.u32 %v4548_v61, 16  ;;  %v4565_v6 = vshll.u32 %v4548_v61, 16  ;;  %v4432_v41 = vpop.permute.xlu1 %4431 }
 0x68a   : > { %v4346_v22 = vpop.permute.xlu0 %4345 }
 0x68b   : > { %v4564_v33 = vrot.slane %v4562_v10, 3  ;;  %v4567_v34 = vrot.slane %v4565_v6, 4  ;;  %v4484_v47 = vsel %vm342_vm4, %v12507_v17, %v4346_v22  ;;  %v8824_v6 = vld [vmem:[%s10239_s29 + $0xc0] sm:$0xf] }
 0x68c   : > { %v4494_v29 = vsel %vm706_vm6, %v4484_v47, %v4370_v38  ;;  %v10100_v47 = vld [vmem:[%s10239_s29 + $0xc4] sm:$0xf] }
 0x68d   : > { %v4568_v26 = vor.u32 %v4567_v34, %v4564_v33  ;;  %v4342_v48 = vpop.permute.xlu1 %4341  ;;  %v4504_v22 = vsel %vm728_vm8, %v4494_v29, %v4389_v43 }
 0x68e   : > { %v4414_v62 = vpop.permute.xlu0 %4413  ;;  %v4480_v54 = vsel %vm342_vm4, %v12461_v15, %v4342_v48 }
 0x68f   : > { %v12700_v5 = vsel %vm761_vm11, %v4561_v50, %v4568_v26  ;;  %v4490_v50 = vsel %vm706_vm6, %v4480_v54, %v4366_v23  ;;  %v4514_v49 = vsel %vm750_vm10, %v4504_v22, %v4414_v62  ;;  %v8836_v54 = vcombine.low %v8824_v6, %v10100_v47 }
 0x690   : > { %9576 = vmatprep.mubr.msk.bf16.mxu0 %vm2025_vm14, %v12700_v5  ;;  %9594 = vmatprep.mubr.msk.bf16.mxu1 %vm2025_vm14, %v12700_v5  ;;  %v4500_v17 = vsel %vm728_vm8, %v4490_v50, %v4385_v37  ;;  %v4524_v23 = vsel %vm1915_vm15, %v4514_v49, %v4434_v20  ;;  %v4915_v49 = vsel %vm829_vm2, %v12629_v45, 0  ;;  %v12771_v45 = vld [vmem:[%s14473_s4 + $0x48] sm:$0xff]  }
 0x691   : > { %v4460_v56 = vpop.permute.xlu1 %4459  ;;  %v4534_v33 = vsel %vm1926_vm13, %v4524_v23, %v12546_v0  ;;  %v5243_v0 = vsel %vm14546_vm3, %v12288_v28, %v12583_v51 }
 0x692   : > { %v4410_v36 = vpop.permute.xlu0 %4409  ;;  %v4544_v20 = vsel %vm1937_vm1, %v4534_v33, %v12560_v46  ;;  %v5254_v51 = vsel %vm342_vm4, %v5243_v0, %v12593_v55 }
 0x693   : > { %v4510_v40 = vsel %vm750_vm10, %v4500_v17, %v4410_v36  ;;  %v4554_v17 = vsel %vm1948_vm0, %v4544_v20, %v12569_v24 }
 0x694   : > { %v4520_v38 = vsel %vm1915_vm15, %v4510_v40, %v4430_v12  ;;  %v4589_v55 = vshll.u32 %v4554_v17, 16 }
 0x695   : > { %v12712_v58 = vpop.permute.xlu1 %5212  ;;  %v4530_v43 = vsel %vm1926_vm13, %v4520_v38, %v12677_v13  ;;  %v5241_v38 = vsel %vm14546_vm3, %v8836_v54, %v12567_v1 }
 0x696   : > { %v12716_v15 = vpop.permute.xlu0 %5196 }
 0x699   : > { %v12720_v61 = vpop.permute.xlu1 %5216 }
 0x69a   : > { %v12723_v3 = vpop.permute.xlu0 %5214 }
 0x69d   : > { %v4458_v19 = vpop.permute.xlu1 %4457 }
 0x69e   : > { %v4540_v37 = vsel %vm1937_vm1, %v4530_v43, %v4458_v19  ;;  %v12729_v10 = vpop.permute.xlu0 %5229  ;;  %v12783_v43 = vld [vmem:[%s14471_s2 + $0x14] sm:$0xff]   ;;  %v5264_v19 = vsel %vm14729_vm7, %v5254_v51, %v12617_v52  ;;  %vm14733_vm7 = vmmov %vm14731_vm5  ;;  %v10036_v51 = vld [vmem:[%s10239_s29 + $0x40] sm:$0xff]  }
 0x69f   : > { %v4550_v34 = vsel %vm1948_vm0, %v4540_v37, %v4470_v35  ;;  %v5245_v37 = vsel %vm14546_vm3, %v12306_v2, %v12579_v11 }
 0x6a0   : > { %v4570_v48 = vshrl.u32 %v4550_v34, 16  ;;  %v4573_v12 = vshll.u32 %v4550_v34, 16  ;;  %v5256_v11 = vsel %vm342_vm4, %v5245_v37, %v12605_v9 }
 0x6a1   : > { %v4344_v62 = vpop.permute.xlu1 %4343  ;;  %v5266_v0 = vsel %vm14732_vm9, %v5256_v11, %v12614_v27  ;;  %vm14736_vm9 = vcmask 1043456  }
 0x6a2   : > { %v4572_v13 = vrot.slane %v4570_v48, 3  ;;  %v4575_v36 = vrot.slane %v4573_v12, 4  ;;  %v12738_v29 = vpop.permute.xlu0 %5088  ;;  %v4482_v50 = vsel %vm342_vm4, %v12513_v39, %v4344_v62  ;;  %v4591_v12 = vrot.slane %v4589_v55, 4 }
 0x6a3   : > { %v4492_v22 = vsel %vm706_vm6, %v4482_v50, %v4368_v14  ;;  %v4586_v14 = vshrl.u32 %v4554_v17, 16  ;;  %v5274_v62 = vsel %vm706_vm6, %v5264_v19, %v12633_v30  ;;  %v10105_v50 = vld [vmem:[%s14473_s4 + $0x60] sm:$0xff]   ;;  %v10035_v17 = vld [vmem:[%s10239_s29 + $0x38] sm:$0xff]  }
 0x6a4   : > { %v4576_v35 = vor.u32 %v4575_v36, %v4572_v13  ;;  %v4502_v40 = vsel %vm728_vm8, %v4492_v22, %v4387_v18  ;;  %v5252_v18 = vsel %vm342_vm4, %v5241_v38, %v12595_v21  ;;  %v5284_v20 = vsel %vm14731_vm5, %v5274_v62, %v12655_v7  ;;  %v10038_v62 = vld [vmem:[%s10239_s29 + $0x50] sm:$0xff]  }
 0x6a5   : > { %v4412_v46 = vpop.permute.xlu1 %4411  ;;  %v5262_v33 = vsel %vm14730_vm12, %v5252_v18, %v12602_v60  ;;  %v4588_v48 = vrot.slane %v4586_v14, 3  ;;  %vm14734_vm12 = vcmask 228352  }
 0x6a6   : > { %v4512_v39 = vsel %vm750_vm10, %v4502_v40, %v4412_v46  ;;  %v12754_v23 = vpop.permute.xlu0 %5090  ;;  %v12757_v28 = vsel %vm761_vm11, %v4568_v26, %v4576_v35  ;;  %v5272_v60 = vsel %vm706_vm6, %v5262_v33, %v12636_v44  ;;  %v5294_v40 = vsel %vm728_vm8, %v5284_v20, %v12663_v25  ;;  %vm14735_vm5 = vmmov %vm14734_vm12 }
 0x6a7   : > { %v4522_v24 = vsel %vm1915_vm15, %v4512_v39, %v4432_v41  ;;  %9577 = vmatmul.mubr.msk.bf16.vlgmr.msra.gmra.mrb[64].mxu0 %vm2025_vm14, %v12757_v28  ;;  %9595 = vmatmul.mubr.msk.bf16.vlgmr.msra.gmra.mrb[72].mxu1 %vm2025_vm14, %v12757_v28  ;;  %v4592_v13 = vor.u32 %v4591_v12, %v4588_v48  ;;  %v5282_v9 = vsel %vm14733_vm7, %v5272_v60, %v12641_v59  ;;  %v10110_v60 = vld [vmem:[%s14471_s2 + $0x10] ss:$0 sps:$4 sm:$0x33]  }
 0x6a8   : > { %v4532_v1 = vsel %vm1926_vm13, %v4522_v24, %v12675_v32  ;;  %9603 = vmatpush3.bf16.msra.mxu0 %v12771_v45  ;;  %9621 = vmatpush3.bf16.msra.mxu1 %v4915_v49  ;;  %v10102_v32 = vld [vmem:[%s14473_s4 + $0x50] sm:$0xff]   ;;  %v8840_v46 = vcombine.low %v12544_v57, %v12544_v57  ;;  %v5304_v27 = vsel %vm14734_vm12, %v5294_v40, %v12723_v3  ;;  %vm14737_vm12 = vmmov %vm14735_vm5 }
 0x6a9   : > { %v4542_v41 = vsel %vm1937_vm1, %v4532_v1, %v4460_v56  ;;  %v5232_v26 = vpop.permute.xlu1 %5231  ;;  %9604 = vmatprep.subr.bf16.mxu0 %v10102_v32  ;;  %9644 = vmatprep.subr.bf16.mxu1 %v12783_v43  ;;  %v5276_v59 = vsel %vm706_vm6, %v5266_v0, %v12644_v63  ;;  %v5292_v57 = vsel %vm728_vm8, %v5282_v9, %v12666_v31  ;;  %v10106_v63 = vld [vmem:[%s14473_s4 + $0x68] ss:$0 sps:$4 sm:$0xff]  }
 0x6aa   : > { %v4552_v21 = vsel %vm1948_vm0, %v4542_v41, %v12681_v8  ;;  %v5113_v56 = vpop.permute.xlu0 %5112  ;;  %v10104_v8 = vld [vmem:[%s14473_s4 + $0x58] sm:$0xff]   ;;  %v5314_v25 = vsel %vm750_vm10, %v5304_v27, %v5232_v26  ;;  %v5286_v38 = vsel %vm14733_vm7, %v5276_v59, %v12652_v16  ;;  %v10107_v16 = vld [vmem:[%s14471_s2] sm:$0xff]   ;;  %v10037_v26 = vld [vmem:[%s10239_s29 + $0x48] sm:$0xff]   ;;  %v5247_v20 = vsel %vm14546_vm3, %v12309_v42, %v12738_v29 }
 0x6ab   : > { %v4578_v6 = vshrl.u32 %v4552_v21, 16  ;;  %v4581_v34 = vshll.u32 %v4552_v21, 16  ;;  %v5331_v39 = vshll.u32 %v5314_v25, 16  ;;  %v5296_v24 = vsel %vm728_vm8, %v5286_v38, %v12716_v15  ;;  %v10113_v27 = vld [vmem:[%s14473_s4] sm:$0xff]  }
 0x6ac   : > { %9605 = vmatpush3.bf16.msra.mxu0 %v10102_v32  ;;  %v5306_v14 = vsel %vm14737_vm12, %v5296_v24, %v12720_v61 }
 0x6ad   : > { %v5234_v52 = vpop.permute.xlu1 %5233  ;;  %9606 = vmatprep.subr.bf16.mxu0 %v10104_v8  ;;  %v4580_v47 = vrot.slane %v4578_v6, 3  ;;  %v4583_v2 = vrot.slane %v4581_v34, 4  ;;  %v5333_v32 = vrot.slane %v5331_v39, 4  ;;  %v10108_v34 = vld [vmem:[%s14471_s2 + $0x8] sm:$0xff]  }
 0x6ae   : > { %v5123_v54 = vpop.permute.xlu0 %5122  ;;  %v5316_v41 = vsel %vm750_vm10, %v5306_v14, %v5234_v52  ;;  %v10115_v39 = vld [vmem:[%s14473_s4 + $0x8] sm:$0xff]  }
 0x6af   : > { %v4584_v30 = vor.u32 %v4583_v2, %v4580_v47  ;;  %v5336_v37 = vshrl.u32 %v5316_v41, 16  ;;  %v5339_v6 = vshll.u32 %v5316_v41, 16  ;;  %v10120_v41 = vld [vmem:[%s14473_s4 + $0x20] ss:$0 sps:$4 sm:$0xff]  }
 0x6b0   : > { %9607 = vmatpush3.bf16.msra.mxu0 %v10104_v8 }
 0x6b1   : > { %v12806_v36 = vpop.permute.xlu1 %5110  ;;  %9608 = vmatprep.subr.bf16.mxu0 %v10105_v50  ;;  %v4585_v22 = vsel %vm761_vm11, %v4576_v35, %v4584_v30  ;;  %v12817_v7 = vsel %vm761_vm11, %v4584_v30, %v4592_v13  ;;  %v5302_v35 = vsel %vm14735_vm5, %v5292_v57, %v12712_v58  ;;  %v5328_v58 = vshrl.u32 %v5314_v25, 16  ;;  %v10111_v13 = vld [vmem:[%s14471_s2 + $0x24] ss:$0 sps:$4 sm:$0x33]  }
 0x6b2   : > { %v5169_v44 = vpop.permute.xlu0 %5168  ;;  %9580 = vmatprep.mubr.msk.bf16.mxu0 %vm2025_vm14, %v4585_v22  ;;  %9598 = vmatprep.mubr.msk.bf16.mxu1 %vm2025_vm14, %v4585_v22  ;;  %v5312_v31 = vsel %vm750_vm10, %v5302_v35, %v12729_v10  ;;  %vm14738_vm5 = vcmask 97280   ;;  %v5341_v2 = vrot.slane %v5339_v6, 4 }
 0x6b3   : > { %9581 = vmatmul.mubr.msk.bf16.gmra.mrb[68].mxu0 %vm2025_vm14, %v12817_v7  ;;  %9599 = vmatmul.mubr.msk.bf16.gmra.mrb[76].mxu1 %vm2025_vm14, %v12817_v7  ;;  %v5321_v10 = vshrl.u32 %v5312_v31, 16  ;;  %v5324_v55 = vshll.u32 %v5312_v31, 16  ;;  %v5330_v15 = vrot.slane %v5328_v58, 3  ;;  %v10114_v58 = vld [vmem:[%s14471_s2 + $0x30] sm:$0xff]  }
 0x6b4   : > { %9609 = vmatpush3.bf16.msra.mxu0 %v10105_v50  ;;  %9612 = vmatprep.mubr.msk.bf16.mxu0 %vm2025_vm14, %v12700_v5  ;;  %v5250_v5 = vsel %vm14546_vm3, %v8840_v46, %v12754_v23  ;;  %v5258_v50 = vsel %vm342_vm4, %v5247_v20, %v12806_v36  ;;  %v10112_v46 = vld [vmem:[%s14471_s2 + $0x28] sm:$0xff]  }
 0x6b5   : > { %v12839_v3 = vpop.permute.xlu1 %5120  ;;  %9903 = vmatprep.subr.msk.bf16.mxu0 %vm14736_vm9, %v10106_v63  ;;  %9622 = vmatprep.mubr.msk.bf16.mxu1 %vm14546_vm3, %v10035_v17  ;;  %v5260_v23 = vsel %vm342_vm4, %v5250_v5, %v5113_v56  ;;  %v5323_v21 = vrot.slane %v5321_v10, 3  ;;  %v5326_v56 = vrot.slane %v5324_v55, 4  ;;  %v5334_v48 = vor.u32 %v5333_v32, %v5330_v15  ;;  %vm14739_vm9 = vmmov %vm14733_vm7  ;;  %v10116_v10 = vld [vmem:[%s14471_s2 + $0x38] ss:$0 sps:$4 sm:$0x33]   ;;  %v10117_v55 = vld [vmem:[%s14473_s4 + $0x10] sm:$0xff]  }
 0x6b6   : > { %v5191_v49 = vpop.permute.xlu0 %5190  ;;  %v5270_v61 = vsel %vm14738_vm5, %v5260_v23, %v5123_v54  ;;  %v5338_v54 = vrot.slane %v5336_v37, 3  ;;  %vm14740_vm7 = vmmov %vm14737_vm12  ;;  %v14752_v23 = vld [vmem:[#allocation7_spill] sm:$0xff]  ;;  %v10122_v32 = vld [vmem:[%s14473_s4 + $0x34] sm:$0xff]  }
 0x6b7   : > { %v5280_v12 = vsel %vm706_vm6, %v5270_v61, %v5169_v44  ;;  %v5327_v47 = vor.u32 %v5326_v56, %v5323_v21  ;;  %vm14741_vm12 = vmmov %vm14738_vm5  ;;  %vm14742_vm5 = vcmask 293888   ;;  %v14755_v15 = vld [vmem:[#allocation27_spill] sm:$0xff]  ;;  %v8899_v21 = vld [vmem:[%s10239_s29 + $0xf4] sm:$0xf] }
 0x6b8   : > { %9611 = vmatpush3.bf16.msra.mxu0 %v12139_v53  ;;  %v5290_v52 = vsel %vm14739_vm9, %v5280_v12, %v5191_v49  ;;  %v5268_v29 = vsel %vm14741_vm12, %v5258_v50, %v12839_v3  ;;  %vm14743_vm9 = vmmov %vm14742_vm5  ;;  %v5342_v44 = vor.u32 %v5341_v2, %v5338_v54  ;;  %vm14746_vm12 = vcmask 228352   ;;  %v10123_v61 = vld [vmem:[%s14473_s4 + $0x3c] sm:$0xff]   ;;  %v8900_v56 = vld [vmem:[%s10239_s29 + $0xf8] sm:$0xf] }
 0x6b9   : > { %v5167_v1 = vpop.permute.xlu1 %5166  ;;  %9630 = vmatprep.subr.bf16.mxu0 %v10107_v16  ;;  %v5335_v42 = vsel %vm761_vm11, %v5327_v47, %v5334_v48  ;;  %v12974_v37 = vld [vmem:[#allocation2 + $0x28] sm:$0xff]  ;;  %v8915_v6 = vcombine.low %v8899_v21, %v8900_v56  ;;  %v8901_v12 = vld [vmem:[%s10239_s29 + $0xfc] sm:$0xf] }
 0x6ba   : > { %v5201_v18 = vpop.permute.xlu0 %5200  ;;  %v5278_v36 = vsel %vm706_vm6, %v5268_v29, %v5167_v1  ;;  %v5343_v3 = vsel %vm761_vm11, %v5334_v48, %v5342_v44  ;;  %5814 = vrot.lane.b32.xlu0 %v12974_v37, %s10181_s26  ;;  %v8904_v2 = vld [vmem:[%s10239_s29 + $0x108] sm:$0xf]  ;;  %v5834_v50 = vrot.slane %v12974_v37, 1 }
 0x6bb   : > { %9613 = vmatmul.mubr.msk.bf16.vlgmr.msra.gmra.mrb[72].mxu0 %vm2025_vm14, %v12757_v28  ;;  %9623 = vmatmul.mubr.msk.bf16.vlgmr.msra.gmra.mrb[80].mxu1 %vm14546_vm3, %v10036_v51  ;;  %v10109_v28 = vld [vmem:[%s14471_s2 + $0x1c] sm:$0xff]   ;;  %v6422_v48 = vshll.u32 %v8915_v6, 16 }
 0x6bc   : > { %9631 = vmatpush3.bf16.msra.mxu0 %v10107_v16  ;;  %9616 = vmatprep.mubr.msk.bf16.mxu0 %vm2025_vm14, %v4585_v22  ;;  %v14744_v22 = vld [vmem:[#allocation6_spill] sm:$0xff] }
 0x6bd   : > { %v5189_v19 = vpop.permute.xlu1 %5188  ;;  %9632 = vmatprep.subr.bf16.mxu0 %v10108_v34  ;;  %9645 = vmatpush3.bf16.msra.mxu1 %v12783_v43  ;;  %v5300_v43 = vsel %vm728_vm8, %v5290_v52, %v5201_v18  ;;  %v10118_v18 = vld [vmem:[%s14473_s4 + $0x24] sm:$0xff]   ;;  %v10119_v16 = vld [vmem:[%s14473_s4 + $0x18] sm:$0xff]   ;;  %v8902_v52 = vld [vmem:[%s10239_s29 + $0x100] sm:$0xf]  ;;  %v6424_v54 = vrot.slane %v6422_v48, 5 }
 0x6be   : > { %v5221_v33 = vpop.permute.xlu0 %5220  ;;  %9626 = vmatprep.mubr.msk.bf16.mxu1 %vm14546_vm3, %v10037_v26  ;;  %9646 = vmatprep.subr.bf16.mxu1 %v10109_v28  ;;  %v10121_v26 = vld [vmem:[%s14473_s4 + $0x2c] sm:$0xff]  }
 0x6bf   : > { %v5310_v30 = vsel %vm14740_vm7, %v5300_v43, %v5221_v33  ;;  %vm14745_vm7 = vcmask 162816   ;;  %v5817_v33 = vshll.u32 %v12974_v37, 16  ;;  %v8916_v43 = vcombine.low %v8901_v12, %v8902_v52 }
 0x6c0   : > { %9633 = vmatpush3.bf16.msra.mxu0 %v10108_v34  ;;  %v5821_v34 = vshrl.u32 %v12974_v37, 16 }
 0x6c1   : > { %v5199_v8 = vpop.permute.xlu1 %5198  ;;  %9647 = vmatpush3.bf16.msra.mxu1 %v10109_v28  ;;  %9905 = vmatprep.subr.msk.bf16.mxu0 %vm829_vm2, %v10110_v60  ;;  %v6419_v28 = vshrl.u32 %v8915_v6, 16 }
 0x6c2   : > { %v5238_v11 = vpop.permute.xlu0 %5237  ;;  %9906 = vmatprep.subr.msk.bf16.mxu1 %vm829_vm2, %v10111_v13  ;;  %v6430_v13 = vshll.u32 %v8916_v43, 16 }
 0x6c3   : > { %v5320_v0 = vsel %vm750_vm10, %v5310_v30, %v5238_v11  ;;  %9617 = vmatmul.mubr.msk.bf16.gmra.mrb[76].mxu0 %vm2025_vm14, %v12817_v7  ;;  %9627 = vmatmul.mubr.msk.bf16.gmra.mrb[84].mxu1 %vm14546_vm3, %v10038_v62  ;;  %v5288_v7 = vsel %vm14745_vm7, %v5278_v36, %v5189_v19  ;;  %vm14748_vm7 = vmmov %vm14742_vm5  ;;  %v14758_v19 = vld [vmem:[#allocation28_spill] sm:$0xff]  ;;  %v12981_v62 = vrot.slane %v5817_v33, 1  ;;  %v6421_v47 = vrot.slane %v6419_v28, 4 }
 0x6c4   : > { %9636 = vmatprep.mubr.msk.bf16.mxu0 %vm14742_vm5, %v5335_v42  ;;  %9650 = vmatprep.mubr.msk.bf16.mxu1 %vm14743_vm9, %v5335_v42  ;;  %v5352_v17 = vshrl.u32 %v5320_v0, 16  ;;  %v5355_v40 = vshll.u32 %v5320_v0, 16  ;;  %v5298_v59 = vsel %vm728_vm8, %v5288_v7, %v5199_v8  ;;  %vm14747_vm9 = vmmov %vm14742_vm5  ;;  %v8903_v8 = vld [vmem:[%s10239_s29 + $0x104] sm:$0xf]  ;;  %v6427_v30 = vshrl.u32 %v8916_v43, 16 }
 0x6c5   : > { %v5219_v9 = vpop.permute.xlu1 %5218  ;;  %9635 = vmatpush3.bf16.msra.mxu0 %v14592_v4  ;;  %9649 = vmatpush3.bf16.msra.mxu1 %v14744_v22  ;;  %vm14751_vm3 = vmmov %vm14742_vm5  ;;  %v5823_v11 = vor.u32 %v5821_v34, %v12981_v62  ;;  %v12987_v60 = vcombine.low %v8903_v8, %v8904_v2  ;;  %v6425_v20 = vor.u32 %v6424_v54, %v6421_v47  ;;  %v13051_v34 = vld [vmem:[%s10239_s29 + $0x110] sm:$0xf] }
 0x6c6   : > { %9658 = vmatprep.subr.bf16.mxu0 %v10112_v46  ;;  %9672 = vmatprep.subr.bf16.mxu1 %v10113_v27  ;;  %v5308_v4 = vsel %vm14746_vm12, %v5298_v59, %v5219_v9  ;;  %v5354_v35 = vrot.slane %v5352_v17, 3  ;;  %v5357_v49 = vrot.slane %v5355_v40, 4  ;;  %vm14749_vm12 = vmmov %vm14742_vm5  ;;  %v6429_v29 = vrot.slane %v6427_v30, 4 }
 0x6c7   : > { %5832 = vrot.lane.b32.xlu0 %v5823_v11, %s10182_s27  ;;  %v6436_v0 = vshrl.u32 %v12987_v60, 16  ;;  %6453 = vrot.lane.b32.xlu1 %v6425_v20, %s10174_s10  ;;  %v6432_v9 = vrot.slane %v6430_v13, 5  ;;  %v12999_v59 = vrot.slane %v8916_v43, 5  ;;  %v4679_v13 = vld [vmem:[#allocation4 + $0x80] sm:$0xff] }
 0x6c8   : > { %v5358_v51 = vor.u32 %v5357_v49, %v5354_v35  ;;  %v8905_v35 = vld [vmem:[%s10239_s29 + $0x10c] sm:$0xf] }
 0x6c9   : > { %v5236_v57 = vpop.permute.xlu1 %5235  ;;  %v6433_v7 = vor.u32 %v6432_v9, %v6429_v29  ;;  %v13055_v28 = vcombine.low %v8905_v35, %v13051_v34  ;;  %v4682_v9 = vld [vmem:[#allocation4 + $0x98] sm:$0xff] }
 0x6ca   : > { %v5318_v25 = vsel %vm750_vm10, %v5308_v4, %v5236_v57  ;;  %v13005_v57 = vcombine.low %v8900_v56, %v8901_v12 }
 0x6cb   : > { %v5344_v63 = vshrl.u32 %v5318_v25, 16  ;;  %v5347_v31 = vshll.u32 %v5318_v25, 16  ;;  %9637 = vmatmul.mubr.msk.bf16.vlgmr.msra.gmra.mrb[80].mxu0 %vm14742_vm5, %v5343_v3  ;;  %9651 = vmatmul.mubr.msk.bf16.vlgmr.msra.gmra.mrb[88].mxu1 %vm14747_vm9, %v5343_v3  ;;  %vm14750_vm9 = vmmov %vm14742_vm5  ;;  %v13007_v25 = vcombine.low %v8902_v52, %v8903_v8  ;;  %v6445_v48 = vshrl.u32 %v13055_v28, 16 }
 0x6cc   : > { %9659 = vmatpush3.bf16.msra.mxu0 %v10112_v46  ;;  %9673 = vmatpush3.bf16.msra.mxu1 %v10113_v27  ;;  %v6466_v27 = vrot.slane %v8915_v6, 5  ;;  %v6497_v49 = vshrl.u32 %v13005_v57, 16  ;;  %v6448_v12 = vshll.u32 %v13055_v28, 16 }
 0x6cd   : > { %v5346_v5 = vrot.slane %v5344_v63, 3  ;;  %v5349_v38 = vrot.slane %v5347_v31, 4  ;;  %9660 = vmatprep.subr.bf16.mxu0 %v10114_v58  ;;  %9674 = vmatprep.subr.bf16.mxu1 %v10115_v39  ;;  %v6500_v63 = vshll.u32 %v13005_v57, 16  ;;  %v6505_v31 = vshrl.u32 %v13007_v25, 16 }
 0x6ce   : > { %5844 = vrot.lane.b32.xlu0 %v5834_v50, %s10183_s13  ;;  %v6447_v52 = vrot.slane %v6445_v48, 4  ;;  %v6450_v8 = vrot.slane %v6448_v12, 5  ;;  %v4771_v12 = vld [vmem:[#allocation4 + $0x58] sm:$0xff] }
 0x6cf   : > { %v5350_v24 = vor.u32 %v5349_v38, %v5346_v5  ;;  %v6508_v5 = vshll.u32 %v13007_v25, 16 }
 0x6d0   : > { %9661 = vmatpush3.bf16.msra.mxu0 %v10114_v58  ;;  %9675 = vmatpush3.bf16.msra.mxu1 %v10115_v39  ;;  %v6499_v58 = vrot.slane %v6497_v49, 4  ;;  %v6502_v39 = vrot.slane %v6500_v63, 5  ;;  %v13063_v47 = vor.u32 %v6450_v8, %v6447_v52 }
 0x6d1   : > { %v5351_v1 = vsel %vm761_vm11, %v5342_v44, %v5350_v24  ;;  %v5359_v14 = vsel %vm761_vm11, %v5350_v24, %v5358_v51  ;;  %9907 = vmatprep.subr.msk.bf16.mxu0 %vm829_vm2, %v10116_v10  ;;  %9676 = vmatprep.subr.bf16.mxu1 %v10117_v55  ;;  %v6438_v44 = vrot.slane %v6436_v0, 4  ;;  %v6507_v51 = vrot.slane %v6505_v31, 4  ;;  %v4683_v31 = vld [vmem:[#allocation4 + $0xa0] sm:$0xff] }
 0x6d2   : > { %9640 = vmatprep.mubr.msk.bf16.mxu0 %vm14748_vm7, %v5351_v1  ;;  %9654 = vmatprep.mubr.msk.bf16.mxu1 %vm14749_vm12, %v5351_v1  ;;  %vm14753_vm7 = vcmask 1043456   ;;  %vm14754_vm12 = vmmov %vm14751_vm3  ;;  %v6510_v24 = vrot.slane %v6508_v5, 5 }
 0x6d3   : > { %9641 = vmatmul.mubr.msk.bf16.gmra.mrb[84].mxu0 %vm14742_vm5, %v5359_v14  ;;  %9655 = vmatmul.mubr.msk.bf16.gmra.mrb[92].mxu1 %vm14750_vm9, %v5359_v14  ;;  %vm14756_vm5 = vmmov %vm14751_vm3 }
 0x6d4   : > { %9664 = vmatprep.mubr.msk.bf16.mxu0 %vm14751_vm3, %v5335_v42  ;;  %9663 = vmatpush3.bf16.msra.mxu0 %v14752_v23  ;;  %vm14757_vm9 = vmmov %vm14753_vm7  ;;  %v6439_v42 = vshll.u32 %v12987_v60, 16  ;;  %v6511_v10 = vor.u32 %v6510_v24, %v6507_v51  ;;  %v4686_v51 = vld [vmem:[#allocation4 + $0xb8] sm:$0xff] }
 0x6d5   : > { %9690 = vmatprep.subr.bf16.mxu0 %v10118_v18  ;;  %9677 = vmatpush3.bf16.msra.mxu1 %v10117_v55 }
 0x6d6   : > { %9678 = vmatprep.subr.bf16.mxu1 %v10119_v16  ;;  %v6441_v36 = vrot.slane %v6439_v42, 5 }
 0x6d8   : > { %v6442_v17 = vor.u32 %v6441_v36, %v6438_v44 }
 0x6d9   : > { %9679 = vmatpush3.bf16.msra.mxu1 %v10119_v16 }
 0x6da   : > { %9908 = vmatprep.subr.msk.bf16.mxu1 %vm14753_vm7, %v10120_v41  ;;  %vm14759_vm7 = vsmask.f32 3328  ;;  %v6544_v41 = vrot.slane %v13005_v57, 5 }
 0x6db   : > { %9665 = vmatmul.mubr.msk.bf16.vlgmr.msra.gmra.mrb[88].mxu0 %vm14751_vm3, %v5343_v3  ;;  %v6443_v40 = vsel %vm14759_vm7, %v6433_v7, %v6442_v17  ;;  %vm14760_vm3 = vmmov %vm14759_vm7  ;;  %v6469_v3 = vrot.slane %v12987_v60, 5 }
 0x6dc   : > { %9668 = vmatprep.mubr.msk.bf16.mxu0 %vm14754_vm12, %v5351_v1  ;;  %9691 = vmatpush3.bf16.msra.mxu0 %v10118_v18  ;;  %v6434_v46 = vsel %vm14760_vm3, %v6425_v20, %v6433_v7  ;;  %vm14761_vm12 = vcmask 1042432   ;;  %v13026_v1 = vcombine.low %v8904_v2, %v8905_v35  ;;  %vm14764_vm7 = vmmov %vm14760_vm3 }
 0x6dd   : > { %9692 = vmatprep.subr.bf16.mxu0 %v10121_v26  ;;  %9681 = vmatpush3.bf16.msra.mxu1 %v14755_v15  ;;  %v6468_v4 = vsel %vm14761_vm12, %v6466_v27, %v12999_v59 }
 0x6de   : > { %9708 = vmatprep.subr.bf16.mxu1 %v12771_v45  ;;  %v10124_v45 = vld [vmem:[%s14473_s4 + $0x44] ss:$0 sps:$4 sm:$0xff]   ;;  %6457 = vrot.lane.b32.xlu1 %v6443_v40, %s10174_s10  ;;  %v6514_v18 = vshrl.u32 %v13026_v1, 16  ;;  %v6517_v16 = vshll.u32 %v13026_v1, 16  ;;  %v6547_v21 = vrot.slane %v13026_v1, 5 }
 0x6df   : > { %6455 = vrot.lane.b32.xlu0 %v6434_v46, %s10174_s10 }
 0x6e0   : > { %9693 = vmatpush3.bf16.msra.mxu0 %v10121_v26  ;;  %v6516_v26 = vrot.slane %v6514_v18, 4 }
 0x6e1   : > { %9694 = vmatprep.subr.bf16.mxu0 %v10122_v32 }
 0x6e2   : > { %6477 = vrot.lane.b32.xlu1 %v6468_v4, %s10172_s8  ;;  %v4685_v4 = vld [vmem:[#allocation4 + $0xb0] sm:$0xff] }
 0x6e3   : > { %9669 = vmatmul.mubr.msk.bf16.gmra.mrb[92].mxu0 %vm14756_vm5, %v5359_v14  ;;  %6475 = vrot.lane.b32.xlu0 %v6466_v27, %s10172_s8  ;;  %vm14762_vm5 = vmmov %vm14761_vm12  ;;  %v6503_v14 = vor.u32 %v6502_v39, %v6499_v58 }
 0x6e4   : > { %9695 = vmatpush3.bf16.msra.mxu0 %v10122_v32  ;;  %v13022_v38 = vsel %vm14762_vm5, %v12999_v59, %v6469_v3  ;;  %v6519_v32 = vrot.slane %v6517_v16, 5 }
 0x6e5   : > { %9696 = vmatprep.subr.bf16.mxu0 %v10123_v61 }
 0x6e6   : > { %6485 = vrot.lane.b32.xlu1 %v8915_v6, %s10171_s30 }
 0x6e7   : > { %6479 = vrot.lane.b32.xlu0 %v13022_v38, %s10172_s8 }
 0x6e8   : > { %9697 = vmatpush3.bf16.msra.mxu0 %v10123_v61  ;;  %v13037_v61 = vor.u32 %v6519_v32, %v6516_v26 }
 0x6e9   : > { %9909 = vmatprep.subr.msk.bf16.mxu0 %vm14757_vm9, %v10124_v45  ;;  %vm14763_vm9 = vmmov %vm14760_vm3  ;;  %v6545_v45 = vrot.slane %v13007_v25, 5 }
 0x6ea   : > { %6489 = vrot.lane.b32.xlu1 %v12987_v60, %s10171_s30  ;;  %v6512_v55 = vsel %vm14763_vm9, %v6503_v14, %v6511_v10  ;;  %v6521_v56 = vsel %vm14764_vm7, %v6511_v10, %v13037_v61  ;;  %vm14765_vm3 = vmmov %vm14762_vm5  ;;  %vm14776_vm9 = vcmask 1046528  }
 0x6eb   : > { %6487 = vrot.lane.b32.xlu0 %v8916_v43, %s10171_s30  ;;  %v6548_v6 = vsel %vm14765_vm3, %v6545_v45, %v6547_v21  ;;  %vm14766_vm12 = vmmov %vm14765_vm3  ;;  %v4681_v43 = vld [vmem:[#allocation4 + $0x90] sm:$0xff]  ;;  %vm14778_vm3 = vcmask 1043456  }
 0x6ec   : > { %9699 = vmatpush3.bf16.msra.mxu0 %v14758_v19  ;;  %v6546_v33 = vsel %vm14766_vm12, %v6544_v41, %v6545_v45  ;;  %vm14767_vm5 = vmmov %vm14764_vm7 }
 0x6ed   : > { %v13070_v54 = vsel %vm14767_vm5, %v6442_v17, %v13063_v47  ;;  %v4680_v17 = vld [vmem:[#allocation4 + $0x88] sm:$0xff]  ;;  %vm14777_vm7 = vmmov %vm14776_vm9  ;;  %vm14780_vm5 = vcmask 1042432  }
 0x6ee   : > { %6533 = vrot.lane.b32.xlu1 %v6512_v55, %s10173_s9  ;;  %v4684_v55 = vld [vmem:[#allocation4 + $0xa8] sm:$0xff]  ;;  %vm14779_vm12 = vmmov %vm14778_vm3 }
 0x6ef   : > { %6531 = vrot.lane.b32.xlu0 %v6503_v14, %s10173_s9 }
 0x6f2   : > { %6553 = vrot.lane.b32.xlu1 %v6544_v41, %s10175_s11  ;;  %v4770_v41 = vld [vmem:[#allocation4 + $0x50] sm:$0xff] }
 0x6f3   : > { %6535 = vrot.lane.b32.xlu0 %v6521_v56, %s10173_s9  ;;  %v4768_v56 = vld [vmem:[#allocation4 + $0x40] sm:$0xff] }
 0x6f6   : > { %6557 = vrot.lane.b32.xlu1 %v6548_v6, %s10175_s11 }
 0x6f7   : > { %6555 = vrot.lane.b32.xlu0 %v6546_v33, %s10175_s11 }
 0x6fa   : > { %6565 = vrot.lane.b32.xlu1 %v13007_v25, %s10176_s12 }
 0x6fb   : > { %6563 = vrot.lane.b32.xlu0 %v13005_v57, %s10176_s12 }
 0x6fe   : > { %6583 = vrot.lane.b32.xlu1 %v6433_v7, %s10177_s21 }
 0x6ff   : > { %6567 = vrot.lane.b32.xlu0 %v13026_v1, %s10176_s12 }
 0x702   : > { %6587 = vrot.lane.b32.xlu1 %v13070_v54, %s10177_s21 }
 0x703   : > { %6585 = vrot.lane.b32.xlu0 %v6443_v40, %s10177_s21 }
 0x77a   : > { %v9578_v2 = vpop.f32.mrb[64].mxu0  ;;  %v9596_v11 = vpop.f32.mrb[72].mxu1 }
 0x77b   : > { %4673 = vst.msk [vmem:[#allocation4 + $0x10] sm:$0xff] %vm342_vm4, %v9578_v2  ;;  %v4754_v20 = vadd.f32 %v9596_v11, %v4681_v43  ;;  %v4640_v30 = vpop.f32.mrb[65].mxu0  ;;  %v4721_v0 = vpop.f32.mrb[73].mxu1  ;;  %v4769_v43 = vld [vmem:[#allocation4 + $0x48] sm:$0xff] }
 0x77c   : > { %4671 = vst.msk [vmem:[#allocation4] sm:$0xff] %vm342_vm4, %v4640_v30  ;;  %v4752_v42 = vadd.f32 %v4721_v0, %v4679_v13  ;;  %v9579_v29 = vpop.f32.mrb[66].mxu0  ;;  %v9597_v44 = vpop.f32.mrb[74].mxu1  ;;  %v4774_v13 = vld [vmem:[#allocation4 + $0x70] sm:$0xff] }
 0x77d   : > { %4762 = vst.msk [vmem:[#allocation4 + $0x90] sm:$0xff] %vm342_vm4, %v4754_v20  ;;  %4674 = vst.msk [vmem:[#allocation4 + $0x18] sm:$0xff] %vm342_vm4, %v9579_v29  ;;  %v4755_v36 = vadd.f32 %v9597_v44, %v4682_v9  ;;  %v4643_v7 = vpop.f32.mrb[67].mxu0  ;;  %v4724_v40 = vpop.f32.mrb[75].mxu1  ;;  %v4772_v9 = vld [vmem:[#allocation4 + $0x60] sm:$0xff] }
 0x77e   : > { %4760 = vst.msk [vmem:[#allocation4 + $0x80] sm:$0xff] %vm342_vm4, %v4752_v42  ;;  %4672 = vst.msk [vmem:[#allocation4 + $0x8] sm:$0xff] %vm342_vm4, %v4643_v7  ;;  %v4753_v46 = vadd.f32 %v4724_v40, %v4680_v17  ;;  %v4775_v40 = vld [vmem:[#allocation4 + $0x78] sm:$0xff] }
 0x77f   : > { %4763 = vst.msk [vmem:[#allocation4 + $0x98] sm:$0xff] %vm342_vm4, %v4755_v36 }
 0x780   : > { %4761 = vst.msk [vmem:[#allocation4 + $0x88] sm:$0xff] %vm342_vm4, %v4753_v46 }
 0x786   : > { %v9582_v27 = vpop.f32.mrb[68].mxu0  ;;  %v9600_v35 = vpop.f32.mrb[76].mxu1 }
 0x787   : > { %4677 = vst.msk [vmem:[#allocation4 + $0x30] sm:$0xff] %vm342_vm4, %v9582_v27  ;;  %v4758_v49 = vadd.f32 %v9600_v35, %v4685_v4  ;;  %v4656_v63 = vpop.f32.mrb[69].mxu0  ;;  %v4737_v5 = vpop.f32.mrb[77].mxu1  ;;  %v10125_v4 = vld [vmem:[%s14474_s5] ss:$0 sm:$0xff] }
 0x788   : > { %4675 = vst.msk [vmem:[#allocation4 + $0x20] sm:$0xff] %vm342_vm4, %v4656_v63  ;;  %v4756_v58 = vadd.f32 %v4737_v5, %v4683_v31  ;;  %v9583_v39 = vpop.f32.mrb[70].mxu0  ;;  %v9601_v24 = vpop.f32.mrb[78].mxu1  ;;  %v4773_v31 = vld [vmem:[#allocation4 + $0x68] sm:$0xff] }
 0x789   : > { %4766 = vst.msk [vmem:[#allocation4 + $0xb0] sm:$0xff] %vm342_vm4, %v4758_v49  ;;  %4678 = vst.msk [vmem:[#allocation4 + $0x38] sm:$0xff] %vm342_vm4, %v9583_v39  ;;  %v4759_v14 = vadd.f32 %v9601_v24, %v4686_v51  ;;  %v4659_v10 = vpop.f32.mrb[71].mxu0  ;;  %v4740_v18 = vpop.f32.mrb[79].mxu1 }
 0x78a   : > { %4764 = vst.msk [vmem:[#allocation4 + $0xa0] sm:$0xff] %vm342_vm4, %v4756_v58  ;;  %4676 = vst.msk [vmem:[#allocation4 + $0x28] sm:$0xff] %vm342_vm4, %v4659_v10  ;;  %v4757_v16 = vadd.f32 %v4740_v18, %v4684_v55 }
 0x78b   : > { %4767 = vst.msk [vmem:[#allocation4 + $0xb8] sm:$0xff] %vm342_vm4, %v4759_v14 }
 0x78c   : > { %4765 = vst.msk [vmem:[#allocation4 + $0xa8] sm:$0xff] %vm342_vm4, %v4757_v16 }
 0x78e   : > { %v9614_v26 = vpop.f32.mrb[72].mxu0  ;;  %v9624_v32 = vpop.f32.mrb[80].mxu1 }
 0x78f   : > { %v4843_v45 = vadd.f32 %v9614_v26, %v4770_v41  ;;  %v4810_v6 = vpop.f32.mrb[73].mxu0  ;;  %v4951_v33 = vpop.f32.mrb[81].mxu1 }
 0x790   : > { %v4841_v48 = vadd.f32 %v4810_v6, %v4768_v56  ;;  %v9615_v52 = vpop.f32.mrb[74].mxu0  ;;  %v9625_v8 = vpop.f32.mrb[82].mxu1 }
 0x791   : > { %4851 = vst.msk [vmem:[#allocation4 + $0x50] sm:$0xff] %vm342_vm4, %v4843_v45  ;;  %v4844_v2 = vadd.f32 %v9615_v52, %v4771_v12  ;;  %v4813_v11 = vpop.f32.mrb[75].mxu0  ;;  %v4954_v20 = vpop.f32.mrb[83].mxu1 }
 0x792   : > { %4849 = vst.msk [vmem:[#allocation4 + $0x40] sm:$0xff] %vm342_vm4, %v4841_v48  ;;  %v4842_v30 = vadd.f32 %v4813_v11, %v4769_v43  ;;  %v5447_v48 = vld [vmem:[#allocation3 + $0x50] sm:$0xff] }
 0x793   : > { %4852 = vst.msk [vmem:[#allocation4 + $0x58] sm:$0xff] %vm342_vm4, %v4844_v2 }
 0x794   : > { %4850 = vst.msk [vmem:[#allocation4 + $0x48] sm:$0xff] %vm342_vm4, %v4842_v30 }
 0x796   : > { %v9618_v0 = vpop.f32.mrb[76].mxu0  ;;  %v13095_v42 = vpop.f32.mrb[84].mxu1 }
 0x797   : > { %v4847_v29 = vadd.f32 %v9618_v0, %v4774_v13  ;;  %v4826_v44 = vpop.f32.mrb[77].mxu0  ;;  %v13097_v36 = vpop.f32.mrb[85].mxu1  ;;  %v5448_v13 = vld [vmem:[#allocation3 + $0x58] sm:$0xff] }
 0x798   : > { %v4859_v7 = vld [vmem:[#allocation4 + $0x50] sm:$0xff]  ;;  %v4845_v17 = vadd.f32 %v4826_v44, %v4772_v9  ;;  %v9619_v46 = vpop.f32.mrb[78].mxu0  ;;  %v13099_v27 = vpop.f32.mrb[86].mxu1 }
 0x799   : > { %4855 = vst.msk [vmem:[#allocation4 + $0x70] sm:$0xff] %vm342_vm4, %v4847_v29  ;;  %v4867_v35 = vadd.f32 %v10125_v4, %v4859_v7  ;;  %v4857_v49 = vld [vmem:[#allocation4 + $0x40] sm:$0xff]  ;;  %v4848_v63 = vadd.f32 %v9619_v46, %v4775_v40  ;;  %v4829_v5 = vpop.f32.mrb[79].mxu0  ;;  %v4970_v58 = vpop.f32.mrb[87].mxu1 }
 0x79a   : > { %4853 = vst.msk [vmem:[#allocation4 + $0x60] sm:$0xff] %vm342_vm4, %v4845_v17  ;;  %v4865_v39 = vadd.f32 %v10125_v4, %v4857_v49  ;;  %v4860_v51 = vld [vmem:[#allocation4 + $0x58] sm:$0xff]  ;;  %v4846_v24 = vadd.f32 %v4829_v5, %v4773_v31  ;;  %v5446_v17 = vld [vmem:[#allocation3 + $0x48] sm:$0xff] }
 0x79b   : > { %v4984_v14 = vadd.f32 %v9624_v32, %v4867_v35  ;;  %4856 = vst.msk [vmem:[#allocation4 + $0x78] sm:$0xff] %vm342_vm4, %v4848_v63  ;;  %v4868_v10 = vadd.f32 %v10125_v4, %v4860_v51  ;;  %v4858_v55 = vld [vmem:[#allocation4 + $0x48] sm:$0xff] }
 0x79c   : > { %v4982_v18 = vadd.f32 %v4951_v33, %v4865_v39  ;;  %4854 = vst.msk [vmem:[#allocation4 + $0x68] sm:$0xff] %vm342_vm4, %v4846_v24  ;;  %v4866_v16 = vadd.f32 %v10125_v4, %v4858_v55  ;;  %v5445_v33 = vld [vmem:[#allocation3 + $0x40] sm:$0xff] }
 0x79d   : > { %v4992_v41 = vmax.f32 %v4984_v14, 0.0  ;;  %v4985_v26 = vadd.f32 %v9625_v8, %v4868_v10 }
 0x79e   : > { %v4990_v45 = vmax.f32 %v4982_v18, 0.0  ;;  %v4983_v56 = vadd.f32 %v4954_v20, %v4866_v16  ;;  %v9638_v6 = vpop.f32.mrb[80].mxu0  ;;  %v9652_v12 = vpop.f32.mrb[88].mxu1  ;;  %v5451_v16 = vld [vmem:[#allocation3 + $0x70] sm:$0xff] }
 0x79f   : > { %8818 = vst.msk [vmem:[%s12396_s14 + $0x50] sm:$0xff] %vm342_vm4, %v4992_v41  ;;  %v4993_v32 = vmax.f32 %v4985_v26, 0.0  ;;  %5439 = vst.msk [vmem:[#allocation3 + $0x90] sm:$0xff] %vm342_vm4, %v9638_v6  ;;  %v5520_v52 = vadd.f32 %v9652_v12, %v5447_v48  ;;  %v5406_v2 = vpop.f32.mrb[81].mxu0  ;;  %v5487_v43 = vpop.f32.mrb[89].mxu1  ;;  %v5452_v6 = vld [vmem:[#allocation3 + $0x78] sm:$0xff] }
 0x7a0   : > { %8816 = vst.msk [vmem:[%s12396_s14 + $0x40] sm:$0xff] %vm342_vm4, %v4990_v45  ;;  %v4991_v11 = vmax.f32 %v4983_v56, 0.0  ;;  %v4863_v8 = vld [vmem:[#allocation4 + $0x70] sm:$0xff]  ;;  %5437 = vst.msk [vmem:[#allocation3 + $0x80] sm:$0xff] %vm342_vm4, %v5406_v2  ;;  %v5518_v20 = vadd.f32 %v5487_v43, %v5445_v33  ;;  %v9639_v30 = vpop.f32.mrb[82].mxu0  ;;  %v9653_v0 = vpop.f32.mrb[90].mxu1 }
 0x7a1   : > { %8819 = vst.msk [vmem:[%s12396_s14 + $0x58] sm:$0xff] %vm342_vm4, %v4993_v32  ;;  %v4871_v29 = vadd.f32 %v10125_v4, %v4863_v8  ;;  %v4861_v9 = vld [vmem:[#allocation4 + $0x60] sm:$0xff]  ;;  %5528 = vst.msk [vmem:[#allocation3 + $0x50] sm:$0xff] %vm342_vm4, %v5520_v52  ;;  %v5521_v44 = vadd.f32 %v9653_v0, %v5448_v13  ;;  %v5409_v7 = vpop.f32.mrb[83].mxu0  ;;  %v5490_v40 = vpop.f32.mrb[91].mxu1  ;;  %v5450_v52 = vld [vmem:[#allocation3 + $0x68] sm:$0xff] }
 0x7a2   : > { %5440 = vst.msk [vmem:[#allocation3 + $0x98] sm:$0xff] %vm342_vm4, %v9639_v30  ;;  %8817 = vst.msk [vmem:[%s12396_s14 + $0x48] sm:$0xff] %vm342_vm4, %v4991_v11  ;;  %v4869_v46 = vadd.f32 %v10125_v4, %v4861_v9  ;;  %v4864_v35 = vld [vmem:[#allocation4 + $0x78] sm:$0xff]  ;;  %v5519_v49 = vadd.f32 %v5490_v40, %v5446_v17  ;;  %v5536_v43 = vld [vmem:[#allocation3 + $0x10] sm:$0xff] }
 0x7a3   : > { %5526 = vst.msk [vmem:[#allocation3 + $0x40] sm:$0xff] %vm342_vm4, %v5518_v20  ;;  %5438 = vst.msk [vmem:[#allocation3 + $0x88] sm:$0xff] %vm342_vm4, %v5409_v7  ;;  %v4988_v63 = vadd.f32 %v13095_v42, %v4871_v29  ;;  %v4872_v31 = vadd.f32 %v10125_v4, %v4864_v35  ;;  %v4862_v5 = vld [vmem:[#allocation4 + $0x68] sm:$0xff]  ;;  %v5534_v20 = vld [vmem:[#allocation3] sm:$0xff] }
 0x7a4   : > { %5529 = vst.msk [vmem:[#allocation3 + $0x58] sm:$0xff] %vm342_vm4, %v5521_v44  ;;  %v4986_v39 = vadd.f32 %v13097_v36, %v4869_v46  ;;  %v4870_v51 = vadd.f32 %v10125_v4, %v4862_v5  ;;  %5527 = vst.msk [vmem:[#allocation3 + $0x48] sm:$0xff] %vm342_vm4, %v5519_v49  ;;  %v5449_v4 = vld [vmem:[#allocation3 + $0x60] sm:$0xff]  ;;  %v5537_v0 = vld [vmem:[#allocation3 + $0x18] sm:$0xff] }
 0x7a5   : > { %v4996_v24 = vmax.f32 %v4988_v63, 0.0  ;;  %v4989_v14 = vadd.f32 %v13099_v27, %v4872_v31  ;;  %v5535_v44 = vld [vmem:[#allocation3 + $0x8] sm:$0xff]  ;;  %v5540_v40 = vld [vmem:[#allocation3 + $0x30] sm:$0xff]  ;;  %v5538_v49 = vld [vmem:[#allocation3 + $0x20] sm:$0xff] }
 0x7a6   : > { %v4994_v10 = vmax.f32 %v4986_v39, 0.0  ;;  %v4987_v55 = vadd.f32 %v4970_v58, %v4870_v51  ;;  %v9642_v18 = vpop.f32.mrb[84].mxu0  ;;  %v9656_v41 = vpop.f32.mrb[92].mxu1  ;;  %v5541_v39 = vld [vmem:[#allocation3 + $0x38] sm:$0xff] }
 0x7a7   : > { %8822 = vst.msk [vmem:[%s12396_s14 + $0x70] sm:$0xff] %vm342_vm4, %v4996_v24  ;;  %v4997_v42 = vmax.f32 %v4989_v14, 0.0  ;;  %5443 = vst.msk [vmem:[#allocation3 + $0xb0] sm:$0xff] %vm342_vm4, %v9642_v18  ;;  %v5524_v26 = vadd.f32 %v9656_v41, %v5451_v16  ;;  %v5422_v36 = vpop.f32.mrb[85].mxu0  ;;  %v5503_v45 = vpop.f32.mrb[93].mxu1  ;;  %v5539_v18 = vld [vmem:[#allocation3 + $0x28] sm:$0xff] }
 0x7a8   : > { %8820 = vst.msk [vmem:[%s12396_s14 + $0x60] sm:$0xff] %vm342_vm4, %v4994_v10  ;;  %v4995_v56 = vmax.f32 %v4987_v55, 0.0  ;;  %5441 = vst.msk [vmem:[#allocation3 + $0xa0] sm:$0xff] %vm342_vm4, %v5422_v36  ;;  %v5522_v27 = vadd.f32 %v5503_v45, %v5449_v4  ;;  %v9643_v58 = vpop.f32.mrb[86].mxu0  ;;  %v9657_v48 = vpop.f32.mrb[94].mxu1 }
 0x7a9   : > { %8823 = vst.msk [vmem:[%s12396_s14 + $0x78] sm:$0xff] %vm342_vm4, %v4997_v42  ;;  %5532 = vst.msk [vmem:[#allocation3 + $0x70] sm:$0xff] %vm342_vm4, %v5524_v26  ;;  %v5525_v12 = vadd.f32 %v9657_v48, %v5452_v6  ;;  %v5425_v32 = vpop.f32.mrb[87].mxu0  ;;  %v5506_v2 = vpop.f32.mrb[95].mxu1  ;;  %v10126_v24 = vld [vmem:[%s14472_s3] ss:$0 sm:$0xff] }
 0x7aa   : > { %5444 = vst.msk [vmem:[#allocation3 + $0xb8] sm:$0xff] %vm342_vm4, %v9643_v58  ;;  %8821 = vst.msk [vmem:[%s12396_s14 + $0x68] sm:$0xff] %vm342_vm4, %v4995_v56  ;;  %v5523_v33 = vadd.f32 %v5506_v2, %v5450_v52  ;;  %v14768_v48 = vld [vmem:[#allocation11_spill] sm:$0xff]  ;;  %v14770_v2 = vld [vmem:[#allocation10_spill] sm:$0xff] }
 0x7ab   : > { %5530 = vst.msk [vmem:[#allocation3 + $0x60] sm:$0xff] %vm342_vm4, %v5522_v27  ;;  %5442 = vst.msk [vmem:[#allocation3 + $0xa8] sm:$0xff] %vm342_vm4, %v5425_v32  ;;  %v14769_v32 = vld [vmem:[#allocation12_spill] sm:$0xff] }
 0x7ac   : > { %5533 = vst.msk [vmem:[#allocation3 + $0x78] sm:$0xff] %vm342_vm4, %v5525_v12  ;;  %5531 = vst.msk [vmem:[#allocation3 + $0x68] sm:$0xff] %vm342_vm4, %v5523_v33 }
 0x7ae   : > { %v9666_v11 = vpop.f32.mrb[88].mxu0 }
 0x7af   : > { %v5609_v8 = vadd.f32 %v9666_v11, %v5536_v43  ;;  %v5576_v30 = vpop.f32.mrb[89].mxu0  ;;  %v14771_v43 = vld [vmem:[#allocation9_spill] sm:$0xff] }
 0x7b0   : > { %v5607_v13 = vadd.f32 %v5576_v30, %v5534_v20  ;;  %v9667_v29 = vpop.f32.mrb[90].mxu0 }
 0x7b1   : > { %5617 = vst.msk [vmem:[#allocation3 + $0x10] sm:$0xff] %vm342_vm4, %v5609_v8  ;;  %v5610_v9 = vadd.f32 %v9667_v29, %v5537_v0  ;;  %v5579_v7 = vpop.f32.mrb[91].mxu0 }
 0x7b2   : > { %5615 = vst.msk [vmem:[#allocation3] sm:$0xff] %vm342_vm4, %v5607_v13  ;;  %v5608_v17 = vadd.f32 %v5579_v7, %v5535_v44 }
 0x7b3   : > { %5618 = vst.msk [vmem:[#allocation3 + $0x18] sm:$0xff] %vm342_vm4, %v5610_v9 }
 0x7b4   : > { %5616 = vst.msk [vmem:[#allocation3 + $0x8] sm:$0xff] %vm342_vm4, %v5608_v17 }
 0x7b6   : > { %v9670_v46 = vpop.f32.mrb[92].mxu0 }
 0x7b7   : > { %v5613_v35 = vadd.f32 %v9670_v46, %v5540_v40  ;;  %v5592_v63 = vpop.f32.mrb[93].mxu0 }
 0x7b8   : > { %v5625_v31 = vld [vmem:[#allocation3 + $0x10] sm:$0xff]  ;;  %v5611_v5 = vadd.f32 %v5592_v63, %v5538_v49  ;;  %v9671_v51 = vpop.f32.mrb[94].mxu0 }
 0x7b9   : > { %v5633_v14 = vadd.f32 %v10126_v24, %v5625_v31  ;;  %v5623_v10 = vld [vmem:[#allocation3] sm:$0xff]  ;;  %5621 = vst.msk [vmem:[#allocation3 + $0x30] sm:$0xff] %vm342_vm4, %v5613_v35  ;;  %v5614_v55 = vadd.f32 %v9671_v51, %v5541_v39  ;;  %v5595_v16 = vpop.f32.mrb[95].mxu0  ;;  %v14772_v63 = vld [vmem:[#allocation15_spill] sm:$0xff] }
 0x7ba   : > { %v5631_v41 = vadd.f32 %v10126_v24, %v5623_v10  ;;  %v5626_v42 = vld [vmem:[#allocation3 + $0x18] sm:$0xff]  ;;  %5619 = vst.msk [vmem:[#allocation3 + $0x20] sm:$0xff] %vm342_vm4, %v5611_v5  ;;  %v5612_v26 = vadd.f32 %v5595_v16, %v5539_v18  ;;  %v14774_v51 = vld [vmem:[#allocation13_spill] sm:$0xff]  ;;  %v14775_v10 = vld [vmem:[#allocation14_spill] sm:$0xff] }
 0x7bb   : > { %v5641_v36 = vmax.f32 %v5633_v14, 0.0  ;;  %v5634_v4 = vadd.f32 %v10126_v24, %v5626_v42  ;;  %v5624_v45 = vld [vmem:[#allocation3 + $0x8] sm:$0xff]  ;;  %5622 = vst.msk [vmem:[#allocation3 + $0x38] sm:$0xff] %vm342_vm4, %v5614_v55  ;;  %v14773_v5 = vld [vmem:[#allocation16_spill] sm:$0xff]  ;;  %v13164_v16 = vld [vmem:[#allocation2] sm:$0xff] }
 0x7bc   : > { %v5639_v56 = vmax.f32 %v5631_v41, 0.0  ;;  %v5632_v27 = vadd.f32 %v10126_v24, %v5624_v45  ;;  %5620 = vst.msk [vmem:[#allocation3 + $0x28] sm:$0xff] %vm342_vm4, %v5612_v26  ;;  %v5723_v26 = vrot.slane %v13164_v16, 1  ;;  %v5672_v45 = vshll.u32 %v13164_v16, 16 }
 0x7bd   : > { %v5642_v58 = vmax.f32 %v5634_v4, 0.0  ;;  %v5649_v12 = vmul.f32 %v5641_v36, %v14768_v48 }
 0x7be   : > { %v5640_v6 = vmax.f32 %v5632_v27, 0.0  ;;  %v5647_v33 = vmul.f32 %v5639_v56, %v14770_v2 }
 0x7bf   : > { %v5650_v52 = vmul.f32 %v5642_v58, %v14769_v32 }
 0x7c0   : > { %v5648_v11 = vmul.f32 %v5640_v6, %v14771_v43  ;;  %v5629_v8 = vld [vmem:[#allocation3 + $0x30] sm:$0xff] }
 0x7c1   : > { %v5656_v20 = vpack.c.bf16 %v5650_v52, %v5649_v12  ;;  %v5637_v30 = vadd.f32 %v10126_v24, %v5629_v8  ;;  %v5627_v13 = vld [vmem:[#allocation3 + $0x20] sm:$0xff]  ;;  %v5742_v12 = vrot.slane %v13164_v16, 4  ;;  %v5670_v52 = vshrl.u32 %v13164_v16, 16 }
 0x7c2   : > { %v5655_v0 = vpack.c.bf16 %v5648_v11, %v5647_v33  ;;  %v5635_v29 = vadd.f32 %v10126_v24, %v5627_v13  ;;  %v5630_v9 = vld [vmem:[#allocation3 + $0x38] sm:$0xff]  ;;  %v5674_v33 = vrot.slane %v5672_v45, 1 }
 0x7c3   : > { %5660 = vst.msk [vmem:[#allocation2 + $0x10] sm:$0xff] %vm342_vm4, %v5656_v20  ;;  %v5645_v44 = vmax.f32 %v5637_v30, 0.0  ;;  %v5638_v7 = vadd.f32 %v10126_v24, %v5630_v9  ;;  %v5628_v17 = vld [vmem:[#allocation3 + $0x28] sm:$0xff] }
 0x7c4   : > { %5659 = vst.msk [vmem:[#allocation2 + $0x8] sm:$0xff] %vm342_vm4, %v5655_v0  ;;  %v5643_v40 = vmax.f32 %v5635_v29, 0.0  ;;  %v5636_v46 = vadd.f32 %v10126_v24, %v5628_v17 }
 0x7c5   : > { %v5646_v35 = vmax.f32 %v5638_v7, 0.0  ;;  %v5653_v31 = vmul.f32 %v5645_v44, %v14772_v63  ;;  %v5675_v44 = vor.u32 %v5674_v33, %v5670_v52 }
 0x7c6   : > { %v5644_v49 = vmax.f32 %v5636_v46, 0.0  ;;  %v5651_v14 = vmul.f32 %v5643_v40, %v14774_v51 }
 0x7c7   : > { %v5654_v39 = vmul.f32 %v5646_v35, %v14773_v5 }
 0x7c8   : > { %v5652_v55 = vmul.f32 %v5644_v49, %v14775_v10 }
 0x7c9   : > { %v5658_v18 = vpack.c.bf16 %v5654_v39, %v5653_v31 }
 0x7ca   : > { %v5657_v41 = vpack.c.bf16 %v5652_v55, %v5651_v14  ;;  %v13166_v42 = vld [vmem:[#allocation2 + $0x10] sm:$0xff] }
 0x7cb   : > { %5662 = vst.msk [vmem:[#allocation2 + $0x20] sm:$0xff] %vm342_vm4, %v5658_v18  ;;  %5808 = vrot.lane.b32.xlu1 %v13166_v42, %s10181_s26  ;;  %v13172_v24 = vld [vmem:[#allocation2 + $0x8] sm:$0xff]  ;;  %v5726_v27 = vrot.slane %v13166_v42, 1  ;;  %v5745_v6 = vrot.slane %v13166_v42, 4  ;;  %v5685_v11 = vshll.u32 %v13166_v42, 16  ;;  %v5689_v13 = vshrl.u32 %v13166_v42, 16 }
 0x7cc   : > { %5661 = vst.msk [vmem:[#allocation2 + $0x18] sm:$0xff] %vm342_vm4, %v5657_v41  ;;  %5806 = vrot.lane.b32.xlu0 %v13172_v24, %s10181_s26  ;;  %v5787_v36 = vrot.slane %v13172_v24, 5  ;;  %v5724_v4 = vrot.slane %v13172_v24, 1  ;;  %v5743_v58 = vrot.slane %v13172_v24, 4  ;;  %v5677_v20 = vshll.u32 %v13172_v24, 16 }
 0x7cd   : > { %v5681_v30 = vshrl.u32 %v13172_v24, 16  ;;  %v5788_v29 = vrot.slane %v13166_v42, 5  ;;  %v5765_v7 = vrot.slane %v5685_v11, 5  ;;  %v5764_v35 = vrot.slane %v5689_v13, 4 }
 0x7ce   : > { %v5725_v56 = vsel %vm14776_vm9, %v5723_v26, %v5724_v4  ;;  %v5727_v8 = vsel %vm14777_vm7, %v5724_v4, %v5726_v27  ;;  %v5746_v0 = vsel %vm14778_vm3, %v5743_v58, %v5745_v6  ;;  %v5744_v9 = vsel %vm14779_vm12, %v5742_v12, %v5743_v58 }
 0x7cf   : > { %5796 = vrot.lane.b32.xlu1 %v5787_v36, %s10184_s16  ;;  %v5679_v17 = vrot.slane %v5677_v20, 1  ;;  %v5761_v40 = vrot.slane %v5681_v30, 4  ;;  %v5762_v46 = vrot.slane %v5677_v20, 5  ;;  %v5789_v49 = vsel %vm14780_vm5, %v5787_v36, %v5788_v29 }
 0x7d0   : > { %5732 = vrot.lane.b32.xlu0 %v5725_v56, %s10173_s9  ;;  %vm14781_vm9 = vsmask.f32 7424  ;;  %v13204_v14 = vor.u32 %v5765_v7, %v5764_v35  ;;  %vm14782_vm7 = vsmask.f32 3328  ;;  %v5687_v41 = vrot.slane %v5685_v11, 1 }
 0x7d1   : > { %v5680_v31 = vsel %vm14781_vm9, %v5675_v44, %v5679_v17  ;;  %v5763_v39 = vor.u32 %v5762_v46, %v5761_v40  ;;  %v5683_v18 = vor.u32 %v5681_v30, %v5679_v17  ;;  %vm14783_vm3 = vmmov %vm14781_vm9  ;;  %vm14784_vm12 = vcmask 1046528  }
 0x7d2   : > { %v13214_v36 = vld [vmem:[#allocation2 + $0x20] sm:$0xff]  ;;  %vm14785_vm5 = vcmask 1043456   ;;  %vm14786_vm9 = vcmask 1042432   ;;  %v5691_v7 = vor.u32 %v5689_v13, %v5687_v41 }
 0x7d3   : > { %5734 = vrot.lane.b32.xlu1 %v5727_v8, %s10173_s9  ;;  %v5767_v55 = vsel %vm14782_vm7, %v5763_v39, %v13204_v14  ;;  %v5688_v26 = vsel %vm14783_vm3, %v5683_v18, %v5687_v41  ;;  %v5730_v4 = vrot.slane %v13214_v36, 1  ;;  %v13220_v45 = vld [vmem:[#allocation2 + $0x18] sm:$0xff]  ;;  %v5749_v52 = vrot.slane %v13214_v36, 4  ;;  %vm14787_vm7 = vmmov %vm14786_vm9 }
 0x7d4   : > { %5753 = vrot.lane.b32.xlu0 %v5746_v0, %s10176_s12  ;;  %v5747_v58 = vrot.slane %v13220_v45, 4  ;;  %v5790_v33 = vrot.slane %v13220_v45, 5  ;;  %v5792_v11 = vrot.slane %v13214_v36, 5  ;;  %v5728_v30 = vrot.slane %v13220_v45, 1  ;;  %vm14788_vm3 = vmmov %vm14784_vm12 }
 0x7d5   : > { %v5835_v56 = vsel %vm14784_vm12, %v5730_v4, %v5834_v50  ;;  %v13237_v50 = vpop.permute.xlu0 %5814  ;;  %v5693_v0 = vshll.u32 %v13220_v45, 16  ;;  %vm14789_vm12 = vmmov %vm14788_vm3  ;;  %v5705_v46 = vshrl.u32 %v13214_v36, 16 }
 0x7d6   : > { %v5748_v12 = vsel %vm14785_vm5, %v5745_v6, %v5747_v58  ;;  %v5791_v20 = vsel %vm14786_vm9, %v5788_v29, %v5790_v33  ;;  %v5731_v17 = vsel %vm14789_vm12, %v5728_v30, %v5730_v4  ;;  %vm14790_vm5 = vsmask.f32 7424 }
 0x7d7   : > { %5751 = vrot.lane.b32.xlu1 %v5744_v9, %s10176_s12  ;;  %v5701_v9 = vshll.u32 %v13214_v36, 16  ;;  %v5695_v44 = vrot.slane %v5693_v0, 1  ;;  %v5769_v41 = vrot.slane %v5693_v0, 5  ;;  %vm14791_vm9 = vcmask 1043456   ;;  %vm14793_vm12 = vmmov %vm14790_vm5 }
 0x7d8   : > { %5798 = vrot.lane.b32.xlu0 %v5789_v49, %s10184_s16  ;;  %v13259_v49 = vpop.permute.xlu1 %6453 }
 0x7d9   : > { %v13250_v29 = vpop.permute.xlu0 %5832  ;;  %v5703_v40 = vrot.slane %v5701_v9, 1  ;;  %v5696_v35 = vsel %vm14790_vm5, %v5691_v7, %v5695_v44  ;;  %v5773_v13 = vrot.slane %v5701_v9, 5 }
 0x7db   : > { %5708 = vrot.lane.b32.xlu1 %v5680_v31, %s10172_s8 }
 0x7dc   : > { %5836 = vrot.lane.b32.xlu0 %v5727_v8, %s10183_s13  ;;  %v5794_v8 = vrot.slane %v12974_v37, 5  ;;  %v5729_v37 = vsel %vm14788_vm3, %v5726_v27, %v5728_v30  ;;  %v5697_v27 = vshrl.u32 %v13220_v45, 16  ;;  %vm14792_vm3 = vsmask.f32 3328 }
 0x7dd   : > { %v13261_v31 = vpop.permute.xlu0 %5844 }
 0x7de   : > { %v5795_v6 = vsel %vm14787_vm7, %v5792_v11, %v5794_v8  ;;  %v5768_v18 = vrot.slane %v5697_v27, 4 }
 0x7df   : > { %5778 = vrot.lane.b32.xlu1 %v5767_v55, %s10178_s28  ;;  %v5772_v55 = vrot.slane %v5705_v46, 4 }
 0x7e0   : > { %5776 = vrot.lane.b32.xlu0 %v5763_v39, %s10178_s28  ;;  %v5707_v39 = vor.u32 %v5705_v46, %v5703_v40  ;;  %v6471_v46 = vrot.slane %v13055_v28, 5 }
 0x7e1   : > { %v13269_v8 = vpop.permute.xlu0 %6455 }
 0x7e3   : > { %5824 = vrot.lane.b32.xlu1 %v5688_v26, %s10182_s27 }
 0x7e4   : > { %5710 = vrot.lane.b32.xlu0 %v5688_v26, %s10172_s8  ;;  %v5750_v26 = vsel %vm14791_vm9, %v5747_v58, %v5749_v52  ;;  %vm14794_vm9 = vmmov %vm14792_vm3 }
 0x7e7   : > { %5812 = vrot.lane.b32.xlu1 %v13214_v36, %s10181_s26 }
 0x7e8   : > { %5810 = vrot.lane.b32.xlu0 %v13220_v45, %s10181_s26 }
 0x7eb   : > { %5842 = vrot.lane.b32.xlu1 %v5835_v56, %s10183_s13  ;;  %v13266_v56 = vpop.permute.xlu1 %6457 }
 0x7ec   : > { %5740 = vrot.lane.b32.xlu0 %v5730_v4, %s10173_s9  ;;  %v5774_v4 = vor.u32 %v5773_v13, %v5772_v55 }
 0x7ef   : > { %5755 = vrot.lane.b32.xlu1 %v5748_v12, %s10176_s12  ;;  %v5770_v12 = vor.u32 %v5769_v41, %v5768_v18  ;;  %v13277_v58 = vpop.permute.xlu1 %6477 }
 0x7f0   : > { %5759 = vrot.lane.b32.xlu0 %v5749_v52, %s10176_s12  ;;  %v13279_v52 = vpop.permute.xlu0 %6475 }
 0x7f1   : > { %v5771_v30 = vsel %vm14792_vm3, %v13204_v14, %v5770_v12  ;;  %vm14795_vm3 = vmmov %vm14787_vm7 }
 0x7f2   : > { %v6472_v13 = vsel %vm14795_vm3, %v6469_v3, %v6471_v46 }
 0x7f3   : > { %5800 = vrot.lane.b32.xlu1 %v5791_v20, %s10184_s16  ;;  %v5793_v20 = vsel %vm14787_vm7, %v5790_v33, %v5792_v11  ;;  %v5820_v33 = vsel %vm14790_vm5, %v5707_v39, %v12981_v62  ;;  %v8907_v11 = vld [vmem:[%s10239_s29 + $0x114] sm:$0xf]  ;;  %vm14797_vm5 = vmmov %vm14794_vm9 }
 0x7f4   : > { %5804 = vrot.lane.b32.xlu0 %v5795_v6, %s10184_s16  ;;  %v5699_v6 = vor.u32 %v5697_v27, %v5695_v44  ;;  %v13290_v14 = vpop.permute.xlu0 %6479  ;;  %v8919_v9 = vcombine.low %v8907_v11, %v8907_v11  ;;  %v13298_v44 = vld [vmem:[%s14475_s6] sm:$0x3]  ;;  %v8920_v62 = vcombine.low %v13051_v34, %v8907_v11  ;;  %v8908_v27 = vld [vmem:[%s10239_s29 + $0x118] sm:$0xf] }
 0x7f5   : > { %9911 = vmatprep.subr.msk.bf16.mxu0 %vm829_vm2, %v13298_v44 }
 0x7f6   : > { %v5704_v0 = vsel %vm14793_vm12, %v5699_v6, %v5703_v40  ;;  %v5775_v40 = vsel %vm14794_vm9, %v5770_v12, %v5774_v4  ;;  %v8922_v12 = vcombine.low %v8907_v11, %v8908_v27  ;;  %vm14796_vm12 = vmmov %vm14795_vm3 }
 0x7f7   : > { %5838 = vrot.lane.b32.xlu1 %v5729_v37, %s10183_s13  ;;  %vm14798_vm9 = vmmov %vm14795_vm3 }
 0x7f8   : > { %5736 = vrot.lane.b32.xlu0 %v5729_v37, %s10173_s9  ;;  %v13287_v37 = vpop.permute.xlu1 %6485  ;;  %v6575_v60 = vshrl.u32 %v8922_v12, 16  ;;  %v6578_v3 = vshll.u32 %v8922_v12, 16 }
 0x7fb   : > { %5840 = vrot.lane.b32.xlu1 %v5731_v17, %s10183_s13 }
 0x7fc   : > { %5826 = vrot.lane.b32.xlu0 %v5696_v35, %s10182_s27  ;;  %v13305_v7 = vpop.permute.xlu1 %6489 }
 0x7ff   : > { %5738 = vrot.lane.b32.xlu1 %v5731_v17, %s10173_s9  ;;  %v13307_v17 = vpop.permute.xlu0 %6487 }
 0x800   : > { %5716 = vrot.lane.b32.xlu0 %v5707_v39, %s10172_s8  ;;  %v13316_v39 = vpop.permute.xlu1 %6533 }
 0x803   : > { %5757 = vrot.lane.b32.xlu1 %v5750_v26, %s10176_s12  ;;  %v13320_v55 = vpop.permute.xlu0 %6531  ;;  %v8921_v26 = vcombine.low %v8908_v27, %v8908_v27  ;;  %v6596_v27 = vrot.slane %v8922_v12, 5 }
 0x804   : > { %5784 = vrot.lane.b32.xlu0 %v5774_v4, %s10178_s28 }
 0x807   : > { %5802 = vrot.lane.b32.xlu1 %v5793_v20, %s10184_s16  ;;  %v13328_v20 = vpop.permute.xlu1 %6553  ;;  %v13330_v6 = vpop.permute.xlu0 %6535 }
 0x808   : > { %5780 = vrot.lane.b32.xlu0 %v5771_v30, %s10178_s28  ;;  %v6551_v30 = vrot.slane %v8921_v26, 5 }
 0x80b   : > { %5712 = vrot.lane.b32.xlu1 %v5696_v35, %s10172_s8  ;;  %v6526_v35 = vshll.u32 %v8920_v62, 16  ;;  %v13339_v11 = vpop.permute.xlu0 %6555 }
 0x80c   : > { %5714 = vrot.lane.b32.xlu0 %v5704_v0, %s10172_s8 }
 0x80d   : > { %v6528_v41 = vrot.slane %v6526_v35, 5 }
 0x80f   : > { %5830 = vrot.lane.b32.xlu1 %v5820_v33, %s10182_s27  ;;  %v13335_v33 = vpop.permute.xlu1 %6557 }
 0x810   : > { %6600 = vrot.lane.b32.xlu0 %v12999_v59, %s10178_s28  ;;  %v6473_v59 = vrot.slane %v8919_v9, 5 }
 0x812   : > { %v6474_v34 = vsel %vm14787_vm7, %v6471_v46, %v6473_v59  ;;  %v6577_v59 = vrot.slane %v6575_v60, 4  ;;  %vm14799_vm7 = vmmov %vm14795_vm3 }
 0x813   : > { %5828 = vrot.lane.b32.xlu1 %v5704_v0, %s10182_s27  ;;  %vm14800_vm3 = vmmov %vm14797_vm5 }
 0x814   : > { %6459 = vrot.lane.b32.xlu0 %v13070_v54, %s10174_s10  ;;  %v6523_v54 = vshrl.u32 %v8920_v62, 16 }
 0x816   : > { %v6525_v18 = vrot.slane %v6523_v54, 4  ;;  %v10048_v54 = vld [vmem:[%s10239_s29 + $0x11c] ss:$0 sps:$4 sm:$0xff]  }
 0x817   : > { %5782 = vrot.lane.b32.xlu1 %v5775_v40, %s10178_s28  ;;  %v6580_v40 = vrot.slane %v6578_v3, 5 }
 0x818   : > { %6461 = vrot.lane.b32.xlu0 %v13063_v47, %s10174_s10  ;;  %v6529_v4 = vor.u32 %v6528_v41, %v6525_v18  ;;  %v13352_v18 = vpop.permute.xlu0 %6563 }
 0x81b   : > { %6602 = vrot.lane.b32.xlu1 %v13022_v38, %s10178_s28  ;;  %v6549_v38 = vrot.slane %v8920_v62, 5 }
 0x81c   : > { %6483 = vrot.lane.b32.xlu0 %v6474_v34, %s10172_s8  ;;  %v6581_v34 = vor.u32 %v6580_v40, %v6577_v59 }
 0x81d   : > { %v6552_v0 = vsel %vm14796_vm12, %v6549_v38, %v6551_v30  ;;  %v6550_v35 = vsel %vm14798_vm9, %v6547_v21, %v6549_v38  ;;  %v13360_v21 = vpop.permute.xlu0 %6567  ;;  %vm14801_vm12 = vmmov %vm14799_vm7 }
 0x81f   : > { %6604 = vrot.lane.b32.xlu1 %v6472_v13, %s10178_s28 }
 0x820   : > { %6493 = vrot.lane.b32.xlu0 %v8919_v9, %s10171_s30  ;;  %v6530_v9 = vsel %vm14797_vm5, %v13037_v61, %v6529_v4  ;;  %vm14802_vm5 = vcmask 31744  }
 0x821   : > { %v13369_v38 = vpop.permute.xlu0 %6585  ;;  %vm14803_vm9 = vmmov %vm14802_vm5 }
 0x823   : > { %6481 = vrot.lane.b32.xlu1 %v6472_v13, %s10172_s8  ;;  %v6598_v13 = vrot.slane %v10048_v54, 5 }
 0x824   : > { %6539 = vrot.lane.b32.xlu0 %v6529_v4, %s10173_s9  ;;  %v6597_v4 = vsel %vm14801_vm12, %v6471_v46, %v6596_v27 }
 0x825   : > { %v6599_v61 = vsel %vm14799_vm7, %v6596_v27, %v6598_v13  ;;  %vm14804_vm7 = vcmask 97280  }
 0x826   : > { %vm14806_vm12 = vmmov %vm14804_vm7 }
 0x827   : > { %6491 = vrot.lane.b32.xlu1 %v13055_v28, %s10171_s30  ;;  %v13350_v28 = vpop.permute.xlu1 %6565 }
 0x828   : > { %6561 = vrot.lane.b32.xlu0 %v6552_v0, %s10175_s11 }
 0x82b   : > { %6537 = vrot.lane.b32.xlu1 %v6530_v9, %s10173_s9  ;;  %v13357_v41 = vpop.permute.xlu1 %6583 }
 0x82c   : > { %6571 = vrot.lane.b32.xlu0 %v8921_v26, %s10176_s12  ;;  %v6582_v26 = vsel %vm14800_vm3, %v13063_v47, %v6581_v34  ;;  %vm14805_vm3 = vmmov %vm14802_vm5 }
 0x82f   : > { %6559 = vrot.lane.b32.xlu1 %v6550_v35, %s10175_s11  ;;  %v13367_v12 = vpop.permute.xlu1 %6587 }
 0x830   : > { %6591 = vrot.lane.b32.xlu0 %v6581_v34, %s10177_s21 }
 0x833   : > { %6569 = vrot.lane.b32.xlu1 %v8920_v62, %s10176_s12 }
 0x834   : > { %6608 = vrot.lane.b32.xlu0 %v6599_v61, %s10178_s28 }
 0x837   : > { %6589 = vrot.lane.b32.xlu1 %v6582_v26, %s10177_s21 }
 0x83b   : > { %6606 = vrot.lane.b32.xlu1 %v6597_v4, %s10178_s28 }
 0x83d   : > { %v5809_v30 = vpop.permute.xlu1 %5808 }
 0x83e   : > { %v5807_v60 = vpop.permute.xlu0 %5806 }
 0x841   : > { %v5797_v62 = vpop.permute.xlu1 %5796 }
 0x842   : > { %v5733_v3 = vpop.permute.xlu0 %5732 }
 0x845   : > { %v5735_v0 = vpop.permute.xlu1 %5734 }
 0x846   : > { %v5754_v9 = vpop.permute.xlu0 %5753 }
 0x849   : > { %v5752_v59 = vpop.permute.xlu1 %5751 }
 0x84a   : > { %v5799_v47 = vpop.permute.xlu0 %5798 }
 0x84d   : > { %v5709_v40 = vpop.permute.xlu1 %5708 }
 0x84e   : > { %v5837_v54 = vpop.permute.xlu0 %5836  ;;  %v5847_v27 = vsel %vm342_vm4, %v13164_v16, %v5709_v40 }
 0x84f   : > { %v5857_v26 = vsel %vm706_vm6, %v5847_v27, %v5733_v3 }
 0x850   : > { %v5867_v10 = vsel %vm728_vm8, %v5857_v26, %v5752_v59 }
 0x851   : > { %v5779_v35 = vpop.permute.xlu1 %5778 }
 0x852   : > { %v5777_v34 = vpop.permute.xlu0 %5776 }
 0x853   : > { %v5877_v5 = vsel %vm750_vm10, %v5867_v10, %v5777_v34 }
 0x854   : > { %v5887_v2 = vsel %vm1915_vm15, %v5877_v5, %v5797_v62 }
 0x855   : > { %v5825_v13 = vpop.permute.xlu1 %5824  ;;  %v5897_v3 = vsel %vm1926_vm13, %v5887_v2, %v5807_v60 }
 0x856   : > { %v5711_v46 = vpop.permute.xlu0 %5710  ;;  %v5907_v26 = vsel %vm1937_vm1, %v5897_v3, %v5825_v13 }
 0x857   : > { %v5849_v43 = vsel %vm342_vm4, %v13172_v24, %v5711_v46  ;;  %v5917_v15 = vsel %vm1948_vm0, %v5907_v26, %v5837_v54 }
 0x858   : > { %v5859_v16 = vsel %vm706_vm6, %v5849_v43, %v5735_v0  ;;  %v5926_v62 = vshrl.u32 %v5917_v15, 16  ;;  %v5929_v46 = vshll.u32 %v5917_v15, 16 }
 0x859   : > { %v13374_v61 = vpop.permute.xlu1 %5812  ;;  %v5869_v27 = vsel %vm728_vm8, %v5859_v16, %v5754_v9 }
 0x85a   : > { %v13377_v4 = vpop.permute.xlu0 %5810  ;;  %v5879_v10 = vsel %vm750_vm10, %v5869_v27, %v5779_v35  ;;  %v5928_v16 = vrot.slane %v5926_v62, 3  ;;  %v5931_v13 = vrot.slane %v5929_v46, 4 }
 0x85b   : > { %v5889_v5 = vsel %vm1915_vm15, %v5879_v10, %v5799_v47 }
 0x85c   : > { %v5899_v2 = vsel %vm1926_vm13, %v5889_v5, %v5809_v30  ;;  %v5932_v15 = vor.u32 %v5931_v13, %v5928_v16  ;;  %v8898_v13 = vld [vmem:[%s10239_s29 + $0xf0] sm:$0xf] }
 0x85d   : > { %v13380_v51 = vpop.permute.xlu1 %5842 }
 0x85e   : > { %v5741_v63 = vpop.permute.xlu0 %5740 }
 0x861   : > { %v5756_v32 = vpop.permute.xlu1 %5755 }
 0x862   : > { %v5760_v40 = vpop.permute.xlu0 %5759 }
 0x865   : > { %v5801_v48 = vpop.permute.xlu1 %5800 }
 0x866   : > { %v5805_v59 = vpop.permute.xlu0 %5804 }
 0x869   : > { %v5839_v34 = vpop.permute.xlu1 %5838 }
 0x86a   : > { %v5737_v24 = vpop.permute.xlu0 %5736 }
 0x86d   : > { %v5841_v43 = vpop.permute.xlu1 %5840 }
 0x86e   : > { %v5827_v0 = vpop.permute.xlu0 %5826 }
 0x86f   : > { %v5909_v60 = vsel %vm1937_vm1, %v5899_v2, %v5827_v0 }
 0x870   : > { %v5919_v9 = vsel %vm1948_vm0, %v5909_v60, %v5839_v34 }
 0x871   : > { %v5933_v3 = vshrl.u32 %v5919_v9, 16  ;;  %v5936_v35 = vshll.u32 %v5919_v9, 16  ;;  %v5739_v27 = vpop.permute.xlu1 %5738 }
 0x872   : > { %v5717_v19 = vpop.permute.xlu0 %5716 }
 0x873   : > { %v5935_v54 = vrot.slane %v5933_v3, 3  ;;  %v5938_v26 = vrot.slane %v5936_v35, 4  ;;  %v5855_v47 = vsel %vm342_vm4, %v13214_v36, %v5717_v19 }
 0x874   : > { %v5865_v5 = vsel %vm706_vm6, %v5855_v47, %v5741_v63  ;;  %v10127_v47 = vld [vmem:[%s10239_s29 + $0xf4] sm:$0xf] }
 0x875   : > { %v5939_v10 = vor.u32 %v5938_v26, %v5935_v54  ;;  %v5758_v22 = vpop.permute.xlu1 %5757  ;;  %v5875_v46 = vsel %vm728_vm8, %v5865_v5, %v5760_v40 }
 0x876   : > { %v5785_v30 = vpop.permute.xlu0 %5784 }
 0x877   : > { %v13400_v34 = vsel %vm761_vm11, %v5932_v15, %v5939_v10  ;;  %v5885_v36 = vsel %vm750_vm10, %v5875_v46, %v5785_v30 }
 0x878   : > { %9682 = vmatprep.mubr.msk.bf16.mxu1 %vm2025_vm14, %v13400_v34  ;;  %9700 = vmatprep.mubr.msk.bf16.mxu0 %vm2025_vm14, %v13400_v34  ;;  %v5895_v9 = vsel %vm1915_vm15, %v5885_v36, %v5805_v59 }
 0x879   : > { %v5803_v62 = vpop.permute.xlu1 %5802  ;;  %v5905_v26 = vsel %vm1926_vm13, %v5895_v9, %v13237_v50 }
 0x87a   : > { %v5781_v19 = vpop.permute.xlu0 %5780  ;;  %v5915_v30 = vsel %vm1937_vm1, %v5905_v26, %v13250_v29 }
 0x87d   : > { %v5713_v0 = vpop.permute.xlu1 %5712 }
 0x87e   : > { %v5851_v63 = vsel %vm342_vm4, %v13166_v42, %v5713_v0  ;;  %v5715_v2 = vpop.permute.xlu0 %5714 }
 0x87f   : > { %v5861_v60 = vsel %vm706_vm6, %v5851_v63, %v5737_v24  ;;  %v5853_v42 = vsel %vm342_vm4, %v13220_v45, %v5715_v2  ;;  %v8910_v24 = vcombine.low %v8898_v13, %v10127_v47 }
 0x880   : > { %v5871_v16 = vsel %vm728_vm8, %v5861_v60, %v5756_v32  ;;  %v6614_v32 = vsel %vm14802_vm5, %v13005_v57, %v13269_v8  ;;  %vm14807_vm5 = vcmask 162816  }
 0x881   : > { %v5831_v3 = vpop.permute.xlu1 %5830  ;;  %v5881_v35 = vsel %vm750_vm10, %v5871_v16, %v5781_v19  ;;  %v6612_v46 = vsel %vm14803_vm9, %v8910_v24, %v13259_v49  ;;  %v6625_v57 = vsel %vm342_vm4, %v6614_v32, %v13277_v58  ;;  %v5925_v19 = vsel %vm1948_vm0, %v5915_v30, %v13261_v31  ;;  %v10131_v32 = vld [vmem:[%s14471_s2 + $0x28] sm:$0xff]   ;;  %vm14808_vm9 = vmmov %vm14805_vm3 }
 0x882   : > { %v13415_v40 = vpop.permute.xlu0 %6600  ;;  %v5891_v54 = vsel %vm1915_vm15, %v5881_v35, %v5801_v48  ;;  %v5863_v48 = vsel %vm706_vm6, %v5853_v42, %v5739_v27  ;;  %v6623_v49 = vsel %vm342_vm4, %v6612_v46, %v13279_v52  ;;  %v6635_v58 = vsel %vm14804_vm7, %v6625_v57, %v13307_v17 }
 0x883   : > { %v5901_v59 = vsel %vm1926_vm13, %v5891_v54, %v13377_v4  ;;  %v5873_v29 = vsel %vm728_vm8, %v5863_v48, %v5758_v22  ;;  %v5957_v22 = vshrl.u32 %v5925_v19, 16  ;;  %v5960_v9 = vshll.u32 %v5925_v19, 16  ;;  %v10128_v54 = vld [vmem:[%s10239_s29 + $0x110] sm:$0xf] }
 0x884   : > { %v6616_v16 = vsel %vm14805_vm3, %v13007_v25, %v13266_v56  ;;  %v6286_v52 = vsel %vm829_vm2, %v13298_v44, 0  ;;  %v6633_v17 = vsel %vm14806_vm12, %v6623_v49, %v13287_v37  ;;  %v8914_v26 = vcombine.low %v10128_v54, %v10128_v54  ;;  %vm14809_vm3 = vmmov %vm14807_vm5 }
 0x885   : > { %v5829_v15 = vpop.permute.xlu1 %5828  ;;  %v6645_v25 = vsel %vm706_vm6, %v6635_v58, %v13316_v39  ;;  %v6627_v37 = vsel %vm342_vm4, %v6616_v16, %v13290_v14  ;;  %v5959_v39 = vrot.slane %v5957_v22, 3  ;;  %v10130_v14 = vld [vmem:[%s14473_s4 + $0x50] sm:$0xff]   ;;  %vm14810_vm12 = vcmask 228352  }
 0x886   : > { %v5911_v50 = vsel %vm1937_vm1, %v5901_v59, %v5829_v15  ;;  %v13432_v5 = vpop.permute.xlu0 %6459  ;;  %v6655_v59 = vsel %vm14807_vm5, %v6645_v25, %v13339_v11  ;;  %v6637_v48 = vsel %vm14804_vm7, %v6627_v37, %v13305_v7  ;;  %vm14811_vm5 = vmmov %vm14804_vm7 }
 0x887   : > { %v5921_v45 = vsel %vm1948_vm0, %v5911_v50, %v5841_v43  ;;  %v6665_v57 = vsel %vm728_vm8, %v6655_v59, %v13350_v28  ;;  %v6647_v7 = vsel %vm706_vm6, %v6637_v48, %v13330_v6  ;;  %vm14813_vm7 = vmmov %vm14810_vm12 }
 0x888   : > { %v5941_v8 = vshrl.u32 %v5921_v45, 16  ;;  %v5944_v4 = vshll.u32 %v5921_v45, 16  ;;  %v6675_v6 = vsel %vm14810_vm12, %v6665_v57, %v13369_v38 }
 0x889   : > { %v5783_v27 = vpop.permute.xlu1 %5782 }
 0x88a   : > { %v5943_v36 = vrot.slane %v5941_v8, 3  ;;  %v5946_v0 = vrot.slane %v5944_v4, 4  ;;  %v5883_v63 = vsel %vm750_vm10, %v5873_v29, %v5783_v27  ;;  %v6462_v43 = vpop.permute.xlu0 %6461  ;;  %v10132_v4 = vld [vmem:[%s14473_s4 + $0x58] sm:$0xff]   ;;  %v10049_v27 = vld [vmem:[%s10239_s29 + $0x68] sm:$0xff]  }
 0x88b   : > { %v5893_v2 = vsel %vm1915_vm15, %v5883_v63, %v5803_v62  ;;  %v6621_v15 = vsel %vm14808_vm9, %v8914_v26, %v6462_v43  ;;  %vm14812_vm9 = vmmov %vm14809_vm3  ;;  %v10133_v43 = vld [vmem:[%s14473_s4 + $0x60] sm:$0xff]  }
 0x88c   : > { %v5947_v60 = vor.u32 %v5946_v0, %v5943_v36  ;;  %v5903_v31 = vsel %vm1926_vm13, %v5893_v2, %v13374_v61 }
 0x88d   : > { %v5913_v13 = vsel %vm1937_vm1, %v5903_v31, %v5831_v3  ;;  %v6603_v35 = vpop.permute.xlu1 %6602  ;;  %v6643_v3 = vsel %vm706_vm6, %v6633_v17, %v13320_v55  ;;  %v10050_v31 = vld [vmem:[%s10239_s29 + $0x70] sm:$0xff]  }
 0x88e   : > { %v5923_v62 = vsel %vm1948_vm0, %v5913_v13, %v13380_v51  ;;  %v13461_v61 = vsel %vm761_vm11, %v5939_v10, %v5947_v60  ;;  %v6484_v42 = vpop.permute.xlu0 %6483  ;;  %v13475_v51 = vld [vmem:[%s14473_s4 + $0x48] sm:$0xff]   ;;  %v5962_v10 = vrot.slane %v5960_v9, 4  ;;  %v6653_v50 = vsel %vm14809_vm3, %v6643_v3, %v13328_v20 }
 0x88f   : > { %9683 = vmatmul.mubr.msk.bf16.vlgmr.msra.gmra.mrb[96].mxu1 %vm2025_vm14, %v13461_v61  ;;  %9701 = vmatmul.mubr.msk.bf16.vlgmr.msra.gmra.mrb[96].mxu0 %vm2025_vm14, %v13461_v61  ;;  %v5949_v56 = vshrl.u32 %v5923_v62, 16  ;;  %v5952_v44 = vshll.u32 %v5923_v62, 16  ;;  %v6631_v8 = vsel %vm342_vm4, %v6621_v15, %v6484_v42  ;;  %v6663_v28 = vsel %vm728_vm8, %v6653_v50, %v13352_v18  ;;  %v10137_v15 = vld [vmem:[%s14471_s2 + $0x38] ss:$0 sps:$4 sm:$0x33]   ;;  %v10138_v50 = vld [vmem:[%s14471_s2 + $0x1c] sm:$0xff]  }
 0x890   : > { %9709 = vmatpush3.bf16.msra.mxu1 %v13475_v51  ;;  %9727 = vmatpush3.bf16.msra.mxu0 %v6286_v52  ;;  %v5963_v46 = vor.u32 %v5962_v10, %v5959_v39  ;;  %v6657_v18 = vsel %vm14812_vm9, %v6647_v7, %v13335_v33  ;;  %v6685_v0 = vsel %vm750_vm10, %v6675_v6, %v6603_v35  ;;  %vm14814_vm3 = vcmask 31744   ;;  %v10051_v35 = vld [vmem:[%s10239_s29 + $0x78] sm:$0xff]   ;;  %v10139_v7 = vld [vmem:[%s14473_s4 + $0x24] sm:$0xff]  }
 0x891   : > { %v13480_v47 = vpop.permute.xlu1 %6604  ;;  %9710 = vmatprep.subr.bf16.mxu1 %v10130_v14  ;;  %v5951_v24 = vrot.slane %v5949_v56, 3  ;;  %9750 = vmatprep.subr.bf16.mxu0 %v10131_v32  ;;  %v5954_v30 = vrot.slane %v5952_v44, 4  ;;  %v6673_v38 = vsel %vm14813_vm7, %v6663_v28, %v13357_v41  ;;  %vm14815_vm12 = vmmov %vm14814_vm3  ;;  %v6667_v41 = vsel %vm728_vm8, %v6657_v18, %v13360_v21  ;;  %v10136_v10 = vld [vmem:[%s14471_s2 + $0x14] sm:$0xff]  }
 0x892   : > { %v6494_v55 = vpop.permute.xlu0 %6493  ;;  %v6683_v33 = vsel %vm750_vm10, %v6673_v38, %v13415_v40  ;;  %v6707_v2 = vshrl.u32 %v6685_v0, 16  ;;  %v10134_v40 = vld [vmem:[%s14473_s4 + $0x68] ss:$0 sps:$4 sm:$0xff]   ;;  %v6677_v21 = vsel %vm14813_vm7, %v6667_v41, %v13367_v12  ;;  %v10135_v12 = vld [vmem:[%s14471_s2 + $0x30] sm:$0xff]   ;;  %v14824_v18 = vld [vmem:[#allocation6_spill] sm:$0xff] }
 0x893   : > { %v5955_v45 = vor.u32 %v5954_v30, %v5951_v24  ;;  %v6641_v36 = vsel %vm14811_vm5, %v6631_v8, %v6494_v55  ;;  %v6700_v9 = vshrl.u32 %v6683_v33, 16  ;;  %v6703_v16 = vshll.u32 %v6683_v33, 16 }
 0x894   : > { %9711 = vmatpush3.bf16.msra.mxu1 %v10130_v14  ;;  %vm14816_vm5 = vcmask 1043456   ;;  %v6709_v52 = vrot.slane %v6707_v2, 3  ;;  %v6687_v62 = vsel %vm750_vm10, %v6677_v21, %v13480_v47  ;;  %v10052_v14 = vld [vmem:[%s10239_s29 + $0x80] sm:$0xff]  }
 0x895   : > { %v6482_v11 = vpop.permute.xlu1 %6481  ;;  %9712 = vmatprep.subr.bf16.mxu1 %v10132_v4  ;;  %v13504_v19 = vsel %vm761_vm11, %v5947_v60, %v5955_v45  ;;  %v13507_v20 = vsel %vm761_vm11, %v5955_v45, %v5963_v46  ;;  %v6710_v60 = vshll.u32 %v6685_v0, 16  ;;  %v6702_v25 = vrot.slane %v6700_v9, 3  ;;  %v10146_v9 = vld [vmem:[%s14473_s4 + $0x3c] sm:$0xff]  }
 0x896   : > { %v6540_v29 = vpop.permute.xlu0 %6539  ;;  %9686 = vmatprep.mubr.msk.bf16.mxu1 %vm2025_vm14, %v13504_v19  ;;  %9704 = vmatprep.mubr.msk.bf16.mxu0 %vm2025_vm14, %v13504_v19  ;;  %v6705_v56 = vrot.slane %v6703_v16, 4  ;;  %v6715_v44 = vshrl.u32 %v6687_v62, 16  ;;  %v6718_v39 = vshll.u32 %v6687_v62, 16  ;;  %v10147_v16 = vld [vmem:[%s14473_s4 + $0x18] sm:$0xff]  }
 0x897   : > { %9687 = vmatmul.mubr.msk.bf16.gmra.mrb[100].mxu1 %vm2025_vm14, %v13507_v20  ;;  %9705 = vmatmul.mubr.msk.bf16.gmra.mrb[100].mxu0 %vm2025_vm14, %v13507_v20  ;;  %v6651_v58 = vsel %vm706_vm6, %v6641_v36, %v6540_v29  ;;  %v6712_v17 = vrot.slane %v6710_v60, 4  ;;  %v10140_v29 = vld [vmem:[%s14471_s2 + $0x24] ss:$0 sps:$4 sm:$0x33]   ;;  %v10143_v60 = vld [vmem:[%s14473_s4 + $0x8] sm:$0xff]  }
 0x898   : > { %9713 = vmatpush3.bf16.msra.mxu1 %v10132_v4  ;;  %9718 = vmatprep.mubr.msk.bf16.mxu1 %vm2025_vm14, %v13400_v34  ;;  %v6618_v34 = vsel %vm14815_vm12, %v13026_v1, %v13432_v5  ;;  %vm14817_vm12 = vcmask 97280   ;;  %v6706_v59 = vor.u32 %v6705_v56, %v6702_v25  ;;  %v6717_v55 = vrot.slane %v6715_v44, 3 }
 0x899   : > { %v6492_v63 = vpop.permute.xlu1 %6491  ;;  %9714 = vmatprep.subr.bf16.mxu1 %v10133_v43  ;;  %9728 = vmatprep.mubr.msk.bf16.mxu0 %vm14814_vm3, %v10049_v27  ;;  %v6629_v13 = vsel %vm342_vm4, %v6618_v34, %v6482_v11  ;;  %v6713_v3 = vor.u32 %v6712_v17, %v6709_v52  ;;  %v6720_v48 = vrot.slane %v6718_v39, 4  ;;  %v10142_v34 = vld [vmem:[%s14473_s4 + $0x2c] sm:$0xff]  }
 0x89a   : > { %v6562_v49 = vpop.permute.xlu0 %6561  ;;  %v6639_v54 = vsel %vm14817_vm12, %v6629_v13, %v6492_v63  ;;  %vm14821_vm12 = vcmask 293888   ;;  %v10148_v13 = vld [vmem:[%s14473_s4 + $0x44] ss:$0 sps:$4 sm:$0xff]  }
 0x89b   : > { %v6661_v1 = vsel %vm14812_vm9, %v6651_v58, %v6562_v49  ;;  %vm14819_vm9 = vmmov %vm14813_vm7  ;;  %vm14820_vm7 = vcmask 162816   ;;  %v6714_v46 = vsel %vm761_vm11, %v6706_v59, %v6713_v3 }
 0x89c   : > { %9715 = vmatpush3.bf16.msra.mxu1 %v10133_v43  ;;  %v10141_v43 = vld [vmem:[%s14473_s4] sm:$0xff]  }
 0x89d   : > { %v6538_v22 = vpop.permute.xlu1 %6537  ;;  %9910 = vmatprep.subr.msk.bf16.mxu1 %vm14816_vm5, %v10134_v40  ;;  %vm14818_vm5 = vmmov %vm14814_vm3  ;;  %v14832_v40 = vld [vmem:[#allocation28_spill] sm:$0xff] }
 0x89e   : > { %v6572_v5 = vpop.permute.xlu0 %6571  ;;  %v6649_v47 = vsel %vm706_vm6, %v6639_v54, %v6538_v22  ;;  %v10145_v22 = vld [vmem:[%s14473_s4 + $0x10] sm:$0xff]  }
 0x89f   : > { %9729 = vmatmul.mubr.msk.bf16.vlgmr.msra.gmra.mrb[104].mxu0 %vm14814_vm3, %v10050_v31  ;;  %v6671_v42 = vsel %vm728_vm8, %v6661_v1, %v6572_v5  ;;  %v10144_v31 = vld [vmem:[%s14473_s4 + $0x34] sm:$0xff]   ;;  %v10149_v1 = vld [vmem:[%s14473_s4 + $0x20] ss:$0 sps:$4 sm:$0xff]  }
 0x8a0   : > { %9717 = vmatpush3.bf16.msra.mxu1 %v12139_v53  ;;  %9751 = vmatpush3.bf16.msra.mxu0 %v10131_v32  ;;  %v14834_v5 = vld [vmem:[#allocation27_spill] sm:$0xff] }
 0x8a1   : > { %v6560_v26 = vpop.permute.xlu1 %6559  ;;  %9752 = vmatprep.subr.bf16.mxu0 %v10135_v12  ;;  %9732 = vmatprep.mubr.msk.bf16.mxu0 %vm14818_vm5, %v10051_v35  ;;  %vm14822_vm5 = vmmov %vm14819_vm9  ;;  %v13640_v35 = vld [vmem:[#allocation2 + $0x28] sm:$0xff] }
 0x8a2   : > { %v6592_v37 = vpop.permute.xlu0 %6591  ;;  %9736 = vmatprep.subr.bf16.mxu1 %v10136_v10  ;;  %7112 = vrot.lane.b32.xlu0 %v13640_v35, %s10181_s26  ;;  %v7115_v21 = vshll.u32 %v13640_v35, 16  ;;  %v7119_v17 = vshrl.u32 %v13640_v35, 16  ;;  %v13654_v54 = vrot.slane %v13640_v35, 1 }
 0x8a3   : > { %9719 = vmatmul.mubr.msk.bf16.vlgmr.msra.gmra.mrb[104].mxu1 %vm2025_vm14, %v13461_v61  ;;  %v6681_v24 = vsel %vm14819_vm9, %v6671_v42, %v6592_v37  ;;  %v6659_v61 = vsel %vm14820_vm7, %v6649_v47, %v6560_v26  ;;  %vm14823_vm9 = vmmov %vm14821_vm12  ;;  %v6052_v26 = vld [vmem:[#allocation4 + $0x10] sm:$0xff] }
 0x8a4   : > { %9722 = vmatprep.mubr.msk.bf16.mxu1 %vm2025_vm14, %v13504_v19  ;;  %9753 = vmatpush3.bf16.msra.mxu0 %v10135_v12  ;;  %v6721_v19 = vor.u32 %v6720_v48, %v6717_v55  ;;  %vm14825_vm7 = vmmov %vm14823_vm9  ;;  %v13645_v52 = vrot.slane %v7115_v21, 1  ;;  %v6050_v12 = vld [vmem:[#allocation4] sm:$0xff] }
 0x8a5   : > { %v6570_v32 = vpop.permute.xlu1 %6569  ;;  %9737 = vmatpush3.bf16.msra.mxu1 %v10136_v10  ;;  %9913 = vmatprep.subr.msk.bf16.mxu0 %vm829_vm2, %v10137_v15  ;;  %v6053_v10 = vld [vmem:[#allocation4 + $0x18] sm:$0xff] }
 0x8a6   : > { %v6609_v30 = vpop.permute.xlu0 %6608  ;;  %9738 = vmatprep.subr.bf16.mxu1 %v10138_v50  ;;  %v6669_v4 = vsel %vm728_vm8, %v6659_v61, %v6570_v32  ;;  %v6722_v38 = vsel %vm761_vm11, %v6713_v3, %v6721_v19  ;;  %v13649_v62 = vor.u32 %v7119_v17, %v13645_v52 }
 0x8a7   : > { %v6691_v45 = vsel %vm750_vm10, %v6681_v24, %v6609_v30  ;;  %9733 = vmatmul.mubr.msk.bf16.gmra.mrb[108].mxu0 %vm14814_vm3, %v10052_v14  ;;  %vm14826_vm3 = vmmov %vm14825_vm7  ;;  %v6051_v24 = vld [vmem:[#allocation4 + $0x8] sm:$0xff]  ;;  %v6056_v30 = vld [vmem:[#allocation4 + $0x30] sm:$0xff] }
 0x8a8   : > { %9756 = vmatprep.mubr.msk.bf16.mxu0 %vm14821_vm12, %v6714_v46  ;;  %9755 = vmatpush3.bf16.msra.mxu0 %v14752_v23  ;;  %v6731_v8 = vshrl.u32 %v6691_v45, 16  ;;  %v6734_v11 = vshll.u32 %v6691_v45, 16  ;;  %vm14827_vm12 = vmmov %vm14826_vm3 }
 0x8a9   : > { %v6590_v57 = vpop.permute.xlu1 %6589  ;;  %9739 = vmatpush3.bf16.msra.mxu1 %v10138_v50  ;;  %9782 = vmatprep.subr.bf16.mxu0 %v10139_v7  ;;  %v6054_v50 = vld [vmem:[#allocation4 + $0x20] sm:$0xff] }
 0x8aa   : > { %9912 = vmatprep.subr.msk.bf16.mxu1 %vm829_vm2, %v10140_v29  ;;  %v6679_v23 = vsel %vm14822_vm5, %v6669_v4, %v6590_v57  ;;  %v6733_v27 = vrot.slane %v6731_v8, 3  ;;  %v6736_v28 = vrot.slane %v6734_v11, 4  ;;  %vm14828_vm5 = vmmov %vm14826_vm3  ;;  %7130 = vrot.lane.b32.xlu0 %v13649_v62, %s10182_s27  ;;  %v6057_v8 = vld [vmem:[#allocation4 + $0x38] sm:$0xff] }
 0x8ab   : > { %9723 = vmatmul.mubr.msk.bf16.gmra.mrb[108].mxu1 %vm2025_vm14, %v13507_v20 }
 0x8ac   : > { %9742 = vmatprep.mubr.msk.bf16.mxu1 %vm14823_vm9, %v6714_v46  ;;  %v6737_v20 = vor.u32 %v6736_v28, %v6733_v27  ;;  %vm14829_vm9 = vmmov %vm14826_vm3 }
 0x8ad   : > { %v6607_v6 = vpop.permute.xlu1 %6606  ;;  %9741 = vmatpush3.bf16.msra.mxu1 %v14824_v18  ;;  %v6141_v18 = vld [vmem:[#allocation4 + $0x90] sm:$0xff] }
 0x8ae   : > { %v6689_v36 = vsel %vm750_vm10, %v6679_v23, %v6607_v6  ;;  %9764 = vmatprep.subr.bf16.mxu1 %v10141_v43  ;;  %7142 = vrot.lane.b32.xlu0 %v13654_v54, %s10183_s13 }
 0x8af   : > { %v6723_v0 = vshrl.u32 %v6689_v36, 16  ;;  %v6726_v63 = vshll.u32 %v6689_v36, 16  ;;  %9757 = vmatmul.mubr.msk.bf16.vlgmr.msra.gmra.mrb[112].mxu0 %vm14825_vm7, %v6722_v38  ;;  %vm14830_vm7 = vmmov %vm14826_vm3 }
 0x8b0   : > { %9783 = vmatpush3.bf16.msra.mxu0 %v10139_v7 }
 0x8b1   : > { %v6725_v49 = vrot.slane %v6723_v0, 3  ;;  %v6728_v33 = vrot.slane %v6726_v63, 4  ;;  %9784 = vmatprep.subr.bf16.mxu0 %v10142_v34 }
 0x8b2   : > { %7867 = vrot.lane.b32.xlu0 %v13640_v35, %s10181_s26 }
 0x8b3   : > { %v6729_v58 = vor.u32 %v6728_v33, %v6725_v49  ;;  %9743 = vmatmul.mubr.msk.bf16.vlgmr.msra.gmra.mrb[112].mxu1 %vm14826_vm3, %v6722_v38  ;;  %vm14831_vm3 = vcmask 1043456   ;;  %v6139_v38 = vld [vmem:[#allocation4 + $0x80] sm:$0xff]  ;;  %v6142_v49 = vld [vmem:[#allocation4 + $0x98] sm:$0xff] }
 0x8b4   : > { %9765 = vmatpush3.bf16.msra.mxu1 %v10141_v43  ;;  %9785 = vmatpush3.bf16.msra.mxu0 %v10142_v34 }
 0x8b5   : > { %v6730_v41 = vsel %vm761_vm11, %v6721_v19, %v6729_v58  ;;  %v6738_v2 = vsel %vm761_vm11, %v6729_v58, %v6737_v20  ;;  %9766 = vmatprep.subr.bf16.mxu1 %v10143_v60  ;;  %9786 = vmatprep.subr.bf16.mxu0 %v10144_v31  ;;  %v6055_v19 = vld [vmem:[#allocation4 + $0x28] sm:$0xff] }
 0x8b6   : > { %9746 = vmatprep.mubr.msk.bf16.mxu1 %vm14827_vm12, %v6730_v41  ;;  %9760 = vmatprep.mubr.msk.bf16.mxu0 %vm14828_vm5, %v6730_v41  ;;  %vm14833_vm12 = vmmov %vm14831_vm3  ;;  %v6140_v58 = vld [vmem:[#allocation4 + $0x88] sm:$0xff]  ;;  %vm14843_vm5 = vcmask 1046528  }
 0x8b7   : > { %9761 = vmatmul.mubr.msk.bf16.gmra.mrb[116].mxu0 %vm14829_vm9, %v6738_v2  ;;  %vm14844_vm9 = vmmov %vm14843_vm5 }
 0x8b8   : > { %9767 = vmatpush3.bf16.msra.mxu1 %v10143_v60  ;;  %9787 = vmatpush3.bf16.msra.mxu0 %v10144_v31 }
 0x8b9   : > { %9768 = vmatprep.subr.bf16.mxu1 %v10145_v22  ;;  %9788 = vmatprep.subr.bf16.mxu0 %v10146_v9 }
 0x8bb   : > { %9747 = vmatmul.mubr.msk.bf16.gmra.mrb[116].mxu1 %vm14830_vm7, %v6738_v2  ;;  %vm14845_vm7 = vmmov %vm14831_vm3 }
 0x8bc   : > { %9769 = vmatpush3.bf16.msra.mxu1 %v10145_v22  ;;  %9789 = vmatpush3.bf16.msra.mxu0 %v10146_v9 }
 0x8bd   : > { %9770 = vmatprep.subr.bf16.mxu1 %v10147_v16  ;;  %9915 = vmatprep.subr.msk.bf16.mxu0 %vm14831_vm3, %v10148_v13 }
 0x8c0   : > { %9771 = vmatpush3.bf16.msra.mxu1 %v10147_v16  ;;  %9791 = vmatpush3.bf16.msra.mxu0 %v14832_v40  ;;  %v6145_v16 = vld [vmem:[#allocation4 + $0xb0] sm:$0xff] }
 0x8c1   : > { %9914 = vmatprep.subr.msk.bf16.mxu1 %vm14833_vm12, %v10149_v1  ;;  %vm14846_vm12 = vcmask 1042432  }
 0x8c4   : > { %9773 = vmatpush3.bf16.msra.mxu1 %v14834_v5  ;;  %v6143_v5 = vld [vmem:[#allocation4 + $0xa0] sm:$0xff] }
 0x8c5   : > { %9800 = vmatprep.subr.bf16.mxu1 %v13475_v51 }
 0x962   : > { %v9684_v51 = vpop.f32.mrb[96].mxu1  ;;  %v9702_v42 = vpop.f32.mrb[96].mxu0 }
 0x963   : > { %6044 = vst.msk [vmem:[#allocation4 + $0x50] sm:$0xff] %vm342_vm4, %v9684_v51  ;;  %v6125_v25 = vadd.f32 %v9702_v42, %v6052_v26  ;;  %v6011_v56 = vpop.f32.mrb[97].mxu1  ;;  %v6092_v37 = vpop.f32.mrb[97].mxu0  ;;  %v6146_v51 = vld [vmem:[#allocation4 + $0xb8] sm:$0xff] }
 0x964   : > { %6042 = vst.msk [vmem:[#allocation4 + $0x40] sm:$0xff] %vm342_vm4, %v6011_v56  ;;  %v6123_v44 = vadd.f32 %v6092_v37, %v6050_v12  ;;  %v9685_v39 = vpop.f32.mrb[98].mxu1  ;;  %v9703_v3 = vpop.f32.mrb[98].mxu0  ;;  %v6144_v56 = vld [vmem:[#allocation4 + $0xa8] sm:$0xff]  ;;  %v13694_v37 = vld [vmem:[%s14474_s5] ss:$0 sm:$0xff] }
 0x965   : > { %6133 = vst.msk [vmem:[#allocation4 + $0x10] sm:$0xff] %vm342_vm4, %v6125_v25  ;;  %6045 = vst.msk [vmem:[#allocation4 + $0x58] sm:$0xff] %vm342_vm4, %v9685_v39  ;;  %v6126_v47 = vadd.f32 %v9703_v3, %v6053_v10  ;;  %v6014_v14 = vpop.f32.mrb[99].mxu1  ;;  %v6095_v32 = vpop.f32.mrb[99].mxu0  ;;  %v6834_v3 = vld [vmem:[#allocation3 + $0x50] sm:$0xff] }
 0x966   : > { %6131 = vst.msk [vmem:[#allocation4] sm:$0xff] %vm342_vm4, %v6123_v44  ;;  %6043 = vst.msk [vmem:[#allocation4 + $0x48] sm:$0xff] %vm342_vm4, %v6014_v14  ;;  %v6124_v59 = vadd.f32 %v6095_v32, %v6051_v24 }
 0x967   : > { %6134 = vst.msk [vmem:[#allocation4 + $0x18] sm:$0xff] %vm342_vm4, %v6126_v47 }
 0x968   : > { %6132 = vst.msk [vmem:[#allocation4 + $0x8] sm:$0xff] %vm342_vm4, %v6124_v59  ;;  %v6832_v59 = vld [vmem:[#allocation3 + $0x40] sm:$0xff] }
 0x96a   : > { %v9688_v15 = vpop.f32.mrb[100].mxu1  ;;  %v9706_v55 = vpop.f32.mrb[100].mxu0 }
 0x96b   : > { %6048 = vst.msk [vmem:[#allocation4 + $0x70] sm:$0xff] %vm342_vm4, %v9688_v15  ;;  %v6129_v48 = vadd.f32 %v9706_v55, %v6056_v30  ;;  %v6027_v61 = vpop.f32.mrb[101].mxu1  ;;  %v6108_v45 = vpop.f32.mrb[101].mxu0 }
 0x96c   : > { %6046 = vst.msk [vmem:[#allocation4 + $0x60] sm:$0xff] %vm342_vm4, %v6027_v61  ;;  %v6127_v46 = vadd.f32 %v6108_v45, %v6054_v50  ;;  %v9689_v57 = vpop.f32.mrb[102].mxu1  ;;  %v9707_v11 = vpop.f32.mrb[102].mxu0  ;;  %v6835_v50 = vld [vmem:[#allocation3 + $0x58] sm:$0xff] }
 0x96d   : > { %6137 = vst.msk [vmem:[#allocation4 + $0x30] sm:$0xff] %vm342_vm4, %v6129_v48  ;;  %6049 = vst.msk [vmem:[#allocation4 + $0x78] sm:$0xff] %vm342_vm4, %v9689_v57  ;;  %v6130_v4 = vadd.f32 %v9707_v11, %v6057_v8  ;;  %v6030_v7 = vpop.f32.mrb[103].mxu1  ;;  %v6111_v29 = vpop.f32.mrb[103].mxu0  ;;  %v6833_v11 = vld [vmem:[#allocation3 + $0x48] sm:$0xff] }
 0x96e   : > { %6135 = vst.msk [vmem:[#allocation4 + $0x20] sm:$0xff] %vm342_vm4, %v6127_v46  ;;  %6047 = vst.msk [vmem:[#allocation4 + $0x68] sm:$0xff] %vm342_vm4, %v6030_v7  ;;  %v6128_v23 = vadd.f32 %v6111_v29, %v6055_v19  ;;  %v6694_v29 = vld [vmem:[#allocation3 + $0x90] sm:$0xff] }
 0x96f   : > { %6138 = vst.msk [vmem:[#allocation4 + $0x38] sm:$0xff] %vm342_vm4, %v6130_v4 }
 0x970   : > { %6136 = vst.msk [vmem:[#allocation4 + $0x28] sm:$0xff] %vm342_vm4, %v6128_v23 }
 0x972   : > { %v9730_v27 = vpop.f32.mrb[104].mxu0 }
 0x973   : > { %v6322_v28 = vpop.f32.mrb[105].mxu0 }
 0x974   : > { %v9731_v6 = vpop.f32.mrb[106].mxu0 }
 0x975   : > { %v13676_v36 = vpop.f32.mrb[107].mxu0 }
 0x976   : > { %v9720_v0 = vpop.f32.mrb[104].mxu1 }
 0x977   : > { %v6214_v63 = vadd.f32 %v9720_v0, %v6141_v18  ;;  %v6181_v43 = vpop.f32.mrb[105].mxu1 }
 0x978   : > { %v6212_v20 = vadd.f32 %v6181_v43, %v6139_v38  ;;  %v9721_v33 = vpop.f32.mrb[106].mxu1 }
 0x979   : > { %6222 = vst.msk [vmem:[#allocation4 + $0x90] sm:$0xff] %vm342_vm4, %v6214_v63  ;;  %v6215_v34 = vadd.f32 %v9721_v33, %v6142_v49  ;;  %v6184_v41 = vpop.f32.mrb[107].mxu1  ;;  %v6692_v63 = vld [vmem:[#allocation3 + $0x80] sm:$0xff] }
 0x97a   : > { %6220 = vst.msk [vmem:[#allocation4 + $0x80] sm:$0xff] %vm342_vm4, %v6212_v20  ;;  %v6213_v2 = vadd.f32 %v6184_v41, %v6140_v58  ;;  %v13680_v60 = vpop.f32.mrb[108].mxu0  ;;  %v6695_v20 = vld [vmem:[#allocation3 + $0x98] sm:$0xff]  ;;  %v6693_v58 = vld [vmem:[#allocation3 + $0x88] sm:$0xff] }
 0x97b   : > { %6223 = vst.msk [vmem:[#allocation4 + $0x98] sm:$0xff] %vm342_vm4, %v6215_v34  ;;  %v13683_v31 = vpop.f32.mrb[109].mxu0 }
 0x97c   : > { %6221 = vst.msk [vmem:[#allocation4 + $0x88] sm:$0xff] %vm342_vm4, %v6213_v2  ;;  %v13686_v22 = vpop.f32.mrb[110].mxu0 }
 0x97d   : > { %v13688_v9 = vpop.f32.mrb[111].mxu0 }
 0x97e   : > { %v9724_v13 = vpop.f32.mrb[108].mxu1 }
 0x97f   : > { %v6218_v1 = vadd.f32 %v9724_v13, %v6145_v16  ;;  %v6197_v21 = vpop.f32.mrb[109].mxu1 }
 0x980   : > { %v6216_v17 = vadd.f32 %v6197_v21, %v6143_v5  ;;  %v9725_v26 = vpop.f32.mrb[110].mxu1  ;;  %v6230_v42 = vld [vmem:[#allocation4 + $0x90] sm:$0xff] }
 0x981   : > { %6226 = vst.msk [vmem:[#allocation4 + $0xb0] sm:$0xff] %vm342_vm4, %v6218_v1  ;;  %v6219_v25 = vadd.f32 %v9725_v26, %v6146_v51  ;;  %v6200_v12 = vpop.f32.mrb[111].mxu1  ;;  %v6238_v44 = vadd.f32 %v13694_v37, %v6230_v42  ;;  %v6228_v39 = vld [vmem:[#allocation4 + $0x80] sm:$0xff]  ;;  %v6838_v1 = vld [vmem:[#allocation3 + $0x70] sm:$0xff] }
 0x982   : > { %6224 = vst.msk [vmem:[#allocation4 + $0xa0] sm:$0xff] %vm342_vm4, %v6216_v17  ;;  %v6217_v10 = vadd.f32 %v6200_v12, %v6144_v56  ;;  %v9758_v47 = vpop.f32.mrb[112].mxu0  ;;  %v6236_v14 = vadd.f32 %v13694_v37, %v6228_v39  ;;  %v6231_v24 = vld [vmem:[#allocation4 + $0x98] sm:$0xff]  ;;  %v6836_v26 = vld [vmem:[#allocation3 + $0x60] sm:$0xff] }
 0x983   : > { %6227 = vst.msk [vmem:[#allocation4 + $0xb8] sm:$0xff] %vm342_vm4, %v6219_v25  ;;  %v6907_v32 = vadd.f32 %v9758_v47, %v6834_v3  ;;  %v6874_v15 = vpop.f32.mrb[113].mxu0  ;;  %v6355_v30 = vadd.f32 %v9730_v27, %v6238_v44  ;;  %v6239_v55 = vadd.f32 %v13694_v37, %v6231_v24  ;;  %v6229_v48 = vld [vmem:[#allocation4 + $0x88] sm:$0xff]  ;;  %v13729_v24 = vld [vmem:[%s14472_s3] ss:$0 sm:$0xff] }
 0x984   : > { %6225 = vst.msk [vmem:[#allocation4 + $0xa8] sm:$0xff] %vm342_vm4, %v6217_v10  ;;  %v6905_v61 = vadd.f32 %v6874_v15, %v6832_v59  ;;  %v9759_v45 = vpop.f32.mrb[114].mxu0  ;;  %v6353_v46 = vadd.f32 %v6322_v28, %v6236_v14  ;;  %v6237_v57 = vadd.f32 %v13694_v37, %v6229_v48  ;;  %v6839_v10 = vld [vmem:[#allocation3 + $0x78] sm:$0xff]  ;;  %v6837_v15 = vld [vmem:[#allocation3 + $0x68] sm:$0xff] }
 0x985   : > { %6915 = vst.msk [vmem:[#allocation3 + $0x50] sm:$0xff] %vm342_vm4, %v6907_v32  ;;  %v6908_v8 = vadd.f32 %v9759_v45, %v6835_v50  ;;  %v6877_v4 = vpop.f32.mrb[115].mxu0  ;;  %v6363_v7 = vmax.f32 %v6355_v30, 0.0  ;;  %v6356_v19 = vadd.f32 %v9731_v6, %v6239_v55 }
 0x986   : > { %6913 = vst.msk [vmem:[#allocation3 + $0x40] sm:$0xff] %vm342_vm4, %v6905_v61  ;;  %v9744_v23 = vpop.f32.mrb[112].mxu1  ;;  %v6906_v27 = vadd.f32 %v6877_v4, %v6833_v11  ;;  %v6361_v18 = vmax.f32 %v6353_v46, 0.0  ;;  %v6354_v0 = vadd.f32 %v13676_v36, %v6237_v57  ;;  %v6698_v61 = vld [vmem:[#allocation3 + $0xb0] sm:$0xff] }
 0x987   : > { %6916 = vst.msk [vmem:[#allocation3 + $0x58] sm:$0xff] %vm342_vm4, %v6908_v8  ;;  %v6818_v28 = vadd.f32 %v9744_v23, %v6694_v29  ;;  %v6785_v38 = vpop.f32.mrb[113].mxu1  ;;  %8892 = vst.msk [vmem:[%s12396_s14 + $0x90] sm:$0xff] %vm342_vm4, %v6363_v7  ;;  %v6364_v43 = vmax.f32 %v6356_v19, 0.0  ;;  %v6696_v7 = vld [vmem:[#allocation3 + $0xa0] sm:$0xff] }
 0x988   : > { %6914 = vst.msk [vmem:[#allocation3 + $0x48] sm:$0xff] %vm342_vm4, %v6906_v27  ;;  %v6816_v6 = vadd.f32 %v6785_v38, %v6692_v63  ;;  %v9745_v49 = vpop.f32.mrb[114].mxu1  ;;  %8890 = vst.msk [vmem:[%s12396_s14 + $0x80] sm:$0xff] %vm342_vm4, %v6361_v18  ;;  %v6362_v33 = vmax.f32 %v6354_v0, 0.0  ;;  %v6234_v34 = vld [vmem:[#allocation4 + $0xb0] sm:$0xff]  ;;  %v6699_v0 = vld [vmem:[#allocation3 + $0xb8] sm:$0xff] }
 0x989   : > { %6826 = vst.msk [vmem:[#allocation3 + $0x90] sm:$0xff] %vm342_vm4, %v6818_v28  ;;  %v6819_v36 = vadd.f32 %v9745_v49, %v6695_v20  ;;  %v6788_v41 = vpop.f32.mrb[115].mxu1  ;;  %8893 = vst.msk [vmem:[%s12396_s14 + $0x98] sm:$0xff] %vm342_vm4, %v6364_v43  ;;  %v6242_v2 = vadd.f32 %v13694_v37, %v6234_v34  ;;  %v6232_v16 = vld [vmem:[#allocation4 + $0xa0] sm:$0xff]  ;;  %v6697_v49 = vld [vmem:[#allocation3 + $0xa8] sm:$0xff] }
 0x98a   : > { %6824 = vst.msk [vmem:[#allocation3 + $0x80] sm:$0xff] %vm342_vm4, %v6816_v6  ;;  %v6817_v13 = vadd.f32 %v6788_v41, %v6693_v58  ;;  %v9762_v5 = vpop.f32.mrb[116].mxu0  ;;  %8891 = vst.msk [vmem:[%s12396_s14 + $0x88] sm:$0xff] %vm342_vm4, %v6362_v33  ;;  %v6240_v21 = vadd.f32 %v13694_v37, %v6232_v16  ;;  %v6235_v17 = vld [vmem:[#allocation4 + $0xb8] sm:$0xff] }
 0x98b   : > { %6827 = vst.msk [vmem:[#allocation3 + $0x98] sm:$0xff] %vm342_vm4, %v6819_v36  ;;  %v6911_v51 = vadd.f32 %v9762_v5, %v6838_v1  ;;  %v6890_v42 = vpop.f32.mrb[117].mxu0  ;;  %v6359_v25 = vadd.f32 %v13680_v60, %v6242_v2  ;;  %v6243_v56 = vadd.f32 %v13694_v37, %v6235_v17  ;;  %v6233_v12 = vld [vmem:[#allocation4 + $0xa8] sm:$0xff]  ;;  %v14835_v2 = vld [vmem:[#allocation11_spill] sm:$0xff] }
 0x98c   : > { %v6923_v44 = vld [vmem:[#allocation3 + $0x50] sm:$0xff]  ;;  %6825 = vst.msk [vmem:[#allocation3 + $0x88] sm:$0xff] %vm342_vm4, %v6817_v13  ;;  %v6909_v39 = vadd.f32 %v6890_v42, %v6836_v26  ;;  %v9763_v3 = vpop.f32.mrb[118].mxu0  ;;  %v6357_v47 = vadd.f32 %v13683_v31, %v6240_v21  ;;  %v6241_v14 = vadd.f32 %v13694_v37, %v6233_v12  ;;  %v14836_v13 = vld [vmem:[#allocation12_spill] sm:$0xff]  ;;  %v14837_v17 = vld [vmem:[#allocation10_spill] sm:$0xff] }
 0x98d   : > { %v6931_v60 = vadd.f32 %v13729_v24, %v6923_v44  ;;  %v6921_v32 = vld [vmem:[#allocation3 + $0x40] sm:$0xff]  ;;  %6919 = vst.msk [vmem:[#allocation3 + $0x70] sm:$0xff] %vm342_vm4, %v6911_v51  ;;  %v6912_v59 = vadd.f32 %v9763_v3, %v6839_v10  ;;  %v6893_v30 = vpop.f32.mrb[119].mxu0  ;;  %v6367_v55 = vmax.f32 %v6359_v25, 0.0  ;;  %v6360_v48 = vadd.f32 %v13686_v22, %v6243_v56 }
 0x98e   : > { %v6929_v31 = vadd.f32 %v13729_v24, %v6921_v32  ;;  %v6924_v37 = vld [vmem:[#allocation3 + $0x58] sm:$0xff]  ;;  %6917 = vst.msk [vmem:[#allocation3 + $0x60] sm:$0xff] %vm342_vm4, %v6909_v39  ;;  %v9748_v50 = vpop.f32.mrb[116].mxu1  ;;  %v6910_v45 = vadd.f32 %v6893_v30, %v6837_v15  ;;  %v6365_v46 = vmax.f32 %v6357_v47, 0.0  ;;  %v6358_v57 = vadd.f32 %v13688_v9, %v6241_v14  ;;  %v14838_v26 = vld [vmem:[#allocation9_spill] sm:$0xff] }
 0x98f   : > { %v6939_v8 = vmax.f32 %v6931_v60, 0.0  ;;  %v6932_v11 = vadd.f32 %v13729_v24, %v6924_v37  ;;  %v6922_v4 = vld [vmem:[#allocation3 + $0x48] sm:$0xff]  ;;  %6920 = vst.msk [vmem:[#allocation3 + $0x78] sm:$0xff] %vm342_vm4, %v6912_v59  ;;  %v6822_v22 = vadd.f32 %v9748_v50, %v6698_v61  ;;  %v6801_v19 = vpop.f32.mrb[117].mxu1  ;;  %8896 = vst.msk [vmem:[%s12396_s14 + $0xb0] sm:$0xff] %vm342_vm4, %v6367_v55  ;;  %v6368_v29 = vmax.f32 %v6360_v48, 0.0 }
 0x990   : > { %v6937_v23 = vmax.f32 %v6929_v31, 0.0  ;;  %v7678_v27 = vld [vmem:[#allocation3 + $0x90] sm:$0xff]  ;;  %v6930_v18 = vadd.f32 %v13729_v24, %v6922_v4  ;;  %6918 = vst.msk [vmem:[#allocation3 + $0x68] sm:$0xff] %vm342_vm4, %v6910_v45  ;;  %v6820_v9 = vadd.f32 %v6801_v19, %v6696_v7  ;;  %v9749_v28 = vpop.f32.mrb[118].mxu1  ;;  %8894 = vst.msk [vmem:[%s12396_s14 + $0xa0] sm:$0xff] %vm342_vm4, %v6365_v46  ;;  %v6366_v63 = vmax.f32 %v6358_v57, 0.0 }
 0x991   : > { %v6940_v38 = vmax.f32 %v6932_v11, 0.0  ;;  %v7686_v43 = vadd.f32 %v13729_v24, %v7678_v27  ;;  %v7676_v6 = vld [vmem:[#allocation3 + $0x80] sm:$0xff]  ;;  %6830 = vst.msk [vmem:[#allocation3 + $0xb0] sm:$0xff] %vm342_vm4, %v6822_v22  ;;  %v6823_v20 = vadd.f32 %v9749_v28, %v6699_v0  ;;  %v6804_v33 = vpop.f32.mrb[119].mxu1  ;;  %8897 = vst.msk [vmem:[%s12396_s14 + $0xb8] sm:$0xff] %vm342_vm4, %v6368_v29  ;;  %v6947_v16 = vmul.f32 %v6939_v8, %v14835_v2  ;;  %v14839_v22 = vld [vmem:[#allocation15_spill] sm:$0xff] }
 0x992   : > { %v6938_v34 = vmax.f32 %v6930_v18, 0.0  ;;  %v7684_v36 = vadd.f32 %v13729_v24, %v7676_v6  ;;  %v7679_v58 = vld [vmem:[#allocation3 + $0x98] sm:$0xff]  ;;  %6828 = vst.msk [vmem:[#allocation3 + $0xa0] sm:$0xff] %vm342_vm4, %v6820_v9  ;;  %v6821_v41 = vadd.f32 %v6804_v33, %v6697_v49  ;;  %8895 = vst.msk [vmem:[%s12396_s14 + $0xa8] sm:$0xff] %vm342_vm4, %v6366_v63  ;;  %v6945_v51 = vmul.f32 %v6937_v23, %v14837_v17  ;;  %v14841_v9 = vld [vmem:[#allocation13_spill] sm:$0xff] }
 0x993   : > { %v6948_v1 = vmul.f32 %v6940_v38, %v14836_v13  ;;  %v7687_v5 = vadd.f32 %v13729_v24, %v7679_v58  ;;  %v7677_v21 = vld [vmem:[#allocation3 + $0x88] sm:$0xff]  ;;  %6831 = vst.msk [vmem:[#allocation3 + $0xb8] sm:$0xff] %vm342_vm4, %v6823_v20  ;;  %v7694_v44 = vmax.f32 %v7686_v43, 0.0  ;;  %v14840_v19 = vld [vmem:[#allocation16_spill] sm:$0xff]  ;;  %v13779_v33 = vld [vmem:[#allocation2] sm:$0xff] }
 0x994   : > { %v6946_v42 = vmul.f32 %v6938_v34, %v14838_v26  ;;  %v7685_v25 = vadd.f32 %v13729_v24, %v7677_v21  ;;  %v6927_v56 = vld [vmem:[#allocation3 + $0x70] sm:$0xff]  ;;  %6829 = vst.msk [vmem:[#allocation3 + $0xa8] sm:$0xff] %vm342_vm4, %v6821_v41  ;;  %v7692_v14 = vmax.f32 %v7684_v36, 0.0  ;;  %v14842_v28 = vld [vmem:[#allocation14_spill] sm:$0xff] }
 0x995   : > { %v6954_v12 = vpack.c.bf16 %v6948_v1, %v6947_v16  ;;  %v7695_v39 = vmax.f32 %v7687_v5, 0.0  ;;  %v6935_v10 = vadd.f32 %v13729_v24, %v6927_v56  ;;  %v6925_v3 = vld [vmem:[#allocation3 + $0x60] sm:$0xff]  ;;  %v7702_v46 = vmul.f32 %v7694_v44, %v14835_v2 }
 0x996   : > { %v6953_v47 = vpack.c.bf16 %v6946_v42, %v6945_v51  ;;  %v7693_v60 = vmax.f32 %v7685_v25, 0.0  ;;  %v6933_v32 = vadd.f32 %v13729_v24, %v6925_v3  ;;  %v6928_v59 = vld [vmem:[#allocation3 + $0x78] sm:$0xff]  ;;  %v7700_v57 = vmul.f32 %v7692_v14, %v14837_v17 }
 0x997   : > { %6958 = vst.msk [vmem:[#allocation2 + $0x10] sm:$0xff] %vm342_vm4, %v6954_v12  ;;  %v6943_v15 = vmax.f32 %v6935_v10, 0.0  ;;  %v6936_v30 = vadd.f32 %v13729_v24, %v6928_v59  ;;  %v6926_v55 = vld [vmem:[#allocation3 + $0x68] sm:$0xff]  ;;  %v7703_v61 = vmul.f32 %v7695_v39, %v14836_v13  ;;  %v7021_v2 = vrot.slane %v13779_v33, 1 }
 0x998   : > { %6957 = vst.msk [vmem:[#allocation2 + $0x8] sm:$0xff] %vm342_vm4, %v6953_v47  ;;  %v6941_v48 = vmax.f32 %v6933_v32, 0.0  ;;  %v7682_v31 = vld [vmem:[#allocation3 + $0xb0] sm:$0xff]  ;;  %v6934_v37 = vadd.f32 %v13729_v24, %v6926_v55  ;;  %v7701_v8 = vmul.f32 %v7693_v60, %v14838_v26  ;;  %v6970_v17 = vshll.u32 %v13779_v33, 16 }
 0x999   : > { %v6944_v50 = vmax.f32 %v6936_v30, 0.0  ;;  %v7680_v45 = vld [vmem:[#allocation3 + $0xa0] sm:$0xff]  ;;  %v6951_v7 = vmul.f32 %v6943_v15, %v14839_v22  ;;  %v7690_v23 = vadd.f32 %v13729_v24, %v7682_v31  ;;  %v7709_v49 = vpack.c.bf16 %v7703_v61, %v7702_v46 }
 0x99a   : > { %v6942_v11 = vmax.f32 %v6934_v37, 0.0  ;;  %v7683_v4 = vld [vmem:[#allocation3 + $0xb8] sm:$0xff]  ;;  %v6949_v0 = vmul.f32 %v6941_v48, %v14841_v9  ;;  %v7688_v38 = vadd.f32 %v13729_v24, %v7680_v45  ;;  %v7708_v41 = vpack.c.bf16 %v7701_v8, %v7700_v57 }
 0x99b   : > { %v6952_v29 = vmul.f32 %v6944_v50, %v14840_v19  ;;  %v7691_v27 = vadd.f32 %v13729_v24, %v7683_v4  ;;  %v7681_v18 = vld [vmem:[#allocation3 + $0xa8] sm:$0xff]  ;;  %v7698_v16 = vmax.f32 %v7690_v23, 0.0  ;;  %v7040_v39 = vrot.slane %v13779_v33, 4 }
 0x99c   : > { %v6950_v63 = vmul.f32 %v6942_v11, %v14842_v28  ;;  %v7689_v43 = vadd.f32 %v13729_v24, %v7681_v18  ;;  %v7696_v13 = vmax.f32 %v7688_v38, 0.0  ;;  %v6968_v10 = vshrl.u32 %v13779_v33, 16 }
 0x99d   : > { %v6956_v6 = vpack.c.bf16 %v6952_v29, %v6951_v7  ;;  %v7699_v20 = vmax.f32 %v7691_v27, 0.0  ;;  %v7706_v25 = vmul.f32 %v7698_v16, %v14839_v22  ;;  %v6972_v3 = vrot.slane %v6970_v17, 1 }
 0x99e   : > { %v6955_v34 = vpack.c.bf16 %v6950_v63, %v6949_v0  ;;  %v7697_v36 = vmax.f32 %v7689_v43, 0.0  ;;  %v13781_v58 = vld [vmem:[#allocation2 + $0x10] sm:$0xff]  ;;  %v7704_v44 = vmul.f32 %v7696_v13, %v14841_v9 }
 0x99f   : > { %6960 = vst.msk [vmem:[#allocation2 + $0x20] sm:$0xff] %vm342_vm4, %v6956_v6  ;;  %7106 = vrot.lane.b32.xlu1 %v13781_v58, %s10181_s26  ;;  %7713 = vst.msk [vmem:[#allocation2 + $0x10] sm:$0xff] %vm342_vm4, %v7709_v49  ;;  %v13788_v24 = vld [vmem:[#allocation2 + $0x8] sm:$0xff]  ;;  %v7707_v21 = vmul.f32 %v7699_v20, %v14840_v19  ;;  %v7024_v42 = vrot.slane %v13781_v58, 1  ;;  %v7043_v12 = vrot.slane %v13781_v58, 4  ;;  %v6983_v59 = vshll.u32 %v13781_v58, 16 }
 0x9a0   : > { %6959 = vst.msk [vmem:[#allocation2 + $0x18] sm:$0xff] %vm342_vm4, %v6955_v34  ;;  %7104 = vrot.lane.b32.xlu0 %v13788_v24, %s10181_s26  ;;  %7712 = vst.msk [vmem:[#allocation2 + $0x8] sm:$0xff] %vm342_vm4, %v7708_v41  ;;  %v7085_v1 = vrot.slane %v13788_v24, 5  ;;  %v7022_v5 = vrot.slane %v13788_v24, 1  ;;  %v7705_v51 = vmul.f32 %v7697_v36, %v14842_v28  ;;  %v7041_v56 = vrot.slane %v13788_v24, 4 }
 0x9a1   : > { %v6975_v47 = vshll.u32 %v13788_v24, 16  ;;  %v6979_v14 = vshrl.u32 %v13788_v24, 16  ;;  %v7711_v60 = vpack.c.bf16 %v7707_v21, %v7706_v25  ;;  %v6987_v15 = vshrl.u32 %v13781_v58, 16 }
 0x9a2   : > { %v7023_v26 = vsel %vm14843_vm5, %v7021_v2, %v7022_v5  ;;  %v7025_v32 = vsel %vm14844_vm9, %v7022_v5, %v7024_v42  ;;  %v7710_v55 = vpack.c.bf16 %v7705_v51, %v7704_v44  ;;  %v7044_v48 = vsel %vm14845_vm7, %v7041_v56, %v7043_v12 }
 0x9a3   : > { %7094 = vrot.lane.b32.xlu1 %v7085_v1, %s10184_s16  ;;  %v7086_v31 = vrot.slane %v13781_v58, 5  ;;  %v7042_v61 = vsel %vm14831_vm3, %v7040_v39, %v7041_v56  ;;  %v13831_v50 = vor.u32 %v6972_v3, %v6968_v10  ;;  %v6977_v45 = vrot.slane %v6975_v47, 1 }
 0x9a4   : > { %7030 = vrot.lane.b32.xlu0 %v7023_v26, %s10173_s9  ;;  %v7059_v46 = vrot.slane %v6979_v14, 4  ;;  %v7060_v57 = vrot.slane %v6975_v47, 5  ;;  %v7062_v8 = vrot.slane %v6987_v15, 4  ;;  %v7063_v11 = vrot.slane %v6983_v59, 5 }
 0x9a5   : > { %v7087_v4 = vsel %vm14846_vm12, %v7085_v1, %v7086_v31  ;;  %vm14847_vm5 = vsmask.f32 7424  ;;  %vm14848_vm9 = vsmask.f32 3328  ;;  %v6981_v23 = vor.u32 %v6979_v14, %v6977_v45 }
 0x9a6   : > { %v13818_v30 = vld [vmem:[#allocation2 + $0x20] sm:$0xff]  ;;  %v6978_v22 = vsel %vm14847_vm5, %v13831_v50, %v6977_v45  ;;  %v7061_v7 = vor.u32 %v7060_v57, %v7059_v46  ;;  %v13840_v19 = vor.u32 %v7063_v11, %v7062_v8  ;;  %v6985_v27 = vrot.slane %v6983_v59, 1  ;;  %vm14849_vm7 = vmmov %vm14847_vm5  ;;  %v13855_v9 = vld [vmem:[#allocation2 + $0x10] sm:$0xff] }
 0x9a7   : > { %7032 = vrot.lane.b32.xlu1 %v7025_v32, %s10173_s9  ;;  %7715 = vst.msk [vmem:[#allocation2 + $0x20] sm:$0xff] %vm342_vm4, %v7711_v60  ;;  %v13824_v37 = vld [vmem:[#allocation2 + $0x18] sm:$0xff]  ;;  %v7028_v0 = vrot.slane %v13818_v30, 1  ;;  %v13860_v28 = vld [vmem:[#allocation2 + $0x8] sm:$0xff]  ;;  %vm14850_vm3 = vcmask 1046528   ;;  %v7047_v43 = vrot.slane %v13818_v30, 4 }
 0x9a8   : > { %7051 = vrot.lane.b32.xlu0 %v7044_v48, %s10176_s12  ;;  %7714 = vst.msk [vmem:[#allocation2 + $0x18] sm:$0xff] %vm342_vm4, %v7710_v55  ;;  %v7065_v29 = vsel %vm14848_vm9, %v7061_v7, %v13840_v19  ;;  %v6986_v18 = vsel %vm14849_vm7, %v6981_v23, %v6985_v27  ;;  %v7840_v38 = vrot.slane %v13860_v28, 5  ;;  %v7045_v6 = vrot.slane %v13824_v37, 4  ;;  %vm14854_vm7 = vmmov %vm14850_vm3 }
 0x9a9   : > { %v7133_v63 = vsel %vm14850_vm3, %v7028_v0, %v13654_v54  ;;  %v7090_v20 = vrot.slane %v13818_v30, 5  ;;  %v7092_v49 = vrot.slane %v13640_v35, 5  ;;  %vm14851_vm12 = vcmask 1043456  }
 0x9aa   : > { %v7046_v34 = vsel %vm14851_vm12, %v7043_v12, %v7045_v6  ;;  %v7088_v36 = vrot.slane %v13824_v37, 5  ;;  %vm14852_vm5 = vcmask 1042432   ;;  %v7026_v16 = vrot.slane %v13824_v37, 1  ;;  %vm14855_vm12 = vmmov %vm14850_vm3 }
 0x9ab   : > { %7049 = vrot.lane.b32.xlu1 %v7042_v61, %s10176_s12  ;;  %v7093_v41 = vsel %vm14852_vm5, %v7090_v20, %v7092_v49  ;;  %vm14853_vm9 = vmmov %vm14852_vm5  ;;  %v7777_v21 = vrot.slane %v13860_v28, 1  ;;  %v7796_v51 = vrot.slane %v13860_v28, 4  ;;  %v7798_v26 = vrot.slane %v13855_v9, 4 }
 0x9ac   : > { %7096 = vrot.lane.b32.xlu0 %v7087_v4, %s10184_s16  ;;  %v7089_v13 = vsel %vm14853_vm9, %v7086_v31, %v7088_v36  ;;  %v7027_v1 = vsel %vm14854_vm7, %v7024_v42, %v7026_v16  ;;  %v7029_v5 = vsel %vm14850_vm3, %v7026_v16, %v7028_v0  ;;  %vm14856_vm5 = vcmask 1043456  }
 0x9ad   : > { %v7778_v17 = vsel %vm14855_vm12, %v7021_v2, %v7777_v21  ;;  %v7048_v42 = vsel %vm14856_vm5, %v7045_v6, %v7047_v43  ;;  %vm14857_vm9 = vmmov %vm14856_vm5  ;;  %v7841_v56 = vrot.slane %v13855_v9, 5  ;;  %vm14858_vm7 = vcmask 1042432  }
 0x9ae   : > { %v7799_v25 = vsel %vm14857_vm9, %v7796_v51, %v7798_v26  ;;  %v7091_v2 = vsel %vm14858_vm7, %v7088_v36, %v7090_v20  ;;  %v7779_v12 = vrot.slane %v13855_v9, 1  ;;  %vm14859_vm3 = vmmov %vm14858_vm7  ;;  %v6991_v10 = vshll.u32 %v13824_v37, 16 }
 0x9af   : > { %7006 = vrot.lane.b32.xlu1 %v6978_v22, %s10172_s8  ;;  %v7842_v44 = vsel %vm14859_vm3, %v7840_v38, %v7841_v56  ;;  %v6999_v47 = vshll.u32 %v13818_v30, 16  ;;  %v6989_v60 = vor.u32 %v6987_v15, %v6985_v27  ;;  %v7003_v55 = vshrl.u32 %v13818_v30, 16 }
 0x9b0   : > { %7134 = vrot.lane.b32.xlu0 %v7025_v32, %s10183_s13  ;;  %v7780_v3 = vsel %vm14855_vm12, %v7777_v21, %v7779_v12  ;;  %v6993_v14 = vrot.slane %v6991_v10, 1  ;;  %v7797_v32 = vsel %vm14856_vm5, %v7040_v39, %v7796_v51  ;;  %v7730_v48 = vshll.u32 %v13860_v28, 16 }
 0x9b1   : > { %v7001_v59 = vrot.slane %v6999_v47, 1  ;;  %vm14860_vm9 = vsmask.f32 7424  ;;  %v7734_v61 = vshrl.u32 %v13860_v28, 16  ;;  %v7070_v15 = vrot.slane %v7003_v55, 4 }
 0x9b2   : > { %v6994_v31 = vsel %vm14860_vm9, %v6989_v60, %v6993_v14  ;;  %v7732_v46 = vrot.slane %v7730_v48, 1  ;;  %v7071_v57 = vrot.slane %v6999_v47, 5  ;;  %v6995_v39 = vshrl.u32 %v13824_v37, 16  ;;  %vm14861_vm7 = vmmov %vm14860_vm9 }
 0x9b3   : > { %7076 = vrot.lane.b32.xlu1 %v7065_v29, %s10178_s28  ;;  %v7005_v45 = vor.u32 %v7003_v55, %v7001_v59  ;;  %v7814_v4 = vrot.slane %v7734_v61, 4  ;;  %v7815_v22 = vrot.slane %v7730_v48, 5  ;;  %v7067_v29 = vrot.slane %v6991_v10, 5  ;;  %vm14862_vm3 = vmmov %vm14861_vm7 }
 0x9b4   : > { %7074 = vrot.lane.b32.xlu0 %v7061_v7, %s10178_s28  ;;  %v7733_v8 = vsel %vm14861_vm7, %v13831_v50, %v7732_v46  ;;  %v7072_v11 = vor.u32 %v7071_v57, %v7070_v15  ;;  %v7066_v7 = vrot.slane %v6995_v39, 4  ;;  %v7738_v50 = vshll.u32 %v13855_v9, 16  ;;  %vm14863_vm12 = vmmov %vm14862_vm3 }
 0x9b5   : > { %v7118_v23 = vsel %vm14862_vm3, %v7005_v45, %v13645_v52  ;;  %v7816_v27 = vor.u32 %v7815_v22, %v7814_v4  ;;  %vm14864_vm5 = vsmask.f32 3328  ;;  %v7736_v6 = vor.u32 %v7734_v61, %v7732_v46  ;;  %vm14865_vm9 = vmmov %vm14862_vm3 }
 0x9b6   : > { %v7740_v20 = vrot.slane %v7738_v50, 1  ;;  %vm14866_vm7 = vmmov %vm14864_vm5 }
 0x9b7   : > { %7122 = vrot.lane.b32.xlu1 %v6986_v18, %s10182_s27  ;;  %vm14867_vm3 = vmmov %vm14864_vm5 }
 0x9b8   : > { %7008 = vrot.lane.b32.xlu0 %v6986_v18, %s10172_s8  ;;  %v6997_v18 = vor.u32 %v6995_v39, %v6993_v14  ;;  %v7741_v16 = vsel %vm14865_vm9, %v7736_v6, %v7740_v20  ;;  %vm14870_vm9 = vcmask 1046528  }
 0x9bb   : > { %7110 = vrot.lane.b32.xlu1 %v13818_v30, %s10181_s26 }
 0x9bc   : > { %7108 = vrot.lane.b32.xlu0 %v13824_v37, %s10181_s26 }
 0x9bf   : > { %7861 = vrot.lane.b32.xlu1 %v13855_v9, %s10181_s26 }
 0x9c0   : > { %7859 = vrot.lane.b32.xlu0 %v13860_v28, %s10181_s26 }
 0x9c3   : > { %7140 = vrot.lane.b32.xlu1 %v7133_v63, %s10183_s13  ;;  %v7002_v63 = vsel %vm14863_vm12, %v6997_v18, %v7001_v59  ;;  %vm14868_vm12 = vcmask 1042432  }
 0x9c4   : > { %7038 = vrot.lane.b32.xlu0 %v7028_v0, %s10173_s9  ;;  %v7068_v0 = vor.u32 %v7067_v29, %v7066_v7 }
 0x9c7   : > { %7849 = vrot.lane.b32.xlu1 %v7840_v38, %s10184_s16  ;;  %v7742_v38 = vshrl.u32 %v13855_v9, 16 }
 0x9c8   : > { %7057 = vrot.lane.b32.xlu0 %v7047_v43, %s10176_s12  ;;  %v7069_v43 = vsel %vm14864_vm5, %v13840_v19, %v7068_v0  ;;  %v13957_v19 = vld [vmem:[#allocation2 + $0x18] sm:$0xff]  ;;  %vm14869_vm5 = vcmask 1043456  }
 0x9c9   : > { %v7817_v36 = vrot.slane %v7742_v38, 4  ;;  %v7800_v10 = vrot.slane %v13957_v19, 4  ;;  %v7781_v47 = vrot.slane %v13957_v19, 1  ;;  %v7746_v14 = vshll.u32 %v13957_v19, 16 }
 0x9ca   : > { %v7843_v59 = vrot.slane %v13957_v19, 5 }
 0x9cb   : > { %7053 = vrot.lane.b32.xlu1 %v7046_v34, %s10176_s12  ;;  %v13950_v34 = vpop.permute.xlu0 %7112  ;;  %v7782_v35 = vsel %vm14870_vm9, %v7779_v12, %v7781_v47  ;;  %v7750_v12 = vshrl.u32 %v13957_v19, 16 }
 0x9cc   : > { %7102 = vrot.lane.b32.xlu0 %v7093_v41, %s10184_s16  ;;  %v7818_v41 = vrot.slane %v7738_v50, 5 }
 0x9cd   : > { %v7821_v22 = vrot.slane %v7750_v12, 4 }
 0x9cf   : > { %7098 = vrot.lane.b32.xlu1 %v7089_v13, %s10184_s16  ;;  %v7073_v13 = vsel %vm14866_vm7, %v7068_v0, %v7072_v11  ;;  %v13963_v21 = vpop.permute.xlu0 %7130  ;;  %vm14871_vm7 = vmmov %vm14868_vm12 }
 0x9d0   : > { %7034 = vrot.lane.b32.xlu0 %v7027_v1, %s10173_s9 }
 0x9d3   : > { %7136 = vrot.lane.b32.xlu1 %v7027_v1, %s10183_s13  ;;  %v7819_v1 = vor.u32 %v7818_v41, %v7817_v36 }
 0x9d4   : > { %7138 = vrot.lane.b32.xlu0 %v7029_v5, %s10183_s13 }
 0x9d7   : > { %7036 = vrot.lane.b32.xlu1 %v7029_v5, %s10173_s9  ;;  %v13959_v5 = vld [vmem:[#allocation2 + $0x20] sm:$0xff] }
 0x9d8   : > { %7785 = vrot.lane.b32.xlu0 %v7778_v17, %s10173_s9  ;;  %v7820_v17 = vsel %vm14867_vm3, %v7816_v27, %v7819_v1  ;;  %v13967_v51 = vrot.slane %v13959_v5, 1  ;;  %v7754_v55 = vshll.u32 %v13959_v5, 16  ;;  %v7758_v46 = vshrl.u32 %v13959_v5, 16 }
 0x9d9   : > { %vm14872_vm3 = vsmask.f32 7424 }
 0x9da   : > { %v7826_v4 = vrot.slane %v7754_v55, 5 }
 0x9db   : > { %7055 = vrot.lane.b32.xlu1 %v7048_v42, %s10176_s12  ;;  %v13975_v42 = vld [vmem:[%s14475_s6] sm:$0x3] }
 0x9dc   : > { %7806 = vrot.lane.b32.xlu0 %v7799_v25, %s10176_s12  ;;  %9917 = vmatprep.subr.msk.bf16.mxu0 %vm829_vm2, %v13975_v42  ;;  %v7802_v25 = vrot.slane %v13959_v5, 4 }
 0x9df   : > { %7100 = vrot.lane.b32.xlu1 %v7091_v2, %s10184_s16  ;;  %v13980_v2 = vpop.permute.xlu0 %7142 }
 0x9e0   : > { %7851 = vrot.lane.b32.xlu0 %v7842_v44, %s10184_s16  ;;  %v7845_v44 = vrot.slane %v13959_v5, 5 }
 0x9e3   : > { %7787 = vrot.lane.b32.xlu1 %v7780_v3, %s10173_s9  ;;  %v13994_v60 = vpop.permute.xlu0 %7867 }
 0x9e4   : > { %7889 = vrot.lane.b32.xlu0 %v7780_v3, %s10183_s13  ;;  %v7848_v3 = vsel %vm14868_vm12, %v7845_v44, %v7092_v49  ;;  %v7748_v49 = vrot.slane %v7746_v14, 1  ;;  %vm14873_vm12 = vmmov %vm14870_vm9  ;;  %vm14875_vm9 = vcmask 1043456  }
 0x9e5   : > { %v7803_v36 = vsel %vm14875_vm9, %v7800_v10, %v7802_v25  ;;  %vm14879_vm9 = vcmask 1046528  }
 0x9e7   : > { %7804 = vrot.lane.b32.xlu1 %v7797_v32, %s10176_s12  ;;  %v7801_v32 = vsel %vm14869_vm5, %v7798_v26, %v7800_v10  ;;  %v7844_v26 = vsel %vm14871_vm7, %v7841_v56, %v7843_v59  ;;  %v7822_v56 = vrot.slane %v7746_v14, 5  ;;  %vm14874_vm5 = vsmask.f32 3328  ;;  %vm14876_vm7 = vmmov %vm14872_vm3 }
 0x9e8   : > { %7124 = vrot.lane.b32.xlu0 %v6994_v31, %s10182_s27 }
 0x9e9   : > { %v7823_v18 = vor.u32 %v7822_v56, %v7821_v22 }
 0x9eb   : > { %7010 = vrot.lane.b32.xlu1 %v6994_v31, %s10172_s8  ;;  %v7744_v31 = vor.u32 %v7742_v38, %v7740_v20  ;;  %v7752_v38 = vor.u32 %v7750_v12, %v7748_v49 }
 0x9ec   : > { %7014 = vrot.lane.b32.xlu0 %v7005_v45, %s10172_s8  ;;  %v7756_v45 = vrot.slane %v7754_v55, 1 }
 0x9ed   : > { %v7749_v15 = vsel %vm14872_vm3, %v7744_v31, %v7748_v49  ;;  %vm14877_vm3 = vcmask 1042432  }
 0x9ef   : > { %7761 = vrot.lane.b32.xlu1 %v7733_v8, %s10172_s8  ;;  %v7760_v8 = vor.u32 %v7758_v46, %v7756_v45 }
 0x9f0   : > { %7082 = vrot.lane.b32.xlu0 %v7072_v11, %s10178_s28  ;;  %v7825_v11 = vrot.slane %v7758_v46, 4 }
 0x9f3   : > { %7128 = vrot.lane.b32.xlu1 %v7118_v23, %s10182_s27  ;;  %v7784_v23 = vsel %vm14873_vm12, %v7781_v47, %v13967_v51  ;;  %vm14878_vm12 = vmmov %vm14876_vm7 }
 0x9f4   : > { %7829 = vrot.lane.b32.xlu0 %v7816_v27, %s10178_s28  ;;  %v7827_v27 = vor.u32 %v7826_v4, %v7825_v11 }
 0x9f7   : > { %7126 = vrot.lane.b32.xlu1 %v7002_v63, %s10182_s27 }
 0x9f8   : > { %7078 = vrot.lane.b32.xlu0 %v7069_v43, %s10178_s28 }
 0x9fb   : > { %7012 = vrot.lane.b32.xlu1 %v7002_v63, %s10172_s8  ;;  %v7824_v63 = vsel %vm14874_vm5, %v7819_v1, %v7823_v18 }
 0x9fc   : > { %7763 = vrot.lane.b32.xlu0 %v7741_v16, %s10172_s8 }
 0x9ff   : > { %7080 = vrot.lane.b32.xlu1 %v7073_v13, %s10178_s28 }
 0xa00   : > { %7863 = vrot.lane.b32.xlu0 %v13957_v19, %s10181_s26 }
 0xa03   : > { %7831 = vrot.lane.b32.xlu1 %v7820_v17, %s10178_s28 }
 0xa04   : > { %7793 = vrot.lane.b32.xlu0 %v13967_v51, %s10173_s9 }
 0xa07   : > { %7877 = vrot.lane.b32.xlu1 %v7741_v16, %s10182_s27  ;;  %v7757_v16 = vsel %vm14876_vm7, %v7752_v38, %v7756_v45  ;;  %vm14880_vm7 = vcmask 31744  }
 0xa08   : > { %7812 = vrot.lane.b32.xlu0 %v7802_v25, %s10176_s12 }
 0xa0b   : > { %7865 = vrot.lane.b32.xlu1 %v13959_v5, %s10181_s26 }
 0xa0c   : > { %7857 = vrot.lane.b32.xlu0 %v7848_v3, %s10184_s16  ;;  %v7846_v3 = vsel %vm14877_vm3, %v7843_v59, %v7845_v44  ;;  %v7873_v59 = vsel %vm14878_vm12, %v7760_v8, %v13645_v52  ;;  %v7888_v52 = vsel %vm14879_vm9, %v13967_v51, %v13654_v54  ;;  %vm14881_vm3 = vcmask 1043456   ;;  %vm14882_vm12 = vmmov %vm14880_vm7 }
 0xa0f   : > { %7808 = vrot.lane.b32.xlu1 %v7801_v32, %s10176_s12 }
 0xa10   : > { %7789 = vrot.lane.b32.xlu0 %v7782_v35, %s10173_s9 }
 0xa11   : > { %v14006_v48 = vpop.permute.xlu1 %7106 }
 0xa12   : > { %v7105_v61 = vpop.permute.xlu0 %7104 }
 0xa13   : > { %7853 = vrot.lane.b32.xlu1 %v7844_v26, %s10184_s16 }
 0xa14   : > { %7879 = vrot.lane.b32.xlu0 %v7749_v15, %s10182_s27 }
 0xa15   : > { %v7095_v57 = vpop.permute.xlu1 %7094 }
 0xa16   : > { %v7031_v39 = vpop.permute.xlu0 %7030 }
 0xa17   : > { %7891 = vrot.lane.b32.xlu1 %v7782_v35, %s10183_s13 }
 0xa18   : > { %7769 = vrot.lane.b32.xlu0 %v7760_v8, %s10172_s8 }
 0xa19   : > { %v7033_v7 = vpop.permute.xlu1 %7032 }
 0xa1a   : > { %v7052_v29 = vpop.permute.xlu0 %7051 }
 0xa1b   : > { %7893 = vrot.lane.b32.xlu1 %v7784_v23, %s10183_s13 }
 0xa1c   : > { %7837 = vrot.lane.b32.xlu0 %v7827_v27, %s10178_s28 }
 0xa1d   : > { %v7050_v0 = vpop.permute.xlu1 %7049 }
 0xa1e   : > { %v7097_v50 = vpop.permute.xlu0 %7096 }
 0xa1f   : > { %7791 = vrot.lane.b32.xlu1 %v7784_v23, %s10173_s9 }
 0xa20   : > { %7833 = vrot.lane.b32.xlu0 %v7824_v63, %s10178_s28 }
 0xa21   : > { %v7007_v43 = vpop.permute.xlu1 %7006 }
 0xa22   : > { %v7145_v6 = vsel %vm342_vm4, %v13779_v33, %v7007_v43  ;;  %v7135_v20 = vpop.permute.xlu0 %7134 }
 0xa23   : > { %v7155_v41 = vsel %vm706_vm6, %v7145_v6, %v7031_v39  ;;  %7810 = vrot.lane.b32.xlu1 %v7803_v36, %s10176_s12 }
 0xa24   : > { %7767 = vrot.lane.b32.xlu0 %v7757_v16, %s10172_s8  ;;  %v7165_v17 = vsel %vm728_vm8, %v7155_v41, %v7050_v0 }
 0xa25   : > { %v7077_v13 = vpop.permute.xlu1 %7076 }
 0xa26   : > { %v7075_v1 = vpop.permute.xlu0 %7074 }
 0xa27   : > { %v7175_v47 = vsel %vm750_vm10, %v7165_v17, %v7075_v1  ;;  %7855 = vrot.lane.b32.xlu1 %v7846_v3, %s10184_s16 }
 0xa28   : > { %v7185_v25 = vsel %vm1915_vm15, %v7175_v47, %v7095_v57  ;;  %7885 = vrot.lane.b32.xlu0 %v13649_v62, %s10182_s27 }
 0xa29   : > { %v7195_v10 = vsel %vm1926_vm13, %v7185_v25, %v7105_v61  ;;  %v7123_v14 = vpop.permute.xlu1 %7122  ;;  %v7828_v61 = vsel %vm14874_vm5, %v7823_v18, %v7827_v27  ;;  %vm14883_vm5 = vmmov %vm14880_vm7 }
 0xa2a   : > { %v7009_v32 = vpop.permute.xlu0 %7008  ;;  %v7205_v0 = vsel %vm1937_vm1, %v7195_v10, %v7123_v14  ;;  %vm14884_vm9 = vmmov %vm14883_vm5 }
 0xa2b   : > { %7765 = vrot.lane.b32.xlu1 %v7749_v15, %s10172_s8  ;;  %v7147_v22 = vsel %vm342_vm4, %v13788_v24, %v7009_v32  ;;  %v7215_v24 = vsel %vm1948_vm0, %v7205_v0, %v7135_v20 }
 0xa2c   : > { %7897 = vrot.lane.b32.xlu0 %v13654_v54, %s10183_s13  ;;  %v7157_v23 = vsel %vm706_vm6, %v7147_v22, %v7033_v7  ;;  %v7224_v6 = vshrl.u32 %v7215_v24, 16  ;;  %v7227_v36 = vshll.u32 %v7215_v24, 16 }
 0xa2d   : > { %v14043_v55 = vpop.permute.xlu1 %7110  ;;  %v7167_v51 = vsel %vm728_vm8, %v7157_v23, %v7052_v29 }
 0xa2e   : > { %v14045_v44 = vpop.permute.xlu0 %7108  ;;  %v7177_v63 = vsel %vm750_vm10, %v7167_v51, %v7077_v13  ;;  %v7226_v13 = vrot.slane %v7224_v6, 3  ;;  %v7229_v3 = vrot.slane %v7227_v36, 4 }
 0xa2f   : > { %7883 = vrot.lane.b32.xlu1 %v7873_v59, %s10182_s27  ;;  %v7187_v7 = vsel %vm1915_vm15, %v7177_v63, %v7097_v50 }
 0xa31   : > { %v14050_v35 = vpop.permute.xlu1 %7861 }
 0xa32   : > { %v14052_v62 = vpop.permute.xlu0 %7859 }
 0xa33   : > { %7881 = vrot.lane.b32.xlu1 %v7757_v16, %s10182_s27  ;;  %v7197_v16 = vsel %vm1926_vm13, %v7187_v7, %v14006_v48 }
 0xa35   : > { %v14055_v49 = vpop.permute.xlu1 %7140 }
 0xa36   : > { %v7039_v31 = vpop.permute.xlu0 %7038 }
 0xa37   : > { %7835 = vrot.lane.b32.xlu1 %v7828_v61, %s10178_s28  ;;  %v7230_v61 = vor.u32 %v7229_v3, %v7226_v13 }
 0xa39   : > { %v7850_v26 = vpop.permute.xlu1 %7849 }
 0xa3a   : > { %v7058_v45 = vpop.permute.xlu0 %7057 }
 0xa3b   : > { %7895 = vrot.lane.b32.xlu1 %v7888_v52, %s10183_s13 }
 0xa3d   : > { %v7054_v46 = vpop.permute.xlu1 %7053 }
 0xa3e   : > { %v7103_v15 = vpop.permute.xlu0 %7102 }
 0xa41   : > { %v7099_v12 = vpop.permute.xlu1 %7098 }
 0xa42   : > { %v7035_v57 = vpop.permute.xlu0 %7034 }
 0xa45   : > { %v7137_v39 = vpop.permute.xlu1 %7136 }
 0xa46   : > { %v14063_v8 = vpop.permute.xlu0 %7138 }
 0xa49   : > { %v14065_v11 = vpop.permute.xlu1 %7036 }
 0xa4a   : > { %v7786_v4 = vpop.permute.xlu0 %7785 }
 0xa4d   : > { %v14069_v56 = vpop.permute.xlu1 %7055 }
 0xa4e   : > { %v14072_v54 = vpop.permute.xlu0 %7806 }
 0xa51   : > { %v14075_v27 = vpop.permute.xlu1 %7100 }
 0xa52   : > { %v14077_v18 = vpop.permute.xlu0 %7851 }
 0xa55   : > { %v14081_v38 = vpop.permute.xlu1 %7787 }
 0xa56   : > { %v14084_v43 = vpop.permute.xlu0 %7889 }
 0xa59   : > { %v7805_v41 = vpop.permute.xlu1 %7804 }
 0xa5a   : > { %v7125_v29 = vpop.permute.xlu0 %7124 }
 0xa5b   : > { %v7207_v1 = vsel %vm1937_vm1, %v7197_v16, %v7125_v29 }
 0xa5c   : > { %v7217_v17 = vsel %vm1948_vm0, %v7207_v1, %v7137_v39 }
 0xa5d   : > { %v7231_v47 = vshrl.u32 %v7217_v17, 16  ;;  %v7234_v25 = vshll.u32 %v7217_v17, 16  ;;  %v7011_v20 = vpop.permute.xlu1 %7010 }
 0xa5e   : > { %v7015_v10 = vpop.permute.xlu0 %7014  ;;  %v7149_v63 = vsel %vm342_vm4, %v13781_v58, %v7011_v20 }
 0xa5f   : > { %v7233_v14 = vrot.slane %v7231_v47, 3  ;;  %v7236_v32 = vrot.slane %v7234_v25, 4  ;;  %v7153_v50 = vsel %vm342_vm4, %v13818_v30, %v7015_v10 }
 0xa60   : > { %v7163_v59 = vsel %vm706_vm6, %v7153_v50, %v7039_v31 }
 0xa61   : > { %v7237_v52 = vor.u32 %v7236_v32, %v7233_v14  ;;  %v7762_v48 = vpop.permute.xlu1 %7761  ;;  %v7173_v22 = vsel %vm728_vm8, %v7163_v59, %v7058_v45 }
 0xa62   : > { %v7900_v39 = vsel %vm342_vm4, %v13779_v33, %v7762_v48  ;;  %v7083_v23 = vpop.permute.xlu0 %7082 }
 0xa63   : > { %v7910_v51 = vsel %vm706_vm6, %v7900_v39, %v7786_v4  ;;  %v14099_v0 = vsel %vm761_vm11, %v7230_v61, %v7237_v52  ;;  %v7183_v30 = vsel %vm750_vm10, %v7173_v22, %v7083_v23  ;;  %v7159_v4 = vsel %vm706_vm6, %v7149_v63, %v7035_v57 }
 0xa64   : > { %9774 = vmatprep.mubr.msk.bf16.mxu1 %vm2025_vm14, %v14099_v0  ;;  %9792 = vmatprep.mubr.msk.bf16.mxu0 %vm2025_vm14, %v14099_v0  ;;  %v7920_v33 = vsel %vm728_vm8, %v7910_v51, %v7805_v41  ;;  %v7193_v24 = vsel %vm1915_vm15, %v7183_v30, %v7103_v15  ;;  %v7169_v1 = vsel %vm728_vm8, %v7159_v4, %v7054_v46 }
 0xa65   : > { %v7129_v31 = vpop.permute.xlu1 %7128  ;;  %v7203_v29 = vsel %vm1926_vm13, %v7193_v24, %v13950_v34 }
 0xa66   : > { %v7830_v45 = vpop.permute.xlu0 %7829  ;;  %v7213_v15 = vsel %vm1937_vm1, %v7203_v29, %v13963_v21 }
 0xa67   : > { %v7930_v7 = vsel %vm750_vm10, %v7920_v33, %v7830_v45 }
 0xa68   : > { %v7940_v58 = vsel %vm1915_vm15, %v7930_v7, %v7850_v26 }
 0xa69   : > { %v7127_v6 = vpop.permute.xlu1 %7126  ;;  %v14115_v36 = vsel %vm1926_vm13, %v7940_v58, %v14052_v62 }
 0xa6a   : > { %v7079_v16 = vpop.permute.xlu0 %7078 }
 0xa6b   : > { %v7179_v41 = vsel %vm750_vm10, %v7169_v1, %v7079_v16  ;;  %v10053_v16 = vld [vmem:[%s10239_s29 + $0x98] sm:$0xff]  }
 0xa6c   : > { %v7189_v57 = vsel %vm1915_vm15, %v7179_v41, %v7099_v12  ;;  %v7223_v12 = vsel %vm1948_vm0, %v7213_v15, %v13980_v2  ;;  %v14213_v15 = vld [vmem:[%s14473_s4 + $0x60] sm:$0xff]  }
 0xa6d   : > { %v7199_v26 = vsel %vm1926_vm13, %v7189_v57, %v14045_v44  ;;  %v7013_v17 = vpop.permute.xlu1 %7012  ;;  %v7255_v32 = vshrl.u32 %v7223_v12, 16 }
 0xa6e   : > { %v7209_v62 = vsel %vm1937_vm1, %v7199_v26, %v7127_v6  ;;  %v7151_v13 = vsel %vm342_vm4, %v13824_v37, %v7013_v17  ;;  %v7764_v34 = vpop.permute.xlu0 %7763  ;;  %v14184_v6 = vld [vmem:[%s14473_s4 + $0x58] sm:$0xff]   ;;  %v10054_v17 = vld [vmem:[%s10239_s29 + $0xa0] sm:$0xff]  }
 0xa6f   : > { %v7219_v46 = vsel %vm1948_vm0, %v7209_v62, %v14063_v8  ;;  %v7161_v3 = vsel %vm706_vm6, %v7151_v13, %v14065_v11  ;;  %v7258_v11 = vshll.u32 %v7223_v12, 16  ;;  %v7257_v23 = vrot.slane %v7255_v32, 3 }
 0xa70   : > { %v7239_v21 = vshrl.u32 %v7219_v46, 16  ;;  %v7242_v47 = vshll.u32 %v7219_v46, 16  ;;  %v7171_v44 = vsel %vm728_vm8, %v7161_v3, %v14069_v56  ;;  %v7584_v56 = vsel %vm829_vm2, %v13975_v42, 0  ;;  %v14161_v42 = vld [vmem:[%s14473_s4 + $0x48] sm:$0xff]  }
 0xa71   : > { %v7081_v25 = vpop.permute.xlu1 %7080  ;;  %v7260_v51 = vrot.slane %v7258_v11, 4  ;;  %v7902_v33 = vsel %vm342_vm4, %v13860_v28, %v7764_v34  ;;  %v10157_v34 = vld [vmem:[%s14473_s4 + $0x68] ss:$0 sps:$4 sm:$0xff]  }
 0xa72   : > { %v7241_v20 = vrot.slane %v7239_v21, 3  ;;  %v7244_v10 = vrot.slane %v7242_v47, 4  ;;  %v7181_v37 = vsel %vm750_vm10, %v7171_v44, %v7081_v25  ;;  %v14138_v14 = vpop.permute.xlu0 %7863  ;;  %v7912_v28 = vsel %vm706_vm6, %v7902_v33, %v14081_v38  ;;  %v10158_v25 = vld [vmem:[%s14473_s4 + $0x2c] sm:$0xff]  }
 0xa73   : > { %v7191_v8 = vsel %vm1915_vm15, %v7181_v37, %v14075_v27  ;;  %v7261_v24 = vor.u32 %v7260_v51, %v7257_v23  ;;  %v7922_v38 = vsel %vm728_vm8, %v7912_v28, %v14072_v54  ;;  %v10161_v51 = vld [vmem:[%s14473_s4 + $0x44] ss:$0 sps:$4 sm:$0xff]  }
 0xa74   : > { %v7201_v2 = vsel %vm1926_vm13, %v7191_v8, %v14043_v55  ;;  %v7245_v50 = vor.u32 %v7244_v10, %v7241_v20  ;;  %v10056_v8 = vld [vmem:[%s10239_s29 + $0xb0] sm:$0xff]  }
 0xa75   : > { %v7211_v59 = vsel %vm1937_vm1, %v7201_v2, %v7129_v31  ;;  %v7832_v61 = vpop.permute.xlu1 %7831  ;;  %v10154_v31 = vld [vmem:[%s14473_s4 + $0x24] sm:$0xff]  }
 0xa76   : > { %v7221_v48 = vsel %vm1948_vm0, %v7211_v59, %v14055_v49  ;;  %v14149_v22 = vpop.permute.xlu0 %7793  ;;  %v14152_v39 = vsel %vm761_vm11, %v7237_v52, %v7245_v50  ;;  %v14167_v52 = vld [vmem:[%s14473_s4 + $0x50] sm:$0xff]   ;;  %v7932_v26 = vsel %vm750_vm10, %v7922_v38, %v7832_v61 }
 0xa77   : > { %9775 = vmatmul.mubr.msk.bf16.vlgmr.msra.gmra.mrb[120].mxu1 %vm2025_vm14, %v14152_v39  ;;  %9793 = vmatmul.mubr.msk.bf16.vlgmr.msra.gmra.mrb[120].mxu0 %vm2025_vm14, %v14152_v39  ;;  %v7247_v55 = vshrl.u32 %v7221_v48, 16  ;;  %v7250_v27 = vshll.u32 %v7221_v48, 16  ;;  %v7942_v62 = vsel %vm1915_vm15, %v7932_v26, %v14077_v18  ;;  %v10159_v59 = vld [vmem:[%s14473_s4 + $0x34] sm:$0xff]  }
 0xa78   : > { %9801 = vmatpush3.bf16.msra.mxu1 %v14161_v42  ;;  %9819 = vmatpush3.bf16.msra.mxu0 %v7584_v56 }
 0xa79   : > { %v7878_v49 = vpop.permute.xlu1 %7877  ;;  %9802 = vmatprep.subr.bf16.mxu1 %v14167_v52  ;;  %v7249_v63 = vrot.slane %v7247_v55, 3  ;;  %v7252_v30 = vrot.slane %v7250_v27, 4  ;;  %9828 = vmatprep.subr.bf16.mxu0 %v10154_v31  ;;  %v10160_v55 = vld [vmem:[%s14473_s4 + $0x3c] sm:$0xff]  }
 0xa7a   : > { %v14173_v45 = vpop.permute.xlu0 %7812  ;;  %v7960_v41 = vsel %vm1937_vm1, %v14115_v36, %v7878_v49  ;;  %v10055_v36 = vld [vmem:[%s10239_s29 + $0xa8] sm:$0xff]   ;;  %v8232_v49 = vld [vmem:[%s14475_s6] sm:$0x3] }
 0xa7b   : > { %v7253_v4 = vor.u32 %v7252_v30, %v7249_v63  ;;  %v7970_v54 = vsel %vm1948_vm0, %v7960_v41, %v14084_v43  ;;  %v7952_v43 = vsel %vm1926_vm13, %v7942_v62, %v14050_v35 }
 0xa7c   : > { %9803 = vmatpush3.bf16.msra.mxu1 %v14167_v52  ;;  %v7987_v3 = vshrl.u32 %v7970_v54, 16  ;;  %v7990_v12 = vshll.u32 %v7970_v54, 16 }
 0xa7d   : > { %v14178_v7 = vpop.permute.xlu1 %7865  ;;  %v7254_v58 = vsel %vm761_vm11, %v7245_v50, %v7253_v4  ;;  %9804 = vmatprep.subr.bf16.mxu1 %v14184_v6  ;;  %v14188_v29 = vsel %vm761_vm11, %v7253_v4, %v7261_v24 }
 0xa7e   : > { %v14193_v1 = vpop.permute.xlu0 %7857  ;;  %9778 = vmatprep.mubr.msk.bf16.mxu1 %vm2025_vm14, %v7254_v58  ;;  %9796 = vmatprep.mubr.msk.bf16.mxu0 %vm2025_vm14, %v7254_v58  ;;  %v7989_v35 = vrot.slane %v7987_v3, 3  ;;  %v7992_v20 = vrot.slane %v7990_v12, 4 }
 0xa7f   : > { %9779 = vmatmul.mubr.msk.bf16.gmra.mrb[124].mxu1 %vm2025_vm14, %v14188_v29  ;;  %9797 = vmatmul.mubr.msk.bf16.gmra.mrb[124].mxu0 %vm2025_vm14, %v14188_v29 }
 0xa80   : > { %9805 = vmatpush3.bf16.msra.mxu1 %v14184_v6  ;;  %9810 = vmatprep.mubr.msk.bf16.mxu1 %vm2025_vm14, %v14099_v0  ;;  %v7993_v61 = vor.u32 %v7992_v20, %v7989_v35 }
 0xa81   : > { %v14208_v57 = vpop.permute.xlu1 %7808  ;;  %9806 = vmatprep.subr.bf16.mxu1 %v14213_v15  ;;  %9820 = vmatprep.mubr.msk.bf16.mxu0 %vm14880_vm7, %v10053_v16  ;;  %vm14885_vm7 = vmmov %vm14881_vm3 }
 0xa82   : > { %v14218_v0 = vpop.permute.xlu0 %7789 }
 0xa84   : > { %9807 = vmatpush3.bf16.msra.mxu1 %v14213_v15 }
 0xa85   : > { %v14227_v13 = vpop.permute.xlu1 %7853  ;;  %9916 = vmatprep.subr.msk.bf16.mxu1 %vm14881_vm3, %v10157_v34 }
 0xa86   : > { %v7880_v46 = vpop.permute.xlu0 %7879 }
 0xa87   : > { %9821 = vmatmul.mubr.msk.bf16.vlgmr.msra.gmra.mrb[128].mxu0 %vm14882_vm12, %v10054_v17  ;;  %v7962_v18 = vsel %vm1937_vm1, %v7952_v43, %v7880_v46 }
 0xa88   : > { %9809 = vmatpush3.bf16.msra.mxu1 %v12139_v53  ;;  %9824 = vmatprep.mubr.msk.bf16.mxu0 %vm14883_vm5, %v10055_v36 }
 0xa89   : > { %v7892_v21 = vpop.permute.xlu1 %7891  ;;  %9846 = vmatprep.subr.bf16.mxu1 %v14161_v42  ;;  %9829 = vmatpush3.bf16.msra.mxu0 %v10154_v31 }
 0xa8a   : > { %v7972_v47 = vsel %vm1948_vm0, %v7962_v18, %v7892_v21  ;;  %v7770_v44 = vpop.permute.xlu0 %7769  ;;  %9830 = vmatprep.subr.bf16.mxu0 %v10158_v25  ;;  %v8266_v21 = vsel %vm829_vm2, %v8232_v49, 0 }
 0xa8b   : > { %v7994_v10 = vshrl.u32 %v7972_v47, 16  ;;  %v7997_v37 = vshll.u32 %v7972_v47, 16  ;;  %9811 = vmatmul.mubr.msk.bf16.vlgmr.msra.gmra.mrb[128].mxu1 %vm2025_vm14, %v14152_v39 }
 0xa8c   : > { %9814 = vmatprep.mubr.msk.bf16.mxu1 %vm2025_vm14, %v7254_v58  ;;  %9847 = vmatpush3.bf16.msra.mxu1 %v14161_v42  ;;  %v7908_v42 = vsel %vm342_vm4, %v13959_v5, %v7770_v44  ;;  %v8382_v5 = vld [vmem:[%s14475_s6] sm:$0x3] }
 0xa8d   : > { %v7996_v32 = vrot.slane %v7994_v10, 3  ;;  %v7999_v11 = vrot.slane %v7997_v37, 4  ;;  %v7894_v2 = vpop.permute.xlu1 %7893  ;;  %9848 = vmatprep.subr.bf16.mxu1 %v14167_v52  ;;  %9831 = vmatpush3.bf16.msra.mxu0 %v10158_v25  ;;  %v7918_v30 = vsel %vm706_vm6, %v7908_v42, %v14149_v22  ;;  %v8416_v47 = vsel %vm829_vm2, %v8382_v5, 0  ;;  %v7350_v42 = vld [vmem:[#allocation4 + $0x50] sm:$0xff] }
 0xa8e   : > { %v7838_v50 = vpop.permute.xlu0 %7837  ;;  %9832 = vmatprep.subr.bf16.mxu0 %v10159_v59  ;;  %v7928_v31 = vsel %vm728_vm8, %v7918_v30, %v14173_v45  ;;  %v7348_v30 = vld [vmem:[#allocation4 + $0x40] sm:$0xff] }
 0xa8f   : > { %v14253_v56 = vor.u32 %v7999_v11, %v7996_v32  ;;  %9825 = vmatmul.mubr.msk.bf16.gmra.mrb[132].mxu0 %vm14884_vm9, %v10056_v8  ;;  %v7938_v24 = vsel %vm750_vm10, %v7928_v31, %v7838_v50  ;;  %v10058_v50 = vld [vmem:[%s10239_s29 + $0xf8] sm:$0xff]  }
 0xa90   : > { %9849 = vmatpush3.bf16.msra.mxu1 %v14167_v52 }
 0xa91   : > { %v7792_v48 = vpop.permute.xlu1 %7791  ;;  %v8001_v39 = vsel %vm761_vm11, %v7993_v61, %v14253_v56  ;;  %9850 = vmatprep.subr.bf16.mxu1 %v14184_v6  ;;  %9833 = vmatpush3.bf16.msra.mxu0 %v10159_v59 }
 0xa92   : > { %9838 = vmatprep.mubr.msk.bf16.mxu0 %vm2025_vm14, %v8001_v39  ;;  %9834 = vmatprep.subr.bf16.mxu0 %v10160_v55  ;;  %v7834_v27 = vpop.permute.xlu0 %7833 }
 0xa93   : > { %9815 = vmatmul.mubr.msk.bf16.gmra.mrb[132].mxu1 %vm2025_vm14, %v14188_v29  ;;  %v7948_v29 = vsel %vm1915_vm15, %v7938_v24, %v14193_v1 }
 0xa94   : > { %9856 = vmatprep.mubr.msk.bf16.mxu1 %vm2025_vm14, %v8001_v39  ;;  %9851 = vmatpush3.bf16.msra.mxu1 %v14184_v6  ;;  %v10061_v39 = vld [vmem:[%s10239_s29 + $0xd8] sm:$0xff]  }
 0xa95   : > { %v7811_v23 = vpop.permute.xlu1 %7810  ;;  %9852 = vmatprep.subr.bf16.mxu1 %v14213_v15  ;;  %9835 = vmatpush3.bf16.msra.mxu0 %v10160_v55  ;;  %v10062_v55 = vld [vmem:[%s10239_s29 + $0x108] sm:$0xff]  }
 0xa96   : > { %9918 = vmatprep.subr.msk.bf16.mxu0 %vm14885_vm7, %v10161_v51  ;;  %v7768_v52 = vpop.permute.xlu0 %7767 }
 0xa98   : > { %9853 = vmatpush3.bf16.msra.mxu1 %v14213_v15 }
 0xa99   : > { %v7856_v63 = vpop.permute.xlu1 %7855  ;;  %9919 = vmatprep.subr.msk.bf16.mxu1 %vm14881_vm3, %v10157_v34  ;;  %9837 = vmatpush3.bf16.msra.mxu0 %v14832_v40 }
 0xa9a   : > { %9920 = vmatprep.subr.msk.bf16.mxu0 %vm829_vm2, %v8232_v49  ;;  %v7886_v4 = vpop.permute.xlu0 %7885 }
 0xa9c   : > { %9855 = vmatpush3.bf16.msra.mxu1 %v12139_v53 }
 0xa9d   : > { %v7766_v33 = vpop.permute.xlu1 %7765  ;;  %9921 = vmatprep.subr.msk.bf16.mxu1 %vm829_vm2, %v8382_v5 }
 0xa9e   : > { %v7904_v40 = vsel %vm342_vm4, %v13855_v9, %v7766_v33  ;;  %v7906_v9 = vsel %vm342_vm4, %v13957_v19, %v7768_v52  ;;  %v7898_v16 = vpop.permute.xlu0 %7897 }
 0xa9f   : > { %v7914_v22 = vsel %vm706_vm6, %v7904_v40, %v14218_v0  ;;  %v7916_v41 = vsel %vm706_vm6, %v7906_v9, %v7792_v48  ;;  %v10060_v48 = vld [vmem:[%s10239_s29 + $0x100] sm:$0xff]   ;;  %v7351_v40 = vld [vmem:[#allocation4 + $0x58] sm:$0xff] }
 0xaa0   : > { %v7924_v58 = vsel %vm728_vm8, %v7914_v22, %v14208_v57  ;;  %v7958_v57 = vsel %vm1926_vm13, %v7948_v29, %v13994_v60  ;;  %v7926_v54 = vsel %vm728_vm8, %v7916_v41, %v7811_v23  ;;  %v10064_v23 = vld [vmem:[%s10239_s29 + $0x110] sm:$0xff]   ;;  %v7354_v29 = vld [vmem:[#allocation4 + $0x70] sm:$0xff] }
 0xaa1   : > { %v7884_v6 = vpop.permute.xlu1 %7883  ;;  %v7934_v53 = vsel %vm750_vm10, %v7924_v58, %v7834_v27  ;;  %v7968_v26 = vsel %vm1937_vm1, %v7958_v57, %v7886_v4  ;;  %v10063_v27 = vld [vmem:[%s10239_s29 + $0xe0] sm:$0xff]   ;;  %v7349_v58 = vld [vmem:[#allocation4 + $0x48] sm:$0xff] }
 0xaa2   : > { %v7944_v45 = vsel %vm1915_vm15, %v7934_v53, %v14227_v13  ;;  %v7978_v1 = vsel %vm1948_vm0, %v7968_v26, %v7898_v16  ;;  %v7355_v26 = vld [vmem:[#allocation4 + $0x78] sm:$0xff] }
 0xaa3   : > { %v7954_v28 = vsel %vm1926_vm13, %v7944_v45, %v14138_v14  ;;  %v8018_v34 = vshrl.u32 %v7978_v1, 16  ;;  %v8021_v46 = vshll.u32 %v7978_v1, 16 }
 0xaa5   : > { %v7882_v38 = vpop.permute.xlu1 %7881  ;;  %v8020_v35 = vrot.slane %v8018_v34, 3  ;;  %v8023_v20 = vrot.slane %v8021_v46, 4  ;;  %v7439_v46 = vld [vmem:[#allocation4 + $0x10] sm:$0xff] }
 0xaa6   : > { %v7964_v15 = vsel %vm1937_vm1, %v7954_v28, %v7882_v38  ;;  %v7352_v38 = vld [vmem:[#allocation4 + $0x60] sm:$0xff] }
 0xaa7   : > { %v7974_v0 = vsel %vm1948_vm0, %v7964_v15, %v7894_v2  ;;  %v8024_v32 = vor.u32 %v8023_v20, %v8020_v35  ;;  %v10057_v2 = vld [vmem:[%s10239_s29 + $0xc8] sm:$0xff]  }
 0xaa8   : > { %v8002_v17 = vshrl.u32 %v7974_v0, 16  ;;  %v8005_v19 = vshll.u32 %v7974_v0, 16 }
 0xaa9   : > { %v7836_v36 = vpop.permute.xlu1 %7835 }
 0xaaa   : > { %v8004_v14 = vrot.slane %v8002_v17, 3  ;;  %v8007_v62 = vrot.slane %v8005_v19, 4  ;;  %v7936_v13 = vsel %vm750_vm10, %v7926_v54, %v7836_v36  ;;  %v7353_v19 = vld [vmem:[#allocation4 + $0x68] sm:$0xff] }
 0xaab   : > { %v7946_v60 = vsel %vm1915_vm15, %v7936_v13, %v7856_v63 }
 0xaac   : > { %v8008_v3 = vor.u32 %v8007_v62, %v8004_v14  ;;  %v7956_v12 = vsel %vm1926_vm13, %v7946_v60, %v14178_v7 }
 0xaad   : > { %v7966_v43 = vsel %vm1937_vm1, %v7956_v12, %v7884_v6  ;;  %v7896_v18 = vpop.permute.xlu1 %7895  ;;  %v7437_v12 = vld [vmem:[#allocation4] sm:$0xff] }
 0xaae   : > { %v7976_v44 = vsel %vm1948_vm0, %v7966_v43, %v7896_v18  ;;  %v8009_v25 = vsel %vm761_vm11, %v14253_v56, %v8008_v3  ;;  %vm14886_vm0 = vmmov %vm14883_vm5  ;;  %v10059_v56 = vld [vmem:[%s10239_s29 + $0xd0] sm:$0xff]  }
 0xaaf   : > { %v8010_v10 = vshrl.u32 %v7976_v44, 16  ;;  %v8013_v37 = vshll.u32 %v7976_v44, 16  ;;  %9839 = vmatmul.mubr.msk.bf16.vlgmr.msra.gmra.mrb[136].mxu0 %vm2025_vm14, %v8009_v25  ;;  %9857 = vmatmul.mubr.msk.bf16.vlgmr.msra.gmra.mrb[136].mxu1 %vm2025_vm14, %v8009_v25  ;;  %vm14887_vm1 = vmmov %vm14886_vm0  ;;  %v7438_v25 = vld [vmem:[#allocation4 + $0x8] sm:$0xff] }
 0xab0   : > { %9865 = vmatpush3.bf16.msra.mxu0 %v8266_v21  ;;  %9875 = vmatpush3.bf16.msra.mxu1 %v8416_v47  ;;  %vm14888_vm2 = vmmov %vm14886_vm0  ;;  %v7440_v21 = vld [vmem:[#allocation4 + $0x18] sm:$0xff] }
 0xab1   : > { %v8012_v7 = vrot.slane %v8010_v10, 3  ;;  %v8015_v8 = vrot.slane %v8013_v37, 4  ;;  %vm14889_vm6 = vmmov %vm14886_vm0 }
 0xab2   : > { %vm14890_vm8 = vmmov %vm14886_vm0 }
 0xab3   : > { %v8016_v11 = vor.u32 %v8015_v8, %v8012_v7  ;;  %vm14891_vm10 = vmmov %vm14886_vm0 }
 0xab4   : > { %vm14893_vm13 = vmmov %vm14886_vm0 }
 0xab5   : > { %v8017_v59 = vsel %vm761_vm11, %v8008_v3, %v8016_v11  ;;  %v8025_v61 = vsel %vm761_vm11, %v8016_v11, %v8024_v32  ;;  %vm14892_vm11 = vmmov %vm14886_vm0  ;;  %v7443_v32 = vld [vmem:[#allocation4 + $0x30] sm:$0xff] }
 0xab6   : > { %9842 = vmatprep.mubr.msk.bf16.mxu0 %vm2025_vm14, %v8017_v59  ;;  %9860 = vmatprep.mubr.msk.bf16.mxu1 %vm2025_vm14, %v8017_v59 }
 0xab7   : > { %9843 = vmatmul.mubr.msk.bf16.gmra.mrb[140].mxu0 %vm2025_vm14, %v8025_v61  ;;  %9861 = vmatmul.mubr.msk.bf16.gmra.mrb[140].mxu1 %vm2025_vm14, %v8025_v61 }
 0xab8   : > { %9866 = vmatprep.mubr.msk.bf16.mxu0 %vm14886_vm0, %v10057_v2  ;;  %9876 = vmatprep.mubr.msk.bf16.mxu1 %vm14887_vm1, %v10058_v50  ;;  %v7441_v50 = vld [vmem:[#allocation4 + $0x20] sm:$0xff] }
 0xabf   : > { %9867 = vmatmul.mubr.msk.bf16.vlgmr.msra.gmra.mrb[144].mxu0 %vm14888_vm2, %v10059_v56  ;;  %9877 = vmatmul.mubr.msk.bf16.vlgmr.msra.gmra.mrb[144].mxu1 %vm14889_vm6, %v10060_v48  ;;  %v7444_v56 = vld [vmem:[#allocation4 + $0x38] sm:$0xff] }
 0xac0   : > { %9870 = vmatprep.mubr.msk.bf16.mxu0 %vm14890_vm8, %v10061_v39  ;;  %9880 = vmatprep.mubr.msk.bf16.mxu1 %vm14891_vm10, %v10062_v55 }
 0xac7   : > { %9871 = vmatmul.mubr.msk.bf16.gmra.mrb[148].mxu0 %vm14892_vm11, %v10063_v27  ;;  %9881 = vmatmul.mubr.msk.bf16.gmra.mrb[148].mxu1 %vm14893_vm13, %v10064_v23  ;;  %v7442_v27 = vld [vmem:[#allocation4 + $0x28] sm:$0xff] }
 0xb4a   : > { %v9776_v51 = vpop.f32.mrb[120].mxu1  ;;  %v9794_v49 = vpop.f32.mrb[120].mxu0 }
 0xb4b   : > { %7342 = vst.msk [vmem:[#allocation4 + $0x90] sm:$0xff] %vm342_vm4, %v9776_v51  ;;  %v7423_v52 = vadd.f32 %v9794_v49, %v7350_v42  ;;  %v7309_v63 = vpop.f32.mrb[121].mxu1  ;;  %v7390_v5 = vpop.f32.mrb[121].mxu0  ;;  %v14373_v51 = vld [vmem:[%s14474_s5] ss:$0 sm:$0xff] }
 0xb4c   : > { %7340 = vst.msk [vmem:[#allocation4 + $0x80] sm:$0xff] %vm342_vm4, %v7309_v63  ;;  %v7421_v31 = vadd.f32 %v7390_v5, %v7348_v30  ;;  %v9777_v33 = vpop.f32.mrb[122].mxu1  ;;  %v9795_v4 = vpop.f32.mrb[122].mxu0 }
 0xb4d   : > { %7431 = vst.msk [vmem:[#allocation4 + $0x50] sm:$0xff] %vm342_vm4, %v7423_v52  ;;  %7343 = vst.msk [vmem:[#allocation4 + $0x98] sm:$0xff] %vm342_vm4, %v9777_v33  ;;  %v7424_v22 = vadd.f32 %v9795_v4, %v7351_v40  ;;  %v7312_v24 = vpop.f32.mrb[123].mxu1  ;;  %v7393_v6 = vpop.f32.mrb[123].mxu0 }
 0xb4e   : > { %7429 = vst.msk [vmem:[#allocation4 + $0x40] sm:$0xff] %vm342_vm4, %v7421_v31  ;;  %7341 = vst.msk [vmem:[#allocation4 + $0x88] sm:$0xff] %vm342_vm4, %v7312_v24  ;;  %v7422_v53 = vadd.f32 %v7393_v6, %v7349_v58 }
 0xb4f   : > { %7432 = vst.msk [vmem:[#allocation4 + $0x58] sm:$0xff] %vm342_vm4, %v7424_v22 }
 0xb50   : > { %7430 = vst.msk [vmem:[#allocation4 + $0x48] sm:$0xff] %vm342_vm4, %v7422_v53 }
 0xb52   : > { %v9780_v45 = vpop.f32.mrb[124].mxu1  ;;  %v9798_v9 = vpop.f32.mrb[124].mxu0 }
 0xb53   : > { %7346 = vst.msk [vmem:[#allocation4 + $0xb0] sm:$0xff] %vm342_vm4, %v9780_v45  ;;  %v7427_v16 = vadd.f32 %v9798_v9, %v7354_v29  ;;  %v7325_v28 = vpop.f32.mrb[125].mxu1  ;;  %v7406_v41 = vpop.f32.mrb[125].mxu0 }
 0xb54   : > { %7344 = vst.msk [vmem:[#allocation4 + $0xa0] sm:$0xff] %vm342_vm4, %v7325_v28  ;;  %v7425_v57 = vadd.f32 %v7406_v41, %v7352_v38  ;;  %v9781_v15 = vpop.f32.mrb[126].mxu1  ;;  %v9799_v0 = vpop.f32.mrb[126].mxu0 }
 0xb55   : > { %7435 = vst.msk [vmem:[#allocation4 + $0x70] sm:$0xff] %vm342_vm4, %v7427_v16  ;;  %7347 = vst.msk [vmem:[#allocation4 + $0xb8] sm:$0xff] %vm342_vm4, %v9781_v15  ;;  %v7428_v1 = vadd.f32 %v9799_v0, %v7355_v26  ;;  %v7328_v17 = vpop.f32.mrb[127].mxu1  ;;  %v7409_v54 = vpop.f32.mrb[127].mxu0 }
 0xb56   : > { %7433 = vst.msk [vmem:[#allocation4 + $0x60] sm:$0xff] %vm342_vm4, %v7425_v57  ;;  %7345 = vst.msk [vmem:[#allocation4 + $0xa8] sm:$0xff] %vm342_vm4, %v7328_v17  ;;  %v7426_v36 = vadd.f32 %v7409_v54, %v7353_v19 }
 0xb57   : > { %7436 = vst.msk [vmem:[#allocation4 + $0x78] sm:$0xff] %vm342_vm4, %v7428_v1 }
 0xb58   : > { %7434 = vst.msk [vmem:[#allocation4 + $0x68] sm:$0xff] %vm342_vm4, %v7426_v36 }
 0xb5a   : > { %v9822_v14 = vpop.f32.mrb[128].mxu0 }
 0xb5b   : > { %v7620_v62 = vpop.f32.mrb[129].mxu0 }
 0xb5c   : > { %v9823_v13 = vpop.f32.mrb[130].mxu0 }
 0xb5d   : > { %v7623_v34 = vpop.f32.mrb[131].mxu0 }
 0xb5e   : > { %v9812_v60 = vpop.f32.mrb[128].mxu1 }
 0xb5f   : > { %v7512_v3 = vadd.f32 %v9812_v60, %v7439_v46  ;;  %v7479_v43 = vpop.f32.mrb[129].mxu1 }
 0xb60   : > { %v7510_v18 = vadd.f32 %v7479_v43, %v7437_v12  ;;  %v9813_v47 = vpop.f32.mrb[130].mxu1  ;;  %v7979_v12 = vld [vmem:[#allocation4 + $0x80] sm:$0xff] }
 0xb61   : > { %7520 = vst.msk [vmem:[#allocation4 + $0x10] sm:$0xff] %vm342_vm4, %v7512_v3  ;;  %v7513_v44 = vadd.f32 %v9813_v47, %v7440_v21  ;;  %v7482_v35 = vpop.f32.mrb[131].mxu1 }
 0xb62   : > { %7518 = vst.msk [vmem:[#allocation4] sm:$0xff] %vm342_vm4, %v7510_v18  ;;  %v7511_v20 = vadd.f32 %v7482_v35, %v7438_v25  ;;  %v9826_v10 = vpop.f32.mrb[132].mxu0  ;;  %v8119_v18 = vld [vmem:[#allocation4 + $0x40] sm:$0xff]  ;;  %v7982_v25 = vld [vmem:[#allocation4 + $0x98] sm:$0xff] }
 0xb63   : > { %7521 = vst.msk [vmem:[#allocation4 + $0x18] sm:$0xff] %vm342_vm4, %v7513_v44  ;;  %v7636_v37 = vpop.f32.mrb[133].mxu0 }
 0xb64   : > { %7519 = vst.msk [vmem:[#allocation4 + $0x8] sm:$0xff] %vm342_vm4, %v7511_v20  ;;  %v9827_v7 = vpop.f32.mrb[134].mxu0  ;;  %v8122_v20 = vld [vmem:[#allocation4 + $0x58] sm:$0xff] }
 0xb65   : > { %v7639_v8 = vpop.f32.mrb[135].mxu0 }
 0xb66   : > { %v9816_v11 = vpop.f32.mrb[132].mxu1 }
 0xb67   : > { %v7516_v2 = vadd.f32 %v9816_v11, %v7443_v32  ;;  %v7495_v59 = vpop.f32.mrb[133].mxu1  ;;  %v8120_v11 = vld [vmem:[#allocation4 + $0x48] sm:$0xff] }
 0xb68   : > { %v7514_v61 = vadd.f32 %v7495_v59, %v7441_v50  ;;  %v9817_v48 = vpop.f32.mrb[134].mxu1  ;;  %v7528_v39 = vld [vmem:[#allocation4 + $0x10] sm:$0xff] }
 0xb69   : > { %7524 = vst.msk [vmem:[#allocation4 + $0x30] sm:$0xff] %vm342_vm4, %v7516_v2  ;;  %v7517_v55 = vadd.f32 %v9817_v48, %v7444_v56  ;;  %v7498_v23 = vpop.f32.mrb[135].mxu1  ;;  %v7536_v42 = vadd.f32 %v14373_v51, %v7528_v39  ;;  %v7526_v49 = vld [vmem:[#allocation4] sm:$0xff]  ;;  %v8125_v48 = vld [vmem:[#allocation4 + $0x70] sm:$0xff] }
 0xb6a   : > { %7522 = vst.msk [vmem:[#allocation4 + $0x20] sm:$0xff] %vm342_vm4, %v7514_v61  ;;  %v7515_v52 = vadd.f32 %v7498_v23, %v7442_v27  ;;  %v7534_v63 = vadd.f32 %v14373_v51, %v7526_v49  ;;  %v7529_v30 = vld [vmem:[#allocation4 + $0x18] sm:$0xff]  ;;  %v7985_v61 = vld [vmem:[#allocation4 + $0xb0] sm:$0xff]  ;;  %v7983_v23 = vld [vmem:[#allocation4 + $0xa0] sm:$0xff] }
 0xb6b   : > { %7525 = vst.msk [vmem:[#allocation4 + $0x38] sm:$0xff] %vm342_vm4, %v7517_v55  ;;  %v7653_v5 = vadd.f32 %v9822_v14, %v7536_v42  ;;  %v7537_v31 = vadd.f32 %v14373_v51, %v7529_v30  ;;  %v7527_v33 = vld [vmem:[#allocation4 + $0x8] sm:$0xff]  ;;  %v8123_v49 = vld [vmem:[#allocation4 + $0x60] sm:$0xff] }
 0xb6c   : > { %7523 = vst.msk [vmem:[#allocation4 + $0x28] sm:$0xff] %vm342_vm4, %v7515_v52  ;;  %v7651_v40 = vadd.f32 %v7620_v62, %v7534_v63  ;;  %v7535_v4 = vadd.f32 %v14373_v51, %v7527_v33  ;;  %v7981_v62 = vld [vmem:[#allocation4 + $0x90] sm:$0xff]  ;;  %v8126_v33 = vld [vmem:[#allocation4 + $0x78] sm:$0xff] }
 0xb6d   : > { %v7661_v22 = vmax.f32 %v7653_v5, 0.0  ;;  %v7654_v24 = vadd.f32 %v9823_v13, %v7537_v31  ;;  %v7986_v5 = vld [vmem:[#allocation4 + $0xb8] sm:$0xff] }
 0xb6e   : > { %v7659_v58 = vmax.f32 %v7651_v40, 0.0  ;;  %v7652_v6 = vadd.f32 %v7623_v34, %v7535_v4  ;;  %v8121_v34 = vld [vmem:[#allocation4 + $0x50] sm:$0xff] }
 0xb6f   : > { %8962 = vst.msk [vmem:[%s12396_s14 + $0xd0] sm:$0xff] %vm342_vm4, %v7661_v22  ;;  %v7662_v53 = vmax.f32 %v7654_v24, 0.0  ;;  %v7984_v24 = vld [vmem:[#allocation4 + $0xa8] sm:$0xff] }
 0xb70   : > { %8960 = vst.msk [vmem:[%s12396_s14 + $0xc0] sm:$0xff] %vm342_vm4, %v7659_v58  ;;  %v7660_v45 = vmax.f32 %v7652_v6, 0.0  ;;  %v7532_v29 = vld [vmem:[#allocation4 + $0x30] sm:$0xff]  ;;  %v8124_v6 = vld [vmem:[#allocation4 + $0x68] sm:$0xff] }
 0xb71   : > { %8963 = vst.msk [vmem:[%s12396_s14 + $0xd8] sm:$0xff] %vm342_vm4, %v7662_v53  ;;  %v7540_v9 = vadd.f32 %v14373_v51, %v7532_v29  ;;  %v7530_v16 = vld [vmem:[#allocation4 + $0x20] sm:$0xff] }
 0xb72   : > { %8961 = vst.msk [vmem:[%s12396_s14 + $0xc8] sm:$0xff] %vm342_vm4, %v7660_v45  ;;  %v7538_v28 = vadd.f32 %v14373_v51, %v7530_v16  ;;  %v7533_v38 = vld [vmem:[#allocation4 + $0x38] sm:$0xff] }
 0xb73   : > { %v7657_v41 = vadd.f32 %v9826_v10, %v7540_v9  ;;  %v7541_v57 = vadd.f32 %v14373_v51, %v7533_v38  ;;  %v7531_v15 = vld [vmem:[#allocation4 + $0x28] sm:$0xff] }
 0xb74   : > { %v7655_v26 = vadd.f32 %v7636_v37, %v7538_v28  ;;  %v7539_v0 = vadd.f32 %v14373_v51, %v7531_v15 }
 0xb75   : > { %v7665_v1 = vmax.f32 %v7657_v41, 0.0  ;;  %v7658_v17 = vadd.f32 %v9827_v7, %v7541_v57 }
 0xb76   : > { %v7663_v19 = vmax.f32 %v7655_v26, 0.0  ;;  %v7656_v54 = vadd.f32 %v7639_v8, %v7539_v0  ;;  %v7980_v8 = vld [vmem:[#allocation4 + $0x88] sm:$0xff] }
 0xb77   : > { %8966 = vst.msk [vmem:[%s12396_s14 + $0xf0] sm:$0xff] %vm342_vm4, %v7665_v1  ;;  %v7666_v36 = vmax.f32 %v7658_v17, 0.0 }
 0xb78   : > { %8964 = vst.msk [vmem:[%s12396_s14 + $0xe0] sm:$0xff] %vm342_vm4, %v7663_v19  ;;  %v7664_v14 = vmax.f32 %v7656_v54, 0.0 }
 0xb79   : > { %8967 = vst.msk [vmem:[%s12396_s14 + $0xf8] sm:$0xff] %vm342_vm4, %v7666_v36 }
 0xb7a   : > { %8965 = vst.msk [vmem:[%s12396_s14 + $0xe8] sm:$0xff] %vm342_vm4, %v7664_v14 }
 0xb82   : > { %v9840_v13 = vpop.f32.mrb[136].mxu0  ;;  %v9858_v46 = vpop.f32.mrb[136].mxu1 }
 0xb83   : > { %v8105_v60 = vadd.f32 %v9840_v13, %v7981_v62  ;;  %v8194_v3 = vadd.f32 %v9858_v46, %v8121_v34  ;;  %v8072_v43 = vpop.f32.mrb[137].mxu0  ;;  %v8161_v21 = vpop.f32.mrb[137].mxu1 }
 0xb84   : > { %v8103_v47 = vadd.f32 %v8072_v43, %v7979_v12  ;;  %v8192_v44 = vadd.f32 %v8161_v21, %v8119_v18  ;;  %v9841_v35 = vpop.f32.mrb[138].mxu0  ;;  %v9859_v10 = vpop.f32.mrb[138].mxu1 }
 0xb85   : > { %8113 = vst.msk [vmem:[#allocation4 + $0x90] sm:$0xff] %vm342_vm4, %v8105_v60  ;;  %8202 = vst.msk [vmem:[#allocation4 + $0x50] sm:$0xff] %vm342_vm4, %v8194_v3  ;;  %v8106_v37 = vadd.f32 %v9841_v35, %v7982_v25  ;;  %v8195_v7 = vadd.f32 %v9859_v10, %v8122_v20  ;;  %v8075_v32 = vpop.f32.mrb[139].mxu0  ;;  %v8164_v2 = vpop.f32.mrb[139].mxu1 }
 0xb86   : > { %8111 = vst.msk [vmem:[#allocation4 + $0x80] sm:$0xff] %vm342_vm4, %v8103_v47  ;;  %8200 = vst.msk [vmem:[#allocation4 + $0x40] sm:$0xff] %vm342_vm4, %v8192_v44  ;;  %v8104_v50 = vadd.f32 %v8075_v32, %v7980_v8  ;;  %v8193_v59 = vadd.f32 %v8164_v2, %v8120_v11 }
 0xb87   : > { %8114 = vst.msk [vmem:[#allocation4 + $0x98] sm:$0xff] %vm342_vm4, %v8106_v37  ;;  %8203 = vst.msk [vmem:[#allocation4 + $0x58] sm:$0xff] %vm342_vm4, %v8195_v7 }
 0xb88   : > { %8112 = vst.msk [vmem:[#allocation4 + $0x88] sm:$0xff] %vm342_vm4, %v8104_v50  ;;  %8201 = vst.msk [vmem:[#allocation4 + $0x48] sm:$0xff] %vm342_vm4, %v8193_v59 }
 0xb8a   : > { %v9844_v56 = vpop.f32.mrb[140].mxu0  ;;  %v9862_v39 = vpop.f32.mrb[140].mxu1 }
 0xb8b   : > { %v8109_v55 = vadd.f32 %v9844_v56, %v7985_v61  ;;  %v8198_v27 = vadd.f32 %v9862_v39, %v8125_v48  ;;  %v8088_v42 = vpop.f32.mrb[141].mxu0  ;;  %v8177_v52 = vpop.f32.mrb[141].mxu1 }
 0xb8c   : > { %v8107_v63 = vadd.f32 %v8088_v42, %v7983_v23  ;;  %v8196_v30 = vadd.f32 %v8177_v52, %v8123_v49  ;;  %v9845_v31 = vpop.f32.mrb[142].mxu0  ;;  %v9863_v40 = vpop.f32.mrb[142].mxu1  ;;  %v8210_v9 = vld [vmem:[#allocation4 + $0x50] sm:$0xff] }
 0xb8d   : > { %8117 = vst.msk [vmem:[#allocation4 + $0xb0] sm:$0xff] %vm342_vm4, %v8109_v55  ;;  %8206 = vst.msk [vmem:[#allocation4 + $0x70] sm:$0xff] %vm342_vm4, %v8198_v27  ;;  %v8110_v4 = vadd.f32 %v9845_v31, %v7986_v5  ;;  %v8199_v22 = vadd.f32 %v9863_v40, %v8126_v33  ;;  %v8091_v58 = vpop.f32.mrb[143].mxu0  ;;  %v8180_v53 = vpop.f32.mrb[143].mxu1  ;;  %v8360_v16 = vld [vmem:[#allocation4 + $0x90] sm:$0xff]  ;;  %v8208_v28 = vld [vmem:[#allocation4 + $0x40] sm:$0xff]  ;;  %v8218_v15 = vadd.f32 %v14373_v51, %v8210_v9 }
 0xb8e   : > { %8115 = vst.msk [vmem:[#allocation4 + $0xa0] sm:$0xff] %vm342_vm4, %v8107_v63  ;;  %8204 = vst.msk [vmem:[#allocation4 + $0x60] sm:$0xff] %vm342_vm4, %v8196_v30  ;;  %v8108_v45 = vadd.f32 %v8091_v58, %v7984_v24  ;;  %v8197_v29 = vadd.f32 %v8180_v53, %v8124_v6  ;;  %v8358_v38 = vld [vmem:[#allocation4 + $0x80] sm:$0xff]  ;;  %v8211_v41 = vld [vmem:[#allocation4 + $0x58] sm:$0xff]  ;;  %v8368_v26 = vadd.f32 %v14373_v51, %v8360_v16 }
 0xb8f   : > { %8118 = vst.msk [vmem:[#allocation4 + $0xb8] sm:$0xff] %vm342_vm4, %v8110_v4  ;;  %8207 = vst.msk [vmem:[#allocation4 + $0x78] sm:$0xff] %vm342_vm4, %v8199_v22  ;;  %v8361_v57 = vld [vmem:[#allocation4 + $0x98] sm:$0xff]  ;;  %v8209_v0 = vld [vmem:[#allocation4 + $0x48] sm:$0xff]  ;;  %v8216_v54 = vadd.f32 %v14373_v51, %v8208_v28  ;;  %v8366_v36 = vadd.f32 %v14373_v51, %v8358_v38  ;;  %v8219_v46 = vadd.f32 %v14373_v51, %v8211_v41 }
 0xb90   : > { %8116 = vst.msk [vmem:[#allocation4 + $0xa8] sm:$0xff] %vm342_vm4, %v8108_v45  ;;  %8205 = vst.msk [vmem:[#allocation4 + $0x68] sm:$0xff] %vm342_vm4, %v8197_v29  ;;  %v8359_v1 = vld [vmem:[#allocation4 + $0x88] sm:$0xff]  ;;  %v8369_v60 = vadd.f32 %v14373_v51, %v8361_v57  ;;  %v8217_v21 = vadd.f32 %v14373_v51, %v8209_v0 }
 0xb91   : > { %v8367_v47 = vadd.f32 %v14373_v51, %v8359_v1 }
 0xb92   : > { %v9868_v17 = vpop.f32.mrb[144].mxu0  ;;  %v9878_v19 = vpop.f32.mrb[144].mxu1 }
 0xb93   : > { %v8335_v14 = vadd.f32 %v9868_v17, %v8218_v15  ;;  %v8485_v62 = vadd.f32 %v9878_v19, %v8368_v26  ;;  %v8302_v13 = vpop.f32.mrb[145].mxu0  ;;  %v8452_v34 = vpop.f32.mrb[145].mxu1 }
 0xb94   : > { %v8333_v3 = vadd.f32 %v8302_v13, %v8216_v54  ;;  %v8483_v12 = vadd.f32 %v8452_v34, %v8366_v36  ;;  %v9869_v43 = vpop.f32.mrb[146].mxu0  ;;  %v9879_v18 = vpop.f32.mrb[146].mxu1  ;;  %v8214_v2 = vld [vmem:[#allocation4 + $0x70] sm:$0xff] }
 0xb95   : > { %v8343_v44 = vmax.f32 %v8335_v14, 0.0  ;;  %v8493_v25 = vmax.f32 %v8485_v62, 0.0  ;;  %v8336_v35 = vadd.f32 %v9869_v43, %v8219_v46  ;;  %v8486_v20 = vadd.f32 %v9879_v18, %v8369_v60  ;;  %v8305_v10 = vpop.f32.mrb[147].mxu0  ;;  %v8455_v37 = vpop.f32.mrb[147].mxu1  ;;  %v8364_v50 = vld [vmem:[#allocation4 + $0xb0] sm:$0xff]  ;;  %v8212_v56 = vld [vmem:[#allocation4 + $0x60] sm:$0xff] }
 0xb96   : > { %v8341_v7 = vmax.f32 %v8333_v3, 0.0  ;;  %v8491_v8 = vmax.f32 %v8483_v12, 0.0  ;;  %v8334_v32 = vadd.f32 %v8305_v10, %v8217_v21  ;;  %v8484_v11 = vadd.f32 %v8455_v37, %v8367_v47  ;;  %v8362_v48 = vld [vmem:[#allocation4 + $0xa0] sm:$0xff]  ;;  %v8215_v27 = vld [vmem:[#allocation4 + $0x78] sm:$0xff] }
 0xb97   : > { %8994 = vst.msk [vmem:[%s12396_s14 + $0x110] sm:$0xff] %vm342_vm4, %v8343_v44  ;;  %9018 = vst.msk [vmem:[%s12396_s14 + $0x150] sm:$0xff] %vm342_vm4, %v8493_v25  ;;  %v8344_v59 = vmax.f32 %v8336_v35, 0.0  ;;  %v8494_v61 = vmax.f32 %v8486_v20, 0.0  ;;  %v8365_v23 = vld [vmem:[#allocation4 + $0xb8] sm:$0xff]  ;;  %v8222_v42 = vadd.f32 %v14373_v51, %v8214_v2  ;;  %v8372_v49 = vadd.f32 %v14373_v51, %v8364_v50  ;;  %v8213_v52 = vld [vmem:[#allocation4 + $0x68] sm:$0xff] }
 0xb98   : > { %8992 = vst.msk [vmem:[%s12396_s14 + $0x100] sm:$0xff] %vm342_vm4, %v8341_v7  ;;  %9016 = vst.msk [vmem:[%s12396_s14 + $0x140] sm:$0xff] %vm342_vm4, %v8491_v8  ;;  %v8342_v39 = vmax.f32 %v8334_v32, 0.0  ;;  %v8492_v55 = vmax.f32 %v8484_v11, 0.0  ;;  %v8363_v63 = vld [vmem:[#allocation4 + $0xa8] sm:$0xff]  ;;  %v8220_v31 = vadd.f32 %v14373_v51, %v8212_v56  ;;  %v8370_v33 = vadd.f32 %v14373_v51, %v8362_v48 }
 0xb99   : > { %8995 = vst.msk [vmem:[%s12396_s14 + $0x118] sm:$0xff] %vm342_vm4, %v8344_v59  ;;  %9019 = vst.msk [vmem:[%s12396_s14 + $0x158] sm:$0xff] %vm342_vm4, %v8494_v61  ;;  %v8223_v58 = vadd.f32 %v14373_v51, %v8215_v27  ;;  %v8373_v6 = vadd.f32 %v14373_v51, %v8365_v23  ;;  %v8221_v16 = vadd.f32 %v14373_v51, %v8213_v52 }
 0xb9a   : > { %8993 = vst.msk [vmem:[%s12396_s14 + $0x108] sm:$0xff] %vm342_vm4, %v8342_v39  ;;  %9017 = vst.msk [vmem:[%s12396_s14 + $0x148] sm:$0xff] %vm342_vm4, %v8492_v55  ;;  %v9872_v30 = vpop.f32.mrb[148].mxu0  ;;  %v9882_v5 = vpop.f32.mrb[148].mxu1  ;;  %v8371_v28 = vadd.f32 %v14373_v51, %v8363_v63 }
 0xb9b   : > { %v8339_v40 = vadd.f32 %v9872_v30, %v8222_v42  ;;  %v8489_v4 = vadd.f32 %v9882_v5, %v8372_v49  ;;  %v8318_v22 = vpop.f32.mrb[149].mxu0  ;;  %v8468_v24 = vpop.f32.mrb[149].mxu1 }
 0xb9c   : > { %v8337_v53 = vadd.f32 %v8318_v22, %v8220_v31  ;;  %v8487_v45 = vadd.f32 %v8468_v24, %v8370_v33  ;;  %v9873_v29 = vpop.f32.mrb[150].mxu0  ;;  %v9883_v9 = vpop.f32.mrb[150].mxu1 }
 0xb9d   : > { %v8347_v38 = vmax.f32 %v8339_v40, 0.0  ;;  %v8497_v41 = vmax.f32 %v8489_v4, 0.0  ;;  %v8340_v57 = vadd.f32 %v9873_v29, %v8223_v58  ;;  %v8490_v15 = vadd.f32 %v9883_v9, %v8373_v6  ;;  %v8321_v26 = vpop.f32.mrb[151].mxu0  ;;  %v8471_v0 = vpop.f32.mrb[151].mxu1 }
 0xb9e   : > { %v8345_v1 = vmax.f32 %v8337_v53, 0.0  ;;  %v8495_v17 = vmax.f32 %v8487_v45, 0.0  ;;  %v8338_v19 = vadd.f32 %v8321_v26, %v8221_v16  ;;  %v8488_v54 = vadd.f32 %v8471_v0, %v8371_v28 }
 0xb9f   : > { %8998 = vst.msk [vmem:[%s12396_s14 + $0x130] sm:$0xff] %vm342_vm4, %v8347_v38  ;;  %9022 = vst.msk [vmem:[%s12396_s14 + $0x170] sm:$0xff] %vm342_vm4, %v8497_v41  ;;  %v8348_v51 = vmax.f32 %v8340_v57, 0.0  ;;  %v8498_v36 = vmax.f32 %v8490_v15, 0.0 }
 0xba0   : > { %8996 = vst.msk [vmem:[%s12396_s14 + $0x120] sm:$0xff] %vm342_vm4, %v8345_v1  ;;  %9020 = vst.msk [vmem:[%s12396_s14 + $0x160] sm:$0xff] %vm342_vm4, %v8495_v17  ;;  %v8346_v14 = vmax.f32 %v8338_v19, 0.0  ;;  %v8496_v62 = vmax.f32 %v8488_v54, 0.0 }
 0xba1   : > { %8999 = vst.msk [vmem:[%s12396_s14 + $0x138] sm:$0xff] %vm342_vm4, %v8348_v51  ;;  %9023 = vst.msk [vmem:[%s12396_s14 + $0x178] sm:$0xff] %vm342_vm4, %v8498_v36 }
 0xba2   : > { %8997 = vst.msk [vmem:[%s12396_s14 + $0x128] sm:$0xff] %vm342_vm4, %v8346_v14  ;;  %9021 = vst.msk [vmem:[%s12396_s14 + $0x168] sm:$0xff] %vm342_vm4, %v8496_v62 }
 0xba3 PF: > { %s17_s24 = sadd.s32 1, %s10169_s24  }
 0xba4   : > { %p14_p4 = scmp.ge.s32.totalorder %s17_s24, 4  }
 0xba6   :  { %16 = sbr.rel (!%p14_p4) target bundleno = 1 (0x1), region = 96 }

</bundles_post_ra>
